<compile_context>
chip_gen: v5e
topology: v5e:2x2
jax: 0.10.0
libtpu: 0.0.40
codegen_flags: <defaults>
</compile_context>

<pallas_src>
import functools

import jax
import jax.numpy as jnp
from jax.experimental import pallas as pl
from jax.experimental.pallas import tpu as pltpu

# ---- sizes -------------------------------------------------------------------
N = 64            # number of graph nodes (single tile, single grid step)
IN_DIM = 32       # in_dim == out_dim so residual stays enabled
OUT_DIM = 32
HID = OUT_DIM     # MLP hidden_size = out_dim (as in the module)
N_AGG = 2         # mean, max
BN_EPS = 1e-5


# ---- kernel ------------------------------------------------------------------
def pna_kernel(hp_ref, adj_ref, w1_ref, b1_ref, w2_ref, bns_ref, bnb_ref, out_ref):
    hp = hp_ref[...]                                    # (N, 2*IN_DIM)  = [h | p]
    adj = adj_ref[...]                                  # (N, N)

    # in-degree; guard against isolated nodes (test graph guarantees deg >= 1)
    deg = jnp.maximum(jnp.sum(adj, axis=-1, keepdims=True), 1.0)   # (N, 1)
    inv_deg = pl.reciprocal(deg, approx=True)                      # EUP, ~free slot

    # --- mean aggregator (MXU matmul) ---
    mean_agg = jnp.dot(adj, hp, preferred_element_type=jnp.float32) * inv_deg

    # --- max aggregator: fully vectorized masked max over source nodes ---
    # (N_dst, N_src, 2*IN_DIM) f32 intermediate = 1 MiB, trivially fits VMEM.
    masked = jnp.where(adj[:, :, None] > 0.0, hp[None, :, :], -jnp.inf)
    max_agg = jnp.max(masked, axis=1)                   # (N, 2*IN_DIM)

    # scalers = "identity" only -> no scaling branch (len(scalers) == 1)
    agg = jnp.concatenate([mean_agg, max_agg], axis=-1)  # (N, N_AGG*2*IN_DIM) = (N, 128)

    # --- posttrans_h: Linear -> relu -> Linear (b2 folded into BN shift) ---
    z = jnp.dot(agg, w1_ref[...], preferred_element_type=jnp.float32) + b1_ref[...]
    z = jnp.maximum(z, 0.0)
    h2 = jnp.dot(z, w2_ref[...], preferred_element_type=jnp.float32)

    # --- BatchNorm1d (eval mode) folded with b2 into scale/shift ---
    h_bn = h2 * bns_ref[...] + bnb_ref[...]

    h_act = jnp.maximum(h_bn, 0.0)    # F.relu(h)
    p_act = jnp.tanh(h_act)           # p = torch.tanh(h)  (as written in the module)

    # --- residual: [h_in | p_in] + [h_act | p_act], fused lane-dense store ---
    out_ref[...] = hp + jnp.concatenate([h_act, p_act], axis=-1)


# ---- wrapper -----------------------------------------------------------------
@functools.partial(jax.jit, static_argnames=())
def pna_layer(h, p, adj, w1, b1, w2, b2, bn_scale, bn_shift):
    # concat once on the host side of the kernel; also serves as the residual term
    hp = jnp.concatenate([h, p], axis=-1)                 # (N, 2*IN_DIM)
    # fold posttrans_h second bias into the (eval-mode) BN affine
    scale = bn_scale                                      # (1, OUT_DIM)
    shift = b2 * bn_scale + bn_shift                      # (1, OUT_DIM)

    full = lambda i: (0, 0)
    out = pl.pallas_call(
        pna_kernel,
        out_shape=jax.ShapeDtypeStruct((N, 2 * OUT_DIM), jnp.float32),
        grid_spec=pltpu.PrefetchScalarGridSpec(
            num_scalar_prefetch=0,
            grid=(1,),
            in_specs=[
                pl.BlockSpec((N, 2 * IN_DIM), full),            # hp = [h | p]
                pl.BlockSpec((N, N), full),                     # adjacency
                pl.BlockSpec((N_AGG * 2 * IN_DIM, HID), full),  # posttrans_h W1
                pl.BlockSpec((1, HID), full),                   # posttrans_h b1
                pl.BlockSpec((HID, OUT_DIM), full),             # posttrans_h W2
                pl.BlockSpec((1, OUT_DIM), full),               # folded scale
                pl.BlockSpec((1, OUT_DIM), full),               # folded shift (incl. b2)
            ],
            out_specs=pl.BlockSpec((N, 2 * OUT_DIM), full),
        ),
    )(hp, adj, w1, b1, w2, scale, shift)
    return out[:, :OUT_DIM], out[:, OUT_DIM:]


# ---- pure-JAX reference (for verification) -----------------------------------
def reference(h, p, adj, w1, b1, w2, b2, bn_scale, bn_shift):
    hp = jnp.concatenate([h, p], axis=-1)
    deg = jnp.maximum(adj.sum(-1, keepdims=True), 1.0)
    mean_agg = adj @ hp / deg
    masked = jnp.where(adj[:, :, None] > 0, hp[None, :, :], -jnp.inf)
    max_agg = masked.max(axis=1)
    agg = jnp.concatenate([mean_agg, max_agg], axis=-1)
    z = jnp.maximum(agg @ w1 + b1, 0.0)
    h2 = z @ w2 + b2
    h_bn = h2 * bn_scale + bn_shift
    h_act = jnp.maximum(h_bn, 0.0)
    p_act = jnp.tanh(h_act)
    return h + h_act, p + p_act


if __name__ == "__main__":
    key = jax.random.PRNGKey(0)
    k = jax.random.split(key, 10)

    h = jax.random.normal(k[0], (N, IN_DIM), jnp.float32)
    p = jax.random.normal(k[1], (N, IN_DIM), jnp.float32)

    # deterministic graph: random edges + a ring so every node has >= 1 in-edge
    rand_edges = jax.random.bernoulli(k[2], 0.15, (N, N)).astype(jnp.float32)
    ring = jnp.eye(N, dtype=jnp.float32)[:, jnp.concatenate(
        [jnp.arange(1, N), jnp.arange(1)])]              # edge (i+1) -> i
    adj = jnp.clip(rand_edges + ring, 0.0, 1.0)

    # posttrans_h MLP parameters (deterministic synthetic init)
    w1 = 0.1 * jax.random.normal(k[3], (N_AGG * 2 * IN_DIM, HID), jnp.float32)
    b1 = 0.1 * jax.random.normal(k[4], (1, HID), jnp.float32)
    w2 = 0.1 * jax.random.normal(k[5], (HID, OUT_DIM), jnp.float32)
    b2 = 0.1 * jax.random.normal(k[6], (1, OUT_DIM), jnp.float32)

    # BatchNorm1d(out_dim) parameters, eval mode -> folded into scale/shift
    gamma = 1.0 + 0.1 * jax.random.normal(k[7], (1, OUT_DIM), jnp.float32)
    beta = 0.1 * jax.random.normal(k[8], (1, OUT_DIM), jnp.float32)
    run_mean = 0.1 * jax.random.normal(k[9], (1, OUT_DIM), jnp.float32)
    run_var = jnp.ones((1, OUT_DIM), jnp.float32)
    bn_scale = gamma / jnp.sqrt(run_var + BN_EPS)
    bn_shift = beta - run_mean * bn_scale

    h_out, p_out = pna_layer(h, p, adj, w1, b1, w2, b2, bn_scale, bn_shift)
    jax.block_until_ready((h_out, p_out))

    h_ref, p_ref = reference(h, p, adj, w1, b1, w2, b2, bn_scale, bn_shift)
    # 1e-3 tolerance accounts for the EUP approximate reciprocal used for 1/deg
    # (reference uses an exact divide); everything else is bit-comparable.
    assert jnp.allclose(h_out, h_ref, rtol=1e-3, atol=1e-3), "h mismatch"
    assert jnp.allclose(p_out, p_ref, rtol=1e-3, atol=1e-3), "p mismatch"

    print("KERNEL_OK")
</pallas_src>

<mosaic_0001>
module attributes {stable_mosaic.version = 11 : i64} {
  func.func @pna_kernel(%arg0: i32, %arg1: memref<64x64xf32, #tpu.memory_space<vmem>>, %arg2: memref<64x64xf32, #tpu.memory_space<vmem>>, %arg3: memref<128x32xf32, #tpu.memory_space<vmem>>, %arg4: memref<1x32xf32, #tpu.memory_space<vmem>>, %arg5: memref<32x32xf32, #tpu.memory_space<vmem>>, %arg6: memref<1x32xf32, #tpu.memory_space<vmem>>, %arg7: memref<1x32xf32, #tpu.memory_space<vmem>>, %arg8: memref<64x64xf32, #tpu.memory_space<vmem>>) attributes {dimension_semantics = [#tpu.dimension_semantics<arbitrary>], iteration_bounds = array<i64: 1>, scalar_prefetch = 0 : i64, scratch_operands = 0 : i64, tpu.core_type = #tpu.core_type<tc>, window_params = [{pipeline_mode = #tpu.pipeline_mode<synchronous>, transform_indices = @transform_0, window_bounds = array<i64: 64, 64>}, {pipeline_mode = #tpu.pipeline_mode<synchronous>, transform_indices = @transform_1, window_bounds = array<i64: 64, 64>}, {pipeline_mode = #tpu.pipeline_mode<synchronous>, transform_indices = @transform_2, window_bounds = array<i64: 128, 32>}, {pipeline_mode = #tpu.pipeline_mode<synchronous>, transform_indices = @transform_3, window_bounds = array<i64: 1, 32>}, {pipeline_mode = #tpu.pipeline_mode<synchronous>, transform_indices = @transform_4, window_bounds = array<i64: 32, 32>}, {pipeline_mode = #tpu.pipeline_mode<synchronous>, transform_indices = @transform_5, window_bounds = array<i64: 1, 32>}, {pipeline_mode = #tpu.pipeline_mode<synchronous>, transform_indices = @transform_6, window_bounds = array<i64: 1, 32>}, {pipeline_mode = #tpu.pipeline_mode<synchronous>, transform_indices = @transform_7, window_bounds = array<i64: 64, 64>}]} {
    %c0 = arith.constant 0 : index
    %c0_0 = arith.constant 0 : index
    %0 = vector.load %arg1[%c0, %c0_0] : memref<64x64xf32, #tpu.memory_space<vmem>>, vector<64x64xf32>
    %c0_1 = arith.constant 0 : index
    %c0_2 = arith.constant 0 : index
    %1 = vector.load %arg2[%c0_1, %c0_2] : memref<64x64xf32, #tpu.memory_space<vmem>>, vector<64x64xf32>
    %cst = arith.constant dense<0.000000e+00> : vector<64xf32>
    %2 = vector.multi_reduction <add>, %1, %cst [1] : vector<64x64xf32> to vector<64xf32>
    %3 = vector.shape_cast %2 : vector<64xf32> to vector<64x1xf32>
    %cst_3 = arith.constant 1.000000e+00 : f32
    %4 = vector.broadcast %cst_3 : f32 to vector<64x1xf32>
    %5 = arith.maximumf %3, %4 : vector<64x1xf32>
    %6 = tpu.reciprocal %5 {approx = true} : vector<64x1xf32> -> vector<64x1xf32>
    %cst_4 = arith.constant dense<0.000000e+00> : vector<64x64xf32>
    %7 = tpu.matmul %1, %0, %cst_4 {dimension_numbers = #tpu.dot_dimension_numbers<[1], [0], [0], [1], [0, 0, 1, 1], [], []>} : vector<64x64xf32>, vector<64x64xf32>, vector<64x64xf32> -> vector<64x64xf32>
    %8 = vector.broadcast %6 : vector<64x1xf32> to vector<64x64xf32>
    %9 = arith.mulf %7, %8 : vector<64x64xf32>
    %10 = vector.shape_cast %1 : vector<64x64xf32> to vector<64x64x1xf32>
    %cst_5 = arith.constant 0.000000e+00 : f32
    %11 = vector.broadcast %cst_5 : f32 to vector<64x64x1xf32>
    %12 = arith.cmpf ogt, %10, %11 : vector<64x64x1xf32>
    %13 = vector.shape_cast %0 : vector<64x64xf32> to vector<1x64x64xf32>
    %cst_6 = arith.constant 0xFF800000 : f32
    %14 = vector.shape_cast %12 : vector<64x64x1xi1> to vector<64x64x1xi1>
    %15 = vector.broadcast %14 : vector<64x64x1xi1> to vector<64x64x64xi1>
    %16 = vector.shape_cast %13 : vector<1x64x64xf32> to vector<1x64x64xf32>
    %17 = vector.broadcast %16 : vector<1x64x64xf32> to vector<64x64x64xf32>
    %18 = vector.broadcast %cst_6 : f32 to vector<64x64x64xf32>
    %19 = arith.select %15, %17, %18 : vector<64x64x64xi1>, vector<64x64x64xf32>
    %cst_7 = arith.constant dense<0xFF800000> : vector<64x64xf32>
    %20 = vector.multi_reduction <maximumf>, %19, %cst_7 [1] : vector<64x64x64xf32> to vector<64x64xf32>
    %21 = tpu.concatenate %9, %20 in 1 : vector<64x64xf32>, vector<64x64xf32> -> vector<64x128xf32>
    %c0_8 = arith.constant 0 : index
    %c0_9 = arith.constant 0 : index
    %22 = vector.load %arg3[%c0_8, %c0_9] : memref<128x32xf32, #tpu.memory_space<vmem>>, vector<128x32xf32>
    %cst_10 = arith.constant dense<0.000000e+00> : vector<64x32xf32>
    %23 = tpu.matmul %21, %22, %cst_10 {dimension_numbers = #tpu.dot_dimension_numbers<[1], [0], [0], [1], [0, 0, 1, 1], [], []>} : vector<64x128xf32>, vector<128x32xf32>, vector<64x32xf32> -> vector<64x32xf32>
    %c0_11 = arith.constant 0 : index
    %c0_12 = arith.constant 0 : index
    %24 = vector.load %arg4[%c0_11, %c0_12] : memref<1x32xf32, #tpu.memory_space<vmem>>, vector<1x32xf32>
    %25 = vector.broadcast %24 : vector<1x32xf32> to vector<64x32xf32>
    %26 = arith.addf %23, %25 : vector<64x32xf32>
    %cst_13 = arith.constant 0.000000e+00 : f32
    %27 = vector.broadcast %cst_13 : f32 to vector<64x32xf32>
    %28 = arith.maximumf %26, %27 : vector<64x32xf32>
    %c0_14 = arith.constant 0 : index
    %c0_15 = arith.constant 0 : index
    %29 = vector.load %arg5[%c0_14, %c0_15] : memref<32x32xf32, #tpu.memory_space<vmem>>, vector<32x32xf32>
    %cst_16 = arith.constant dense<0.000000e+00> : vector<64x32xf32>
    %30 = tpu.matmul %28, %29, %cst_16 {dimension_numbers = #tpu.dot_dimension_numbers<[1], [0], [0], [1], [0, 0, 1, 1], [], []>} : vector<64x32xf32>, vector<32x32xf32>, vector<64x32xf32> -> vector<64x32xf32>
    %c0_17 = arith.constant 0 : index
    %c0_18 = arith.constant 0 : index
    %31 = vector.load %arg6[%c0_17, %c0_18] : memref<1x32xf32, #tpu.memory_space<vmem>>, vector<1x32xf32>
    %32 = vector.broadcast %31 : vector<1x32xf32> to vector<64x32xf32>
    %33 = arith.mulf %30, %32 : vector<64x32xf32>
    %c0_19 = arith.constant 0 : index
    %c0_20 = arith.constant 0 : index
    %34 = vector.load %arg7[%c0_19, %c0_20] : memref<1x32xf32, #tpu.memory_space<vmem>>, vector<1x32xf32>
    %35 = vector.broadcast %34 : vector<1x32xf32> to vector<64x32xf32>
    %36 = arith.addf %33, %35 : vector<64x32xf32>
    %cst_21 = arith.constant 0.000000e+00 : f32
    %37 = vector.broadcast %cst_21 : f32 to vector<64x32xf32>
    %38 = arith.maximumf %36, %37 : vector<64x32xf32>
    %39 = math.tanh %38 : vector<64x32xf32>
    %40 = tpu.concatenate %38, %39 in 1 : vector<64x32xf32>, vector<64x32xf32> -> vector<64x64xf32>
    %41 = arith.addf %0, %40 : vector<64x64xf32>
    %c0_22 = arith.constant 0 : index
    %c0_23 = arith.constant 0 : index
    %42 = vector.load %arg8[%c0_22, %c0_23] : memref<64x64xf32, #tpu.memory_space<vmem>>, vector<64x64xf32>
    tpu.vector_store %arg8[%c0_22, %c0_23], %41 {strides = array<i32>} : memref<64x64xf32, #tpu.memory_space<vmem>>, vector<64x64xf32>,
    return
  }
  func.func @transform_0(%arg0: i32) -> (i32, i32) {
    %c0_i32 = arith.constant 0 : i32
    %c0_i32_0 = arith.constant 0 : i32
    %c0_i32_1 = arith.constant 0 : i32
    return %c0_i32, %c0_i32_0 : i32, i32
  }
  func.func @transform_1(%arg0: i32) -> (i32, i32) {
    %c0_i32 = arith.constant 0 : i32
    %c0_i32_0 = arith.constant 0 : i32
    %c0_i32_1 = arith.constant 0 : i32
    return %c0_i32, %c0_i32_0 : i32, i32
  }
  func.func @transform_2(%arg0: i32) -> (i32, i32) {
    %c0_i32 = arith.constant 0 : i32
    %c0_i32_0 = arith.constant 0 : i32
    %c0_i32_1 = arith.constant 0 : i32
    return %c0_i32, %c0_i32_0 : i32, i32
  }
  func.func @transform_3(%arg0: i32) -> (i32, i32) {
    %c0_i32 = arith.constant 0 : i32
    %c0_i32_0 = arith.constant 0 : i32
    %c0_i32_1 = arith.constant 0 : i32
    return %c0_i32, %c0_i32_0 : i32, i32
  }
  func.func @transform_4(%arg0: i32) -> (i32, i32) {
    %c0_i32 = arith.constant 0 : i32
    %c0_i32_0 = arith.constant 0 : i32
    %c0_i32_1 = arith.constant 0 : i32
    return %c0_i32, %c0_i32_0 : i32, i32
  }
  func.func @transform_5(%arg0: i32) -> (i32, i32) {
    %c0_i32 = arith.constant 0 : i32
    %c0_i32_0 = arith.constant 0 : i32
    %c0_i32_1 = arith.constant 0 : i32
    return %c0_i32, %c0_i32_0 : i32, i32
  }
  func.func @transform_6(%arg0: i32) -> (i32, i32) {
    %c0_i32 = arith.constant 0 : i32
    %c0_i32_0 = arith.constant 0 : i32
    %c0_i32_1 = arith.constant 0 : i32
    return %c0_i32, %c0_i32_0 : i32, i32
  }
  func.func @transform_7(%arg0: i32) -> (i32, i32) {
    %c0_i32 = arith.constant 0 : i32
    %c0_i32_0 = arith.constant 0 : i32
    %c0_i32_1 = arith.constant 0 : i32
    return %c0_i32, %c0_i32_0 : i32, i32
  }
}

</mosaic_0001>

<bundles_post_ra>
// kernel: pna_layer.1
= control target key start
LH: loop header
LB: loop body
LE: loop exit
PB: predicated region body
PF: predicated region fallthrough
CT: control target
= control target key end

     0   :  { %vm42_vm0 = vcmask 523264   ;;  %v157_v0 = vlaneseq  ;;  %s7627_s19 = smov 64   ;;  %s11369_s0 = inlined_call_operand.vmem [shape: f32[64,64], index: 0, kind: input, shape index: {}]   ;;  %s11370_s1 = inlined_call_operand.vmem [shape: f32[64,64], index: 1, kind: input, shape index: {}]   ;;  %s11371_s2 = inlined_call_operand.vmem [shape: f32[128,32], index: 2, kind: input, shape index: {}]   ;;  %s11372_s3 = inlined_call_operand.vmem [shape: f32[1,32], index: 3, kind: input, shape index: {}]   ;;  %s11373_s4 = inlined_call_operand.vmem [shape: f32[32,32], index: 4, kind: input, shape index: {}]   ;;  %s11374_s5 = inlined_call_operand.vmem [shape: f32[1,32], index: 5, kind: input, shape index: {}]   ;;  %s11375_s6 = inlined_call_operand.vmem [shape: f32[1,32], index: 6, kind: input, shape index: {}]   ;;  %s11376_s7 = inlined_call_operand.vmem [shape: f32[64,64], index: 7, kind: output, shape index: {}]  }
   0x1   :  { %v33_v1 = vld [vmem:[%s11369_s0 + $0x38] sm:$0xff]  ;;  %v7675_v2 = vld [vmem:[%s11370_s1 + $0x20] sm:$0xff]  ;;  %v7680_v3 = vld [vmem:[%s11370_s1 + $0x10] sm:$0xff] }
   0x2   :  { %115 = vmatpush.msra.mxu0 %v33_v1  ;;  %v55_v4 = vsel %vm42_vm0, %v7675_v2, 0.0  ;;  %v49_v5 = vsel %vm42_vm0, %v7680_v3, 0.0  ;;  %v7689_v6 = vld [vmem:[%s11370_s1] sm:$0xff]  ;;  %v32_v7 = vld [vmem:[%s11369_s0 + $0x30] sm:$0xff]  ;;  %v7694_v8 = vshrl.u32 %v157_v0, 7  ;;  %v31_v10 = vld [vmem:[%s11369_s0 + $0x28] sm:$0xff] }
   0x3   :  { %56 = vadd.xlane.f32.xlu2 %v55_v4  ;;  %50 = vadd.xlane.f32.xlu1 %v49_v5  ;;  %v43_v9 = vsel %vm42_vm0, %v7689_v6, 0.0  ;;  %v30_v13 = vld [vmem:[%s11369_s0 + $0x20] sm:$0xff]  ;;  %v7713_v14 = vld [vmem:[%s11370_s1 + $0x28] sm:$0xff]  ;;  %v7718_v15 = vld [vmem:[%s11370_s1 + $0x18] sm:$0xff]  ;;  %v156_v28 = vperm.slane %v7689_v6, 0  ;;  %v7774_v29 = vperm.slane %v7689_v6, 2 }
   0x4   :  { %11484 = vst [vmem:[#allocation2_spill] sm:$0xff] %v7694_v8  ;;  %44 = vadd.xlane.f32.xlu0 %v43_v9  ;;  %116 = vmatpush.msra.mxu0 %v32_v7  ;;  %v7702_v11 = vadd.s32 56, %v7694_v8  ;;  %v7705_v12 = vadd.s32 16, %v7694_v8  ;;  %v7724_v16 = vld [vmem:[%s11370_s1 + $0x8] sm:$0xff]  ;;  %v29_v17 = vld [vmem:[%s11369_s0 + $0x18] sm:$0xff]  ;;  %v58_v18 = vsel %vm42_vm0, %v7713_v14, 0.0 }
   0x5   :  { %7116 = vset.pattern.permute.xlu2 %v7694_v8  ;;  %v52_v19 = vsel %vm42_vm0, %v7718_v15, 0.0  ;;  %v46_v20 = vsel %vm42_vm0, %v7724_v16, 0.0  ;;  %v28_v21 = vld [vmem:[%s11369_s0 + $0x10] sm:$0xff]  ;;  %v7743_v22 = vld [vmem:[%s11369_s0 + $0x8] sm:$0xff]  ;;  %v7748_v23 = vld [vmem:[%s11369_s0] sm:$0xff]  ;;  %v7777_v30 = vadd.s32 24, %v7694_v8 }
   0x6   :  { %11485 = vst [vmem:[#allocation3_spill] sm:$0xff] %v7705_v12  ;;  %117 = vmatpush.msra.mxu0 %v31_v10  ;;  %7135 = vset.pattern.permute.xlu0 %v7702_v11  ;;  %v7753_v24 = vld [vmem:[%s11370_s1 + $0x38] sm:$0xff]  ;;  %v7759_v25 = vld [vmem:[%s11370_s1 + $0x30] sm:$0xff]  ;;  %v7784_v31 = vperm.slane %v7689_v6, 7  ;;  %v7788_v32 = vadd.s32 40, %v7694_v8  ;;  %v7794_v33 = vperm.slane %v7724_v16, 4 }
   0x7   :  { %7117 = vset.pattern.permute.xlu1 %v7705_v12  ;;  %v64_v26 = vsel %vm42_vm0, %v7753_v24, 0.0  ;;  %v61_v27 = vsel %vm42_vm0, %v7759_v25, 0.0  ;;  %v7797_v34 = vadd.s32 32, %v7694_v8  ;;  %v7804_v35 = vperm.slane %v7680_v3, 1 }
   0x8   :  { %118 = vmatpush.msra.mxu0 %v30_v13  ;;  %11486 = vst [vmem:[#allocation4_spill] sm:$0xff] %v7788_v32  ;;  %v7811_v36 = vperm.slane %v7680_v3, 6  ;;  %v7814_v37 = vadd.s32 48, %v7694_v8  ;;  %v7821_v38 = vperm.slane %v7718_v15, 3  ;;  %v7826_v39 = vperm.slane %v7675_v2, 0 }
   0x9   :  { %11487 = vst [vmem:[#allocation5_spill] sm:$0xff] %v7804_v35  ;;  %v7829_v40 = vadd.s32 8, %v7694_v8  ;;  %v7833_v41 = vperm.slane %v7689_v6, 1  ;;  %v7838_v42 = vperm.slane %v7675_v2, 5  ;;  %v7844_v43 = vperm.slane %v7713_v14, 2 }
   0xa   :  { %119 = vmatpush.msra.mxu0 %v29_v17  ;;  %11488 = vst [vmem:[#allocation6_spill] sm:$0xff] %v7811_v36  ;;  %v7850_v44 = vperm.slane %v7713_v14, 7  ;;  %v7856_v45 = vperm.slane %v7759_v25, 4  ;;  %v7871_v48 = vperm.slane %v7689_v6, 4  ;;  %v7879_v50 = vperm.slane %v7724_v16, 1 }
   0xb   :  { %59 = vadd.xlane.f32.xlu2 %v58_v18  ;;  %53 = vadd.xlane.f32.xlu1 %v52_v19  ;;  %11489 = vst [vmem:[#allocation7_spill] sm:$0xff] %v7821_v38  ;;  %v7887_v52 = vperm.slane %v7724_v16, 6  ;;  %v7895_v54 = vperm.slane %v7680_v3, 3  ;;  %v7903_v56 = vperm.slane %v7718_v15, 0  ;;  %v7911_v58 = vperm.slane %v7718_v15, 5 }
   0xc   :  { %47 = vadd.xlane.f32.xlu0 %v46_v20  ;;  %120 = vmatpush.msra.mxu0 %v28_v21  ;;  %11490 = vst [vmem:[#allocation8_spill] sm:$0xff] %v7826_v39  ;;  %v7915_v59 = vperm.slane %v7689_v6, 3  ;;  %v7922_v61 = vperm.slane %v7675_v2, 2  ;;  %v7930_v63 = vperm.slane %v7675_v2, 7  ;;  %v7938_v1 = vperm.slane %v7713_v14, 4 }
   0xd   :  { %11491 = vst [vmem:[#allocation9_spill] sm:$0xff] %v7838_v42  ;;  %v7946_v5 = vperm.slane %v7759_v25, 1  ;;  %v7952_v7 = vperm.slane %v7759_v25, 6  ;;  %v7960_v10 = vperm.slane %v7753_v24, 0  ;;  %v7978_v19 = vperm.slane %v7689_v6, 6 }
   0xe   :  { %121 = vmatpush.msra.mxu0 %v7743_v22  ;;  %11492 = vst [vmem:[#allocation10_spill] sm:$0xff] %v7844_v43  ;;  %v7986_v21 = vperm.slane %v7724_v16, 3 }
   0xf   :  { %11493 = vst [vmem:[#allocation11_spill] sm:$0xff] %v7850_v44 }
  0x10   :  { %122 = vmatpush.msra.mxu0 %v7748_v23  ;;  %11494 = vst [vmem:[#allocation12_spill] sm:$0xff] %v7856_v45 }
  0x11   :  { %7082 = vmatmul.msk.f32.vlgmr.msra.gmra.mxu0 %vm42_vm0, %v7689_v6  ;;  %11497 = vst [vmem:[#allocation15_spill] sm:$0xff] %v7871_v48 }
  0x12   :  { %11499 = vst [vmem:[#allocation17_spill] sm:$0xff] %v7879_v50 }
  0x13   :  { %65 = vadd.xlane.f32.xlu1 %v64_v26  ;;  %11501 = vst [vmem:[#allocation19_spill] sm:$0xff] %v7895_v54 }
  0x14   :  { %62 = vadd.xlane.f32.xlu0 %v61_v27  ;;  %11503 = vst [vmem:[#allocation21_spill] sm:$0xff] %v7903_v56  ;;  %v7994_v27 = vperm.slane %v7680_v3, 0 }
  0x15   :  { %11505 = vst [vmem:[#allocation23_spill] sm:$0xff] %v7911_v58 }
  0x16   :  { %11507 = vst [vmem:[#allocation25_spill] sm:$0xff] %v7922_v61 }
  0x17   :  { %11509 = vst [vmem:[#allocation27_spill] sm:$0xff] %v7930_v63 }
  0x18   :  { %11511 = vst [vmem:[#allocation29_spill] sm:$0xff] %v7938_v1 }
  0x19   :  { %7083 = vmatmul.msk.f32.gmra.mxu0 %vm42_vm0, %v7724_v16  ;;  %11513 = vst [vmem:[#allocation31_spill] sm:$0xff] %v7946_v5 }
  0x1a   :  { %11514 = vst [vmem:[#allocation32_spill] sm:$0xff] %v7952_v7 }
  0x1b   :  { %11516 = vst [vmem:[#allocation34_spill] sm:$0xff] %v7960_v10 }
  0x21   :  { %7084 = vmatmul.msk.f32.gmra.mxu0 %vm42_vm0, %v7680_v3 }
  0x23   :  { %161 = vperm.xlu2 %7116, %v156_v28  }
  0x28   :  { %301 = vperm.xlu0 %7135, %v7774_v29  }
  0x29   :  { %7085 = vmatmul.msk.f32.gmra.mxu0 %vm42_vm0, %v7718_v15 }
  0x2b   :  { %7118 = vset.pattern.permute.xlu2 %v7777_v30 }
  0x2c   :  { %173 = vperm.xlu1 %7117, %v156_v28  }
  0x30   :  { %546 = vperm.xlu0 %7135, %v7784_v31  }
  0x31   :  { %7086 = vmatmul.msk.f32.gmra.mxu0 %vm42_vm0, %v7675_v2 }
  0x33   :  { %179 = vperm.xlu2 %7118, %v156_v28  }
  0x34   :  { %7120 = vset.pattern.permute.xlu1 %v7788_v32 }
  0x38   :  { %791 = vperm.xlu0 %7135, %v7794_v33  }
  0x39   :  { %7087 = vmatmul.msk.f32.gmra.mxu0 %vm42_vm0, %v7713_v14 }
  0x3b   :  { %7119 = vset.pattern.permute.xlu2 %v7797_v34 }
  0x3c   :  { %191 = vperm.xlu1 %7120, %v156_v28  }
  0x40   :  { %1036 = vperm.xlu0 %7135, %v7804_v35  }
  0x41   :  { %7088 = vmatmul.msk.f32.gmra.mxu0 %vm42_vm0, %v7759_v25 }
  0x43   :  { %185 = vperm.xlu2 %7119, %v156_v28  }
  0x44   :  { %7122 = vset.pattern.permute.xlu1 %v7702_v11 }
  0x48   :  { %1281 = vperm.xlu0 %7135, %v7811_v36  }
  0x49   :  { %7089 = vmatmul.msk.f32.gmra.mxu0 %vm42_vm0, %v7753_v24 }
  0x4b   :  { %7121 = vset.pattern.permute.xlu2 %v7814_v37 }
  0x4c   :  { %203 = vperm.xlu1 %7122, %v156_v28  }
  0x50   :  { %1526 = vperm.xlu0 %7135, %v7821_v38  }
  0x53   :  { %197 = vperm.xlu2 %7121, %v156_v28  }
  0x54   :  { %7124 = vset.pattern.permute.xlu1 %v7705_v12 }
  0x58   :  { %1771 = vperm.xlu0 %7135, %v7826_v39  }
  0x5b   :  { %7123 = vset.pattern.permute.xlu2 %v7829_v40 }
  0x5c   :  { %222 = vperm.xlu1 %7124, %v7833_v41  }
  0x60   :  { %2016 = vperm.xlu0 %7135, %v7838_v42  }
  0x63   :  { %216 = vperm.xlu2 %7123, %v7833_v41  }
  0x64   :  { %7126 = vset.pattern.permute.xlu1 %v7797_v34 }
  0x68   :  { %2261 = vperm.xlu0 %7135, %v7844_v43  }
  0x6b   :  { %7125 = vset.pattern.permute.xlu2 %v7777_v30 }
  0x6c   :  { %234 = vperm.xlu1 %7126, %v7833_v41  }
  0x70   :  { %2506 = vperm.xlu0 %7135, %v7850_v44  }
  0x73   :  { %228 = vperm.xlu2 %7125, %v7833_v41  }
  0x74   :  { %7128 = vset.pattern.permute.xlu1 %v7702_v11 }
  0x77   :  { %v7861_v46 = vpop.xlane.xlu0 %44 }
  0x78   :  { %2751 = vperm.xlu0 %7135, %v7856_v45   ;;  %11495 = vst [vmem:[#allocation13_spill] sm:$0xff] %v7861_v46 }
  0x7b   :  { %7127 = vset.pattern.permute.xlu2 %v7814_v37 }
  0x7c   :  { %252 = vperm.xlu1 %7128, %v7833_v41  }
  0x7f   :  { %v7866_v47 = vpop.xlane.xlu0 %47 }
  0x80   :  { %7456 = vset.pattern.permute.xlu0 %v7829_v40  ;;  %11496 = vst [vmem:[#allocation14_spill] sm:$0xff] %v7866_v47  ;;  %v8006_v47 = vperm.slane %v7689_v6, 5  ;;  %v8021_v6 = vperm.slane %v7718_v15, 7 }
  0x82   :  { %11526 = vst [vmem:[#allocation44_spill] sm:$0xff] %v8021_v6 }
  0x83   :  { %246 = vperm.xlu2 %7127, %v7833_v41  }
  0x84   :  { %7130 = vset.pattern.permute.xlu1 %v7829_v40 }
  0x87   :  { %v7874_v49 = vpop.xlane.xlu0 %62 }
  0x88   :  { %167 = vperm.xlu0 %7456, %v156_v28   ;;  %11498 = vst [vmem:[#allocation16_spill] sm:$0xff] %v7874_v49  ;;  %v8002_v49 = vperm.slane %v7680_v3, 5 }
  0x8a   :  { %11522 = vst [vmem:[#allocation40_spill] sm:$0xff] %v8002_v49 }
  0x8b   :  { %7129 = vset.pattern.permute.xlu2 %v7694_v8 }
  0x8c   :  { %265 = vperm.xlu1 %7130, %v7774_v29  }
  0x90   :  { %363 = vperm.xlu0 %7456, %v7871_v48  }
  0x93   :  { %259 = vperm.xlu2 %7129, %v7774_v29  }
  0x94   :  { %7132 = vset.pattern.permute.xlu1 %v7797_v34 }
  0x98   :  { %608 = vperm.xlu0 %7456, %v7879_v50  }
  0x9a   :  { %v7882_v51 = vpop.permute.xlu0 %301 }
  0x9b   :  { %7131 = vset.pattern.permute.xlu2 %v7777_v30 }
  0x9c   :  { %283 = vperm.xlu1 %7132, %v7774_v29  }
  0xa0   :  { %853 = vperm.xlu0 %7456, %v7887_v52  }
  0xa2   :  { %v7890_v53 = vpop.permute.xlu0 %546 }
  0xa3   :  { %11500 = vst [vmem:[#allocation18_spill] sm:$0xff] %v7890_v53  ;;  %277 = vperm.xlu2 %7131, %v7774_v29  }
  0xa4   :  { %7134 = vset.pattern.permute.xlu1 %v7814_v37 }
  0xa8   :  { %1098 = vperm.xlu0 %7456, %v7895_v54  }
  0xaa   :  { %v7898_v55 = vpop.permute.xlu0 %791 }
  0xab   :  { %11502 = vst [vmem:[#allocation20_spill] sm:$0xff] %v7898_v55  ;;  %7133 = vset.pattern.permute.xlu2 %v7788_v32 }
  0xac   :  { %295 = vperm.xlu1 %7134, %v7774_v29  }
  0xb0   :  { %1343 = vperm.xlu0 %7456, %v7903_v56  }
  0xb2   :  { %v7906_v57 = vpop.permute.xlu0 %1036 }
  0xb3   :  { %11504 = vst [vmem:[#allocation22_spill] sm:$0xff] %v7906_v57  ;;  %289 = vperm.xlu2 %7133, %v7774_v29  }
  0xb4   :  { %7137 = vset.pattern.permute.xlu1 %v7829_v40 }
  0xb8   :  { %1588 = vperm.xlu0 %7456, %v7911_v58  }
  0xba   :  { %v7917_v60 = vpop.permute.xlu0 %1281 }
  0xbb   :  { %11506 = vst [vmem:[#allocation24_spill] sm:$0xff] %v7917_v60  ;;  %7136 = vset.pattern.permute.xlu2 %v7694_v8  ;;  %v8045_v60 = vperm.slane %v7713_v14, 6 }
  0xbc   :  { %314 = vperm.xlu1 %7137, %v7915_v59  }
  0xbd   :  { %11532 = vst [vmem:[#allocation50_spill] sm:$0xff] %v8045_v60 }
  0xc0   :  { %1833 = vperm.xlu0 %7456, %v7922_v61  }
  0xc2   :  { %v7925_v62 = vpop.permute.xlu0 %1526 }
  0xc3   :  { %11508 = vst [vmem:[#allocation26_spill] sm:$0xff] %v7925_v62  ;;  %308 = vperm.xlu2 %7136, %v7915_v59  }
  0xc4   :  { %7139 = vset.pattern.permute.xlu1 %v7777_v30 }
  0xc8   :  { %2078 = vperm.xlu0 %7456, %v7930_v63  }
  0xca   :  { %v7933_v0 = vpop.permute.xlu0 %1771 }
  0xcb   :  { %11510 = vst [vmem:[#allocation28_spill] sm:$0xff] %v7933_v0  ;;  %7138 = vset.pattern.permute.xlu2 %v7705_v12  ;;  %v8029_v0 = vperm.slane %v7675_v2, 4 }
  0xcc   :  { %326 = vperm.xlu1 %7139, %v7915_v59  }
  0xcd   :  { %11528 = vst [vmem:[#allocation46_spill] sm:$0xff] %v8029_v0 }
  0xd0   :  { %2323 = vperm.xlu0 %7456, %v7938_v1  }
  0xd2   :  { %v7941_v4 = vpop.permute.xlu0 %2016 }
  0xd3   :  { %11512 = vst [vmem:[#allocation30_spill] sm:$0xff] %v7941_v4  ;;  %320 = vperm.xlu2 %7138, %v7915_v59  }
  0xd4   :  { %7141 = vset.pattern.permute.xlu1 %v7814_v37 }
  0xd8   :  { %2568 = vperm.xlu0 %7456, %v7946_v5  }
  0xda   :  { %v7954_v9 = vpop.permute.xlu0 %2261 }
  0xdb   :  { %7140 = vset.pattern.permute.xlu2 %v7788_v32  ;;  %11515 = vst [vmem:[#allocation33_spill] sm:$0xff] %v7954_v9 }
  0xdc   :  { %344 = vperm.xlu1 %7141, %v7915_v59  }
  0xe0   :  { %2813 = vperm.xlu0 %7456, %v7952_v7  }
  0xe2   :  { %v7962_v13 = vpop.permute.xlu0 %2506 }
  0xe3   :  { %338 = vperm.xlu2 %7140, %v7915_v59   ;;  %11517 = vst [vmem:[#allocation35_spill] sm:$0xff] %v7962_v13  ;;  %v8013_v13 = vperm.slane %v7718_v15, 2 }
  0xe4   :  { %7143 = vset.pattern.permute.xlu1 %v7694_v8 }
  0xe5   :  { %11524 = vst [vmem:[#allocation42_spill] sm:$0xff] %v8013_v13 }
  0xe8   :  { %2911 = vperm.xlu0 %7456, %v7960_v10  }
  0xea   :  { %v7968_v17 = vpop.permute.xlu0 %2751 }
  0xeb   :  { %7142 = vset.pattern.permute.xlu2 %v7702_v11  ;;  %11518 = vst [vmem:[#allocation36_spill] sm:$0xff] %v7968_v17 }
  0xec   :  { %357 = vperm.xlu1 %7143, %v7871_v48  }
  0xf0   :  { %7477 = vset.pattern.permute.xlu0 %v7694_v8 }
  0xf3   :  { %350 = vperm.xlu2 %7142, %v7915_v59  }
  0xf4   :  { %7145 = vset.pattern.permute.xlu1 %v7777_v30 }
  0xf8   :  { %210 = vperm.xlu0 %7477, %v7833_v41  }
  0xfa   :  { %v7973_v18 = vpop.permute.xlu0 %167 }
  0xfb   :  { %7144 = vset.pattern.permute.xlu2 %v7705_v12  ;;  %vm3293_vm1 = vcmp.gt.f32.partialorder %v7973_v18, 0.0 }
  0xfc   :  { %375 = vperm.xlu1 %7145, %v7871_v48  }
 0x100   :  { %455 = vperm.xlu0 %7477, %v7978_v19  }
 0x102   :  { %v7981_v20 = vpop.permute.xlu0 %363 }
 0x103   :  { %11519 = vst [vmem:[#allocation37_spill] sm:$0xff] %v7981_v20  ;;  %369 = vperm.xlu2 %7144, %v7871_v48  }
 0x104   :  { %7147 = vset.pattern.permute.xlu1 %v7788_v32 }
 0x108   :  { %700 = vperm.xlu0 %7477, %v7986_v21  }
 0x10a   :  { %v7989_v26 = vpop.permute.xlu0 %608 }
 0x10b   :  { %11520 = vst [vmem:[#allocation38_spill] sm:$0xff] %v7989_v26  ;;  %7146 = vset.pattern.permute.xlu2 %v7797_v34 }
 0x10c   :  { %387 = vperm.xlu1 %7147, %v7871_v48  }
 0x110   :  { %945 = vperm.xlu0 %7477, %v7994_v27  }
 0x112   :  { %v7997_v28 = vpop.permute.xlu0 %853 }
 0x113   :  { %11521 = vst [vmem:[#allocation39_spill] sm:$0xff] %v7997_v28  ;;  %381 = vperm.xlu2 %7146, %v7871_v48  }
 0x114   :  { %7149 = vset.pattern.permute.xlu1 %v7694_v8 }
 0x118   :  { %1190 = vperm.xlu0 %7477, %v8002_v49  }
 0x11a   :  { %v8008_v17 = vpop.permute.xlu0 %1098 }
 0x11b   :  { %11523 = vst [vmem:[#allocation41_spill] sm:$0xff] %v8008_v17  ;;  %7148 = vset.pattern.permute.xlu2 %v7702_v11  ;;  %v8053_v17 = vperm.slane %v7759_v25, 3 }
 0x11c   :  { %406 = vperm.xlu1 %7149, %v8006_v47  }
 0x11d   :  { %11534 = vst [vmem:[#allocation52_spill] sm:$0xff] %v8053_v17 }
 0x120   :  { %1435 = vperm.xlu0 %7477, %v8013_v13  }
 0x122   :  { %v8016_v9 = vpop.permute.xlu0 %1343 }
 0x123   :  { %11525 = vst [vmem:[#allocation43_spill] sm:$0xff] %v8016_v9  ;;  %399 = vperm.xlu2 %7148, %v7871_v48   ;;  %v8037_v9 = vperm.slane %v7713_v14, 1 }
 0x124   :  { %7151 = vset.pattern.permute.xlu1 %v7705_v12 }
 0x125   :  { %11530 = vst [vmem:[#allocation48_spill] sm:$0xff] %v8037_v9 }
 0x128   :  { %1680 = vperm.xlu0 %7477, %v8021_v6  }
 0x12a   :  { %v8024_v4 = vpop.permute.xlu0 %1588 }
 0x12b   :  { %11527 = vst [vmem:[#allocation45_spill] sm:$0xff] %v8024_v4  ;;  %7150 = vset.pattern.permute.xlu2 %v7829_v40 }
 0x12c   :  { %418 = vperm.xlu1 %7151, %v8006_v47  }
 0x130   :  { %1925 = vperm.xlu0 %7477, %v8029_v0  }
 0x132   :  { %v8032_v62 = vpop.permute.xlu0 %1833 }
 0x133   :  { %11529 = vst [vmem:[#allocation47_spill] sm:$0xff] %v8032_v62  ;;  %412 = vperm.xlu2 %7150, %v8006_v47  }
 0x134   :  { %7153 = vset.pattern.permute.xlu1 %v7788_v32 }
 0x138   :  { %2170 = vperm.xlu0 %7477, %v8037_v9  }
 0x13a   :  { %v8040_v4 = vpop.permute.xlu0 %2078 }
 0x13b   :  { %11531 = vst [vmem:[#allocation49_spill] sm:$0xff] %v8040_v4  ;;  %7152 = vset.pattern.permute.xlu2 %v7797_v34  ;;  %v8059_v4 = vperm.slane %v7753_v24, 4 }
 0x13c   :  { %436 = vperm.xlu1 %7153, %v8006_v47  }
 0x13d   :  { %11535 = vst [vmem:[#allocation53_spill] sm:$0xff] %v8059_v4 }
 0x140   :  { %2415 = vperm.xlu0 %7477, %v8045_v60  }
 0x142   :  { %v8048_v62 = vpop.permute.xlu0 %2323 }
 0x143   :  { %11533 = vst [vmem:[#allocation51_spill] sm:$0xff] %v8048_v62  ;;  %430 = vperm.xlu2 %7152, %v8006_v47   ;;  %v8067_v62 = vperm.slane %v7753_v24, 5 }
 0x144   :  { %7155 = vset.pattern.permute.xlu1 %v7702_v11 }
 0x145   :  { %11537 = vst [vmem:[#allocation55_spill] sm:$0xff] %v8067_v62 }
 0x148   :  { %2660 = vperm.xlu0 %7477, %v8053_v17  }
 0x14a   :  { %v8061_v57 = vpop.permute.xlu0 %2568 }
 0x14b   :  { %7154 = vset.pattern.permute.xlu2 %v7814_v37  ;;  %11536 = vst [vmem:[#allocation54_spill] sm:$0xff] %v8061_v57 }
 0x14c   :  { %448 = vperm.xlu1 %7155, %v8006_v47  }
 0x150   :  { %3101 = vperm.xlu0 %7477, %v8059_v4  }
 0x152   :  { %v8069_v46 = vpop.permute.xlu0 %2813 }
 0x153   :  { %442 = vperm.xlu2 %7154, %v8006_v47   ;;  %11538 = vst [vmem:[#allocation56_spill] sm:$0xff] %v8069_v46 }
 0x154   :  { %7157 = vset.pattern.permute.xlu1 %v7705_v12 }
 0x158   :  { %3150 = vperm.xlu0 %7477, %v8067_v62  }
 0x15a   :  { %v8075_v57 = vpop.permute.xlu0 %2911 }
 0x15b   :  { %7156 = vset.pattern.permute.xlu2 %v7829_v40  ;;  %11539 = vst [vmem:[#allocation57_spill] sm:$0xff] %v8075_v57 }
 0x15c   :  { %467 = vperm.xlu1 %7157, %v7978_v19  }
 0x160   :  { %7487 = vset.pattern.permute.xlu0 %v7705_v12 }
 0x163   :  { %461 = vperm.xlu2 %7156, %v7978_v19  }
 0x164   :  { %7159 = vset.pattern.permute.xlu1 %v7797_v34 }
 0x168   :  { %271 = vperm.xlu0 %7487, %v7774_v29  }
 0x16a   :  { %v8080_v7 = vpop.permute.xlu0 %210 }
 0x16b   :  { %7158 = vset.pattern.permute.xlu2 %v7777_v30 }
 0x16c   :  { %479 = vperm.xlu1 %7159, %v7978_v19  }
 0x170   :  { %516 = vperm.xlu0 %7487, %v7784_v31  }
 0x172   :  { %v8085_v62 = vpop.permute.xlu0 %455 }
 0x173   :  { %11540 = vst [vmem:[#allocation58_spill] sm:$0xff] %v8085_v62  ;;  %473 = vperm.xlu2 %7158, %v7978_v19  }
 0x174   :  { %7161 = vset.pattern.permute.xlu1 %v7702_v11 }
 0x178   :  { %761 = vperm.xlu0 %7487, %v7794_v33  }
 0x17a   :  { %v8090_v57 = vpop.permute.xlu0 %700 }
 0x17b   :  { %11541 = vst [vmem:[#allocation59_spill] sm:$0xff] %v8090_v57  ;;  %7160 = vset.pattern.permute.xlu2 %v7814_v37 }
 0x17c   :  { %497 = vperm.xlu1 %7161, %v7978_v19  }
 0x180   :  { %1006 = vperm.xlu0 %7487, %v7804_v35   ;;  %v8235_v35 = vpop.xlane.xlu1 %50 }
 0x181   :  { %11570 = vst [vmem:[#allocation88_spill] sm:$0xff] %v8235_v35 }
 0x182   :  { %v8095_v29 = vpop.permute.xlu0 %945 }
 0x183   :  { %11542 = vst [vmem:[#allocation60_spill] sm:$0xff] %v8095_v29  ;;  %491 = vperm.xlu2 %7160, %v7978_v19  }
 0x184   :  { %7163 = vset.pattern.permute.xlu1 %v7829_v40 }
 0x188   :  { %1251 = vperm.xlu0 %7487, %v7811_v36  }
 0x18a   :  { %v8100_v46 = vpop.permute.xlu0 %1190 }
 0x18b   :  { %11543 = vst [vmem:[#allocation61_spill] sm:$0xff] %v8100_v46  ;;  %7162 = vset.pattern.permute.xlu2 %v7694_v8 }
 0x18c   :  { %510 = vperm.xlu1 %7163, %v7784_v31  }
 0x190   :  { %1496 = vperm.xlu0 %7487, %v7821_v38   ;;  %v8190_v38 = vperm.slane %v7718_v15, 6 }
 0x192   :  { %v8105_v5 = vpop.permute.xlu0 %1435  ;;  %11559 = vst [vmem:[#allocation77_spill] sm:$0xff] %v8190_v38 }
 0x193   :  { %11544 = vst [vmem:[#allocation62_spill] sm:$0xff] %v8105_v5  ;;  %504 = vperm.xlu2 %7162, %v7784_v31  }
 0x194   :  { %7165 = vset.pattern.permute.xlu1 %v7797_v34 }
 0x198   :  { %1741 = vperm.xlu0 %7487, %v7826_v39  }
 0x19a   :  { %v8110_v29 = vpop.permute.xlu0 %1680 }
 0x19b   :  { %11545 = vst [vmem:[#allocation63_spill] sm:$0xff] %v8110_v29  ;;  %7164 = vset.pattern.permute.xlu2 %v7777_v30 }
 0x19c   :  { %528 = vperm.xlu1 %7165, %v7784_v31  }
 0x1a0   :  { %1986 = vperm.xlu0 %7487, %v7838_v42   ;;  %v8182_v42 = vpop.xlane.xlu2 %56 }
 0x1a1   :  { %11557 = vst [vmem:[#allocation75_spill] sm:$0xff] %v8182_v42  ;;  %v8200_v42 = vperm.slane %v7675_v2, 3 }
 0x1a2   :  { %v8115_v46 = vpop.permute.xlu0 %1925 }
 0x1a3   :  { %11546 = vst [vmem:[#allocation64_spill] sm:$0xff] %v8115_v46  ;;  %522 = vperm.xlu2 %7164, %v7784_v31   ;;  %v8131_v46 = vperm.slane %v7724_v16, 0 }
 0x1a4   :  { %7167 = vset.pattern.permute.xlu1 %v7814_v37  ;;  %11562 = vst [vmem:[#allocation80_spill] sm:$0xff] %v8200_v42 }
 0x1a8   :  { %2231 = vperm.xlu0 %7487, %v7844_v43   ;;  %v8180_v43 = vperm.slane %v7718_v15, 1  ;;  %v8193_v36 = vpop.xlane.xlu2 %59 }
 0x1a9   :  { %11560 = vst [vmem:[#allocation78_spill] sm:$0xff] %v8193_v36  ;;  %v8210_v36 = vperm.slane %v7713_v14, 0 }
 0x1aa   :  { %v8120_v5 = vpop.permute.xlu0 %2170  ;;  %11556 = vst [vmem:[#allocation74_spill] sm:$0xff] %v8180_v43 }
 0x1ab   :  { %11547 = vst [vmem:[#allocation65_spill] sm:$0xff] %v8120_v5  ;;  %7166 = vset.pattern.permute.xlu2 %v7788_v32 }
 0x1ac   :  { %540 = vperm.xlu1 %7167, %v7784_v31   ;;  %11564 = vst [vmem:[#allocation82_spill] sm:$0xff] %v8210_v36 }
 0x1b0   :  { %2476 = vperm.xlu0 %7487, %v7850_v44  }
 0x1b2   :  { %v8125_v29 = vpop.permute.xlu0 %2415 }
 0x1b3   :  { %11548 = vst [vmem:[#allocation66_spill] sm:$0xff] %v8125_v29  ;;  %534 = vperm.xlu2 %7166, %v7784_v31   ;;  %v8172_v29 = vperm.slane %v7680_v3, 4 }
 0x1b4   :  { %7169 = vset.pattern.permute.xlu1 %v7829_v40 }
 0x1b5   :  { %11554 = vst [vmem:[#allocation72_spill] sm:$0xff] %v8172_v29 }
 0x1b8   :  { %2721 = vperm.xlu0 %7487, %v7856_v45  }
 0x1ba   :  { %v8135_v5 = vpop.permute.xlu0 %2660 }
 0x1bb   :  { %7168 = vset.pattern.permute.xlu2 %v7694_v8  ;;  %11549 = vst [vmem:[#allocation67_spill] sm:$0xff] %v8135_v5 }
 0x1bc   :  { %559 = vperm.xlu1 %7169, %v8131_v46  }
 0x1c0   :  { %2917 = vperm.xlu0 %7487, %v7960_v10  }
 0x1c2   :  { %v8140_v31 = vpop.permute.xlu0 %3101 }
 0x1c3   :  { %553 = vperm.xlu2 %7168, %v8131_v46   ;;  %11550 = vst [vmem:[#allocation68_spill] sm:$0xff] %v8140_v31  ;;  %v8156_v31 = vperm.slane %v7724_v16, 2 }
 0x1c4   :  { %7171 = vset.pattern.permute.xlu1 %v7777_v30 }
 0x1c8   :  { %3113 = vperm.xlu0 %7487, %v8059_v4  }
 0x1ca   :  { %v8146_v45 = vpop.permute.xlu0 %3150 }
 0x1cb   :  { %7170 = vset.pattern.permute.xlu2 %v7705_v12  ;;  %11551 = vst [vmem:[#allocation69_spill] sm:$0xff] %v8146_v45  ;;  %v8164_v45 = vperm.slane %v7724_v16, 7 }
 0x1cc   :  { %571 = vperm.xlu1 %7171, %v8131_v46  }
 0x1d0   :  { %7490 = vset.pattern.permute.xlu0 %v7777_v30 }
 0x1d3   :  { %565 = vperm.xlu2 %7170, %v8131_v46  }
 0x1d4   :  { %7173 = vset.pattern.permute.xlu1 %v7814_v37 }
 0x1d8   :  { %424 = vperm.xlu0 %7490, %v8006_v47  }
 0x1da   :  { %v8151_v10 = vpop.permute.xlu0 %271 }
 0x1db   :  { %7172 = vset.pattern.permute.xlu2 %v7788_v32  ;;  %vm3310_vm6 = vcmp.gt.f32.partialorder %v8151_v10, 0.0 }
 0x1dc   :  { %589 = vperm.xlu1 %7173, %v8131_v46  }
 0x1e0   :  { %669 = vperm.xlu0 %7490, %v8156_v31  }
 0x1e2   :  { %v8159_v5 = vpop.permute.xlu0 %516 }
 0x1e3   :  { %11552 = vst [vmem:[#allocation70_spill] sm:$0xff] %v8159_v5  ;;  %583 = vperm.xlu2 %7172, %v8131_v46  }
 0x1e4   :  { %7175 = vset.pattern.permute.xlu1 %v7694_v8 }
 0x1e8   :  { %914 = vperm.xlu0 %7490, %v8164_v45  }
 0x1ea   :  { %v8167_v47 = vpop.permute.xlu0 %761 }
 0x1eb   :  { %11553 = vst [vmem:[#allocation71_spill] sm:$0xff] %v8167_v47  ;;  %7174 = vset.pattern.permute.xlu2 %v7702_v11 }
 0x1ec   :  { %602 = vperm.xlu1 %7175, %v7879_v50  }
 0x1f0   :  { %1159 = vperm.xlu0 %7490, %v8172_v29  }
 0x1f2   :  { %v8175_v44 = vpop.permute.xlu0 %1006 }
 0x1f3   :  { %11555 = vst [vmem:[#allocation73_spill] sm:$0xff] %v8175_v44  ;;  %595 = vperm.xlu2 %7174, %v8131_v46  }
 0x1f4   :  { %7177 = vset.pattern.permute.xlu1 %v7777_v30 }
 0x1f8   :  { %1404 = vperm.xlu0 %7490, %v8180_v43   ;;  %v8205_v43 = vpop.permute.xlu2 %161 }
 0x1f9   :  { %vm3292_vm2 = vcmp.gt.f32.partialorder %v8205_v43, 0.0 }
 0x1fa   :  { %v8185_v39 = vpop.permute.xlu0 %1251 }
 0x1fb   :  { %11558 = vst [vmem:[#allocation76_spill] sm:$0xff] %v8185_v39  ;;  %7176 = vset.pattern.permute.xlu2 %v7705_v12 }
 0x1fc   :  { %620 = vperm.xlu1 %7177, %v7879_v50  }
 0x200   :  { %1649 = vperm.xlu0 %7490, %v8190_v38   ;;  %v8215_v38 = vpop.permute.xlu2 %179 }
 0x201   :  { %vm3295_vm9 = vcmp.gt.f32.partialorder %v8215_v38, 0.0  ;;  %v8590_v38 = vld [vmem:[%s11369_s0 + $0x18] sm:$0xff] }
 0x202   :  { %v8195_v44 = vpop.permute.xlu0 %1496 }
 0x203   :  { %11561 = vst [vmem:[#allocation79_spill] sm:$0xff] %v8195_v44  ;;  %614 = vperm.xlu2 %7176, %v7879_v50  }
 0x204   :  { %7179 = vset.pattern.permute.xlu1 %v7788_v32 }
 0x208   :  { %1894 = vperm.xlu0 %7490, %v8200_v42   ;;  %v8225_v29 = vpop.permute.xlu2 %185 }
 0x209   :  { %vm3296_vm13 = vcmp.gt.f32.partialorder %v8225_v29, 0.0  ;;  %v8607_v29 = vld [vmem:[%s11369_s0 + $0x20] sm:$0xff] }
 0x20a   :  { %v8203_v39 = vpop.permute.xlu0 %1741 }
 0x20b   :  { %11563 = vst [vmem:[#allocation81_spill] sm:$0xff] %v8203_v39  ;;  %7178 = vset.pattern.permute.xlu2 %v7797_v34  ;;  %v8220_v39 = vperm.slane %v7713_v14, 5 }
 0x20c   :  { %632 = vperm.xlu1 %7179, %v7879_v50  }
 0x20d   :  { %11566 = vst [vmem:[#allocation84_spill] sm:$0xff] %v8220_v39 }
 0x210   :  { %2139 = vperm.xlu0 %7490, %v8210_v36   ;;  %v8237_v47 = vpop.permute.xlu2 %197 }
 0x212   :  { %v8213_v44 = vpop.permute.xlu0 %1986 }
 0x213   :  { %11565 = vst [vmem:[#allocation83_spill] sm:$0xff] %v8213_v44  ;;  %626 = vperm.xlu2 %7178, %v7879_v50   ;;  %v8230_v44 = vperm.slane %v7759_v25, 2 }
 0x214   :  { %7181 = vset.pattern.permute.xlu1 %v7694_v8 }
 0x215   :  { %11568 = vst [vmem:[#allocation86_spill] sm:$0xff] %v8230_v44 }
 0x218   :  { %2384 = vperm.xlu0 %7490, %v8220_v39   ;;  %v8245_v39 = vpop.permute.xlu2 %216 }
 0x21a   :  { %v8223_v42 = vpop.permute.xlu0 %2231 }
 0x21b   :  { %11567 = vst [vmem:[#allocation85_spill] sm:$0xff] %v8223_v42  ;;  %7180 = vset.pattern.permute.xlu2 %v7702_v11  ;;  %v8242_v42 = vperm.slane %v7759_v25, 7 }
 0x21c   :  { %651 = vperm.xlu1 %7181, %v8156_v31  }
 0x21d   :  { %11571 = vst [vmem:[#allocation89_spill] sm:$0xff] %v8242_v42 }
 0x220   :  { %2629 = vperm.xlu0 %7490, %v8230_v44   ;;  %v8250_v44 = vperm.slane %v7753_v24, 3  ;;  %v8257_v1 = vpop.permute.xlu2 %228 }
 0x222   :  { %v8233_v36 = vpop.permute.xlu0 %2476  ;;  %11572 = vst [vmem:[#allocation90_spill] sm:$0xff] %v8250_v44 }
 0x223   :  { %11569 = vst [vmem:[#allocation87_spill] sm:$0xff] %v8233_v36  ;;  %644 = vperm.xlu2 %7180, %v7879_v50   ;;  %v8254_v36 = vpop.xlane.xlu1 %53 }
 0x224   :  { %7183 = vset.pattern.permute.xlu1 %v7705_v12  ;;  %11574 = vst [vmem:[#allocation92_spill] sm:$0xff] %v8254_v36 }
 0x228   :  { %2874 = vperm.xlu0 %7490, %v8242_v42  }
 0x22a   :  { %v8252_v35 = vpop.permute.xlu0 %2721 }
 0x22b   :  { %7182 = vset.pattern.permute.xlu2 %v7829_v40  ;;  %11573 = vst [vmem:[#allocation91_spill] sm:$0xff] %v8252_v35  ;;  %v8263_v57 = vpop.xlane.xlu1 %65  ;;  %v8268_v35 = vpop.permute.xlu2 %246 }
 0x22c   :  { %663 = vperm.xlu1 %7183, %v8156_v31   ;;  %11576 = vst [vmem:[#allocation94_spill] sm:$0xff] %v8263_v57 }
 0x230   :  { %3070 = vperm.xlu0 %7490, %v8250_v44  }
 0x232   :  { %v8261_v42 = vpop.permute.xlu0 %2917 }
 0x233   :  { %657 = vperm.xlu2 %7182, %v8156_v31   ;;  %11575 = vst [vmem:[#allocation93_spill] sm:$0xff] %v8261_v42  ;;  %v8270_v36 = vpop.permute.xlu1 %173  ;;  %v8279_v57 = vpop.permute.xlu2 %259 }
 0x234   :  { %7185 = vset.pattern.permute.xlu1 %v7788_v32  ;;  %vm3308_vm3 = vcmp.gt.f32.partialorder %v8279_v57, 0.0  ;;  %vm3294_vm5 = vcmp.gt.f32.partialorder %v8270_v36, 0.0 }
 0x235   :  { %v4844_v18 = vsel %vm3308_vm3, %v7748_v23, -inf  ;;  %vm3315_vm3 = vcmp.gt.f32.partialorder %v7882_v51, 0.0 }
 0x238   :  { %3119 = vperm.xlu0 %7490, %v8059_v4  }
 0x23a   :  { %v8273_v63 = vpop.permute.xlu0 %3113 }
 0x23b   :  { %7184 = vset.pattern.permute.xlu2 %v7797_v34  ;;  %11577 = vst [vmem:[#allocation95_spill] sm:$0xff] %v8273_v63  ;;  %v8277_v42 = vpop.permute.xlu1 %191  ;;  %v8288_v28 = vpop.permute.xlu2 %277 }
 0x23c   :  { %681 = vperm.xlu1 %7185, %v8156_v31   ;;  %vm3311_vm11 = vcmp.gt.f32.partialorder %v8288_v28, 0.0 }
 0x240   :  { %7499 = vset.pattern.permute.xlu0 %v7797_v34 }
 0x243   :  { %675 = vperm.xlu2 %7184, %v8156_v31   ;;  %v8286_v61 = vpop.permute.xlu1 %203  ;;  %v8301_v26 = vpop.permute.xlu2 %289 }
 0x244   :  { %7187 = vset.pattern.permute.xlu1 %v7702_v11 }
 0x248   :  { %332 = vperm.xlu0 %7499, %v7915_v59   ;;  %v8296_v59 = vperm.slane %v7724_v16, 5 }
 0x24a   :  { %v8282_v62 = vpop.permute.xlu0 %424 }
 0x24b   :  { %11578 = vst [vmem:[#allocation96_spill] sm:$0xff] %v8282_v62  ;;  %7186 = vset.pattern.permute.xlu2 %v7814_v37  ;;  %v8298_v62 = vpop.permute.xlu1 %222 }
 0x24c   :  { %693 = vperm.xlu1 %7187, %v8156_v31  }
 0x250   :  { %577 = vperm.xlu0 %7499, %v8131_v46   ;;  %v8308_v46 = vperm.slane %v7680_v3, 2 }
 0x252   :  { %v8291_v63 = vpop.permute.xlu0 %669  ;;  %11581 = vst [vmem:[#allocation99_spill] sm:$0xff] %v8308_v46 }
 0x253   :  { %11579 = vst [vmem:[#allocation97_spill] sm:$0xff] %v8291_v63  ;;  %687 = vperm.xlu2 %7186, %v8156_v31   ;;  %v8310_v31 = vpop.permute.xlu1 %234  ;;  %v8315_v63 = vpop.permute.xlu2 %308 }
 0x254   :  { %7189 = vset.pattern.permute.xlu1 %v7705_v12  ;;  %vm3316_vm7 = vcmp.gt.f32.partialorder %v8315_v63, 0.0  ;;  %v8563_v63 = vld [vmem:[%s11369_s0 + $0x10] sm:$0xff] }
 0x255   :  { %v4830_v10 = vsel %vm3294_vm5, %v8563_v63, -inf  ;;  %vm3301_vm5 = vcmp.gt.f32.partialorder %v8245_v39, 0.0 }
 0x258   :  { %822 = vperm.xlu0 %7499, %v8296_v59  }
 0x25a   :  { %v8303_v55 = vpop.permute.xlu0 %914 }
 0x25b   :  { %11580 = vst [vmem:[#allocation98_spill] sm:$0xff] %v8303_v55  ;;  %7188 = vset.pattern.permute.xlu2 %v7829_v40  ;;  %v8320_v55 = vperm.slane %v7680_v3, 7  ;;  %v8322_v58 = vpop.permute.xlu1 %252 }
 0x25c   :  { %712 = vperm.xlu1 %7189, %v7986_v21  }
 0x25d   :  { %11583 = vst [vmem:[#allocation101_spill] sm:$0xff] %v8320_v55 }
 0x260   :  { %1067 = vperm.xlu0 %7499, %v8308_v46   ;;  %v8332_v46 = vpop.permute.xlu2 %320 }
 0x261   :  { %vm3318_vm10 = vcmp.gt.f32.partialorder %v8332_v46, 0.0  ;;  %v4831_v46 = vsel %vm3295_vm9, %v8590_v38, -inf  ;;  %vm3302_vm9 = vcmp.gt.f32.partialorder %v8298_v62, 0.0 }
 0x262   :  { %v8313_v16 = vpop.permute.xlu0 %1159 }
 0x263   :  { %11582 = vst [vmem:[#allocation100_spill] sm:$0xff] %v8313_v16  ;;  %706 = vperm.xlu2 %7188, %v7986_v21   ;;  %v8330_v16 = vperm.slane %v7718_v15, 4  ;;  %v8334_v53 = vpop.permute.xlu1 %265 }
 0x264   :  { %7191 = vset.pattern.permute.xlu1 %v7797_v34  ;;  %vm3309_vm4 = vcmp.gt.f32.partialorder %v8334_v53, 0.0 }
 0x265   :  { %11585 = vst [vmem:[#allocation103_spill] sm:$0xff] %v8330_v16 }
 0x268   :  { %1312 = vperm.xlu0 %7499, %v8320_v55   ;;  %v8344_v55 = vpop.permute.xlu2 %338 }
 0x26a   :  { %v8325_v20 = vpop.permute.xlu0 %1404 }
 0x26b   :  { %11584 = vst [vmem:[#allocation102_spill] sm:$0xff] %v8325_v20  ;;  %7190 = vset.pattern.permute.xlu2 %v7777_v30  ;;  %v8342_v20 = vperm.slane %v7675_v2, 1  ;;  %v8346_v5 = vpop.permute.xlu1 %283 }
 0x26c   :  { %724 = vperm.xlu1 %7191, %v7986_v21   ;;  %vm3312_vm15 = vcmp.gt.f32.partialorder %v8346_v5, 0.0 }
 0x26d   :  { %11587 = vst [vmem:[#allocation105_spill] sm:$0xff] %v8342_v20 }
 0x270   :  { %1557 = vperm.xlu0 %7499, %v8330_v16   ;;  %v8358_v56 = vpop.permute.xlu2 %350 }
 0x272   :  { %v8337_v3 = vpop.permute.xlu0 %1649 }
 0x273   :  { %11586 = vst [vmem:[#allocation104_spill] sm:$0xff] %v8337_v3  ;;  %718 = vperm.xlu2 %7190, %v7986_v21   ;;  %v8354_v3 = vperm.slane %v7675_v2, 6  ;;  %v8356_v16 = vpop.permute.xlu1 %295 }
 0x274   :  { %7193 = vset.pattern.permute.xlu1 %v7702_v11 }
 0x275   :  { %11589 = vst [vmem:[#allocation107_spill] sm:$0xff] %v8354_v3 }
 0x278   :  { %1802 = vperm.xlu0 %7499, %v8342_v20   ;;  %v8371_v2 = vpop.permute.xlu2 %369 }
 0x279   :  { %11592 = vst [vmem:[#allocation110_spill] sm:$0xff] %v8371_v2 }
 0x27a   :  { %v8349_v15 = vpop.permute.xlu0 %1894 }
 0x27b   :  { %11588 = vst [vmem:[#allocation106_spill] sm:$0xff] %v8349_v15  ;;  %7192 = vset.pattern.permute.xlu2 %v7814_v37  ;;  %v8366_v15 = vperm.slane %v7713_v14, 3  ;;  %v8368_v20 = vpop.permute.xlu1 %314 }
 0x27c   :  { %742 = vperm.xlu1 %7193, %v7986_v21   ;;  %vm3317_vm8 = vcmp.gt.f32.partialorder %v8368_v20, 0.0  ;;  %v5382_v20 = vsel %vm42_vm0, %v4844_v18, -inf  ;;  %v5343_v18 = vsel %vm42_vm0, %v4830_v10, -inf }
 0x27d   :  { %11591 = vst [vmem:[#allocation109_spill] sm:$0xff] %v8366_v15 }
 0x280   :  { %2047 = vperm.xlu0 %7499, %v8354_v3   ;;  %v8383_v14 = vpop.permute.xlu2 %381 }
 0x281   :  { %11595 = vst [vmem:[#allocation113_spill] sm:$0xff] %v8383_v14 }
 0x282   :  { %v8361_v54 = vpop.permute.xlu0 %2139 }
 0x283   :  { %11590 = vst [vmem:[#allocation108_spill] sm:$0xff] %v8361_v54  ;;  %736 = vperm.xlu2 %7192, %v7986_v21   ;;  %v8378_v54 = vperm.slane %v7759_v25, 0  ;;  %v8380_v3 = vpop.permute.xlu1 %326 }
 0x284   :  { %7195 = vset.pattern.permute.xlu1 %v7829_v40  ;;  %vm3319_vm12 = vcmp.gt.f32.partialorder %v8380_v3, 0.0 }
 0x285   :  { %11594 = vst [vmem:[#allocation112_spill] sm:$0xff] %v8378_v54 }
 0x288   :  { %2292 = vperm.xlu0 %7499, %v8366_v15   ;;  %v8395_v2 = vpop.permute.xlu2 %399 }
 0x289   :  { %11598 = vst [vmem:[#allocation116_spill] sm:$0xff] %v8395_v2 }
 0x28a   :  { %v8373_v50 = vpop.permute.xlu0 %2384 }
 0x28b   :  { %11593 = vst [vmem:[#allocation111_spill] sm:$0xff] %v8373_v50  ;;  %7194 = vset.pattern.permute.xlu2 %v7694_v8  ;;  %v8390_v50 = vperm.slane %v7759_v25, 5  ;;  %v8392_v15 = vpop.permute.xlu1 %344  ;;  %v8409_v25 = vperm.slane %v7753_v24, 6 }
 0x28c   :  { %755 = vperm.xlu1 %7195, %v7794_v33  }
 0x28d   :  { %11597 = vst [vmem:[#allocation115_spill] sm:$0xff] %v8390_v50 }
 0x290   :  { %2537 = vperm.xlu0 %7499, %v8378_v54   ;;  %v8404_v14 = vpop.permute.xlu2 %412 }
 0x291   :  { %11601 = vst [vmem:[#allocation119_spill] sm:$0xff] %v8404_v14 }
 0x292   :  { %v8385_v48 = vpop.permute.xlu0 %2629 }
 0x293   :  { %11596 = vst [vmem:[#allocation114_spill] sm:$0xff] %v8385_v48  ;;  %749 = vperm.xlu2 %7194, %v7794_v33   ;;  %v8401_v48 = vpop.permute.xlu1 %357 }
 0x294   :  { %7197 = vset.pattern.permute.xlu1 %v7797_v34  ;;  %11600 = vst [vmem:[#allocation118_spill] sm:$0xff] %v8401_v48 }
 0x298   :  { %2782 = vperm.xlu0 %7499, %v8390_v50  }
 0x29a   :  { %v8399_v54 = vpop.permute.xlu0 %2874 }
 0x29b   :  { %7196 = vset.pattern.permute.xlu2 %v7777_v30  ;;  %11599 = vst [vmem:[#allocation117_spill] sm:$0xff] %v8399_v54  ;;  %v8413_v2 = vpop.permute.xlu1 %375  ;;  %v8416_v54 = vpop.permute.xlu2 %430 }
 0x29c   :  { %773 = vperm.xlu1 %7197, %v7794_v33   ;;  %11603 = vst [vmem:[#allocation121_spill] sm:$0xff] %v8413_v2 }
 0x29d   :  { %11604 = vst [vmem:[#allocation122_spill] sm:$0xff] %v8416_v54 }
 0x2a0   :  { %3125 = vperm.xlu0 %7499, %v8059_v4   ;;  %v8421_v4 = vperm.slane %v7753_v24, 7 }
 0x2a2   :  { %v8411_v50 = vpop.permute.xlu0 %3070  ;;  %11605 = vst [vmem:[#allocation123_spill] sm:$0xff] %v8421_v4 }
 0x2a3   :  { %767 = vperm.xlu2 %7196, %v7794_v33   ;;  %11602 = vst [vmem:[#allocation120_spill] sm:$0xff] %v8411_v50  ;;  %v8423_v14 = vpop.permute.xlu1 %387  ;;  %v8430_v50 = vpop.permute.xlu2 %442 }
 0x2a4   :  { %7199 = vset.pattern.permute.xlu1 %v7814_v37  ;;  %11606 = vst [vmem:[#allocation124_spill] sm:$0xff] %v8423_v14 }
 0x2a5   :  { %11608 = vst [vmem:[#allocation126_spill] sm:$0xff] %v8430_v50 }
 0x2a8   :  { %3223 = vperm.xlu0 %7499, %v8409_v25  }
 0x2aa   :  { %v8426_v48 = vpop.permute.xlu0 %3119 }
 0x2ab   :  { %7198 = vset.pattern.permute.xlu2 %v7788_v32  ;;  %11607 = vst [vmem:[#allocation125_spill] sm:$0xff] %v8426_v48  ;;  %v8432_v54 = vpop.permute.xlu1 %406 }
 0x2ac   :  { %785 = vperm.xlu1 %7199, %v7794_v33  }
 0x2b0   :  { %3272 = vperm.xlu0 %7499, %v8421_v4   ;;  %v8441_v4 = vpop.permute.xlu2 %461 }
 0x2b1   :  { %11609 = vst [vmem:[#allocation127_spill] sm:$0xff] %v8441_v4 }
 0x2b3   :  { %779 = vperm.xlu2 %7198, %v7794_v33   ;;  %v8439_v24 = vpop.permute.xlu1 %418 }
 0x2b4   :  { %7201 = vset.pattern.permute.xlu1 %v7829_v40 }
 0x2b8   :  { %7518 = vset.pattern.permute.xlu0 %v7788_v32  ;;  %v8451_v50 = vpop.permute.xlu2 %473 }
 0x2b9   :  { %11612 = vst [vmem:[#allocation130_spill] sm:$0xff] %v8451_v50 }
 0x2ba   :  { %v8435_v2 = vpop.permute.xlu0 %332 }
 0x2bb   :  { %7200 = vset.pattern.permute.xlu2 %v7694_v8  ;;  %v8448_v48 = vpop.permute.xlu1 %436  ;;  %vm3320_vm14 = vcmp.gt.f32.partialorder %v8435_v2, 0.0 }
 0x2bc   :  { %804 = vperm.xlu1 %7201, %v8296_v59   ;;  %11611 = vst [vmem:[#allocation129_spill] sm:$0xff] %v8448_v48 }
 0x2c0   :  { %240 = vperm.xlu0 %7518, %v7833_v41   ;;  %v8460_v41 = vpop.permute.xlu2 %491 }
 0x2c1   :  { %11615 = vst [vmem:[#allocation133_spill] sm:$0xff] %v8460_v41 }
 0x2c2   :  { %v8444_v33 = vpop.permute.xlu0 %577 }
 0x2c3   :  { %11610 = vst [vmem:[#allocation128_spill] sm:$0xff] %v8444_v33  ;;  %798 = vperm.xlu2 %7200, %v8296_v59   ;;  %v8457_v4 = vpop.permute.xlu1 %448 }
 0x2c4   :  { %7203 = vset.pattern.permute.xlu1 %v7777_v30  ;;  %11614 = vst [vmem:[#allocation132_spill] sm:$0xff] %v8457_v4 }
 0x2c8   :  { %485 = vperm.xlu0 %7518, %v7978_v19   ;;  %v8471_v50 = vpop.permute.xlu2 %504 }
 0x2ca   :  { %v8453_v14 = vpop.permute.xlu0 %822 }
 0x2cb   :  { %11613 = vst [vmem:[#allocation131_spill] sm:$0xff] %v8453_v14  ;;  %7202 = vset.pattern.permute.xlu2 %v7705_v12  ;;  %v8466_v19 = vpop.permute.xlu1 %467 }
 0x2cc   :  { %816 = vperm.xlu1 %7203, %v8296_v59  }
 0x2d0   :  { %730 = vperm.xlu0 %7518, %v7986_v21   ;;  %v8482_v41 = vpop.permute.xlu2 %522 }
 0x2d2   :  { %v8462_v33 = vpop.permute.xlu0 %1067 }
 0x2d3   :  { %11616 = vst [vmem:[#allocation134_spill] sm:$0xff] %v8462_v33  ;;  %810 = vperm.xlu2 %7202, %v8296_v59   ;;  %v8475_v21 = vpop.permute.xlu1 %479 }
 0x2d4   :  { %7205 = vset.pattern.permute.xlu1 %v7814_v37  ;;  %11618 = vst [vmem:[#allocation136_spill] sm:$0xff] %v8475_v21 }
 0x2d8   :  { %975 = vperm.xlu0 %7518, %v7994_v27   ;;  %v8491_v21 = vpop.permute.xlu2 %534 }
 0x2da   :  { %v8469_v14 = vpop.permute.xlu0 %1312 }
 0x2db   :  { %11617 = vst [vmem:[#allocation135_spill] sm:$0xff] %v8469_v14  ;;  %7204 = vset.pattern.permute.xlu2 %v7788_v32  ;;  %v8484_v4 = vpop.permute.xlu1 %497 }
 0x2dc   :  { %834 = vperm.xlu1 %7205, %v8296_v59   ;;  %11620 = vst [vmem:[#allocation138_spill] sm:$0xff] %v8484_v4 }
 0x2e0   :  { %1220 = vperm.xlu0 %7518, %v8002_v49   ;;  %v8500_v4 = vpop.permute.xlu2 %553 }
 0x2e2   :  { %v8478_v33 = vpop.permute.xlu0 %1557 }
 0x2e3   :  { %11619 = vst [vmem:[#allocation137_spill] sm:$0xff] %v8478_v33  ;;  %828 = vperm.xlu2 %7204, %v8296_v59   ;;  %v8493_v49 = vpop.permute.xlu1 %510 }
 0x2e4   :  { %7207 = vset.pattern.permute.xlu1 %v7694_v8 }
 0x2e8   :  { %1465 = vperm.xlu0 %7518, %v8013_v13  }
 0x2ea   :  { %v8487_v14 = vpop.permute.xlu0 %1802 }
 0x2eb   :  { %11621 = vst [vmem:[#allocation139_spill] sm:$0xff] %v8487_v14  ;;  %7206 = vset.pattern.permute.xlu2 %v7702_v11  ;;  %v8502_v13 = vpop.permute.xlu1 %528 }
 0x2ec   :  { %847 = vperm.xlu1 %7207, %v7887_v52  }
 0x2f0   :  { %1710 = vperm.xlu0 %7518, %v8021_v6   ;;  %v8511_v6 = vpop.permute.xlu2 %565 }
 0x2f2   :  { %v8496_v33 = vpop.permute.xlu0 %2047 }
 0x2f3   :  { %11622 = vst [vmem:[#allocation140_spill] sm:$0xff] %v8496_v33  ;;  %840 = vperm.xlu2 %7206, %v8296_v59   ;;  %v8509_v48 = vpop.permute.xlu1 %540 }
 0x2f4   :  { %7209 = vset.pattern.permute.xlu1 %v7777_v30 }
 0x2f8   :  { %1955 = vperm.xlu0 %7518, %v8029_v0   ;;  %v8520_v0 = vpop.permute.xlu2 %583 }
 0x2f9   :  { %11625 = vst [vmem:[#allocation143_spill] sm:$0xff] %v8520_v0 }
 0x2fa   :  { %v8505_v14 = vpop.permute.xlu0 %2292 }
 0x2fb   :  { %11623 = vst [vmem:[#allocation141_spill] sm:$0xff] %v8505_v14  ;;  %7208 = vset.pattern.permute.xlu2 %v7705_v12  ;;  %v8518_v33 = vpop.permute.xlu1 %559 }
 0x2fc   :  { %865 = vperm.xlu1 %7209, %v7887_v52  }
 0x300   :  { %2200 = vperm.xlu0 %7518, %v8037_v9   ;;  %v4829_v9 = vsel %vm3293_vm1, %v7743_v22, -inf  ;;  %v8545_v22 = vld [vmem:[%s11369_s0 + $0x8] sm:$0xff]  ;;  %vm3297_vm1 = vcmp.gt.f32.partialorder %v8277_v42, 0.0 }
 0x301   :  { %v5341_v43 = vsel %vm42_vm0, %v4829_v9, -inf  ;;  %v4845_v53 = vsel %vm3309_vm4, %v8545_v22, -inf  ;;  %vm3313_vm4 = vcmp.gt.f32.partialorder %v8301_v26, 0.0 }
 0x302   :  { %v8514_v59 = vpop.permute.xlu0 %2537 }
 0x303   :  { %11624 = vst [vmem:[#allocation142_spill] sm:$0xff] %v8514_v59  ;;  %859 = vperm.xlu2 %7208, %v7887_v52   ;;  %v8530_v59 = vpop.permute.xlu1 %571 }
 0x304   :  { %7211 = vset.pattern.permute.xlu1 %v7788_v32  ;;  %11627 = vst [vmem:[#allocation145_spill] sm:$0xff] %v8530_v59 }
 0x308   :  { %2445 = vperm.xlu0 %7518, %v8045_v60   ;;  %v8535_v60 = vpop.permute.xlu2 %595 }
 0x309   :  { %11628 = vst [vmem:[#allocation146_spill] sm:$0xff] %v8535_v60  ;;  %v5383_v60 = vsel %vm42_vm0, %v4845_v53, -inf }
 0x30a   :  { %v8523_v14 = vpop.permute.xlu0 %2782  ;;  %v5384_v53 = vmax.f32 %v5382_v20, %v5383_v60  ;;  %v4847_v60 = vsel %vm3311_vm11, %v8590_v38, -inf  ;;  %vm3299_vm11 = vcmp.gt.f32.partialorder %v8286_v61, 0.0 }
 0x30b   :  { %11626 = vst [vmem:[#allocation144_spill] sm:$0xff] %v8523_v14  ;;  %7210 = vset.pattern.permute.xlu2 %v7797_v34  ;;  %v4828_v14 = vsel %vm3292_vm2, %v7748_v23, -inf  ;;  %v7569_v23 = vld [vmem:[%s11370_s1 + $0x38] sm:$0xff]  ;;  %v8578_v0 = vpop.permute.xlu1 %589  ;;  %v5387_v5 = vsel %vm42_vm0, %v4847_v60, -inf  ;;  %vm3300_vm2 = vcmp.gt.f32.partialorder %v8080_v7, 0.0  ;;  %v8628_v60 = vld [vmem:[%s11369_s0 + $0x28] sm:$0xff] }
 0x30c   :  { %877 = vperm.xlu1 %7211, %v7887_v52   ;;  %v8555_v36 = vperm.slane %v7569_v23, 1  ;;  %v5340_v9 = vsel %vm42_vm0, %v4828_v14, -inf  ;;  %v8572_v23 = vld [vmem:[%s11369_s0] sm:$0xff]  ;;  %v4849_v39 = vsel %vm3313_vm4, %v8628_v60, -inf  ;;  %vm6750_vm4 = vcmask 1042434  }
 0x30d   :  { %v4852_v14 = vsel %vm3316_vm7, %v8572_v23, -inf  ;;  %vm3298_vm7 = vcmp.gt.f32.partialorder %v8237_v47, 0.0 }
 0x30e   :  { %11629 = vst [vmem:[#allocation147_spill] sm:$0xff] %v8555_v36 }
 0x310   :  { %2690 = vperm.xlu0 %7518, %v8053_v17   ;;  %v4846_v17 = vsel %vm3310_vm6, %v8563_v63, -inf  ;;  %v8596_v20 = vpop.permute.xlu2 %614  ;;  %vm3321_vm6 = vcmp.gt.f32.partialorder %v8344_v55, 0.0 }
 0x311   :  { %v4857_v7 = vsel %vm3321_vm6, %v8628_v60, -inf  ;;  %vm3348_vm6 = vcmp.gt.f32.partialorder %v8471_v50, 0.0 }
 0x312   :  { %v8557_v57 = vpop.permute.xlu0 %3125 }
 0x313   :  { %871 = vperm.xlu2 %7210, %v7887_v52   ;;  %11630 = vst [vmem:[#allocation148_spill] sm:$0xff] %v8557_v57  ;;  %v4853_v57 = vsel %vm3317_vm8, %v8545_v22, -inf  ;;  %vm3314_vm8 = vcmp.gt.f32.partialorder %v8356_v16, 0.0 }
 0x314   :  { %7213 = vset.pattern.permute.xlu1 %v7694_v8  ;;  %v5342_v8 = vmax.f32 %v5340_v9, %v5341_v43  ;;  %v5385_v43 = vsel %vm42_vm0, %v4846_v17, -inf  ;;  %v5403_v9 = vsel %vm42_vm0, %v4852_v14, -inf  ;;  %v5404_v59 = vsel %vm42_vm0, %v4853_v57, -inf }
 0x315   :  { %v4854_v17 = vsel %vm3318_vm10, %v8563_v63, -inf  ;;  %v5386_v10 = vmax.f32 %v5384_v53, %v5385_v43  ;;  %v5405_v3 = vmax.f32 %v5403_v9, %v5404_v59  ;;  %v4855_v57 = vsel %vm3319_vm12, %v8590_v38, -inf }
 0x316   :  { %v5344_v28 = vmax.f32 %v5342_v8, %v5343_v18  ;;  %v5345_v8 = vsel %vm42_vm0, %v4831_v46, -inf  ;;  %v4832_v14 = vsel %vm3296_vm13, %v8607_v29, -inf  ;;  %v5406_v2 = vsel %vm42_vm0, %v4854_v17, -inf }
 0x317   :  { %v4856_v59 = vsel %vm3320_vm14, %v8607_v29, -inf  ;;  %v4848_v53 = vsel %vm3312_vm15, %v8607_v29, -inf  ;;  %v5408_v9 = vsel %vm42_vm0, %v4855_v57, -inf  ;;  %v5388_v46 = vmax.f32 %v5386_v10, %v5387_v5 }
 0x318   :  { %2984 = vperm.xlu0 %7518, %v8555_v36   ;;  %v5346_v18 = vmax.f32 %v5344_v28, %v5345_v8  ;;  %v8619_v36 = vpop.permute.xlu1 %602  ;;  %v5347_v17 = vsel %vm42_vm0, %v4832_v14, -inf  ;;  %v5407_v28 = vmax.f32 %v5405_v3, %v5406_v2  ;;  %v4833_v10 = vsel %vm3297_vm1, %v8628_v60, -inf  ;;  %v8643_v14 = vld [vmem:[%s11369_s0 + $0x38] sm:$0xff]  ;;  %v8648_v2 = vpop.permute.xlu2 %626 }
 0x319   :  { %v5410_v51 = vsel %vm42_vm0, %v4856_v59, -inf  ;;  %v5389_v26 = vsel %vm42_vm0, %v4848_v53, -inf  ;;  %v4836_v8 = vsel %vm3300_vm2, %v8572_v23, -inf  ;;  %v4851_v42 = vsel %vm3315_vm3, %v8643_v14, -inf }
 0x31a   :  { %v8614_v43 = vpop.permute.xlu0 %3223  ;;  %v5348_v57 = vmax.f32 %v5346_v18, %v5347_v17  ;;  %v5409_v3 = vmax.f32 %v5407_v28, %v5408_v9  ;;  %v5390_v55 = vmax.f32 %v5388_v46, %v5389_v26  ;;  %v4837_v18 = vsel %vm3301_vm5, %v8545_v22, -inf  ;;  %v8663_v9 = vld [vmem:[%s11369_s0 + $0x30] sm:$0xff] }
 0x31b   :  { %7212 = vset.pattern.permute.xlu2 %v7702_v11  ;;  %11631 = vst [vmem:[#allocation149_spill] sm:$0xff] %v8614_v43  ;;  %v5349_v59 = vsel %vm42_vm0, %v4833_v10, -inf  ;;  %vm3322_vm10 = vcmp.gt.f32.partialorder %v8392_v15, 0.0  ;;  %v5361_v53 = vsel %vm42_vm0, %v4836_v8, -inf  ;;  %v4834_v16 = vsel %vm3298_vm7, %v8663_v9, -inf }
 0x31c   :  { %896 = vperm.xlu1 %7213, %v8164_v45   ;;  %v5411_v5 = vmax.f32 %v5409_v3, %v5410_v51  ;;  %v5350_v46 = vmax.f32 %v5348_v57, %v5349_v59  ;;  %v5391_v17 = vsel %vm42_vm0, %v4849_v39, -inf  ;;  %v5362_v62 = vsel %vm42_vm0, %v4837_v18, -inf }
 0x31d   :  { %v4850_v15 = vsel %vm3314_vm8, %v8663_v9, -inf  ;;  %v5412_v28 = vsel %vm42_vm0, %v4857_v7, -inf  ;;  %v5392_v10 = vmax.f32 %v5390_v55, %v5391_v17  ;;  %v4838_v26 = vsel %vm3302_vm9, %v8563_v63, -inf }
 0x31e   :  { %v4858_v3 = vsel %vm3322_vm10, %v8663_v9, -inf  ;;  %v5363_v8 = vmax.f32 %v5361_v53, %v5362_v62  ;;  %v5413_v43 = vmax.f32 %v5411_v5, %v5412_v28  ;;  %v5351_v57 = vsel %vm42_vm0, %v4834_v16, -inf }
 0x31f   :  { %vm3303_vm12 = vcmp.gt.f32.partialorder %v8257_v1, 0.0  ;;  %vm3323_vm13 = vcmp.gt.f32.partialorder %v8358_v56, 0.0  ;;  %v4835_v39 = vsel %vm3299_vm11, %v8643_v14, -inf  ;;  %v5352_v55 = vmax.f32 %v5350_v46, %v5351_v57 }
 0x320   :  { %3082 = vperm.xlu0 %7518, %v8250_v44   ;;  %v8672_v51 = vpop.permute.xlu1 %620  ;;  %v5393_v18 = vsel %vm42_vm0, %v4850_v15, -inf  ;;  %v5395_v7 = vsel %vm42_vm0, %v4851_v42, -inf  ;;  %v5364_v5 = vsel %vm42_vm0, %v4838_v26, -inf  ;;  %v5414_v59 = vsel %vm42_vm0, %v4858_v3, -inf  ;;  %v8689_v17 = vpop.permute.xlu2 %644 }
 0x321   :  { %v5394_v53 = vmax.f32 %v5392_v10, %v5393_v18  ;;  %11633 = vst [vmem:[#allocation151_spill] sm:$0xff] %v8689_v17  ;;  %v4839_v56 = vsel %vm3303_vm12, %v8590_v38, -inf  ;;  %v4859_v1 = vsel %vm3323_vm13, %v8643_v14, -inf  ;;  %v5365_v61 = vmax.f32 %v5363_v8, %v5364_v5 }
 0x322   :  { %v8677_v47 = vpop.permute.xlu0 %3272  ;;  %v5415_v16 = vmax.f32 %v5413_v43, %v5414_v59  ;;  %v5353_v46 = vsel %vm42_vm0, %v4835_v39, -inf  ;;  %vm3304_vm14 = vcmp.gt.f32.partialorder %v8310_v31, 0.0  ;;  %v5366_v62 = vsel %vm42_vm0, %v4839_v56, -inf }
 0x323   :  { %889 = vperm.xlu2 %7212, %v7887_v52   ;;  %11632 = vst [vmem:[#allocation150_spill] sm:$0xff] %v8677_v47  ;;  %v5354_v42 = vmax.f32 %v5352_v55, %v5353_v46  ;;  %v5416_v15 = vsel %vm42_vm0, %v4859_v1, -inf  ;;  %v5396_v28 = vmax.f32 %v5394_v53, %v5395_v7  ;;  %v4840_v26 = vsel %vm3304_vm14, %v8607_v29, -inf }
 0x324   :  { %7215 = vset.pattern.permute.xlu1 %v7705_v12  ;;  %v5417_v3 = vmax.f32 %v5415_v16, %v5416_v15  ;;  %v5367_v43 = vmax.f32 %v5365_v61, %v5366_v62  ;;  %vm3306_vm15 = vcmp.gt.f32.partialorder %v8268_v35, 0.0  ;;  %v5368_v31 = vsel %vm42_vm0, %v4840_v26, -inf  ;;  %v11635_v15 = vld [vmem:[#allocation15_spill] sm:$0xff] }
 0x325   :  { %v5355_v8 = vrot.slane %v5354_v42, 4  ;;  %vm3307_vm1 = vcmp.gt.f32.partialorder %v8322_v58, 0.0  ;;  %v5397_v39 = vrot.slane %v5396_v28, 4  ;;  %v4842_v55 = vsel %vm3306_vm15, %v8663_v9, -inf }
 0x326   :  { %v5418_v18 = vrot.slane %v5417_v3, 4  ;;  %v5369_v5 = vmax.f32 %v5367_v43, %v5368_v31  ;;  %v4843_v53 = vsel %vm3307_vm1, %v8643_v14, -inf  ;;  %v5372_v1 = vsel %vm42_vm0, %v4842_v55, -inf }
 0x327   :  { %v5356_v56 = vmax.f32 %v5354_v42, %v5355_v8  ;;  %v5398_v61 = vmax.f32 %v5396_v28, %v5397_v39  ;;  %v5374_v26 = vsel %vm42_vm0, %v4843_v53, -inf  ;;  %v11636_v53 = vld [vmem:[#allocation17_spill] sm:$0xff]  ;;  %vm6748_vm3 = vcmask 1041409  }
 0x328   :  { %3229 = vperm.xlu0 %7518, %v8409_v25   ;;  %v8699_v10 = vpop.permute.xlu1 %632  ;;  %v8710_v59 = vpop.permute.xlu2 %657  ;;  %v5419_v46 = vmax.f32 %v5417_v3, %v5418_v18  ;;  %vm6752_vm5 = vcmask 1043459   ;;  %vm3349_vm7 = vcmp.gt.f32.partialorder %v8493_v49, 0.0  ;;  %v11644_v49 = vld [vmem:[#allocation18_spill] sm:$0xff]  ;;  %vm3351_vm10 = vcmp.gt.f32.partialorder %v8482_v41, 0.0 }
 0x329   :  { %11634 = vst [vmem:[#allocation152_spill] sm:$0xff] %v8699_v10  ;;  %v5357_v43 = vrot.slane %v5356_v56, 2  ;;  %vm3355_vm9 = vcmp.gt.f32.partialorder %v11644_v49, 0.0  ;;  %vm3352_vm12 = vcmp.gt.f32.partialorder %v8502_v13, 0.0  ;;  %v11646_v49 = vld [vmem:[#allocation23_spill] sm:$0xff]  ;;  %v11647_v41 = vld [vmem:[#allocation118_spill] sm:$0xff] }
 0x32a   :  { %v5420_v42 = vrot.slane %v5419_v46, 2  ;;  %vm3324_vm13 = vcmp.gt.f32.partialorder %v11647_v41, 0.0  ;;  %vm3332_vm14 = vcmp.gt.f32.partialorder %v8432_v54, 0.0  ;;  %v11649_v13 = vld [vmem:[#allocation119_spill] sm:$0xff]  ;;  %vm3353_vm1 = vcmp.gt.f32.partialorder %v8491_v21, 0.0  ;;  %v11652_v41 = vld [vmem:[#allocation38_spill] sm:$0xff] }
 0x32b   :  { %7214 = vset.pattern.permute.xlu2 %v7829_v40  ;;  %v5358_v39 = vmax.f32 %v5356_v56, %v5357_v43  ;;  %vm3333_vm15 = vcmp.gt.f32.partialorder %v11649_v13, 0.0  ;;  %v4868_v21 = vsel %vm3332_vm14, %v8572_v23, -inf  ;;  %v11660_v10 = vld [vmem:[#allocation127_spill] sm:$0xff] }
 0x32c   :  { %908 = vperm.xlu1 %7215, %v8164_v45   ;;  %vm3341_vm14 = vcmp.gt.f32.partialorder %v11660_v10, 0.0 }
 0x330   :  { %7521 = vset.pattern.permute.xlu0 %v7814_v37  ;;  %v8715_v16 = vpop.permute.xlu1 %651  ;;  %v8723_v28 = vpop.permute.xlu2 %675 }
 0x332   :  { %v241_v57 = vpop.permute.xlu0 %240 }
 0x333   :  { %vm3305_vm2 = vcmp.gt.f32.partialorder %v241_v57, 0.0  ;;  %902 = vperm.xlu2 %7214, %v8164_v45  }
 0x334   :  { %v4841_v7 = vsel %vm3305_vm2, %v8628_v60, -inf  ;;  %7217 = vset.pattern.permute.xlu1 %v7788_v32  ;;  %v11659_v32 = vld [vmem:[#allocation58_spill] sm:$0xff] }
 0x335   :  { %v5370_v35 = vsel %vm42_vm0, %v4841_v7, -inf  ;;  %v5399_v7 = vrot.slane %v5398_v61, 2 }
 0x336   :  { %v5371_v58 = vmax.f32 %v5369_v5, %v5370_v35  ;;  %v5421_v5 = vmax.f32 %v5419_v46, %v5420_v42 }
 0x337   :  { %v5400_v55 = vmax.f32 %v5398_v61, %v5399_v7 }
 0x338   :  { %v5373_v62 = vmax.f32 %v5371_v58, %v5372_v1  ;;  %393 = vperm.xlu0 %7521, %v11635_v15   ;;  %v8725_v18 = vpop.permute.xlu1 %663  ;;  %v5359_v58 = vrot.slane %v5358_v39, 1  ;;  %v8732_v56 = vpop.permute.xlu2 %687 }
 0x339   :  { %v5401_v15 = vrot.slane %v5400_v55, 1 }
 0x33a   :  { %v5375_v57 = vmax.f32 %v5373_v62, %v5374_v26  ;;  %v8719_v31 = vpop.permute.xlu0 %485  ;;  %v5422_v26 = vrot.slane %v5421_v5, 1  ;;  %v5360_v43 = vmax.f32 %v5358_v39, %v5359_v58  ;;  %v4884_v58 = vsel %vm3348_vm6, %v8572_v23, -inf }
 0x33b   :  { %7216 = vset.pattern.permute.xlu2 %v7797_v34 }
 0x33c   :  { %v5376_v8 = vrot.slane %v5375_v57, 4  ;;  %926 = vperm.xlu1 %7217, %v8164_v45   ;;  %v5423_v7 = vmax.f32 %v5421_v5, %v5422_v26  ;;  %v11642_v26 = vld [vmem:[#allocation70_spill] sm:$0xff] }
 0x33d   :  { %vm3350_vm8 = vcmp.gt.f32.partialorder %v11642_v26, 0.0  ;;  %v4887_v26 = vsel %vm3351_vm10, %v8590_v38, -inf }
 0x33e   :  { %v5377_v3 = vmax.f32 %v5375_v57, %v5376_v8  ;;  %v5402_v57 = vmax.f32 %v5400_v55, %v5401_v15  ;;  %v11639_v55 = vld [vmem:[#allocation19_spill] sm:$0xff]  ;;  %v11641_v15 = vld [vmem:[#allocation21_spill] sm:$0xff] }
 0x340   :  { %v5378_v35 = vrot.slane %v5377_v3, 2  ;;  %638 = vperm.xlu0 %7521, %v11636_v53   ;;  %v8734_v46 = vpop.permute.xlu1 %681 }
 0x342   :  { %v5379_v1 = vmax.f32 %v5377_v3, %v5378_v35  ;;  %v8728_v62 = vpop.permute.xlu0 %730 }
 0x343   :  { %920 = vperm.xlu2 %7216, %v8164_v45  }
 0x344   :  { %v5380_v47 = vrot.slane %v5379_v1, 1  ;;  %7219 = vset.pattern.permute.xlu1 %v7702_v11 }
 0x346   :  { %v5381_v61 = vmax.f32 %v5379_v1, %v5380_v47  ;;  %v8746_v47 = vpop.permute.xlu2 %706  ;;  %v4885_v1 = vsel %vm3349_vm7, %v8545_v22, -inf  ;;  %vm3365_vm7 = vcmp.gt.f32.partialorder %v11652_v41, 0.0 }
 0x347   :  { %v5488_v50 = vsel %vm42_vm0, %v4885_v1, -inf }
 0x348   :  { %883 = vperm.xlu0 %7521, %v7887_v52   ;;  %v6749_v42 = vsel %vm6748_vm3, %v5381_v61, %v5360_v43  ;;  %v8748_v39 = vpop.permute.xlu1 %693  ;;  %v4886_v43 = vsel %vm3350_vm8, %v8563_v63, -inf  ;;  %vm3334_vm8 = vcmp.gt.f32.partialorder %v8439_v24, 0.0 }
 0x349   :  { %v6751_v8 = vsel %vm6750_vm4, %v5402_v57, %v6749_v42  ;;  %v11645_v57 = vld [vmem:[#allocation37_spill] sm:$0xff]  ;;  %v4891_v42 = vsel %vm3355_vm9, %v8643_v14, -inf  ;;  %vm3354_vm9 = vcmp.gt.f32.partialorder %v8509_v48, 0.0  ;;  %v4870_v48 = vsel %vm3334_vm8, %v8563_v63, -inf }
 0x34a   :  { %v8739_v3 = vpop.permute.xlu0 %975  ;;  %v8742_v35 = vsel %vm6752_vm5, %v5423_v7, %v6751_v8  ;;  %vm3325_vm11 = vcmp.gt.f32.partialorder %v11645_v57, 0.0  ;;  %v5490_v8 = vsel %vm42_vm0, %v4886_v43, -inf  ;;  %v4888_v43 = vsel %vm3352_vm12, %v8607_v29, -inf }
 0x34b   :  { %11637 = vst [vmem:[#allocation15_spill] sm:$0xff] %v8739_v3  ;;  %7218 = vset.pattern.permute.xlu2 %v7814_v37  ;;  %v4861_v44 = vsel %vm3325_vm11, %v8545_v22, -inf  ;;  %v5494_v54 = vsel %vm42_vm0, %v4888_v43, -inf  ;;  %v11656_v43 = vld [vmem:[#allocation121_spill] sm:$0xff] }
 0x34c   :  { %11638 = vst [vmem:[#allocation17_spill] sm:$0xff] %v8742_v35  ;;  %938 = vperm.xlu1 %7219, %v8164_v45   ;;  %vm3327_vm12 = vcmp.gt.f32.partialorder %v11656_v43, 0.0  ;;  %v11662_v43 = vld [vmem:[#allocation122_spill] sm:$0xff] }
 0x34e   :  { %v8759_v53 = vpop.permute.xlu2 %718 }
 0x350   :  { %1128 = vperm.xlu0 %7521, %v11639_v55   ;;  %v8757_v5 = vpop.permute.xlu1 %712  ;;  %v4890_v55 = vsel %vm3354_vm9, %v8663_v9, -inf }
 0x351   :  { %v5498_v41 = vsel %vm42_vm0, %v4890_v55, -inf }
 0x352   :  { %v8751_v52 = vpop.permute.xlu0 %1220 }
 0x353   :  { %11640 = vst [vmem:[#allocation153_spill] sm:$0xff] %v8751_v52  ;;  %932 = vperm.xlu2 %7218, %v8164_v45   ;;  %v5487_v45 = vsel %vm42_vm0, %v4884_v58, -inf  ;;  %v11654_v52 = vld [vmem:[#allocation96_spill] sm:$0xff] }
 0x354   :  { %7221 = vset.pattern.permute.xlu1 %v7705_v12  ;;  %v5489_v7 = vmax.f32 %v5487_v45, %v5488_v50  ;;  %v8787_v45 = vsel %vm42_vm0, %v4891_v42, -inf  ;;  %v5425_v42 = vsel %vm42_vm0, %v4861_v44, -inf  ;;  %v4889_v44 = vsel %vm3353_vm1, %v8628_v60, -inf }
 0x355   :  { %vm3335_vm11 = vcmp.gt.f32.partialorder %v11654_v52, 0.0  ;;  %v5496_v52 = vsel %vm42_vm0, %v4889_v44, -inf  ;;  %v5448_v44 = vsel %vm42_vm0, %v4870_v48, -inf }
 0x356   :  { %v8780_v1 = vpop.permute.xlu2 %736  ;;  %v5491_v50 = vmax.f32 %v5489_v7, %v5490_v8  ;;  %v4860_v7 = vsel %vm3324_vm13, %v8572_v23, -inf  ;;  %v11651_v8 = vld [vmem:[#allocation110_spill] sm:$0xff]  ;;  %vm3340_vm13 = vcmp.gt.f32.partialorder %v11659_v32, 0.0 }
 0x357   :  { %vm3326_vm6 = vcmp.gt.f32.partialorder %v11651_v8, 0.0  ;;  %v5424_v8 = vsel %vm42_vm0, %v4860_v7, -inf  ;;  %v5445_v7 = vsel %vm42_vm0, %v4868_v21, -inf }
 0x358   :  { %1373 = vperm.xlu0 %7521, %v11641_v15   ;;  %v8778_v58 = vpop.permute.xlu1 %724  ;;  %v4862_v15 = vsel %vm3326_vm6, %v8563_v63, -inf  ;;  %v5426_v21 = vmax.f32 %v5424_v8, %v5425_v42  ;;  %vm3342_vm6 = vcmp.gt.f32.partialorder %v8466_v19, 0.0 }
 0x35a   :  { %v8765_v61 = vpop.permute.xlu0 %1465 }
 0x35b   :  { %11643 = vst [vmem:[#allocation70_spill] sm:$0xff] %v8765_v61  ;;  %7220 = vset.pattern.permute.xlu2 %v7829_v40  ;;  %v5492_v61 = vsel %vm42_vm0, %v4887_v26, -inf  ;;  %v4869_v26 = vsel %vm3333_vm15, %v8545_v22, -inf  ;;  %vm3336_vm15 = vcmp.gt.f32.partialorder %v11662_v43, 0.0 }
 0x35c   :  { %957 = vperm.xlu1 %7221, %v7994_v27   ;;  %v5493_v13 = vmax.f32 %v5491_v50, %v5492_v61  ;;  %v11657_v61 = vld [vmem:[#allocation25_spill] sm:$0xff]  ;;  %v5446_v12 = vsel %vm42_vm0, %v4869_v26, -inf  ;;  %v4863_v26 = vsel %vm3327_vm12, %v8590_v38, -inf }
 0x35d   :  { %v5429_v48 = vsel %vm42_vm0, %v4863_v26, -inf }
 0x35e   :  { %v5495_v3 = vmax.f32 %v5493_v13, %v5494_v54  ;;  %v8825_v35 = vpop.permute.xlu2 %749  ;;  %v4901_v54 = vsel %vm3365_vm7, %v8545_v22, -inf }
 0x35f   :  { %v8850_v8 = vsel %vm42_vm0, %v4901_v54, -inf  ;;  %v11665_v54 = vld [vmem:[#allocation124_spill] sm:$0xff] }
 0x360   :  { %1618 = vperm.xlu0 %7521, %v11646_v49   ;;  %v11650_v49 = vld [vmem:[#allocation20_spill] sm:$0xff]  ;;  %v8813_v24 = vpop.permute.xlu1 %742 }
 0x361   :  { %vm3395_vm2 = vcmp.gt.f32.partialorder %v11650_v49, 0.0  ;;  %11655 = vst [vmem:[#allocation37_spill] sm:$0xff] %v8813_v24  ;;  %v4871_v49 = vsel %vm3335_vm11, %v8590_v38, -inf }
 0x362   :  { %v8790_v57 = vpop.permute.xlu0 %1710  ;;  %v4931_v50 = vsel %vm3395_vm2, %v8643_v14, -inf  ;;  %v5450_v55 = vsel %vm42_vm0, %v4871_v49, -inf  ;;  %vm3329_vm2 = vcmp.gt.f32.partialorder %v11665_v54, 0.0  ;;  %v4872_v49 = vsel %vm3336_vm15, %v8607_v29, -inf }
 0x363   :  { %11648 = vst [vmem:[#allocation18_spill] sm:$0xff] %v8790_v57  ;;  %951 = vperm.xlu2 %7220, %v7994_v27   ;;  %v11653_v57 = vld [vmem:[#allocation39_spill] sm:$0xff]  ;;  %v8847_v42 = vsel %vm42_vm0, %v4931_v50, -inf  ;;  %v4876_v50 = vsel %vm3340_vm13, %v8572_v23, -inf  ;;  %v4865_v19 = vsel %vm3329_vm2, %v8628_v60, -inf  ;;  %vm3372_vm15 = vcmp.gt.f32.partialorder %v8715_v16, 0.0 }
 0x364   :  { %7223 = vset.pattern.permute.xlu1 %v7797_v34  ;;  %vm3405_vm10 = vcmp.gt.f32.partialorder %v11653_v57, 0.0  ;;  %v5447_v57 = vmax.f32 %v5445_v7, %v5446_v12  ;;  %11661 = vst [vmem:[#allocation119_spill] sm:$0xff] %v8847_v42  ;;  %v4877_v7 = vsel %vm3341_vm14, %v8545_v22, -inf  ;;  %v11675_v42 = vld [vmem:[#allocation136_spill] sm:$0xff] }
 0x365   :  { %v4941_v13 = vsel %vm3405_vm10, %v8545_v22, -inf  ;;  %vm3344_vm13 = vcmp.gt.f32.partialorder %v11675_v42, 0.0 }
 0x366   :  { %v5449_v12 = vmax.f32 %v5447_v57, %v5448_v44  ;;  %v8857_v10 = vsel %vm42_vm0, %v4941_v13, -inf  ;;  %v11669_v57 = vld [vmem:[#allocation116_spill] sm:$0xff]  ;;  %v4880_v42 = vsel %vm3344_vm13, %v8607_v29, -inf  ;;  %vm3364_vm13 = vcmp.gt.f32.partialorder %v8619_v36, 0.0 }
 0x367   :  { %11664 = vst [vmem:[#allocation20_spill] sm:$0xff] %v8857_v10  ;;  %vm3331_vm9 = vcmp.gt.f32.partialorder %v11669_v57, 0.0 }
 0x368   :  { %1863 = vperm.xlu0 %7521, %v11657_v61   ;;  %v5427_v61 = vsel %vm42_vm0, %v4862_v15, -inf  ;;  %v5497_v15 = vmax.f32 %v5495_v3, %v5496_v52  ;;  %v8861_v52 = vpop.permute.xlu1 %755  ;;  %v5451_v26 = vmax.f32 %v5449_v12, %v5450_v55  ;;  %v5452_v55 = vsel %vm42_vm0, %v4872_v49, -inf  ;;  %v11671_v12 = vld [vmem:[#allocation130_spill] sm:$0xff]  ;;  %v11672_v49 = vld [vmem:[#allocation132_spill] sm:$0xff] }
 0x369   :  { %v5428_v3 = vmax.f32 %v5426_v21, %v5427_v61  ;;  %v11668_v61 = vld [vmem:[#allocation129_spill] sm:$0xff]  ;;  %v5466_v21 = vsel %vm42_vm0, %v4876_v50, -inf  ;;  %vm3343_vm10 = vcmp.gt.f32.partialorder %v11671_v12, 0.0  ;;  %vm3339_vm11 = vcmp.gt.f32.partialorder %v11672_v49, 0.0 }
 0x36a   :  { %v8835_v17 = vpop.permute.xlu0 %1955  ;;  %v5499_v32 = vmax.f32 %v5497_v15, %v5498_v41  ;;  %v11667_v41 = vld [vmem:[#allocation59_spill] sm:$0xff]  ;;  %vm3337_vm8 = vcmp.gt.f32.partialorder %v11668_v61, 0.0  ;;  %v5467_v15 = vsel %vm42_vm0, %v4877_v7, -inf  ;;  %v11673_v61 = vld [vmem:[#allocation126_spill] sm:$0xff]  ;;  %v8891_v12 = vsel %vm42_vm0, %v4865_v19, -inf }
 0x36b   :  { %11658 = vst [vmem:[#allocation118_spill] sm:$0xff] %v8835_v17  ;;  %7222 = vset.pattern.permute.xlu2 %v7777_v30  ;;  %v11663_v17 = vld [vmem:[#allocation113_spill] sm:$0xff]  ;;  %v5430_v44 = vmax.f32 %v5428_v3, %v5429_v48  ;;  %vm3380_vm7 = vcmp.gt.f32.partialorder %v11667_v41, 0.0  ;;  %v4878_v48 = vsel %vm3342_vm6, %v8563_v63, -inf  ;;  %v8880_v3 = vpop.permute.xlu2 %767  ;;  %v4867_v41 = vsel %vm3331_vm9, %v8643_v14, -inf }
 0x36c   :  { %969 = vperm.xlu1 %7223, %v7994_v27   ;;  %vm3328_vm1 = vcmp.gt.f32.partialorder %v11663_v17, 0.0  ;;  %v11666_v17 = vld [vmem:[#allocation27_spill] sm:$0xff]  ;;  %v5501_v43 = vmax.f32 %v5499_v32, %v8787_v45  ;;  %v4916_v7 = vsel %vm3380_vm7, %v8572_v23, -inf  ;;  %v4873_v45 = vsel %vm3337_vm8, %v8628_v60, -inf  ;;  %11674 = vst [vmem:[#allocation38_spill] sm:$0xff] %v8891_v12 }
 0x36d   :  { %v4864_v13 = vsel %vm3328_vm1, %v8607_v29, -inf  ;;  %v5453_v32 = vmax.f32 %v5451_v26, %v5452_v55  ;;  %vm3338_vm12 = vcmp.gt.f32.partialorder %v11673_v61, 0.0  ;;  %v5468_v57 = vmax.f32 %v5466_v21, %v5467_v15  ;;  %v11677_v61 = vld [vmem:[#allocation29_spill] sm:$0xff] }
 0x36e   :  { %v5431_v50 = vsel %vm42_vm0, %v4864_v13, -inf  ;;  %v4879_v13 = vsel %vm3343_vm10, %v8590_v38, -inf  ;;  %v8898_v26 = vsel %vm42_vm0, %v4916_v7, -inf  ;;  %v5454_v55 = vsel %vm42_vm0, %v4873_v45, -inf  ;;  %v11678_v45 = vld [vmem:[#allocation133_spill] sm:$0xff] }
 0x36f   :  { %v8895_v10 = vmax.f32 %v5430_v44, %v5431_v50  ;;  %v8905_v21 = vsel %vm42_vm0, %v4867_v41, -inf  ;;  %v4875_v15 = vsel %vm3339_vm11, %v8643_v14, -inf  ;;  %v4874_v19 = vsel %vm3338_vm12, %v8663_v9, -inf }
 0x370   :  { %2108 = vperm.xlu0 %7521, %v11666_v17   ;;  %v5502_v17 = vrot.slane %v5501_v43, 4  ;;  %v8902_v49 = vpop.permute.xlu1 %773  ;;  %11676 = vst [vmem:[#allocation39_spill] sm:$0xff] %v8905_v21  ;;  %v5471_v7 = vsel %vm42_vm0, %v4879_v13, -inf  ;;  %vm3346_vm14 = vcmp.gt.f32.partialorder %v11678_v45, 0.0  ;;  %vm3373_vm1 = vcmp.gt.f32.partialorder %v8710_v59, 0.0  ;;  %v11682_v45 = vld [vmem:[#allocation97_spill] sm:$0xff] }
 0x371   :  { %vm3356_vm6 = vcmp.gt.f32.partialorder %v8500_v4, 0.0  ;;  %vm3357_vm7 = vcmp.gt.f32.partialorder %v8518_v33, 0.0  ;;  %vm3374_vm8 = vcmp.gt.f32.partialorder %v8725_v18, 0.0  ;;  %v5473_v13 = vsel %vm42_vm0, %v4880_v42, -inf }
 0x372   :  { %v8874_v54 = vpop.permute.xlu0 %2200  ;;  %v5503_v24 = vmax.f32 %v5501_v43, %v5502_v17  ;;  %v4882_v17 = vsel %vm3346_vm14, %v8663_v9, -inf  ;;  %v4908_v4 = vsel %vm3372_vm15, %v8572_v23, -inf  ;;  %v4892_v18 = vsel %vm3356_vm6, %v8572_v23, -inf }
 0x373   :  { %11670 = vst [vmem:[#allocation110_spill] sm:$0xff] %v8874_v54  ;;  %963 = vperm.xlu2 %7222, %v7994_v27   ;;  %v5469_v54 = vsel %vm42_vm0, %v4878_v48, -inf  ;;  %v5455_v48 = vmax.f32 %v5453_v32, %v5454_v55  ;;  %v5458_v32 = vsel %vm42_vm0, %v4875_v15, -inf  ;;  %v5456_v55 = vsel %vm42_vm0, %v4874_v19, -inf  ;;  %v11681_v19 = vld [vmem:[#allocation138_spill] sm:$0xff] }
 0x374   :  { %7225 = vset.pattern.permute.xlu1 %v7702_v11  ;;  %v5470_v50 = vmax.f32 %v5468_v57, %v5469_v54  ;;  %v8923_v54 = vpop.permute.xlu2 %779  ;;  %v4909_v15 = vsel %vm3373_vm1, %v8545_v22, -inf  ;;  %vm3347_vm9 = vcmp.gt.f32.partialorder %v11681_v19, 0.0  ;;  %vm3358_vm10 = vcmp.gt.f32.partialorder %v8511_v6, 0.0  ;;  %v11683_v19 = vld [vmem:[#allocation31_spill] sm:$0xff] }
 0x375   :  { %v5457_v43 = vmax.f32 %v5455_v48, %v5456_v55  ;;  %v5504_v48 = vrot.slane %v5503_v24, 2  ;;  %v4910_v16 = vsel %vm3374_vm8, %v8563_v63, -inf  ;;  %vm3375_vm11 = vcmp.gt.f32.partialorder %v11682_v45, 0.0  ;;  %v11685_v45 = vld [vmem:[#allocation143_spill] sm:$0xff] }
 0x376   :  { %v5472_v57 = vmax.f32 %v5470_v50, %v5471_v7  ;;  %v4893_v50 = vsel %vm3357_vm7, %v8545_v22, -inf  ;;  %v5550_v42 = vsel %vm42_vm0, %v4908_v4, -inf  ;;  %v5551_v55 = vsel %vm42_vm0, %v4909_v15, -inf }
 0x377   :  { %v5459_v59 = vmax.f32 %v5457_v43, %v5458_v32  ;;  %v5508_v21 = vsel %vm42_vm0, %v4892_v18, -inf  ;;  %v5509_v12 = vsel %vm42_vm0, %v4893_v50, -inf  ;;  %v11684_v32 = vld [vmem:[#allocation145_spill] sm:$0xff]  ;;  %v5553_v43 = vsel %vm42_vm0, %v4910_v16, -inf }
 0x378   :  { %2353 = vperm.xlu0 %7521, %v11677_v61   ;;  %v11680_v61 = vld [vmem:[#allocation71_spill] sm:$0xff]  ;;  %v8946_v7 = vpop.permute.xlu1 %785  ;;  %v8952_v44 = vmax.f32 %v5472_v57, %v5473_v13  ;;  %vm3359_vm12 = vcmp.gt.f32.partialorder %v11684_v32, 0.0  ;;  %v8964_v15 = vmax.f32 %v5503_v24, %v5504_v48  ;;  %v4894_v57 = vsel %vm3358_vm10, %v8563_v63, -inf  ;;  %v11686_v24 = vld [vmem:[#allocation146_spill] sm:$0xff] }
 0x379   :  { %vm3390_vm2 = vcmp.gt.f32.partialorder %v11680_v61, 0.0  ;;  %v8941_v61 = vsel %vm42_vm0, %v4882_v17, -inf  ;;  %v4883_v17 = vsel %vm3347_vm9, %v8643_v14, -inf  ;;  %v4911_v13 = vsel %vm3375_vm11, %v8590_v38, -inf }
 0x37a   :  { %v8917_v41 = vpop.permute.xlu0 %2445  ;;  %v4926_v33 = vsel %vm3390_vm2, %v8563_v63, -inf  ;;  %v8975_v50 = vsel %vm42_vm0, %v4883_v17, -inf  ;;  %v5460_v16 = vrot.slane %v5459_v59, 4  ;;  %vm3361_vm14 = vcmp.gt.f32.partialorder %v11685_v45, 0.0 }
 0x37b   :  { %11679 = vst [vmem:[#allocation96_spill] sm:$0xff] %v8917_v41  ;;  %7224 = vset.pattern.permute.xlu2 %v7814_v37  ;;  %v8956_v41 = vsel %vm42_vm0, %v4926_v33, -inf  ;;  %v5552_v33 = vmax.f32 %v5550_v42, %v5551_v55  ;;  %vm3376_vm15 = vcmp.gt.f32.partialorder %v8723_v28, 0.0  ;;  %v5510_v6 = vmax.f32 %v5508_v21, %v5509_v12 }
 0x37c   :  { %987 = vperm.xlu1 %7225, %v7994_v27   ;;  %v8971_v18 = vpop.permute.xlu2 %798  ;;  %v4895_v36 = vsel %vm3359_vm12, %v8590_v38, -inf  ;;  %vm3363_vm1 = vcmp.gt.f32.partialorder %v11686_v24, 0.0  ;;  %v5555_v42 = vsel %vm42_vm0, %v4911_v13, -inf  ;;  %v4900_v55 = vsel %vm3364_vm13, %v8572_v23, -inf  ;;  %v11687_v13 = vld [vmem:[#allocation32_spill] sm:$0xff] }
 0x37d   :  { %v5554_v48 = vmax.f32 %v5552_v33, %v5553_v43  ;;  %vm3377_vm2 = vcmp.gt.f32.partialorder %v8734_v46, 0.0  ;;  %v4897_v28 = vsel %vm3361_vm14, %v8628_v60, -inf  ;;  %vm3366_vm6 = vcmp.gt.f32.partialorder %v8596_v20, 0.0 }
 0x37e   :  { %v4912_v12 = vsel %vm3376_vm15, %v8607_v29, -inf  ;;  %v8993_v32 = vsel %vm42_vm0, %v4895_v36, -inf  ;;  %v5461_v43 = vmax.f32 %v5459_v59, %v5460_v16  ;;  %vm3362_vm7 = vcmp.gt.f32.partialorder %v8578_v0, 0.0 }
 0x37f   :  { %v5529_v33 = vsel %vm42_vm0, %v4900_v55, -inf  ;;  %v5556_v45 = vmax.f32 %v5554_v48, %v5555_v42  ;;  %v4913_v20 = vsel %vm3377_vm2, %v8628_v60, -inf  ;;  %v4902_v24 = vsel %vm3366_vm6, %v8563_v63, -inf  ;;  %v11688_v48 = vld [vmem:[#allocation2_spill] sm:$0xff]  ;;  %v11689_v42 = vld [vmem:[#allocation128_spill] sm:$0xff]  ;;  %v11690_v55 = vld [vmem:[#allocation5_spill] sm:$0xff] }
 0x380   :  { %2598 = vperm.xlu0 %7521, %v11683_v19   ;;  %v805_v21 = vpop.permute.xlu1 %804  ;;  %vm3367_vm8 = vcmp.gt.f32.partialorder %v8672_v51, 0.0  ;;  %v5557_v36 = vsel %vm42_vm0, %v4912_v12, -inf  ;;  %vm3378_vm9 = vcmp.gt.f32.partialorder %v8732_v56, 0.0  ;;  %v4898_v59 = vsel %vm3362_vm7, %v8663_v9, -inf }
 0x381   :  { %v9007_v16 = vsel %vm42_vm0, %v4897_v28, -inf  ;;  %v5559_v51 = vsel %vm42_vm0, %v4913_v20, -inf  ;;  %vm3360_vm10 = vcmp.gt.f32.partialorder %v11689_v42, 0.0  ;;  %v5462_v12 = vrot.slane %v5461_v43, 2 }
 0x382   :  { %v8962_v4 = vpop.permute.xlu0 %2690  ;;  %v4903_v28 = vsel %vm3367_vm8, %v8590_v38, -inf  ;;  %vm3368_vm11 = vcmp.gt.f32.partialorder %v8648_v2, 0.0  ;;  %vm3388_vm12 = vcmp.gt.f32.partialorder %v8825_v35, 0.0  ;;  %vm3389_vm13 = vcmp.gt.f32.partialorder %v8861_v52, 0.0 }
 0x383   :  { %981 = vperm.xlu2 %7224, %v7994_v27   ;;  %v5511_v27 = vsel %vm42_vm0, %v4894_v57, -inf  ;;  %v4899_v57 = vsel %vm3363_vm1, %v8643_v14, -inf  ;;  %vm3379_vm14 = vcmp.gt.f32.partialorder %v8748_v39, 0.0  ;;  %vm3381_vm15 = vcmp.gt.f32.partialorder %v8746_v47, 0.0 }
 0x384   :  { %7227 = vset.pattern.permute.xlu1 %v7829_v40  ;;  %v5512_v46 = vmax.f32 %v5510_v6, %v5511_v27  ;;  %v9010_v6 = vsel %vm42_vm0, %v4899_v57, -inf  ;;  %v5531_v27 = vmax.f32 %v5529_v33, %v8850_v8  ;;  %v4914_v57 = vsel %vm3378_vm9, %v8663_v9, -inf  ;;  %v811_v17 = vpop.permute.xlu2 %810 }
 0x385   :  { %v4896_v33 = vsel %vm3360_vm10, %v8607_v29, -inf  ;;  %v9038_v35 = vmax.f32 %v5461_v43, %v5462_v12  ;;  %v4924_v52 = vsel %vm3388_vm12, %v8572_v23, -inf  ;;  %v4925_v39 = vsel %vm3389_vm13, %v8545_v22, -inf }
 0x386   :  { %v5514_v0 = vmax.f32 %v5512_v46, %v8993_v32  ;;  %v5532_v32 = vsel %vm42_vm0, %v4902_v24, -inf  ;;  %v5558_v46 = vmax.f32 %v5556_v45, %v5557_v36  ;;  %v9034_v24 = vsel %vm42_vm0, %v4903_v28, -inf }
 0x387   :  { %v9031_v20 = vmax.f32 %v5531_v27, %v5532_v32  ;;  %v5561_v36 = vsel %vm42_vm0, %v4914_v57, -inf  ;;  %vm3396_vm1 = vcmp.gt.f32.partialorder %v8971_v18, 0.0  ;;  %vm3397_vm2 = vcmp.gt.f32.partialorder %v805_v21, 0.0  ;;  %v11691_v57 = vld [vmem:[#allocation131_spill] sm:$0xff] }
 0x388   :  { %2843 = vperm.xlu0 %7521, %v11687_v13   ;;  %v9023_v13 = vsel %vm42_vm0, %v4898_v59, -inf  ;;  %v5560_v8 = vmax.f32 %v5558_v46, %v5559_v51  ;;  %v817_v45 = vpop.permute.xlu1 %816  ;;  %v9046_v47 = vsel %vm3368_vm11, %v8607_v29, -inf  ;;  %v4915_v59 = vsel %vm3379_vm14, %v8643_v14, -inf }
 0x389   :  { %v5515_v27 = vsel %vm42_vm0, %v4896_v33, -inf  ;;  %v4917_v51 = vsel %vm3381_vm15, %v8545_v22, -inf  ;;  %v5535_v43 = vmax.f32 %v9031_v20, %v9034_v24  ;;  %vm3382_vm6 = vcmp.gt.f32.partialorder %v8757_v5, 0.0  ;;  %v11694_v20 = vld [vmem:[#allocation119_spill] sm:$0xff] }
 0x38a   :  { %v9017_v56 = vpop.permute.xlu0 %2984  ;;  %v9053_v42 = vmax.f32 %v5560_v8, %v5561_v36  ;;  %vm3345_vm7 = vcmp.gt.f32.partialorder %v8719_v31, 0.0  ;;  %v5592_v2 = vsel %vm42_vm0, %v4924_v52, -inf  ;;  %v5593_v18 = vsel %vm42_vm0, %v4925_v39, -inf }
 0x38b   :  { %7226 = vset.pattern.permute.xlu2 %v11688_v48  ;;  %v4932_v21 = vsel %vm3396_vm1, %v8572_v23, -inf  ;;  %v4933_v12 = vsel %vm3397_vm2, %v8545_v22, -inf  ;;  %v9064_v32 = vsel %vm42_vm0, %v4915_v59, -inf  ;;  %v5516_v28 = vmax.f32 %v5514_v0, %v5515_v27 }
 0x38c   :  { %1000 = vperm.xlu1 %7227, %v11690_v55   ;;  %v5572_v5 = vsel %vm42_vm0, %v4917_v51, -inf  ;;  %vm3398_vm8 = vcmp.gt.f32.partialorder %v811_v17, 0.0  ;;  %v829_v31 = vpop.permute.xlu2 %828  ;;  %v4918_v46 = vsel %vm3382_vm6, %v8563_v63, -inf  ;;  %vm3400_vm9 = vcmp.gt.f32.partialorder %v11691_v57, 0.0 }
 0x38d   :  { %vm3391_vm10 = vcmp.gt.f32.partialorder %v8880_v3, 0.0  ;;  %v4881_v23 = vsel %vm3345_vm7, %v8628_v60, -inf  ;;  %v5594_v22 = vmax.f32 %v5592_v2, %v5593_v18  ;;  %v5613_v33 = vsel %vm42_vm0, %v4932_v21, -inf }
 0x38e   :  { %v5614_v36 = vsel %vm42_vm0, %v4933_v12, -inf  ;;  %vm3399_vm11 = vcmp.gt.f32.partialorder %v817_v45, 0.0  ;;  %v5573_v17 = vmax.f32 %v8898_v26, %v5572_v5  ;;  %vm3383_vm12 = vcmp.gt.f32.partialorder %v8759_v53, 0.0 }
 0x38f   :  { %vm3392_vm13 = vcmp.gt.f32.partialorder %v8902_v49, 0.0  ;;  %v4934_v52 = vsel %vm3398_vm8, %v8563_v63, -inf  ;;  %v5518_v3 = vmax.f32 %v5516_v28, %v9007_v16  ;;  %v4936_v39 = vsel %vm3400_vm9, %v8607_v29, -inf }
 0x390   :  { %3235 = vperm.xlu0 %7521, %v8409_v25   ;;  %v835_v0 = vpop.permute.xlu1 %834  ;;  %v4927_v59 = vsel %vm3391_vm10, %v8590_v38, -inf  ;;  %v5475_v27 = vsel %vm42_vm0, %v4881_v23, -inf  ;;  %v5574_v45 = vsel %vm42_vm0, %v4918_v46, -inf  ;;  %vm3384_vm14 = vcmp.gt.f32.partialorder %v8778_v58, 0.0 }
 0x391   :  { %v5615_v26 = vmax.f32 %v5613_v33, %v5614_v36  ;;  %v4935_v53 = vsel %vm3399_vm11, %v8590_v38, -inf  ;;  %v4919_v49 = vsel %vm3383_vm12, %v8590_v38, -inf  ;;  %v5596_v63 = vmax.f32 %v5594_v22, %v8956_v41 }
 0x392   :  { %v9071_v8 = vpop.permute.xlu0 %3082  ;;  %v4928_v51 = vsel %vm3392_vm13, %v8607_v29, -inf  ;;  %v5616_v16 = vsel %vm42_vm0, %v4934_v52, -inf  ;;  %v5597_v2 = vsel %vm42_vm0, %v4927_v59, -inf  ;;  %vm3393_vm15 = vcmp.gt.f32.partialorder %v8923_v54, 0.0 }
 0x393   :  { %994 = vperm.xlu2 %7226, %v11690_v55   ;;  %v5476_v18 = vmax.f32 %v8952_v44, %v5475_v27  ;;  %vm3385_vm1 = vcmp.gt.f32.partialorder %v8728_v62, 0.0  ;;  %v5575_v58 = vmax.f32 %v5573_v17, %v5574_v45  ;;  %v5620_v38 = vsel %vm42_vm0, %v4936_v39, -inf  ;;  %v11692_v27 = vld [vmem:[#allocation37_spill] sm:$0xff] }
 0x394   :  { %7229 = vset.pattern.permute.xlu1 %v7797_v34  ;;  %v4920_v41 = vsel %vm3384_vm14, %v8607_v29, -inf  ;;  %v5618_v21 = vsel %vm42_vm0, %v4935_v53, -inf  ;;  %v841_v12 = vpop.permute.xlu2 %840  ;;  %v5576_v28 = vsel %vm42_vm0, %v4919_v49, -inf  ;;  %v5599_v5 = vsel %vm42_vm0, %v4928_v51, -inf }
 0x395   :  { %vm3394_vm2 = vcmp.gt.f32.partialorder %v8946_v7, 0.0  ;;  %v5617_v54 = vmax.f32 %v5615_v26, %v5616_v16  ;;  %v5598_v44 = vmax.f32 %v5596_v63, %v5597_v2  ;;  %v4929_v62 = vsel %vm3393_vm15, %v8628_v60, -inf }
 0x396   :  { %v4921_v46 = vsel %vm3385_vm1, %v8628_v60, -inf  ;;  %vm3401_vm6 = vcmp.gt.f32.partialorder %v829_v31, 0.0  ;;  %v5578_v23 = vsel %vm42_vm0, %v4920_v41, -inf  ;;  %vm3386_vm7 = vcmp.gt.f32.partialorder %v8780_v1, 0.0 }
 0x397   :  { %v5478_v29 = vmax.f32 %v5476_v18, %v8941_v61  ;;  %v5619_v22 = vmax.f32 %v5617_v54, %v5618_v21  ;;  %v5577_v36 = vmax.f32 %v5575_v58, %v5576_v28  ;;  %v5600_v17 = vmax.f32 %v5598_v44, %v5599_v5  ;;  %v9144_v54 = vld [vmem:[%s11369_s0] sm:$0xff] }
 0x398   :  { %7532 = vset.pattern.permute.xlu0 %v7702_v11  ;;  %v848_v57 = vpop.permute.xlu1 %847  ;;  %v4930_v7 = vsel %vm3394_vm2, %v8663_v9, -inf  ;;  %vm3402_vm8 = vcmp.gt.f32.partialorder %v835_v0, 0.0  ;;  %v5520_v52 = vmax.f32 %v5518_v3, %v9023_v13  ;;  %v5601_v39 = vsel %vm42_vm0, %v4929_v62, -inf }
 0x399   :  { %v5580_v31 = vsel %vm42_vm0, %v4921_v46, -inf  ;;  %v4937_v59 = vsel %vm3401_vm6, %v8628_v60, -inf  ;;  %v5564_v1 = vmax.f32 %v9053_v42, %v9064_v32  ;;  %v5579_v61 = vmax.f32 %v5577_v36, %v5578_v23 }
 0x39a   :  { %v9108_v33 = vpop.permute.xlu0 %3229  ;;  %vm3387_vm9 = vcmp.gt.f32.partialorder %v11692_v27, 0.0  ;;  %v4922_v45 = vsel %vm3386_vm7, %v8663_v9, -inf  ;;  %v5603_v0 = vsel %vm42_vm0, %v4930_v7, -inf  ;;  %v5480_v13 = vmax.f32 %v5478_v29, %v8975_v50  ;;  %v11693_v50 = vld [vmem:[#allocation152_spill] sm:$0xff]  ;;  %v11696_v27 = vld [vmem:[#allocation151_spill] sm:$0xff] }
 0x39b   :  { %7228 = vset.pattern.permute.xlu2 %v7777_v30  ;;  %v5621_v3 = vmax.f32 %v5619_v22, %v5620_v38  ;;  %v4938_v26 = vsel %vm3402_vm8, %v8663_v9, -inf  ;;  %v5602_v53 = vmax.f32 %v5600_v17, %v5601_v39  ;;  %v5581_v49 = vmax.f32 %v5579_v61, %v5580_v31  ;;  %v11695_v29 = vld [vmem:[#allocation4_spill] sm:$0xff] }
 0x39c   :  { %1018 = vperm.xlu1 %7229, %v11690_v55   ;;  %v5622_v42 = vsel %vm42_vm0, %v4937_v59, -inf  ;;  %vm3403_vm10 = vcmp.gt.f32.partialorder %v841_v12, 0.0  ;;  %v860_v32 = vpop.permute.xlu2 %859  ;;  %v5536_v63 = vsel %vm42_vm0, %v9046_v47, -inf  ;;  %v5522_v51 = vmax.f32 %v5520_v52, %v9010_v6  ;;  %v9158_v52 = vld [vmem:[%s11369_s0 + $0x10] sm:$0xff] }
 0x39d   :  { %vm3404_vm11 = vcmp.gt.f32.partialorder %v848_v57, 0.0  ;;  %v5464_v16 = vrot.slane %v9038_v35, 1  ;;  %vm3369_vm12 = vcmp.gt.f32.partialorder %v11693_v50, 0.0  ;;  %v5582_v2 = vsel %vm42_vm0, %v4922_v45, -inf }
 0x39e   :  { %v5604_v18 = vmax.f32 %v5602_v53, %v5603_v0  ;;  %v5624_v58 = vsel %vm42_vm0, %v4938_v26, -inf  ;;  %v4923_v41 = vsel %vm3387_vm9, %v8643_v14, -inf  ;;  %v5481_v21 = vrot.slane %v5480_v13, 4  ;;  %v11699_v26 = vld [vmem:[#allocation20_spill] sm:$0xff] }
 0x39f   :  { %v5623_v12 = vmax.f32 %v5621_v3, %v5622_v42  ;;  %v4939_v47 = vsel %vm3403_vm10, %v8643_v14, -inf  ;;  %v9139_v6 = vmax.f32 %v5535_v43, %v5536_v63  ;;  %v5565_v28 = vrot.slane %v5564_v1, 4 }
 0x3a0   :  { %v866_v38 = vpop.permute.xlu1 %865  ;;  %v5583_v5 = vmax.f32 %v5581_v49, %v5582_v2  ;;  %v4940_v44 = vsel %vm3404_vm11, %v9144_v54, -inf  ;;  %v4905_v62 = vsel %vm3369_vm12, %v8628_v60, -inf  ;;  %v5523_v46 = vrot.slane %v5522_v51, 4  ;;  %v9171_v49 = vld [vmem:[%s11369_s0 + $0x18] sm:$0xff]  ;;  %v11700_v2 = vld [vmem:[#allocation39_spill] sm:$0xff] }
 0x3a1   :  { %v5625_v57 = vmax.f32 %v5623_v12, %v5624_v58  ;;  %vm3406_vm13 = vcmp.gt.f32.partialorder %v860_v32, 0.0  ;;  %v5584_v23 = vsel %vm42_vm0, %v4923_v41, -inf  ;;  %v5606_v24 = vmax.f32 %v5604_v18, %v11694_v20  ;;  %v9181_v18 = vld [vmem:[%s11369_s0 + $0x38] sm:$0xff] }
 0x3a2   :  { %v5626_v43 = vsel %vm42_vm0, %v4939_v47, -inf  ;;  %v5482_v22 = vmax.f32 %v5480_v13, %v5481_v21  ;;  %v5634_v36 = vsel %vm42_vm0, %v4940_v44, -inf  ;;  %vm3407_vm15 = vcmp.gt.f32.partialorder %v866_v38, 0.0 }
 0x3a3   :  { %1012 = vperm.xlu2 %7228, %v11690_v55   ;;  %v5566_v60 = vmax.f32 %v5564_v1, %v5565_v28  ;;  %v5585_v7 = vmax.f32 %v5583_v5, %v5584_v23  ;;  %v4942_v39 = vsel %vm3406_vm13, %v9158_v52, -inf  ;;  %v5538_v61 = vsel %vm42_vm0, %v4905_v62, -inf  ;;  %v9195_v23 = vld [vmem:[%s11369_s0 + $0x30] sm:$0xff] }
 0x3a4   :  { %7231 = vset.pattern.permute.xlu1 %v7814_v37  ;;  %v872_v31 = vpop.permute.xlu2 %871  ;;  %vm3371_vm1 = vcmp.gt.f32.partialorder %v11696_v27, 0.0  ;;  %v5627_v45 = vmax.f32 %v5625_v57, %v5626_v43  ;;  %v5524_v13 = vmax.f32 %v5522_v51, %v5523_v46  ;;  %v5607_v3 = vrot.slane %v5606_v24, 4 }
 0x3a5   :  { %v5636_v53 = vmax.f32 %v5634_v36, %v11699_v26  ;;  %v4943_v42 = vsel %vm3407_vm15, %v9171_v49, -inf  ;;  %v5483_v63 = vrot.slane %v5482_v22, 2  ;;  %v5637_v50 = vsel %vm42_vm0, %v4942_v39, -inf }
 0x3a6   :  { %vm3408_vm2 = vcmp.gt.f32.partialorder %v872_v31, 0.0  ;;  %v5539_v51 = vmax.f32 %v9139_v6, %v5538_v61  ;;  %v4907_v58 = vsel %vm3371_vm1, %v9181_v18, -inf  ;;  %v5567_v41 = vrot.slane %v5566_v60, 2  ;;  %v9188_v6 = vld [vmem:[%s11369_s0 + $0x20] sm:$0xff] }
 0x3a7   :  { %v5586_v21 = vrot.slane %v5585_v7, 4  ;;  %v5628_v38 = vrot.slane %v5627_v45, 4  ;;  %v5639_v12 = vsel %vm42_vm0, %v4943_v42, -inf  ;;  %v5525_v5 = vrot.slane %v5524_v13, 2 }
 0x3a8   :  { %v878_v32 = vpop.permute.xlu1 %877  ;;  %v5638_v44 = vmax.f32 %v5636_v53, %v5637_v50  ;;  %v4944_v62 = vsel %vm3408_vm2, %v9188_v6, -inf  ;;  %v5608_v46 = vmax.f32 %v5606_v24, %v5607_v3  ;;  %v5484_v57 = vmax.f32 %v5482_v22, %v5483_v63 }
 0x3a9   :  { %vm3409_vm6 = vcmp.gt.f32.partialorder %v878_v32, 0.0  ;;  %v5587_v43 = vmax.f32 %v5585_v7, %v5586_v21  ;;  %v5629_v22 = vmax.f32 %v5627_v45, %v5628_v38  ;;  %v5641_v39 = vsel %vm42_vm0, %v4944_v62, -inf }
 0x3aa   :  { %v394_v14 = vpop.permute.xlu0 %393  ;;  %v5640_v36 = vmax.f32 %v5638_v44, %v5639_v12  ;;  %v5542_v61 = vsel %vm42_vm0, %v4907_v58, -inf  ;;  %v5568_v27 = vmax.f32 %v5566_v60, %v5567_v41  ;;  %v5526_v53 = vmax.f32 %v5524_v13, %v5525_v5  ;;  %v11702_v13 = vld [vmem:[#allocation99_spill] sm:$0xff]  ;;  %v11703_v5 = vld [vmem:[#allocation17_spill] sm:$0xff] }
 0x3ab   :  { %vm3330_vm14 = vcmp.gt.f32.partialorder %v394_v14, 0.0  ;;  %7230 = vset.pattern.permute.xlu2 %v11695_v29  ;;  %v5588_v42 = vrot.slane %v5587_v43, 2  ;;  %v5485_v63 = vrot.slane %v5484_v57, 1  ;;  %v5609_v50 = vrot.slane %v5608_v46, 2 }
 0x3ac   :  { %v4866_v17 = vsel %vm3330_vm14, %v8663_v9, -inf  ;;  %1030 = vperm.xlu1 %7231, %v11690_v55   ;;  %v11697_v9 = vld [vmem:[#allocation38_spill] sm:$0xff]  ;;  %v890_v7 = vpop.permute.xlu2 %889  ;;  %v5642_v32 = vmax.f32 %v5640_v36, %v5641_v39  ;;  %v5630_v60 = vrot.slane %v5629_v22, 2  ;;  %vm6754_vm10 = vcmask 1044484  }
 0x3ad   :  { %v5435_v59 = vsel %vm42_vm0, %v4866_v17, -inf  ;;  %v11698_v0 = vmax.f32 %v8895_v10, %v11697_v9  ;;  %v9202_v17 = vld [vmem:[%s11369_s0 + $0x28] sm:$0xff]  ;;  %v5465_v9 = vmax.f32 %v9038_v35, %v5464_v16  ;;  %vm3411_vm8 = vcmp.gt.f32.partialorder %v890_v7, 0.0 }
 0x3ae   :  { %v4947_v35 = vsel %vm3411_vm8, %v9181_v18, -inf  ;;  %vm6756_vm11 = vcmask 1045509   ;;  %v5589_v21 = vmax.f32 %v5587_v43, %v5588_v42  ;;  %v5486_v12 = vmax.f32 %v5484_v57, %v5485_v63 }
 0x3af   :  { %v5436_v1 = vmax.f32 %v11698_v0, %v5435_v59  ;;  %v11701_v0 = vrot.slane %v8964_v15, 1  ;;  %vm6758_vm12 = vcmask 1046534   ;;  %vm11483_vm13 = vcmask 1047559  }
 0x3b0   :  { %v5527_v62 = vrot.slane %v5526_v53, 1 }
 0x3b1   :  { %v5438_v10 = vmax.f32 %v5436_v1, %v11700_v2  ;;  %v5507_v1 = vmax.f32 %v8964_v15, %v11701_v0 }
 0x3b2   :  { %v639_v28 = vpop.permute.xlu0 %638 }
 0x3b3   :  { %v5439_v47 = vrot.slane %v5438_v10, 4  ;;  %vm3370_vm7 = vcmp.gt.f32.partialorder %v639_v28, 0.0  ;;  %1024 = vperm.xlu2 %7230, %v11690_v55   ;;  %v4945_v55 = vsel %vm3409_vm6, %v9202_v17, -inf }
 0x3b4   :  { %v4906_v20 = vsel %vm3370_vm7, %v9195_v23, -inf  ;;  %7233 = vset.pattern.permute.xlu1 %v7829_v40  ;;  %v5643_v3 = vsel %vm42_vm0, %v4945_v55, -inf  ;;  %v5631_v55 = vmax.f32 %v5629_v22, %v5630_v60 }
 0x3b5   :  { %v5440_v14 = vmax.f32 %v5438_v10, %v5439_v47  ;;  %v5540_v24 = vsel %vm42_vm0, %v4906_v20, -inf  ;;  %v5644_v58 = vmax.f32 %v5642_v32, %v5643_v3  ;;  %v5647_v20 = vsel %vm42_vm0, %v4947_v35, -inf }
 0x3b6   :  { %v5541_v59 = vmax.f32 %v5539_v51, %v5540_v24  ;;  %v5632_v3 = vrot.slane %v5631_v55, 1 }
 0x3b7   :  { %v5441_v31 = vrot.slane %v5440_v14, 2 }
 0x3b8   :  { %v5543_v26 = vmax.f32 %v5541_v59, %v5542_v61  ;;  %v5590_v59 = vrot.slane %v5589_v21, 1 }
 0x3b9   :  { %v5442_v45 = vmax.f32 %v5440_v14, %v5441_v31  ;;  %v5610_v14 = vmax.f32 %v5608_v46, %v5609_v50  ;;  %v5569_v31 = vrot.slane %v5568_v27, 1  ;;  %v5528_v46 = vmax.f32 %v5526_v53, %v5527_v62  ;;  %v6857_v62 = vld [vmem:[%s11371_s2 + $0x70] sm:$0xff] }
 0x3ba   :  { %v5544_v10 = vrot.slane %v5543_v26, 4  ;;  %v884_v51 = vpop.permute.xlu0 %883  ;;  %v5633_v50 = vmax.f32 %v5631_v55, %v5632_v3  ;;  %v6855_v55 = vld [vmem:[%s11371_s2 + $0x60] sm:$0xff]  ;;  %v6848_v3 = vld [vmem:[%s11371_s2 + $0x28] sm:$0xff] }
 0x3bb   :  { %v5443_v2 = vrot.slane %v5442_v45, 1  ;;  %vm3410_vm9 = vcmp.gt.f32.partialorder %v884_v51, 0.0  ;;  %7232 = vset.pattern.permute.xlu2 %v11688_v48  ;;  %v5611_v0 = vrot.slane %v5610_v14, 1 }
 0x3bc   :  { %v5545_v16 = vmax.f32 %v5543_v26, %v5544_v10  ;;  %v4946_v41 = vsel %vm3410_vm9, %v9195_v23, -inf  ;;  %1049 = vperm.xlu1 %7233, %v11702_v13   ;;  %v5591_v26 = vmax.f32 %v5589_v21, %v5590_v59  ;;  %v9252_v21 = vpop.permute.xlu1 %896  ;;  %v6851_v59 = vld [vmem:[%s11371_s2 + $0x40] sm:$0xff] }
 0x3bd   :  { %v5444_v15 = vmax.f32 %v5442_v45, %v5443_v2  ;;  %v5645_v38 = vsel %vm42_vm0, %v4946_v41, -inf  ;;  %v5570_v45 = vmax.f32 %v5568_v27, %v5569_v31  ;;  %v5612_v32 = vmax.f32 %v5610_v14, %v5611_v0  ;;  %v6850_v0 = vld [vmem:[%s11371_s2 + $0x38] sm:$0xff] }
 0x3be   :  { %v5546_v47 = vrot.slane %v5545_v16, 2  ;;  %v5646_v28 = vmax.f32 %v5644_v58, %v5645_v38  ;;  %v11704_v58 = vld [vmem:[#allocation3_spill] sm:$0xff] }
 0x3bf   :  { %v6755_v44 = vsel %vm6754_vm10, %v5444_v15, %v11703_v5 }
 0x3c0   :  { %v6757_v36 = vsel %vm6756_vm11, %v5465_v9, %v6755_v44  ;;  %v5547_v24 = vmax.f32 %v5545_v16, %v5546_v47  ;;  %v5648_v39 = vmax.f32 %v5646_v28, %v5647_v20  ;;  %v9246_v16 = vpop.permute.xlu2 %902  ;;  %v6858_v44 = vld [vmem:[%s11371_s2 + $0x78] sm:$0xff]  ;;  %v6856_v20 = vld [vmem:[%s11371_s2 + $0x68] sm:$0xff] }
 0x3c1   :  { %v6759_v43 = vsel %vm6758_vm12, %v5486_v12, %v6757_v36  ;;  %v11705_v12 = vld [vmem:[#allocation19_spill] sm:$0xff]  ;;  %6863 = vmatpush.msra.mxu1 %v6858_v44  ;;  %7098 = vmatpush.msra.mxu3 %v6858_v44  ;;  %v11707_v44 = vld [vmem:[#allocation13_spill] sm:$0xff] }
 0x3c2   :  { %v6761_v57 = vsel %vm11483_vm13, %v5507_v1, %v6759_v43  ;;  %v5548_v61 = vrot.slane %v5547_v24, 1  ;;  %v5649_v7 = vrot.slane %v5648_v39, 4  ;;  %v9242_v15 = vpop.permute.xlu0 %1128  ;;  %v6853_v43 = vld [vmem:[%s11371_s2 + $0x50] sm:$0xff] }
 0x3c3   :  { %6811 = vrot.lane.b32.xlu0 %v6761_v57, %s7627_s19  ;;  %1043 = vperm.xlu2 %7232, %v11702_v13   ;;  %v6852_v57 = vld [vmem:[%s11371_s2 + $0x48] sm:$0xff] }
 0x3c4   :  { %v5549_v9 = vmax.f32 %v5547_v24, %v5548_v61  ;;  %v5650_v22 = vmax.f32 %v5648_v39, %v5649_v7  ;;  %7235 = vset.pattern.permute.xlu1 %v7777_v30  ;;  %v9258_v47 = vpop.permute.xlu1 %908  ;;  %6864 = vmatpush.msra.mxu1 %v6857_v62  ;;  %v6854_v24 = vld [vmem:[%s11371_s2 + $0x58] sm:$0xff] }
 0x3c5   :  { %7099 = vmatpush.msra.mxu3 %v6857_v62  ;;  %v67_v62 = vmax.f32 %v11707_v44, 1.0 }
 0x3c6   :  { %v6762_v42 = vsel %vm6748_vm3, %v5549_v9, %v5528_v46  ;;  %v5651_v1 = vrot.slane %v5650_v22, 2  ;;  %6865 = vmatpush.msra.mxu1 %v6856_v20  ;;  %v6849_v46 = vld [vmem:[%s11371_s2 + $0x30] sm:$0xff] }
 0x3c7   :  { %v6763_v63 = vsel %vm6750_vm4, %v5570_v45, %v6762_v42  ;;  %7100 = vmatpush.msra.mxu3 %v6856_v20  ;;  %v6846_v42 = vld [vmem:[%s11371_s2 + $0x18] sm:$0xff]  ;;  %7536 = vrcp.f32 %v67_v62 }
 0x3c8   :  { %v5652_v60 = vmax.f32 %v5650_v22, %v5651_v1  ;;  %v6764_v2 = vsel %vm6752_vm5, %v5591_v26, %v6763_v63  ;;  %v9254_v38 = vpop.permute.xlu2 %920  ;;  %6866 = vmatpush.msra.mxu1 %v6855_v55  ;;  %v6847_v22 = vld [vmem:[%s11371_s2 + $0x20] sm:$0xff]  ;;  %v6845_v1 = vld [vmem:[%s11371_s2 + $0x10] sm:$0xff] }
 0x3c9   :  { %v6765_v10 = vsel %vm6754_vm10, %v5612_v32, %v6764_v2  ;;  %7101 = vmatpush.msra.mxu3 %v6855_v55  ;;  %v6844_v32 = vld [vmem:[%s11371_s2 + $0x8] sm:$0xff]  ;;  %v6843_v63 = vld [vmem:[%s11371_s2] sm:$0xff] }
 0x3ca   :  { %v5653_v53 = vrot.slane %v5652_v60, 1  ;;  %v6766_v51 = vsel %vm6756_vm11, %v5633_v50, %v6765_v10  ;;  %v9250_v41 = vpop.permute.xlu0 %1373  ;;  %6867 = vmatpush.msra.mxu1 %v6854_v24  ;;  %v11706_v10 = vld [vmem:[#allocation72_spill] sm:$0xff] }
 0x3cb   :  { %7234 = vset.pattern.permute.xlu2 %v11704_v58  ;;  %7102 = vmatpush.msra.mxu3 %v6854_v24  ;;  %v11708_v24 = vld [vmem:[#allocation60_spill] sm:$0xff] }
 0x3cc   :  { %1061 = vperm.xlu1 %7235, %v11702_v13   ;;  %v5654_v27 = vmax.f32 %v5652_v60, %v5653_v53  ;;  %v9272_v14 = vpop.permute.xlu1 %926  ;;  %6868 = vmatpush.msra.mxu1 %v6853_v43  ;;  %vm3420_vm1 = vcmp.gt.f32.partialorder %v11708_v24, 0.0 }
 0x3cd   :  { %7103 = vmatpush.msra.mxu3 %v6853_v43 }
 0x3ce   :  { %v9238_v35 = vsel %vm6758_vm12, %v5654_v27, %v6766_v51  ;;  %6869 = vmatpush.msra.mxu1 %v6852_v57 }
 0x3cf   :  { %7104 = vmatpush.msra.mxu3 %v6852_v57 }
 0x3d0   :  { %v9262_v5 = vpop.permute.xlu2 %932  ;;  %6870 = vmatpush.msra.mxu1 %v6851_v59 }
 0x3d1   :  { %7105 = vmatpush.msra.mxu3 %v6851_v59 }
 0x3d2   :  { %v9260_v28 = vpop.permute.xlu0 %1618  ;;  %6871 = vmatpush.msra.mxu1 %v6850_v0 }
 0x3d3   :  { %1055 = vperm.xlu2 %7234, %v11702_v13   ;;  %7106 = vmatpush.msra.mxu3 %v6850_v0  ;;  %v11709_v0 = vld [vmem:[#allocation73_spill] sm:$0xff] }
 0x3d4   :  { %7237 = vset.pattern.permute.xlu1 %v7814_v37  ;;  %v9289_v39 = vpop.permute.xlu1 %938  ;;  %6872 = vmatpush.msra.mxu1 %v6849_v46  ;;  %vm3430_vm6 = vcmp.gt.f32.partialorder %v11709_v0, 0.0 }
 0x3d5   :  { %7107 = vmatpush.msra.mxu3 %v6849_v46  ;;  %v4956_v46 = vsel %vm3420_vm1, %v9144_v54, -inf }
 0x3d6   :  { %6873 = vmatpush.msra.mxu1 %v6848_v3 }
 0x3d7   :  { %7108 = vmatpush.msra.mxu3 %v6848_v3  ;;  %v7537_v3 = vpop.eup %7536 }
 0x3d8   :  { %v9279_v36 = vpop.permute.xlu2 %951  ;;  %6874 = vmatpush.msra.mxu1 %v6847_v22 }
 0x3d9   :  { %7109 = vmatpush.msra.mxu3 %v6847_v22  ;;  %vm3421_vm2 = vcmp.gt.f32.partialorder %v9279_v36, 0.0 }
 0x3da   :  { %6875 = vmatpush.msra.mxu1 %v6846_v42 }
 0x3db   :  { %7236 = vset.pattern.permute.xlu2 %v11695_v29  ;;  %7110 = vmatpush.msra.mxu3 %v6846_v42 }
 0x3dc   :  { %1079 = vperm.xlu1 %7237, %v11702_v13   ;;  %v9306_v7 = vpop.permute.xlu1 %957  ;;  %6876 = vmatpush.msra.mxu1 %v6845_v1 }
 0x3dd   :  { %7111 = vmatpush.msra.mxu3 %v6845_v1  ;;  %vm3422_vm7 = vcmp.gt.f32.partialorder %v9306_v7, 0.0 }
 0x3de   :  { %6877 = vmatpush.msra.mxu1 %v6844_v32  ;;  %v4958_v24 = vsel %vm3422_vm7, %v9158_v52, -inf }
 0x3df   :  { %7112 = vmatpush.msra.mxu3 %v6844_v32  ;;  %v4966_v32 = vsel %vm3430_vm6, %v9158_v52, -inf }
 0x3e0   :  { %v9304_v61 = vpop.permute.xlu2 %963  ;;  %6878 = vmatpush.msra.mxu1 %v6843_v63  ;;  %v5700_v7 = vsel %vm42_vm0, %v4966_v32, -inf  ;;  %v11710_v32 = vld [vmem:[#allocation15_spill] sm:$0xff] }
 0x3e1   :  { %7113 = vmatpush.msra.mxu3 %v6843_v63  ;;  %v124_v63 = vpop.f32.mrf.mxu0  ;;  %vm3423_vm9 = vcmp.gt.f32.partialorder %v9304_v61, 0.0 }
 0x3e2   :  { %v148_v62 = vmul.f32 %v7537_v3, %v124_v63 }
 0x3e3   :  { %1073 = vperm.xlu2 %7236, %v11702_v13  }
 0x3e4   :  { %7239 = vset.pattern.permute.xlu1 %v11688_v48  ;;  %v9326_v26 = vpop.permute.xlu1 %969 }
 0x3e8   :  { %v9324_v45 = vpop.permute.xlu2 %981 }
 0x3eb   :  { %7238 = vset.pattern.permute.xlu2 %v7702_v11 }
 0x3ec   :  { %1092 = vperm.xlu1 %7239, %v11705_v12  }
 0x3ee   :  { %v9342_v60 = vpop.permute.xlu1 %987 }
 0x3f0   :  { %v995_v50 = vpop.permute.xlu2 %994 }
 0x3f1   :  { %vm3428_vm14 = vcmp.gt.f32.partialorder %v995_v50, 0.0  ;;  %v5676_v50 = vsel %vm42_vm0, %v4956_v46, -inf  ;;  %v5679_v46 = vsel %vm42_vm0, %v4958_v24, -inf }
 0x3f2   :  { %v4964_v57 = vsel %vm3428_vm14, %v9144_v54, -inf }
 0x3f3   :  { %1085 = vperm.xlu2 %7238, %v11702_v13   ;;  %v9277_v13 = vpop.permute.xlu0 %1863  ;;  %v5697_v22 = vsel %vm42_vm0, %v4964_v57, -inf }
 0x3f4   :  { %7241 = vset.pattern.permute.xlu1 %v7777_v30 }
 0x3fb   :  { %7240 = vset.pattern.permute.xlu2 %v11704_v58  ;;  %v9294_v31 = vpop.permute.xlu0 %2108 }
 0x3fc   :  { %1110 = vperm.xlu1 %7241, %v11705_v12  }
 0x3fd   :  { %v1013_v51 = vpop.permute.xlu2 %1012 }
 0x3fe   :  { %v1001_v53 = vpop.permute.xlu1 %1000  ;;  %vm3431_vm8 = vcmp.gt.f32.partialorder %v1013_v51, 0.0 }
 0x3ff   :  { %vm3429_vm15 = vcmp.gt.f32.partialorder %v1001_v53, 0.0 }
 0x403   :  { %1104 = vperm.xlu2 %7240, %v11705_v12   ;;  %v9319_v9 = vpop.permute.xlu0 %2353 }
 0x404   :  { %7243 = vset.pattern.permute.xlu1 %v11695_v29 }
 0x40b   :  { %7242 = vset.pattern.permute.xlu2 %v7797_v34  ;;  %v9344_v2 = vpop.permute.xlu0 %2598 }
 0x40c   :  { %1122 = vperm.xlu1 %7243, %v11705_v12  }
 0x40d   :  { %v1025_v55 = vpop.permute.xlu2 %1024 }
 0x40e   :  { %v1019_v20 = vpop.permute.xlu1 %1018  ;;  %vm3433_vm1 = vcmp.gt.f32.partialorder %v1025_v55, 0.0 }
 0x40f   :  { %vm3432_vm14 = vcmp.gt.f32.partialorder %v1019_v20, 0.0 }
 0x413   :  { %1116 = vperm.xlu2 %7242, %v11705_v12   ;;  %v9348_v27 = vpop.permute.xlu0 %2843 }
 0x414   :  { %7245 = vset.pattern.permute.xlu1 %v11688_v48 }
 0x41b   :  { %7244 = vset.pattern.permute.xlu2 %v7702_v11  ;;  %v9355_v43 = vpop.permute.xlu0 %3235 }
 0x41c   :  { %1141 = vperm.xlu1 %7245, %v11706_v10  }
 0x41d   :  { %v1044_v44 = vpop.permute.xlu2 %1043 }
 0x41e   :  { %v1031_v1 = vpop.permute.xlu1 %1030  ;;  %vm3436_vm7 = vcmp.gt.f32.partialorder %v1044_v44, 0.0 }
 0x41f   :  { %vm3434_vm6 = vcmp.gt.f32.partialorder %v1031_v1, 0.0  ;;  %v4972_v44 = vsel %vm3436_vm7, %v9144_v54, -inf }
 0x423   :  { %1134 = vperm.xlu2 %7244, %v11705_v12   ;;  %v9361_v12 = vld [vmem:[%s11369_s0 + $0x8] sm:$0xff] }
 0x424   :  { %7247 = vset.pattern.permute.xlu1 %v11704_v58  ;;  %v4965_v59 = vsel %vm3429_vm15, %v9361_v12, -inf  ;;  %v4957_v36 = vsel %vm3421_vm2, %v9361_v12, -inf  ;;  %vm3424_vm15 = vcmp.gt.f32.partialorder %v9326_v26, 0.0  ;;  %vm3425_vm2 = vcmp.gt.f32.partialorder %v11710_v32, 0.0 }
 0x425   :  { %v5698_v42 = vsel %vm42_vm0, %v4965_v59, -inf  ;;  %v5677_v53 = vsel %vm42_vm0, %v4957_v36, -inf  ;;  %v4967_v59 = vsel %vm3431_vm8, %v9171_v49, -inf  ;;  %v4959_v36 = vsel %vm3423_vm9, %v9171_v49, -inf }
 0x426   :  { %v5699_v0 = vmax.f32 %v5697_v22, %v5698_v42  ;;  %v5678_v57 = vmax.f32 %v5676_v50, %v5677_v53  ;;  %v4968_v22 = vsel %vm3432_vm14, %v9188_v6, -inf  ;;  %v5702_v20 = vsel %vm42_vm0, %v4967_v59, -inf }
 0x427   :  { %v4960_v26 = vsel %vm3424_vm15, %v9188_v6, -inf  ;;  %v5681_v50 = vsel %vm42_vm0, %v4959_v36, -inf  ;;  %v5704_v53 = vsel %vm42_vm0, %v4968_v22, -inf  ;;  %v4961_v55 = vsel %vm3425_vm2, %v9202_v17, -inf }
 0x428   :  { %v5701_v3 = vmax.f32 %v5699_v0, %v5700_v7  ;;  %v5680_v63 = vmax.f32 %v5678_v57, %v5679_v46  ;;  %v4969_v0 = vsel %vm3433_vm1, %v9202_v17, -inf  ;;  %v5683_v7 = vsel %vm42_vm0, %v4960_v26, -inf }
 0x429   :  { %vm3426_vm14 = vcmp.gt.f32.partialorder %v9324_v45, 0.0  ;;  %v5706_v1 = vsel %vm42_vm0, %v4969_v0, -inf  ;;  %vm3427_vm1 = vcmp.gt.f32.partialorder %v9342_v60, 0.0 }
 0x42a   :  { %v5703_v24 = vmax.f32 %v5701_v3, %v5702_v20  ;;  %v5682_v57 = vmax.f32 %v5680_v63, %v5681_v50  ;;  %v4962_v45 = vsel %vm3426_vm14, %v9195_v23, -inf  ;;  %v5718_v63 = vsel %vm42_vm0, %v4972_v44, -inf }
 0x42b   :  { %7246 = vset.pattern.permute.xlu2 %v7829_v40 }
 0x42c   :  { %1153 = vperm.xlu1 %7247, %v11706_v10   ;;  %v5705_v46 = vmax.f32 %v5703_v24, %v5704_v53  ;;  %v5684_v22 = vmax.f32 %v5682_v57, %v5683_v7  ;;  %v4963_v24 = vsel %vm3427_vm1, %v9181_v18, -inf }
 0x42d   :  { %v1056_v59 = vpop.permute.xlu2 %1055 }
 0x42e   :  { %v1050_v42 = vpop.permute.xlu1 %1049  ;;  %vm3438_vm15 = vcmp.gt.f32.partialorder %v1056_v59, 0.0  ;;  %v5707_v32 = vmax.f32 %v5705_v46, %v5706_v1  ;;  %v11712_v59 = vld [vmem:[#allocation134_spill] sm:$0xff]  ;;  %v5689_v46 = vsel %vm42_vm0, %v4963_v24, -inf }
 0x42f   :  { %vm3437_vm8 = vcmp.gt.f32.partialorder %v1050_v42, 0.0  ;;  %v4974_v50 = vsel %vm3438_vm15, %v9158_v52, -inf }
 0x430   :  { %v4973_v36 = vsel %vm3437_vm8, %v9361_v12, -inf  ;;  %v5721_v57 = vsel %vm42_vm0, %v4974_v50, -inf }
 0x431   :  { %v5719_v26 = vsel %vm42_vm0, %v4973_v36, -inf }
 0x432   :  { %v5720_v60 = vmax.f32 %v5718_v63, %v5719_v26 }
 0x433   :  { %1147 = vperm.xlu2 %7246, %v11706_v10  }
 0x434   :  { %7249 = vset.pattern.permute.xlu1 %v11695_v29 }
 0x435   :  { %v6812_v51 = vpop.permute.xlu0 %6811 }
 0x436   :  { %v6835_v61 = vsel %vm42_vm0, %v148_v62, %v6812_v51  ;;  %v11711_v62 = vld [vmem:[#allocation22_spill] sm:$0xff]  ;;  %v4970_v51 = vsel %vm3434_vm6, %v9195_v23, -inf  ;;  %vm3440_vm6 = vcmp.gt.f32.partialorder %v11712_v59, 0.0 }
 0x437   :  { %6879 = vmatmul.f32.vlgmr.msra.gmra.mxu1 %v6835_v61  ;;  %vm3435_vm9 = vcmp.gt.f32.partialorder %v11711_v62, 0.0  ;;  %v5685_v61 = vsel %vm42_vm0, %v4961_v55, -inf  ;;  %v5708_v20 = vsel %vm42_vm0, %v4970_v51, -inf  ;;  %v5687_v55 = vsel %vm42_vm0, %v4962_v45, -inf }
 0x438   :  { %v4971_v3 = vsel %vm3435_vm9, %v9181_v18, -inf  ;;  %v5686_v53 = vmax.f32 %v5684_v22, %v5685_v61  ;;  %v5709_v0 = vmax.f32 %v5707_v32, %v5708_v20  ;;  %v5722_v22 = vmax.f32 %v5720_v60, %v5721_v57 }
 0x439   :  { %v5710_v62 = vsel %vm42_vm0, %v4971_v3, -inf  ;;  %v4976_v3 = vsel %vm3440_vm6, %v9188_v6, -inf }
 0x43a   :  { %v5688_v1 = vmax.f32 %v5686_v53, %v5687_v55  ;;  %v5711_v44 = vmax.f32 %v5709_v0, %v5710_v62  ;;  %v5725_v20 = vsel %vm42_vm0, %v4976_v3, -inf }
 0x43b   :  { %7248 = vset.pattern.permute.xlu2 %v7797_v34 }
 0x43c   :  { %1171 = vperm.xlu1 %7249, %v11706_v10   ;;  %v5690_v61 = vmax.f32 %v5688_v1, %v5689_v46 }
 0x43d   :  { %v1074_v51 = vpop.permute.xlu2 %1073 }
 0x43e   :  { %v1062_v42 = vpop.permute.xlu1 %1061  ;;  %vm3441_vm7 = vcmp.gt.f32.partialorder %v1074_v51, 0.0  ;;  %v5691_v63 = vrot.slane %v5690_v61, 4 }
 0x43f   :  { %vm3439_vm2 = vcmp.gt.f32.partialorder %v1062_v42, 0.0  ;;  %v5712_v42 = vrot.slane %v5711_v44, 4  ;;  %v4977_v32 = vsel %vm3441_vm7, %v9202_v17, -inf  ;;  %vm3450_vm7 = vcmp.gt.f32.partialorder %v9242_v15, 0.0 }
 0x440   :  { %v4975_v7 = vsel %vm3439_vm2, %v9171_v49, -inf  ;;  %v5727_v53 = vsel %vm42_vm0, %v4977_v32, -inf  ;;  %v5692_v62 = vmax.f32 %v5690_v61, %v5691_v63  ;;  %v11713_v63 = vld [vmem:[#allocation40_spill] sm:$0xff] }
 0x441   :  { %v5723_v36 = vsel %vm42_vm0, %v4975_v7, -inf  ;;  %v5713_v50 = vmax.f32 %v5711_v44, %v5712_v42 }
 0x442   :  { %v5724_v45 = vmax.f32 %v5722_v22, %v5723_v36  ;;  %v5693_v1 = vrot.slane %v5692_v62, 2 }
 0x443   :  { %1165 = vperm.xlu2 %7248, %v11706_v10   ;;  %v5714_v59 = vrot.slane %v5713_v50, 2 }
 0x444   :  { %7251 = vset.pattern.permute.xlu1 %v7702_v11  ;;  %v5726_v26 = vmax.f32 %v5724_v45, %v5725_v20  ;;  %v5694_v22 = vmax.f32 %v5692_v62, %v5693_v1 }
 0x445   :  { %v5715_v36 = vmax.f32 %v5713_v50, %v5714_v59 }
 0x446   :  { %v5728_v60 = vmax.f32 %v5726_v26, %v5727_v53  ;;  %v5695_v42 = vrot.slane %v5694_v22, 1 }
 0x447   :  { %v5716_v45 = vrot.slane %v5715_v36, 1 }
 0x449   :  { %v5717_v26 = vmax.f32 %v5715_v36, %v5716_v45 }
 0x44b   :  { %7250 = vset.pattern.permute.xlu2 %v7814_v37 }
 0x44c   :  { %1183 = vperm.xlu1 %7251, %v11706_v10  }
 0x44d   :  { %v1086_v24 = vpop.permute.xlu2 %1085 }
 0x44e   :  { %v1080_v0 = vpop.permute.xlu1 %1079  ;;  %vm3443_vm8 = vcmp.gt.f32.partialorder %v1086_v24, 0.0  ;;  %v5696_v24 = vmax.f32 %v5694_v22, %v5695_v42 }
 0x44f   :  { %vm3442_vm9 = vcmp.gt.f32.partialorder %v1080_v0, 0.0  ;;  %v4979_v55 = vsel %vm3443_vm8, %v9181_v18, -inf }
 0x450   :  { %v4978_v7 = vsel %vm3442_vm9, %v9195_v23, -inf  ;;  %v5731_v46 = vsel %vm42_vm0, %v4979_v55, -inf }
 0x451   :  { %v5729_v57 = vsel %vm42_vm0, %v4978_v7, -inf }
 0x452   :  { %v5730_v51 = vmax.f32 %v5728_v60, %v5729_v57  ;;  %v11714_v60 = vld [vmem:[#allocation41_spill] sm:$0xff] }
 0x453   :  { %1177 = vperm.xlu2 %7250, %v11706_v10   ;;  %v6769_v10 = vsel %vm6748_vm3, %v5717_v26, %v5696_v24  ;;  %vm3445_vm14 = vcmp.gt.f32.partialorder %v11714_v60, 0.0 }
 0x454   :  { %v5732_v44 = vmax.f32 %v5730_v51, %v5731_v46  ;;  %7253 = vset.pattern.permute.xlu1 %v11704_v58  ;;  %v4981_v7 = vsel %vm3445_vm14, %v9361_v12, -inf  ;;  %vm11482_vm14 = vcmask 261120  }
 0x455   :  { %v5740_v46 = vsel %vm42_vm0, %v4981_v7, -inf }
 0x456   :  { %v5733_v3 = vrot.slane %v5732_v44, 4 }
 0x458   :  { %v5734_v61 = vmax.f32 %v5732_v44, %v5733_v3 }
 0x45a   :  { %v5735_v20 = vrot.slane %v5734_v61, 2 }
 0x45b   :  { %7252 = vset.pattern.permute.xlu2 %v7829_v40 }
 0x45c   :  { %v5736_v32 = vmax.f32 %v5734_v61, %v5735_v20  ;;  %1202 = vperm.xlu1 %7253, %v11713_v63  }
 0x45d   :  { %v1105_v62 = vpop.permute.xlu2 %1104 }
 0x45e   :  { %v5737_v53 = vrot.slane %v5736_v32, 1  ;;  %v1093_v50 = vpop.permute.xlu1 %1092  ;;  %vm3446_vm1 = vcmp.gt.f32.partialorder %v1105_v62, 0.0 }
 0x45f   :  { %vm3444_vm15 = vcmp.gt.f32.partialorder %v1093_v50, 0.0  ;;  %v4982_v1 = vsel %vm3446_vm1, %v9158_v52, -inf }
 0x460   :  { %v5738_v0 = vmax.f32 %v5736_v32, %v5737_v53  ;;  %v4980_v59 = vsel %vm3444_vm15, %v9144_v54, -inf  ;;  %v5742_v22 = vsel %vm42_vm0, %v4982_v1, -inf  ;;  %v4986_v53 = vsel %vm3450_vm7, %v9195_v23, -inf }
 0x461   :  { %v5739_v51 = vsel %vm42_vm0, %v4980_v59, -inf  ;;  %v5750_v15 = vsel %vm42_vm0, %v4986_v53, -inf }
 0x462   :  { %v9436_v55 = vsel %vm6750_vm4, %v5738_v0, %v6769_v10  ;;  %v5741_v36 = vmax.f32 %v5739_v51, %v5740_v46 }
 0x463   :  { %1196 = vperm.xlu2 %7252, %v11713_v63  }
 0x464   :  { %7255 = vset.pattern.permute.xlu1 %v7797_v34  ;;  %v5743_v45 = vmax.f32 %v5741_v36, %v5742_v22  ;;  %v6915_v22 = vld [vmem:[%s11373_s4 + $0x18] sm:$0xff] }
 0x465   :  { %6953 = vmatpush.msra.mxu2 %v6915_v22 }
 0x46b   :  { %7254 = vset.pattern.permute.xlu2 %v7777_v30 }
 0x46c   :  { %1214 = vperm.xlu1 %7255, %v11713_v63  }
 0x46d   :  { %v1117_v44 = vpop.permute.xlu2 %1116 }
 0x46e   :  { %v1111_v57 = vpop.permute.xlu1 %1110  ;;  %vm3448_vm6 = vcmp.gt.f32.partialorder %v1117_v44, 0.0  ;;  %v11715_v44 = vld [vmem:[#allocation6_spill] sm:$0xff] }
 0x46f   :  { %vm3447_vm2 = vcmp.gt.f32.partialorder %v1111_v57, 0.0  ;;  %v4984_v20 = vsel %vm3448_vm6, %v9188_v6, -inf }
 0x470   :  { %v4983_v3 = vsel %vm3447_vm2, %v9171_v49, -inf  ;;  %v5746_v32 = vsel %vm42_vm0, %v4984_v20, -inf }
 0x471   :  { %v5744_v61 = vsel %vm42_vm0, %v4983_v3, -inf }
 0x472   :  { %v5745_v42 = vmax.f32 %v5743_v45, %v5744_v61  ;;  %v6913_v45 = vld [vmem:[%s11373_s4 + $0x8] sm:$0xff] }
 0x473   :  { %1208 = vperm.xlu2 %7254, %v11713_v63  }
 0x474   :  { %7257 = vset.pattern.permute.xlu1 %v7702_v11  ;;  %v5747_v0 = vmax.f32 %v5745_v42, %v5746_v32  ;;  %v6912_v42 = vld [vmem:[%s11373_s4] sm:$0xff] }
 0x47b   :  { %7256 = vset.pattern.permute.xlu2 %v7814_v37 }
 0x47c   :  { %1232 = vperm.xlu1 %7257, %v11713_v63  }
 0x47d   :  { %v1135_v26 = vpop.permute.xlu2 %1134 }
 0x47e   :  { %v1123_v24 = vpop.permute.xlu1 %1122  ;;  %vm3451_vm8 = vcmp.gt.f32.partialorder %v1135_v26, 0.0 }
 0x47f   :  { %vm3449_vm9 = vcmp.gt.f32.partialorder %v1123_v24, 0.0  ;;  %v4987_v50 = vsel %vm3451_vm8, %v9181_v18, -inf }
 0x480   :  { %v4985_v10 = vsel %vm3449_vm9, %v9202_v17, -inf  ;;  %v5752_v7 = vsel %vm42_vm0, %v4987_v50, -inf }
 0x481   :  { %v5748_v62 = vsel %vm42_vm0, %v4985_v10, -inf  ;;  %v11716_v10 = vld [vmem:[#allocation101_spill] sm:$0xff] }
 0x482   :  { %v5749_v60 = vmax.f32 %v5747_v0, %v5748_v62 }
 0x483   :  { %1226 = vperm.xlu2 %7256, %v11713_v63   ;;  %v6914_v63 = vld [vmem:[%s11373_s4 + $0x10] sm:$0xff] }
 0x484   :  { %v5751_v59 = vmax.f32 %v5749_v60, %v5750_v15  ;;  %7259 = vset.pattern.permute.xlu1 %v7829_v40  ;;  %6954 = vmatpush.msra.mxu2 %v6914_v63 }
 0x486   :  { %v5753_v57 = vmax.f32 %v5751_v59, %v5752_v7  ;;  %6955 = vmatpush.msra.mxu2 %v6913_v45 }
 0x488   :  { %v5754_v46 = vrot.slane %v5753_v57, 4  ;;  %6956 = vmatpush.msra.mxu2 %v6912_v42  ;;  %v11718_v42 = vld [vmem:[#allocation61_spill] sm:$0xff] }
 0x489   :  { %vm3460_vm9 = vcmp.gt.f32.partialorder %v11718_v42, 0.0  ;;  %v11719_v42 = vld [vmem:[#allocation153_spill] sm:$0xff] }
 0x48a   :  { %v5755_v51 = vmax.f32 %v5753_v57, %v5754_v46  ;;  %v11717_v46 = vld [vmem:[#allocation100_spill] sm:$0xff] }
 0x48b   :  { %7258 = vset.pattern.permute.xlu2 %v11688_v48  ;;  %vm3455_vm6 = vcmp.gt.f32.partialorder %v11717_v46, 0.0 }
 0x48c   :  { %v5756_v1 = vrot.slane %v5755_v51, 2  ;;  %1245 = vperm.xlu1 %7259, %v11715_v44   ;;  %v4991_v22 = vsel %vm3455_vm6, %v9171_v49, -inf }
 0x48d   :  { %v1148_v0 = vpop.permute.xlu2 %1147  ;;  %v5765_v45 = vsel %vm42_vm0, %v4991_v22, -inf }
 0x48e   :  { %v5757_v36 = vmax.f32 %v5755_v51, %v5756_v1  ;;  %v1142_v53 = vpop.permute.xlu1 %1141  ;;  %vm3453_vm1 = vcmp.gt.f32.partialorder %v1148_v0, 0.0 }
 0x48f   :  { %vm3452_vm15 = vcmp.gt.f32.partialorder %v1142_v53, 0.0  ;;  %v4989_v59 = vsel %vm3453_vm1, %v9361_v12, -inf }
 0x490   :  { %v5758_v3 = vrot.slane %v5757_v36, 1  ;;  %v4988_v7 = vsel %vm3452_vm15, %v9144_v54, -inf  ;;  %v5761_v1 = vsel %vm42_vm0, %v4989_v59, -inf }
 0x491   :  { %v5760_v51 = vsel %vm42_vm0, %v4988_v7, -inf }
 0x492   :  { %v5759_v61 = vmax.f32 %v5757_v36, %v5758_v3 }
 0x493   :  { %1239 = vperm.xlu2 %7258, %v11715_v44  }
 0x494   :  { %7261 = vset.pattern.permute.xlu1 %v7797_v34  ;;  %v9481_v20 = vsel %vm6752_vm5, %v5759_v61, %v9436_v55  ;;  %v7533_v55 = vld [vmem:[%s11372_s3] ss:$0 sm:$0xff]  ;;  %v5762_v61 = vmax.f32 %v5760_v51, %v5761_v1 }
 0x49b   :  { %7260 = vset.pattern.permute.xlu2 %v7777_v30 }
 0x49c   :  { %1263 = vperm.xlu1 %7261, %v11715_v44  }
 0x49d   :  { %v1166_v15 = vpop.permute.xlu2 %1165 }
 0x49e   :  { %v1154_v50 = vpop.permute.xlu1 %1153  ;;  %vm3456_vm7 = vcmp.gt.f32.partialorder %v1166_v15, 0.0 }
 0x49f   :  { %vm3454_vm2 = vcmp.gt.f32.partialorder %v1154_v50, 0.0 }
 0x4a0   :  { %v4990_v57 = vsel %vm3454_vm2, %v9158_v52, -inf }
 0x4a1   :  { %v5763_v36 = vsel %vm42_vm0, %v4990_v57, -inf }
 0x4a2   :  { %v5764_v63 = vmax.f32 %v5762_v61, %v5763_v36 }
 0x4a3   :  { %1257 = vperm.xlu2 %7260, %v11715_v44  }
 0x4a4   :  { %7263 = vset.pattern.permute.xlu1 %v7814_v37 }
 0x4ab   :  { %7262 = vset.pattern.permute.xlu2 %v11695_v29 }
 0x4ac   :  { %1275 = vperm.xlu1 %7263, %v11715_v44  }
 0x4ad   :  { %v1178_v60 = vpop.permute.xlu2 %1177 }
 0x4ae   :  { %v1172_v62 = vpop.permute.xlu1 %1171  ;;  %vm3458_vm1 = vcmp.gt.f32.partialorder %v1178_v60, 0.0 }
 0x4af   :  { %vm3457_vm8 = vcmp.gt.f32.partialorder %v1172_v62, 0.0  ;;  %v4994_v57 = vsel %vm3458_vm1, %v9195_v23, -inf }
 0x4b0   :  { %v4993_v53 = vsel %vm3457_vm8, %v9202_v17, -inf  ;;  %v5771_v1 = vsel %vm42_vm0, %v4994_v57, -inf }
 0x4b1   :  { %v5769_v15 = vsel %vm42_vm0, %v4993_v53, -inf }
 0x4b3   :  { %1269 = vperm.xlu2 %7262, %v11715_v44  }
 0x4b4   :  { %v6880_v32 = vpop.f32.mrf.mxu1  ;;  %7265 = vset.pattern.permute.xlu1 %v7829_v40 }
 0x4b5   :  { %v6881_v26 = vadd.f32 %v7533_v55, %v6880_v32  ;;  %v4992_v55 = vsel %vm3456_vm7, %v9188_v6, -inf }
 0x4b6   :  { %v5767_v0 = vsel %vm42_vm0, %v4992_v55, -inf }
 0x4b7   :  { %v6904_v24 = vmax.f32 %v6881_v26, 0.0  ;;  %v5766_v26 = vmax.f32 %v5764_v63, %v5765_v45 }
 0x4b9   :  { %7090 = vmatmul.msk.f32.vlgmr.msra.gmra.mxu2 %vm11482_vm14, %v6904_v24  ;;  %v4996_v24 = vsel %vm3460_vm9, %v9144_v54, -inf  ;;  %v5768_v59 = vmax.f32 %v5766_v26, %v5767_v0  ;;  %vm3465_vm9 = vcmp.gt.f32.partialorder %v11719_v42, 0.0 }
 0x4ba   :  { %v5781_v7 = vsel %vm42_vm0, %v4996_v24, -inf  ;;  %v5001_v53 = vsel %vm3465_vm9, %v9202_v17, -inf }
 0x4bb   :  { %7264 = vset.pattern.permute.xlu2 %v11688_v48  ;;  %v5770_v60 = vmax.f32 %v5768_v59, %v5769_v15 }
 0x4bc   :  { %1294 = vperm.xlu1 %7265, %v11716_v10  }
 0x4bd   :  { %v1197_v3 = vpop.permute.xlu2 %1196  ;;  %v5772_v63 = vmax.f32 %v5770_v60, %v5771_v1 }
 0x4be   :  { %v1184_v44 = vpop.permute.xlu1 %1183  ;;  %vm3461_vm15 = vcmp.gt.f32.partialorder %v1197_v3, 0.0 }
 0x4bf   :  { %v4997_v50 = vsel %vm3461_vm15, %v9361_v12, -inf  ;;  %vm3459_vm6 = vcmp.gt.f32.partialorder %v1184_v44, 0.0 }
 0x4c0   :  { %v5782_v46 = vsel %vm42_vm0, %v4997_v50, -inf  ;;  %v4995_v51 = vsel %vm3459_vm6, %v9181_v18, -inf }
 0x4c1   :  { %v5783_v44 = vmax.f32 %v5781_v7, %v5782_v46  ;;  %v5773_v22 = vsel %vm42_vm0, %v4995_v51, -inf  ;;  %v11720_v7 = vld [vmem:[#allocation21_spill] sm:$0xff] }
 0x4c2   :  { %v5774_v55 = vmax.f32 %v5772_v63, %v5773_v22 }
 0x4c3   :  { %1288 = vperm.xlu2 %7264, %v11716_v10  }
 0x4c4   :  { %7267 = vset.pattern.permute.xlu1 %v7777_v30 }
 0x4cb   :  { %7266 = vset.pattern.permute.xlu2 %v11704_v58 }
 0x4cc   :  { %1306 = vperm.xlu1 %7267, %v11716_v10  }
 0x4cd   :  { %v1209_v62 = vpop.permute.xlu2 %1208 }
 0x4ce   :  { %v1203_v32 = vpop.permute.xlu1 %1202  ;;  %vm3463_vm7 = vcmp.gt.f32.partialorder %v1209_v62, 0.0 }
 0x4cf   :  { %vm3462_vm2 = vcmp.gt.f32.partialorder %v1203_v32, 0.0  ;;  %v4999_v61 = vsel %vm3463_vm7, %v9171_v49, -inf  ;;  %v5775_v49 = vrot.slane %v5774_v55, 4 }
 0x4d0   :  { %v4998_v54 = vsel %vm3462_vm2, %v9158_v52, -inf  ;;  %v5786_v18 = vsel %vm42_vm0, %v4999_v61, -inf }
 0x4d1   :  { %v5784_v3 = vsel %vm42_vm0, %v4998_v54, -inf  ;;  %v5776_v15 = vmax.f32 %v5774_v55, %v5775_v49  ;;  %v9548_v54 = vld [vmem:[%s11369_s0 + $0x38] sm:$0xff] }
 0x4d2   :  { %v5785_v45 = vmax.f32 %v5783_v44, %v5784_v3 }
 0x4d3   :  { %1300 = vperm.xlu2 %7266, %v11716_v10   ;;  %v5777_v46 = vrot.slane %v5776_v15, 2 }
 0x4d4   :  { %7269 = vset.pattern.permute.xlu1 %v7814_v37  ;;  %v5787_v24 = vmax.f32 %v5785_v45, %v5786_v18  ;;  %v11721_v18 = vld [vmem:[#allocation74_spill] sm:$0xff] }
 0x4d5   :  { %v5778_v1 = vmax.f32 %v5776_v15, %v5777_v46 }
 0x4d7   :  { %v5779_v3 = vrot.slane %v5778_v1, 1 }
 0x4d9   :  { %v5780_v63 = vmax.f32 %v5778_v1, %v5779_v3  ;;  %v9601_v1 = vld [vmem:[%s11369_s0 + $0x20] sm:$0xff] }
 0x4db   :  { %7268 = vset.pattern.permute.xlu2 %v11695_v29  ;;  %v6772_v42 = vsel %vm6754_vm10, %v5780_v63, %v9481_v20  ;;  %v9609_v63 = vld [vmem:[%s11369_s0 + $0x28] sm:$0xff] }
 0x4dc   :  { %1324 = vperm.xlu1 %7269, %v11716_v10  }
 0x4dd   :  { %v1227_v32 = vpop.permute.xlu2 %1226 }
 0x4de   :  { %v1215_v36 = vpop.permute.xlu1 %1214  ;;  %vm3466_vm15 = vcmp.gt.f32.partialorder %v1227_v32, 0.0 }
 0x4df   :  { %vm3464_vm8 = vcmp.gt.f32.partialorder %v1215_v36, 0.0  ;;  %v5002_v50 = vsel %vm3466_vm15, %v9195_v23, -inf }
 0x4e0   :  { %v5000_v52 = vsel %vm3464_vm8, %v9188_v6, -inf  ;;  %v5790_v6 = vsel %vm42_vm0, %v5001_v53, -inf  ;;  %v5792_v59 = vsel %vm42_vm0, %v5002_v50, -inf }
 0x4e1   :  { %v5788_v26 = vsel %vm42_vm0, %v5000_v52, -inf }
 0x4e2   :  { %v5789_v0 = vmax.f32 %v5787_v24, %v5788_v26  ;;  %v9574_v24 = vld [vmem:[%s11369_s0] sm:$0xff] }
 0x4e3   :  { %1318 = vperm.xlu2 %7268, %v11716_v10  }
 0x4e4   :  { %7271 = vset.pattern.permute.xlu1 %v11688_v48  ;;  %v5791_v62 = vmax.f32 %v5789_v0, %v5790_v6  ;;  %v11722_v6 = vld [vmem:[#allocation76_spill] sm:$0xff] }
 0x4e5   :  { %vm3470_vm7 = vcmp.gt.f32.partialorder %v11722_v6, 0.0 }
 0x4e6   :  { %v5793_v17 = vmax.f32 %v5791_v62, %v5792_v59 }
 0x4eb   :  { %7270 = vset.pattern.permute.xlu2 %v7702_v11 }
 0x4ec   :  { %1337 = vperm.xlu1 %7271, %v11720_v7  }
 0x4ee   :  { %v1233_v57 = vpop.permute.xlu1 %1232 }
 0x4ef   :  { %vm3467_vm1 = vcmp.gt.f32.partialorder %v1233_v57, 0.0 }
 0x4f0   :  { %v5003_v60 = vsel %vm3467_vm1, %v9548_v54, -inf }
 0x4f1   :  { %v5794_v23 = vsel %vm42_vm0, %v5003_v60, -inf  ;;  %v9593_v60 = vld [vmem:[%s11369_s0 + $0x18] sm:$0xff] }
 0x4f2   :  { %v5795_v51 = vmax.f32 %v5793_v17, %v5794_v23 }
 0x4f3   :  { %1330 = vperm.xlu2 %7270, %v11716_v10   ;;  %v1240_v10 = vpop.permute.xlu2 %1239 }
 0x4f4   :  { %v5796_v44 = vrot.slane %v5795_v51, 4  ;;  %7273 = vset.pattern.permute.xlu1 %v7777_v30  ;;  %vm3468_vm2 = vcmp.gt.f32.partialorder %v1240_v10, 0.0 }
 0x4f5   :  { %v5004_v49 = vsel %vm3468_vm2, %v9574_v24, -inf }
 0x4f6   :  { %v5797_v36 = vmax.f32 %v5795_v51, %v5796_v44  ;;  %v5802_v50 = vsel %vm42_vm0, %v5004_v49, -inf }
 0x4f8   :  { %v5798_v22 = vrot.slane %v5797_v36, 2 }
 0x4fa   :  { %v5799_v61 = vmax.f32 %v5797_v36, %v5798_v22 }
 0x4fb   :  { %7272 = vset.pattern.permute.xlu2 %v11704_v58 }
 0x4fc   :  { %v5800_v45 = vrot.slane %v5799_v61, 1  ;;  %1355 = vperm.xlu1 %7273, %v11720_v7  }
 0x4fd   :  { %v1258_v32 = vpop.permute.xlu2 %1257 }
 0x4fe   :  { %v5801_v52 = vmax.f32 %v5799_v61, %v5800_v45  ;;  %v1246_v20 = vpop.permute.xlu1 %1245  ;;  %vm3471_vm8 = vcmp.gt.f32.partialorder %v1258_v32, 0.0 }
 0x4ff   :  { %vm3469_vm6 = vcmp.gt.f32.partialorder %v1246_v20, 0.0  ;;  %v5007_v23 = vsel %vm3471_vm8, %v9593_v60, -inf  ;;  %v9616_v20 = vld [vmem:[%s11369_s0 + $0x30] sm:$0xff] }
 0x500   :  { %v9559_v55 = vsel %vm6756_vm11, %v5801_v52, %v6772_v42  ;;  %v5005_v0 = vsel %vm3469_vm6, %v9361_v12, -inf  ;;  %v5807_v36 = vsel %vm42_vm0, %v5007_v23, -inf  ;;  %v11723_v42 = vld [vmem:[#allocation24_spill] sm:$0xff] }
 0x501   :  { %v5803_v15 = vsel %vm42_vm0, %v5005_v0, -inf }
 0x502   :  { %v5804_v46 = vmax.f32 %v5802_v50, %v5803_v15 }
 0x503   :  { %1349 = vperm.xlu2 %7272, %v11720_v7  }
 0x504   :  { %7275 = vset.pattern.permute.xlu1 %v11695_v29 }
 0x50b   :  { %7274 = vset.pattern.permute.xlu2 %v7797_v34 }
 0x50c   :  { %1367 = vperm.xlu1 %7275, %v11720_v7  }
 0x50d   :  { %v1270_v53 = vpop.permute.xlu2 %1269 }
 0x50e   :  { %v1264_v26 = vpop.permute.xlu1 %1263  ;;  %vm3473_vm15 = vcmp.gt.f32.partialorder %v1270_v53, 0.0 }
 0x50f   :  { %vm3472_vm9 = vcmp.gt.f32.partialorder %v1264_v26, 0.0  ;;  %v5009_v45 = vsel %vm3473_vm15, %v9609_v63, -inf }
 0x510   :  { %v5008_v44 = vsel %vm3472_vm9, %v9601_v1, -inf  ;;  %v5811_v26 = vsel %vm42_vm0, %v5009_v45, -inf }
 0x511   :  { %v5809_v22 = vsel %vm42_vm0, %v5008_v44, -inf  ;;  %v11724_v44 = vld [vmem:[#allocation135_spill] sm:$0xff] }
 0x512   :  { %vm3480_vm15 = vcmp.gt.f32.partialorder %v11724_v44, 0.0 }
 0x513   :  { %1361 = vperm.xlu2 %7274, %v11720_v7   ;;  %v5016_v45 = vsel %vm3480_vm15, %v9601_v1, -inf }
 0x514   :  { %7277 = vset.pattern.permute.xlu1 %v11688_v48 }
 0x51b   :  { %7276 = vset.pattern.permute.xlu2 %v7702_v11 }
 0x51c   :  { %1386 = vperm.xlu1 %7277, %v11721_v18  }
 0x51d   :  { %v1289_v57 = vpop.permute.xlu2 %1288 }
 0x51e   :  { %v1276_v62 = vpop.permute.xlu1 %1275  ;;  %vm3476_vm2 = vcmp.gt.f32.partialorder %v1289_v57, 0.0 }
 0x51f   :  { %vm3474_vm1 = vcmp.gt.f32.partialorder %v1276_v62, 0.0  ;;  %v5012_v53 = vsel %vm3476_vm2, %v9574_v24, -inf }
 0x520   :  { %v5010_v32 = vsel %vm3474_vm1, %v9616_v20, -inf  ;;  %v5823_v62 = vsel %vm42_vm0, %v5012_v53, -inf }
 0x521   :  { %v5813_v6 = vsel %vm42_vm0, %v5010_v32, -inf }
 0x523   :  { %1379 = vperm.xlu2 %7276, %v11720_v7   ;;  %v9586_v7 = vld [vmem:[%s11369_s0 + $0x10] sm:$0xff] }
 0x524   :  { %7279 = vset.pattern.permute.xlu1 %v11704_v58  ;;  %v5006_v59 = vsel %vm3470_vm7, %v9586_v7, -inf  ;;  %vm3475_vm7 = vcmp.gt.f32.partialorder %v11723_v42, 0.0 }
 0x525   :  { %v5805_v17 = vsel %vm42_vm0, %v5006_v59, -inf  ;;  %v5011_v0 = vsel %vm3475_vm7, %v9548_v54, -inf }
 0x526   :  { %v5806_v51 = vmax.f32 %v5804_v46, %v5805_v17  ;;  %v5815_v17 = vsel %vm42_vm0, %v5011_v0, -inf }
 0x528   :  { %v5808_v61 = vmax.f32 %v5806_v51, %v5807_v36 }
 0x52a   :  { %v5810_v10 = vmax.f32 %v5808_v61, %v5809_v22 }
 0x52b   :  { %7278 = vset.pattern.permute.xlu2 %v7829_v40 }
 0x52c   :  { %1398 = vperm.xlu1 %7279, %v11721_v18   ;;  %v5812_v15 = vmax.f32 %v5810_v10, %v5811_v26  ;;  %v5830_v10 = vsel %vm42_vm0, %v5016_v45, -inf }
 0x52d   :  { %v1301_v52 = vpop.permute.xlu2 %1300 }
 0x52e   :  { %v1295_v3 = vpop.permute.xlu1 %1294  ;;  %vm3478_vm8 = vcmp.gt.f32.partialorder %v1301_v52, 0.0  ;;  %v5814_v46 = vmax.f32 %v5812_v15, %v5813_v6 }
 0x52f   :  { %vm3477_vm6 = vcmp.gt.f32.partialorder %v1295_v3, 0.0  ;;  %v5014_v57 = vsel %vm3478_vm8, %v9586_v7, -inf }
 0x530   :  { %v5013_v49 = vsel %vm3477_vm6, %v9361_v12, -inf  ;;  %v5826_v36 = vsel %vm42_vm0, %v5014_v57, -inf  ;;  %v5816_v22 = vmax.f32 %v5814_v46, %v5815_v17 }
 0x531   :  { %v5824_v59 = vsel %vm42_vm0, %v5013_v49, -inf }
 0x532   :  { %v5825_v23 = vmax.f32 %v5823_v62, %v5824_v59  ;;  %v5817_v32 = vrot.slane %v5816_v22, 4 }
 0x533   :  { %1392 = vperm.xlu2 %7278, %v11721_v18  }
 0x534   :  { %7281 = vset.pattern.permute.xlu1 %v11695_v29  ;;  %v5827_v52 = vmax.f32 %v5825_v23, %v5826_v36  ;;  %v5818_v49 = vmax.f32 %v5816_v22, %v5817_v32 }
 0x536   :  { %v5819_v57 = vrot.slane %v5818_v49, 2 }
 0x538   :  { %v5820_v44 = vmax.f32 %v5818_v49, %v5819_v57  ;;  %v11728_v57 = vld [vmem:[#allocation103_spill] sm:$0xff] }
 0x53a   :  { %v5821_v22 = vrot.slane %v5820_v44, 1 }
 0x53b   :  { %7280 = vset.pattern.permute.xlu2 %v7797_v34 }
 0x53c   :  { %1416 = vperm.xlu1 %7281, %v11721_v18  }
 0x53d   :  { %v1319_v3 = vpop.permute.xlu2 %1318 }
 0x53e   :  { %v1307_v50 = vpop.permute.xlu1 %1306  ;;  %vm3481_vm1 = vcmp.gt.f32.partialorder %v1319_v3, 0.0 }
 0x53f   :  { %vm3479_vm9 = vcmp.gt.f32.partialorder %v1307_v50, 0.0  ;;  %v5017_v26 = vsel %vm3481_vm1, %v9609_v63, -inf }
 0x540   :  { %v5015_v51 = vsel %vm3479_vm9, %v9593_v60, -inf  ;;  %v5832_v0 = vsel %vm42_vm0, %v5017_v26, -inf }
 0x541   :  { %v5828_v61 = vsel %vm42_vm0, %v5015_v51, -inf }
 0x542   :  { %v5829_v42 = vmax.f32 %v5827_v52, %v5828_v61  ;;  %v11725_v52 = vld [vmem:[#allocation42_spill] sm:$0xff] }
 0x543   :  { %1410 = vperm.xlu2 %7280, %v11721_v18  }
 0x544   :  { %7283 = vset.pattern.permute.xlu1 %v7702_v11  ;;  %v5831_v53 = vmax.f32 %v5829_v42, %v5830_v10  ;;  %v5822_v42 = vmax.f32 %v5820_v44, %v5821_v22 }
 0x546   :  { %v5833_v62 = vmax.f32 %v5831_v53, %v5832_v0  ;;  %v6774_v26 = vsel %vm6758_vm12, %v5822_v42, %v9559_v55  ;;  %v11727_v55 = vld [vmem:[#allocation7_spill] sm:$0xff] }
 0x54b   :  { %7282 = vset.pattern.permute.xlu2 %v7814_v37 }
 0x54c   :  { %1428 = vperm.xlu1 %7283, %v11721_v18  }
 0x54d   :  { %v1331_v6 = vpop.permute.xlu2 %1330 }
 0x54e   :  { %v1325_v50 = vpop.permute.xlu1 %1324  ;;  %vm3483_vm2 = vcmp.gt.f32.partialorder %v1331_v6, 0.0 }
 0x54f   :  { %vm3482_vm6 = vcmp.gt.f32.partialorder %v1325_v50, 0.0  ;;  %v5019_v15 = vsel %vm3483_vm2, %v9548_v54, -inf }
 0x550   :  { %v5018_v59 = vsel %vm3482_vm6, %v9616_v20, -inf  ;;  %v5836_v17 = vsel %vm42_vm0, %v5019_v15, -inf }
 0x551   :  { %v5834_v46 = vsel %vm42_vm0, %v5018_v59, -inf }
 0x552   :  { %v5835_v23 = vmax.f32 %v5833_v62, %v5834_v46 }
 0x553   :  { %1422 = vperm.xlu2 %7282, %v11721_v18  }
 0x554   :  { %v5837_v51 = vmax.f32 %v5835_v23, %v5836_v17  ;;  %7285 = vset.pattern.permute.xlu1 %v11704_v58 }
 0x556   :  { %v5838_v36 = vrot.slane %v5837_v51, 4 }
 0x558   :  { %v5839_v3 = vmax.f32 %v5837_v51, %v5838_v36  ;;  %v11729_v51 = vld [vmem:[#allocation43_spill] sm:$0xff] }
 0x559   :  { %vm3485_vm7 = vcmp.gt.f32.partialorder %v11729_v51, 0.0 }
 0x55a   :  { %v5840_v61 = vrot.slane %v5839_v3, 2  ;;  %v5021_v36 = vsel %vm3485_vm7, %v9361_v12, -inf }
 0x55b   :  { %7284 = vset.pattern.permute.xlu2 %v7829_v40 }
 0x55c   :  { %v5841_v45 = vmax.f32 %v5839_v3, %v5840_v61  ;;  %1447 = vperm.xlu1 %7285, %v11725_v52  }
 0x55d   :  { %v1350_v49 = vpop.permute.xlu2 %1349 }
 0x55e   :  { %v5842_v10 = vrot.slane %v5841_v45, 1  ;;  %v1338_v53 = vpop.permute.xlu1 %1337  ;;  %vm3486_vm2 = vcmp.gt.f32.partialorder %v1350_v49, 0.0 }
 0x55f   :  { %vm3484_vm8 = vcmp.gt.f32.partialorder %v1338_v53, 0.0 }
 0x560   :  { %v5843_v32 = vmax.f32 %v5841_v45, %v5842_v10  ;;  %v5020_v3 = vsel %vm3484_vm8, %v9574_v24, -inf  ;;  %v5845_v45 = vsel %vm42_vm0, %v5021_v36, -inf }
 0x561   :  { %v5844_v10 = vsel %vm42_vm0, %v5020_v3, -inf }
 0x562   :  { %v9653_v18 = vsel %vm11483_vm13, %v5843_v32, %v6774_v26 }
 0x563   :  { %11726 = vst [vmem:[#allocation121_spill] sm:$0xff] %v9653_v18  ;;  %1441 = vperm.xlu2 %7284, %v11725_v52   ;;  %v11771_v18 = vld [vmem:[#allocation33_spill] sm:$0xff] }
 0x564   :  { %7287 = vset.pattern.permute.xlu1 %v7797_v34 }
 0x56b   :  { %7286 = vset.pattern.permute.xlu2 %v7777_v30 }
 0x56c   :  { %1459 = vperm.xlu1 %7287, %v11725_v52  }
 0x56d   :  { %v1362_v6 = vpop.permute.xlu2 %1361 }
 0x56e   :  { %v1356_v0 = vpop.permute.xlu1 %1355  ;;  %vm3488_vm8 = vcmp.gt.f32.partialorder %v1362_v6, 0.0 }
 0x56f   :  { %vm3487_vm7 = vcmp.gt.f32.partialorder %v1356_v0, 0.0  ;;  %v11731_v0 = vld [vmem:[#allocation62_spill] sm:$0xff] }
 0x573   :  { %1453 = vperm.xlu2 %7286, %v11725_v52  }
 0x574   :  { %7289 = vset.pattern.permute.xlu1 %v7702_v11 }
 0x57b   :  { %7288 = vset.pattern.permute.xlu2 %v7814_v37 }
 0x57c   :  { %1477 = vperm.xlu1 %7289, %v11725_v52  }
 0x57d   :  { %v9675_v15 = vpop.permute.xlu2 %1379 }
 0x57e   :  { %v1368_v50 = vpop.permute.xlu1 %1367 }
 0x583   :  { %1471 = vperm.xlu2 %7288, %v11725_v52   ;;  %v11730_v52 = vld [vmem:[#allocation102_spill] sm:$0xff] }
 0x584   :  { %7291 = vset.pattern.permute.xlu1 %v7829_v40  ;;  %vm3495_vm6 = vcmp.gt.f32.partialorder %v11730_v52, 0.0  ;;  %v5024_v52 = vsel %vm3488_vm8, %v9601_v1, -inf }
 0x58b   :  { %7290 = vset.pattern.permute.xlu2 %v11688_v48 }
 0x58c   :  { %1490 = vperm.xlu1 %7291, %v11727_v55  }
 0x58d   :  { %v1393_v59 = vpop.permute.xlu2 %1392 }
 0x58e   :  { %v1387_v62 = vpop.permute.xlu1 %1386  ;;  %vm3493_vm15 = vcmp.gt.f32.partialorder %v1393_v59, 0.0  ;;  %v5846_v59 = vmax.f32 %v5844_v10, %v5845_v45 }
 0x58f   :  { %vm3492_vm9 = vcmp.gt.f32.partialorder %v1387_v62, 0.0  ;;  %v5029_v61 = vsel %vm3493_vm15, %v9361_v12, -inf  ;;  %v5022_v12 = vsel %vm3486_vm2, %v9586_v7, -inf  ;;  %v5031_v62 = vsel %vm3495_vm6, %v9593_v60, -inf }
 0x590   :  { %v5028_v22 = vsel %vm3492_vm9, %v9574_v24, -inf  ;;  %v5866_v26 = vsel %vm42_vm0, %v5029_v61, -inf  ;;  %v5847_v36 = vsel %vm42_vm0, %v5022_v12, -inf  ;;  %vm3500_vm15 = vcmp.gt.f32.partialorder %v11731_v0, 0.0 }
 0x591   :  { %v5865_v32 = vsel %vm42_vm0, %v5028_v22, -inf  ;;  %v5870_v22 = vsel %vm42_vm0, %v5031_v62, -inf  ;;  %v5848_v45 = vmax.f32 %v5846_v59, %v5847_v36  ;;  %v5036_v6 = vsel %vm3500_vm15, %v9574_v24, -inf }
 0x592   :  { %v5867_v51 = vmax.f32 %v5865_v32, %v5866_v26  ;;  %vm3491_vm15 = vcmp.gt.f32.partialorder %v9675_v15, 0.0 }
 0x593   :  { %1484 = vperm.xlu2 %7290, %v11727_v55  }
 0x594   :  { %7293 = vset.pattern.permute.xlu1 %v7797_v34 }
 0x59b   :  { %7292 = vset.pattern.permute.xlu2 %v7777_v30 }
 0x59c   :  { %1508 = vperm.xlu1 %7293, %v11727_v55  }
 0x59d   :  { %v1411_v17 = vpop.permute.xlu2 %1410 }
 0x59e   :  { %v1399_v46 = vpop.permute.xlu1 %1398  ;;  %vm3496_vm9 = vcmp.gt.f32.partialorder %v1411_v17, 0.0 }
 0x59f   :  { %vm3494_vm1 = vcmp.gt.f32.partialorder %v1399_v46, 0.0  ;;  %v5023_v46 = vsel %vm3487_vm7, %v9593_v60, -inf  ;;  %vm3490_vm7 = vcmp.gt.f32.partialorder %v9250_v41, 0.0  ;;  %v5886_v41 = vsel %vm42_vm0, %v5036_v6, -inf }
 0x5a0   :  { %v5030_v42 = vsel %vm3494_vm1, %v9586_v7, -inf  ;;  %v5849_v61 = vsel %vm42_vm0, %v5023_v46, -inf  ;;  %vm3489_vm1 = vcmp.gt.f32.partialorder %v1368_v50, 0.0  ;;  %v5026_v62 = vsel %vm3490_vm7, %v9616_v20, -inf }
 0x5a1   :  { %v5868_v53 = vsel %vm42_vm0, %v5030_v42, -inf  ;;  %v5032_v42 = vsel %vm3496_vm9, %v9601_v1, -inf  ;;  %v5850_v10 = vmax.f32 %v5848_v45, %v5849_v61  ;;  %v5025_v32 = vsel %vm3489_vm1, %v9609_v63, -inf }
 0x5a2   :  { %v5869_v3 = vmax.f32 %v5867_v51, %v5868_v53  ;;  %v5872_v12 = vsel %vm42_vm0, %v5032_v42, -inf  ;;  %v9717_v53 = vld [vmem:[%s11369_s0 + $0x8] sm:$0xff]  ;;  %v5853_v59 = vsel %vm42_vm0, %v5025_v32, -inf }
 0x5a3   :  { %1502 = vperm.xlu2 %7292, %v11727_v55  }
 0x5a4   :  { %7295 = vset.pattern.permute.xlu1 %v7814_v37  ;;  %v5871_v26 = vmax.f32 %v5869_v3, %v5870_v22 }
 0x5ab   :  { %7294 = vset.pattern.permute.xlu2 %v11695_v29 }
 0x5ac   :  { %1520 = vperm.xlu1 %7295, %v11727_v55  }
 0x5ad   :  { %v1423_v44 = vpop.permute.xlu2 %1422 }
 0x5ae   :  { %v1417_v23 = vpop.permute.xlu1 %1416  ;;  %vm3498_vm14 = vcmp.gt.f32.partialorder %v1423_v44, 0.0  ;;  %v5873_v44 = vmax.f32 %v5871_v26, %v5872_v12 }
 0x5af   :  { %vm3497_vm2 = vcmp.gt.f32.partialorder %v1417_v23, 0.0  ;;  %v5851_v23 = vsel %vm42_vm0, %v5024_v52, -inf  ;;  %v5034_v0 = vsel %vm3498_vm14, %v9616_v20, -inf }
 0x5b0   :  { %v5033_v50 = vsel %vm3497_vm2, %v9609_v63, -inf  ;;  %v5852_v36 = vmax.f32 %v5850_v10, %v5851_v23  ;;  %v5876_v42 = vsel %vm42_vm0, %v5034_v0, -inf  ;;  %v5027_v10 = vsel %vm3491_vm15, %v9548_v54, -inf }
 0x5b1   :  { %v5874_v46 = vsel %vm42_vm0, %v5033_v50, -inf  ;;  %v5857_v12 = vsel %vm42_vm0, %v5027_v10, -inf }
 0x5b2   :  { %v5854_v61 = vmax.f32 %v5852_v36, %v5853_v59  ;;  %v5875_v45 = vmax.f32 %v5873_v44, %v5874_v46  ;;  %v11732_v59 = vld [vmem:[#allocation70_spill] sm:$0xff] }
 0x5b3   :  { %1514 = vperm.xlu2 %7294, %v11727_v55   ;;  %vm3505_vm2 = vcmp.gt.f32.partialorder %v11732_v59, 0.0 }
 0x5b4   :  { %7297 = vset.pattern.permute.xlu1 %v7829_v40  ;;  %v5877_v23 = vmax.f32 %v5875_v45, %v5876_v42  ;;  %v5041_v0 = vsel %vm3505_vm2, %v9609_v63, -inf }
 0x5b5   :  { %v5895_v45 = vsel %vm42_vm0, %v5041_v0, -inf }
 0x5bb   :  { %7296 = vset.pattern.permute.xlu2 %v11688_v48 }
 0x5bc   :  { %1539 = vperm.xlu1 %7297, %v11728_v57  }
 0x5bd   :  { %v1442_v49 = vpop.permute.xlu2 %1441 }
 0x5be   :  { %v1429_v55 = vpop.permute.xlu1 %1428  ;;  %vm3501_vm6 = vcmp.gt.f32.partialorder %v1442_v49, 0.0 }
 0x5bf   :  { %v5037_v49 = vsel %vm3501_vm6, %v9717_v53, -inf  ;;  %vm3499_vm9 = vcmp.gt.f32.partialorder %v1429_v55, 0.0  ;;  %v5855_v55 = vsel %vm42_vm0, %v5026_v62, -inf }
 0x5c0   :  { %v5887_v3 = vsel %vm42_vm0, %v5037_v49, -inf  ;;  %v5035_v52 = vsel %vm3499_vm9, %v9548_v54, -inf  ;;  %v5856_v50 = vmax.f32 %v5854_v61, %v5855_v55 }
 0x5c1   :  { %v5888_v6 = vmax.f32 %v5886_v41, %v5887_v3  ;;  %v5878_v15 = vsel %vm42_vm0, %v5035_v52, -inf }
 0x5c2   :  { %v5879_v41 = vmax.f32 %v5877_v23, %v5878_v15  ;;  %v5858_v36 = vmax.f32 %v5856_v50, %v5857_v12 }
 0x5c3   :  { %1533 = vperm.xlu2 %7296, %v11728_v57  }
 0x5c4   :  { %7299 = vset.pattern.permute.xlu1 %v7777_v30  ;;  %v5859_v52 = vrot.slane %v5858_v36, 4 }
 0x5c6   :  { %v5860_v10 = vmax.f32 %v5858_v36, %v5859_v52 }
 0x5c8   :  { %v5861_v12 = vrot.slane %v5860_v10, 2 }
 0x5cb   :  { %7298 = vset.pattern.permute.xlu2 %v11704_v58 }
 0x5cc   :  { %1551 = vperm.xlu1 %7299, %v11728_v57  }
 0x5cd   :  { %v1454_v51 = vpop.permute.xlu2 %1453 }
 0x5ce   :  { %v1448_v17 = vpop.permute.xlu1 %1447  ;;  %vm3503_vm1 = vcmp.gt.f32.partialorder %v1454_v51, 0.0 }
 0x5cf   :  { %vm3502_vm8 = vcmp.gt.f32.partialorder %v1448_v17, 0.0  ;;  %v5039_v26 = vsel %vm3503_vm1, %v9593_v60, -inf }
 0x5d0   :  { %v5038_v22 = vsel %vm3502_vm8, %v9586_v7, -inf  ;;  %v5891_v46 = vsel %vm42_vm0, %v5039_v26, -inf }
 0x5d1   :  { %v5889_v32 = vsel %vm42_vm0, %v5038_v22, -inf  ;;  %v5880_v22 = vrot.slane %v5879_v41, 4 }
 0x5d2   :  { %v5890_v49 = vmax.f32 %v5888_v6, %v5889_v32 }
 0x5d3   :  { %1545 = vperm.xlu2 %7298, %v11728_v57   ;;  %v5881_v42 = vmax.f32 %v5879_v41, %v5880_v22 }
 0x5d4   :  { %7301 = vset.pattern.permute.xlu1 %v7814_v37  ;;  %v5892_v3 = vmax.f32 %v5890_v49, %v5891_v46  ;;  %v5862_v46 = vmax.f32 %v5860_v10, %v5861_v12  ;;  %v11735_v12 = vld [vmem:[#allocation79_spill] sm:$0xff] }
 0x5d5   :  { %v5882_v26 = vrot.slane %v5881_v42, 2  ;;  %vm3510_vm15 = vcmp.gt.f32.partialorder %v11735_v12, 0.0 }
 0x5d6   :  { %v5863_v0 = vrot.slane %v5862_v46, 1 }
 0x5d7   :  { %v5883_v59 = vmax.f32 %v5881_v42, %v5882_v26 }
 0x5d9   :  { %v5884_v36 = vrot.slane %v5883_v59, 1 }
 0x5db   :  { %7300 = vset.pattern.permute.xlu2 %v11695_v29  ;;  %v5885_v22 = vmax.f32 %v5883_v59, %v5884_v36  ;;  %v5046_v59 = vsel %vm3510_vm15, %v9586_v7, -inf }
 0x5dc   :  { %1569 = vperm.xlu1 %7301, %v11728_v57  }
 0x5dd   :  { %v1472_v51 = vpop.permute.xlu2 %1471 }
 0x5de   :  { %v1460_v17 = vpop.permute.xlu1 %1459  ;;  %vm3506_vm6 = vcmp.gt.f32.partialorder %v1472_v51, 0.0 }
 0x5df   :  { %vm3504_vm14 = vcmp.gt.f32.partialorder %v1460_v17, 0.0  ;;  %v5042_v55 = vsel %vm3506_vm6, %v9616_v20, -inf  ;;  %v11733_v17 = vld [vmem:[#allocation23_spill] sm:$0xff] }
 0x5e0   :  { %v5040_v62 = vsel %vm3504_vm14, %v9601_v1, -inf  ;;  %v5897_v32 = vsel %vm42_vm0, %v5042_v55, -inf }
 0x5e1   :  { %v5893_v44 = vsel %vm42_vm0, %v5040_v62, -inf }
 0x5e2   :  { %v5894_v61 = vmax.f32 %v5892_v3, %v5893_v44 }
 0x5e3   :  { %1563 = vperm.xlu2 %7300, %v11728_v57  }
 0x5e4   :  { %7303 = vset.pattern.permute.xlu1 %v11688_v48  ;;  %v5896_v6 = vmax.f32 %v5894_v61, %v5895_v45  ;;  %v5864_v45 = vmax.f32 %v5862_v46, %v5863_v0 }
 0x5e6   :  { %v5898_v50 = vmax.f32 %v5896_v6, %v5897_v32  ;;  %v6776_v55 = vsel %vm6748_vm3, %v5885_v22, %v5864_v45  ;;  %v11734_v6 = vld [vmem:[#allocation77_spill] sm:$0xff] }
 0x5eb   :  { %7302 = vset.pattern.permute.xlu2 %v7702_v11 }
 0x5ec   :  { %1582 = vperm.xlu1 %7303, %v11733_v17  }
 0x5ed   :  { %v1485_v42 = vpop.permute.xlu2 %1484 }
 0x5ee   :  { %v1478_v15 = vpop.permute.xlu1 %1477  ;;  %vm3508_vm8 = vcmp.gt.f32.partialorder %v1485_v42, 0.0  ;;  %v11736_v42 = vld [vmem:[#allocation26_spill] sm:$0xff] }
 0x5ef   :  { %vm3507_vm7 = vcmp.gt.f32.partialorder %v1478_v15, 0.0 }
 0x5f0   :  { %v5043_v23 = vsel %vm3507_vm7, %v9548_v54, -inf }
 0x5f1   :  { %v5899_v49 = vsel %vm42_vm0, %v5043_v23, -inf }
 0x5f2   :  { %v5900_v62 = vmax.f32 %v5898_v50, %v5899_v49  ;;  %v5044_v50 = vsel %vm3508_vm8, %v9574_v24, -inf }
 0x5f3   :  { %1575 = vperm.xlu2 %7302, %v11728_v57   ;;  %v5907_v49 = vsel %vm42_vm0, %v5044_v50, -inf }
 0x5f4   :  { %v5901_v41 = vrot.slane %v5900_v62, 4  ;;  %7305 = vset.pattern.permute.xlu1 %v7777_v30 }
 0x5f6   :  { %v5902_v51 = vmax.f32 %v5900_v62, %v5901_v41 }
 0x5f8   :  { %v5903_v44 = vrot.slane %v5902_v51, 2 }
 0x5fa   :  { %v5904_v3 = vmax.f32 %v5902_v51, %v5903_v44  ;;  %v5910_v51 = vsel %vm42_vm0, %v5046_v59, -inf }
 0x5fb   :  { %7304 = vset.pattern.permute.xlu2 %v11704_v58 }
 0x5fc   :  { %v5905_v61 = vrot.slane %v5904_v3, 1  ;;  %1600 = vperm.xlu1 %7305, %v11733_v17  }
 0x5fd   :  { %v1503_v32 = vpop.permute.xlu2 %1502 }
 0x5fe   :  { %v5906_v52 = vmax.f32 %v5904_v3, %v5905_v61  ;;  %v1491_v10 = vpop.permute.xlu1 %1490  ;;  %vm3511_vm1 = vcmp.gt.f32.partialorder %v1503_v32, 0.0 }
 0x5ff   :  { %vm3509_vm9 = vcmp.gt.f32.partialorder %v1491_v10, 0.0  ;;  %v5047_v36 = vsel %vm3511_vm1, %v9593_v60, -inf }
 0x600   :  { %v9758_v57 = vsel %vm6750_vm4, %v5906_v52, %v6776_v55  ;;  %v5045_v23 = vsel %vm3509_vm9, %v9717_v53, -inf  ;;  %v5912_v3 = vsel %vm42_vm0, %v5047_v36, -inf  ;;  %vm3515_vm9 = vcmp.gt.f32.partialorder %v11736_v42, 0.0 }
 0x603   :  { %1594 = vperm.xlu2 %7304, %v11733_v17  }
 0x604   :  { %7307 = vset.pattern.permute.xlu1 %v11695_v29 }
 0x60b   :  { %7306 = vset.pattern.permute.xlu2 %v7797_v34 }
 0x60c   :  { %1612 = vperm.xlu1 %7307, %v11733_v17  }
 0x60d   :  { %v1515_v26 = vpop.permute.xlu2 %1514 }
 0x60e   :  { %v1509_v15 = vpop.permute.xlu1 %1508  ;;  %vm3513_vm2 = vcmp.gt.f32.partialorder %v1515_v26, 0.0 }
 0x60f   :  { %vm3512_vm14 = vcmp.gt.f32.partialorder %v1509_v15, 0.0  ;;  %v5049_v52 = vsel %vm3513_vm2, %v9609_v63, -inf }
 0x610   :  { %v5048_v0 = vsel %vm3512_vm14, %v9601_v1, -inf  ;;  %v5916_v15 = vsel %vm42_vm0, %v5049_v52, -inf }
 0x611   :  { %v5914_v61 = vsel %vm42_vm0, %v5048_v0, -inf  ;;  %v11737_v0 = vld [vmem:[#allocation137_spill] sm:$0xff] }
 0x612   :  { %vm3520_vm14 = vcmp.gt.f32.partialorder %v11737_v0, 0.0 }
 0x613   :  { %1606 = vperm.xlu2 %7306, %v11733_v17   ;;  %v5056_v52 = vsel %vm3520_vm14, %v9601_v1, -inf }
 0x614   :  { %7309 = vset.pattern.permute.xlu1 %v11688_v48 }
 0x61b   :  { %7308 = vset.pattern.permute.xlu2 %v7702_v11 }
 0x61c   :  { %1631 = vperm.xlu1 %7309, %v11734_v6  }
 0x61d   :  { %v1534_v41 = vpop.permute.xlu2 %1533 }
 0x61e   :  { %v1521_v62 = vpop.permute.xlu1 %1520  ;;  %vm3516_vm7 = vcmp.gt.f32.partialorder %v1534_v41, 0.0 }
 0x61f   :  { %vm3514_vm6 = vcmp.gt.f32.partialorder %v1521_v62, 0.0  ;;  %v5052_v26 = vsel %vm3516_vm7, %v9574_v24, -inf }
 0x620   :  { %v5050_v32 = vsel %vm3514_vm6, %v9616_v20, -inf  ;;  %v5928_v62 = vsel %vm42_vm0, %v5052_v26, -inf }
 0x621   :  { %v5918_v12 = vsel %vm42_vm0, %v5050_v32, -inf }
 0x623   :  { %1624 = vperm.xlu2 %7308, %v11733_v17   ;;  %v5908_v17 = vsel %vm42_vm0, %v5045_v23, -inf  ;;  %v5051_v23 = vsel %vm3515_vm9, %v9548_v54, -inf }
 0x624   :  { %7311 = vset.pattern.permute.xlu1 %v11704_v58  ;;  %v5909_v46 = vmax.f32 %v5907_v49, %v5908_v17 }
 0x626   :  { %v5911_v44 = vmax.f32 %v5909_v46, %v5910_v51  ;;  %v5920_v51 = vsel %vm42_vm0, %v5051_v23, -inf }
 0x628   :  { %v5913_v45 = vmax.f32 %v5911_v44, %v5912_v3 }
 0x62a   :  { %v5915_v10 = vmax.f32 %v5913_v45, %v5914_v61 }
 0x62b   :  { %7310 = vset.pattern.permute.xlu2 %v7829_v40 }
 0x62c   :  { %1643 = vperm.xlu1 %7311, %v11734_v6   ;;  %v5917_v17 = vmax.f32 %v5915_v10, %v5916_v15  ;;  %v5935_v10 = vsel %vm42_vm0, %v5056_v52, -inf }
 0x62d   :  { %v1546_v55 = vpop.permute.xlu2 %1545 }
 0x62e   :  { %v1540_v22 = vpop.permute.xlu1 %1539  ;;  %vm3518_vm15 = vcmp.gt.f32.partialorder %v1546_v55, 0.0  ;;  %v5919_v46 = vmax.f32 %v5917_v17, %v5918_v12 }
 0x62f   :  { %vm3517_vm8 = vcmp.gt.f32.partialorder %v1540_v22, 0.0  ;;  %v5054_v41 = vsel %vm3518_vm15, %v9586_v7, -inf }
 0x630   :  { %v5053_v50 = vsel %vm3517_vm8, %v9717_v53, -inf  ;;  %v5931_v3 = vsel %vm42_vm0, %v5054_v41, -inf  ;;  %v5921_v61 = vmax.f32 %v5919_v46, %v5920_v51 }
 0x631   :  { %v5929_v59 = vsel %vm42_vm0, %v5053_v50, -inf }
 0x632   :  { %v5930_v36 = vmax.f32 %v5928_v62, %v5929_v59  ;;  %v5922_v32 = vrot.slane %v5921_v61, 4 }
 0x633   :  { %1637 = vperm.xlu2 %7310, %v11734_v6  }
 0x634   :  { %7313 = vset.pattern.permute.xlu1 %v11695_v29  ;;  %v5932_v55 = vmax.f32 %v5930_v36, %v5931_v3  ;;  %v5923_v50 = vmax.f32 %v5921_v61, %v5922_v32 }
 0x636   :  { %v5924_v41 = vrot.slane %v5923_v50, 2 }
 0x638   :  { %v5925_v0 = vmax.f32 %v5923_v50, %v5924_v41 }
 0x63a   :  { %v5926_v61 = vrot.slane %v5925_v0, 1 }
 0x63b   :  { %7312 = vset.pattern.permute.xlu2 %v7797_v34 }
 0x63c   :  { %1661 = vperm.xlu1 %7313, %v11734_v6  }
 0x63d   :  { %v1564_v22 = vpop.permute.xlu2 %1563 }
 0x63e   :  { %v1552_v49 = vpop.permute.xlu1 %1551  ;;  %vm3521_vm2 = vcmp.gt.f32.partialorder %v1564_v22, 0.0 }
 0x63f   :  { %vm3519_vm1 = vcmp.gt.f32.partialorder %v1552_v49, 0.0  ;;  %v5057_v15 = vsel %vm3521_vm2, %v9609_v63, -inf  ;;  %vm3530_vm2 = vcmp.gt.f32.partialorder %v9260_v28, 0.0 }
 0x640   :  { %v5055_v44 = vsel %vm3519_vm1, %v9593_v60, -inf  ;;  %v5937_v23 = vsel %vm42_vm0, %v5057_v15, -inf }
 0x641   :  { %v5933_v45 = vsel %vm42_vm0, %v5055_v44, -inf }
 0x642   :  { %v5934_v42 = vmax.f32 %v5932_v55, %v5933_v45  ;;  %v11738_v55 = vld [vmem:[#allocation44_spill] sm:$0xff] }
 0x643   :  { %1655 = vperm.xlu2 %7312, %v11734_v6  }
 0x644   :  { %7315 = vset.pattern.permute.xlu1 %v7702_v11  ;;  %v5936_v26 = vmax.f32 %v5934_v42, %v5935_v10  ;;  %v5927_v42 = vmax.f32 %v5925_v0, %v5926_v61 }
 0x646   :  { %v5938_v62 = vmax.f32 %v5936_v26, %v5937_v23  ;;  %v6778_v15 = vsel %vm6752_vm5, %v5927_v42, %v9758_v57  ;;  %v11739_v23 = vld [vmem:[#allocation45_spill] sm:$0xff] }
 0x647   :  { %vm3525_vm8 = vcmp.gt.f32.partialorder %v11739_v23, 0.0 }
 0x64b   :  { %7314 = vset.pattern.permute.xlu2 %v7814_v37 }
 0x64c   :  { %1673 = vperm.xlu1 %7315, %v11734_v6  }
 0x64d   :  { %v1576_v12 = vpop.permute.xlu2 %1575 }
 0x64e   :  { %v1570_v49 = vpop.permute.xlu1 %1569  ;;  %vm3523_vm6 = vcmp.gt.f32.partialorder %v1576_v12, 0.0  ;;  %v5061_v12 = vsel %vm3525_vm8, %v9717_v53, -inf }
 0x64f   :  { %vm3522_vm7 = vcmp.gt.f32.partialorder %v1570_v49, 0.0  ;;  %v5059_v17 = vsel %vm3523_vm6, %v9548_v54, -inf }
 0x650   :  { %v5058_v59 = vsel %vm3522_vm7, %v9616_v20, -inf  ;;  %v5941_v51 = vsel %vm42_vm0, %v5059_v17, -inf  ;;  %v5950_v17 = vsel %vm42_vm0, %v5061_v12, -inf }
 0x651   :  { %v5939_v46 = vsel %vm42_vm0, %v5058_v59, -inf }
 0x652   :  { %v5940_v36 = vmax.f32 %v5938_v62, %v5939_v46 }
 0x653   :  { %1667 = vperm.xlu2 %7314, %v11734_v6  }
 0x654   :  { %v5942_v44 = vmax.f32 %v5940_v36, %v5941_v51  ;;  %7317 = vset.pattern.permute.xlu1 %v11704_v58 }
 0x656   :  { %v5943_v3 = vrot.slane %v5942_v44, 4 }
 0x658   :  { %v5944_v22 = vmax.f32 %v5942_v44, %v5943_v3 }
 0x65a   :  { %v5945_v45 = vrot.slane %v5944_v22, 2 }
 0x65b   :  { %7316 = vset.pattern.permute.xlu2 %v7829_v40 }
 0x65c   :  { %v5946_v52 = vmax.f32 %v5944_v22, %v5945_v45  ;;  %1692 = vperm.xlu1 %7317, %v11738_v55  }
 0x65d   :  { %v1595_v50 = vpop.permute.xlu2 %1594 }
 0x65e   :  { %v5947_v10 = vrot.slane %v5946_v52, 1  ;;  %v1583_v26 = vpop.permute.xlu1 %1582  ;;  %vm3526_vm15 = vcmp.gt.f32.partialorder %v1595_v50, 0.0 }
 0x65f   :  { %vm3524_vm9 = vcmp.gt.f32.partialorder %v1583_v26, 0.0  ;;  %v5062_v59 = vsel %vm3526_vm15, %v9586_v7, -inf }
 0x660   :  { %v5948_v32 = vmax.f32 %v5946_v52, %v5947_v10  ;;  %v5060_v49 = vsel %vm3524_vm9, %v9574_v24, -inf  ;;  %v5952_v36 = vsel %vm42_vm0, %v5062_v59, -inf  ;;  %v5066_v52 = vsel %vm3530_vm2, %v9616_v20, -inf  ;;  %v11740_v59 = vld [vmem:[#allocation8_spill] sm:$0xff] }
 0x661   :  { %v5949_v62 = vsel %vm42_vm0, %v5060_v49, -inf  ;;  %v5960_v28 = vsel %vm42_vm0, %v5066_v52, -inf }
 0x662   :  { %v6779_v6 = vsel %vm6754_vm10, %v5948_v32, %v6778_v15  ;;  %v5951_v46 = vmax.f32 %v5949_v62, %v5950_v17 }
 0x663   :  { %1686 = vperm.xlu2 %7316, %v11738_v55  }
 0x664   :  { %7319 = vset.pattern.permute.xlu1 %v7797_v34  ;;  %v5953_v0 = vmax.f32 %v5951_v46, %v5952_v36 }
 0x66b   :  { %7318 = vset.pattern.permute.xlu2 %v7777_v30 }
 0x66c   :  { %1704 = vperm.xlu1 %7319, %v11738_v55  }
 0x66d   :  { %v1607_v41 = vpop.permute.xlu2 %1606 }
 0x66e   :  { %v1601_v57 = vpop.permute.xlu1 %1600  ;;  %vm3528_vm14 = vcmp.gt.f32.partialorder %v1607_v41, 0.0 }
 0x66f   :  { %vm3527_vm1 = vcmp.gt.f32.partialorder %v1601_v57, 0.0  ;;  %v5064_v3 = vsel %vm3528_vm14, %v9601_v1, -inf }
 0x670   :  { %v5063_v51 = vsel %vm3527_vm1, %v9593_v60, -inf  ;;  %v5956_v61 = vsel %vm42_vm0, %v5064_v3, -inf }
 0x671   :  { %v5954_v44 = vsel %vm42_vm0, %v5063_v51, -inf }
 0x672   :  { %v5955_v22 = vmax.f32 %v5953_v0, %v5954_v44 }
 0x673   :  { %1698 = vperm.xlu2 %7318, %v11738_v55  }
 0x674   :  { %7321 = vset.pattern.permute.xlu1 %v7702_v11  ;;  %v5957_v10 = vmax.f32 %v5955_v22, %v5956_v61 }
 0x67b   :  { %7320 = vset.pattern.permute.xlu2 %v7814_v37 }
 0x67c   :  { %1722 = vperm.xlu1 %7321, %v11738_v55  }
 0x67d   :  { %v1625_v45 = vpop.permute.xlu2 %1624 }
 0x67e   :  { %v1613_v42 = vpop.permute.xlu1 %1612  ;;  %vm3531_vm6 = vcmp.gt.f32.partialorder %v1625_v45, 0.0 }
 0x67f   :  { %vm3529_vm7 = vcmp.gt.f32.partialorder %v1613_v42, 0.0  ;;  %v5067_v15 = vsel %vm3531_vm6, %v9548_v54, -inf  ;;  %v11742_v42 = vld [vmem:[#allocation104_spill] sm:$0xff] }
 0x680   :  { %v5065_v32 = vsel %vm3529_vm7, %v9609_v63, -inf  ;;  %v5962_v23 = vsel %vm42_vm0, %v5067_v15, -inf  ;;  %vm3535_vm1 = vcmp.gt.f32.partialorder %v11742_v42, 0.0 }
 0x681   :  { %v5958_v26 = vsel %vm42_vm0, %v5065_v32, -inf }
 0x682   :  { %v5959_v50 = vmax.f32 %v5957_v10, %v5958_v26 }
 0x683   :  { %1716 = vperm.xlu2 %7320, %v11738_v55  }
 0x684   :  { %v5961_v12 = vmax.f32 %v5959_v50, %v5960_v28  ;;  %7323 = vset.pattern.permute.xlu1 %v7829_v40  ;;  %v5071_v50 = vsel %vm3535_vm1, %v9593_v60, -inf }
 0x686   :  { %v5963_v49 = vmax.f32 %v5961_v12, %v5962_v23 }
 0x688   :  { %v5964_v57 = vrot.slane %v5963_v49, 4 }
 0x68a   :  { %v5965_v17 = vmax.f32 %v5963_v49, %v5964_v57  ;;  %v5975_v49 = vsel %vm42_vm0, %v5071_v50, -inf  ;;  %v11743_v57 = vld [vmem:[#allocation63_spill] sm:$0xff] }
 0x68b   :  { %7322 = vset.pattern.permute.xlu2 %v11688_v48  ;;  %vm3540_vm6 = vcmp.gt.f32.partialorder %v11743_v57, 0.0 }
 0x68c   :  { %v5966_v62 = vrot.slane %v5965_v17, 2  ;;  %1735 = vperm.xlu1 %7323, %v11740_v59  }
 0x68d   :  { %v1638_v36 = vpop.permute.xlu2 %1637 }
 0x68e   :  { %v5967_v54 = vmax.f32 %v5965_v17, %v5966_v62  ;;  %v1632_v51 = vpop.permute.xlu1 %1631  ;;  %vm3533_vm9 = vcmp.gt.f32.partialorder %v1638_v36, 0.0 }
 0x68f   :  { %vm3532_vm8 = vcmp.gt.f32.partialorder %v1632_v51, 0.0  ;;  %v5069_v45 = vsel %vm3533_vm9, %v9717_v53, -inf }
 0x690   :  { %v5968_v41 = vrot.slane %v5967_v54, 1  ;;  %v5068_v61 = vsel %vm3532_vm8, %v9574_v24, -inf  ;;  %v5971_v32 = vsel %vm42_vm0, %v5069_v45, -inf }
 0x691   :  { %v5970_v10 = vsel %vm42_vm0, %v5068_v61, -inf }
 0x692   :  { %v5969_v46 = vmax.f32 %v5967_v54, %v5968_v41  ;;  %v5972_v23 = vmax.f32 %v5970_v10, %v5971_v32  ;;  %v5076_v41 = vsel %vm3540_vm6, %v9574_v24, -inf }
 0x693   :  { %1729 = vperm.xlu2 %7322, %v11740_v59  }
 0x694   :  { %7325 = vset.pattern.permute.xlu1 %v7797_v34  ;;  %v9855_v55 = vsel %vm6756_vm11, %v5969_v46, %v6779_v6  ;;  %v11741_v6 = vld [vmem:[#allocation105_spill] sm:$0xff] }
 0x69b   :  { %7324 = vset.pattern.permute.xlu2 %v7777_v30 }
 0x69c   :  { %1753 = vperm.xlu1 %7325, %v11740_v59  }
 0x69d   :  { %v1656_v0 = vpop.permute.xlu2 %1655 }
 0x69e   :  { %v1644_v44 = vpop.permute.xlu1 %1643  ;;  %vm3536_vm14 = vcmp.gt.f32.partialorder %v1656_v0, 0.0  ;;  %v5991_v0 = vsel %vm42_vm0, %v5076_v41, -inf }
 0x69f   :  { %vm3534_vm15 = vcmp.gt.f32.partialorder %v1644_v44, 0.0  ;;  %v5072_v17 = vsel %vm3536_vm14, %v9601_v1, -inf }
 0x6a0   :  { %v5070_v52 = vsel %vm3534_vm15, %v9586_v7, -inf  ;;  %v5977_v46 = vsel %vm42_vm0, %v5072_v17, -inf }
 0x6a1   :  { %v5973_v28 = vsel %vm42_vm0, %v5070_v52, -inf  ;;  %v9898_v52 = vld [vmem:[%s11369_s0 + $0x38] sm:$0xff] }
 0x6a2   :  { %v5974_v12 = vmax.f32 %v5972_v23, %v5973_v28 }
 0x6a3   :  { %1747 = vperm.xlu2 %7324, %v11740_v59  }
 0x6a4   :  { %7327 = vset.pattern.permute.xlu1 %v7814_v37 }
 0x6ab   :  { %7326 = vset.pattern.permute.xlu2 %v11695_v29 }
 0x6ac   :  { %1765 = vperm.xlu1 %7327, %v11740_v59  }
 0x6ad   :  { %v1668_v22 = vpop.permute.xlu2 %1667 }
 0x6ae   :  { %v1662_v3 = vpop.permute.xlu1 %1661  ;;  %vm3538_vm8 = vcmp.gt.f32.partialorder %v1668_v22, 0.0 }
 0x6af   :  { %vm3537_vm2 = vcmp.gt.f32.partialorder %v1662_v3, 0.0  ;;  %v5074_v61 = vsel %vm3538_vm8, %v9616_v20, -inf }
 0x6b0   :  { %v5073_v54 = vsel %vm3537_vm2, %v9609_v63, -inf  ;;  %v5981_v10 = vsel %vm42_vm0, %v5074_v61, -inf }
 0x6b1   :  { %v5979_v36 = vsel %vm42_vm0, %v5073_v54, -inf }
 0x6b3   :  { %1759 = vperm.xlu2 %7326, %v11740_v59   ;;  %v5976_v59 = vmax.f32 %v5974_v12, %v5975_v49  ;;  %v11744_v49 = vld [vmem:[#allocation18_spill] sm:$0xff] }
 0x6b4   :  { %7329 = vset.pattern.permute.xlu1 %v7829_v40  ;;  %vm3545_vm2 = vcmp.gt.f32.partialorder %v11744_v49, 0.0 }
 0x6b5   :  { %v5978_v3 = vmax.f32 %v5976_v59, %v5977_v46  ;;  %v5081_v54 = vsel %vm3545_vm2, %v9609_v63, -inf }
 0x6b7   :  { %v5980_v22 = vmax.f32 %v5978_v3, %v5979_v36 }
 0x6b9   :  { %v5982_v50 = vmax.f32 %v5980_v22, %v5981_v10 }
 0x6bb   :  { %7328 = vset.pattern.permute.xlu2 %v11688_v48 }
 0x6bc   :  { %1784 = vperm.xlu1 %7329, %v11741_v6  }
 0x6bd   :  { %v1687_v26 = vpop.permute.xlu2 %1686 }
 0x6be   :  { %v1674_v15 = vpop.permute.xlu1 %1673  ;;  %vm3541_vm7 = vcmp.gt.f32.partialorder %v1687_v26, 0.0 }
 0x6bf   :  { %v5077_v51 = vsel %vm3541_vm7, %v9717_v53, -inf  ;;  %vm3539_vm15 = vcmp.gt.f32.partialorder %v1674_v15, 0.0 }
 0x6c0   :  { %v5992_v45 = vsel %vm42_vm0, %v5077_v51, -inf  ;;  %v5075_v42 = vsel %vm3539_vm15, %v9898_v52, -inf }
 0x6c1   :  { %v5993_v32 = vmax.f32 %v5991_v0, %v5992_v45  ;;  %v11745_v0 = vld [vmem:[#allocation25_spill] sm:$0xff] }
 0x6c3   :  { %1778 = vperm.xlu2 %7328, %v11741_v6  }
 0x6c4   :  { %7331 = vset.pattern.permute.xlu1 %v7777_v30 }
 0x6cb   :  { %7330 = vset.pattern.permute.xlu2 %v11704_v58 }
 0x6cc   :  { %1796 = vperm.xlu1 %7331, %v11741_v6  }
 0x6cd   :  { %v1699_v44 = vpop.permute.xlu2 %1698 }
 0x6ce   :  { %v1693_v62 = vpop.permute.xlu1 %1692  ;;  %vm3543_vm1 = vcmp.gt.f32.partialorder %v1699_v44, 0.0 }
 0x6cf   :  { %vm3542_vm9 = vcmp.gt.f32.partialorder %v1693_v62, 0.0  ;;  %v5079_v26 = vsel %vm3543_vm1, %v9593_v60, -inf }
 0x6d0   :  { %v5078_v24 = vsel %vm3542_vm9, %v9586_v7, -inf  ;;  %v5983_v7 = vsel %vm42_vm0, %v5075_v42, -inf  ;;  %v5996_v17 = vsel %vm42_vm0, %v5079_v26, -inf }
 0x6d1   :  { %v5994_v28 = vsel %vm42_vm0, %v5078_v24, -inf  ;;  %v5984_v57 = vmax.f32 %v5982_v50, %v5983_v7 }
 0x6d2   :  { %v5995_v23 = vmax.f32 %v5993_v32, %v5994_v28 }
 0x6d3   :  { %1790 = vperm.xlu2 %7330, %v11741_v6   ;;  %v5985_v60 = vrot.slane %v5984_v57, 4 }
 0x6d4   :  { %7333 = vset.pattern.permute.xlu1 %v7814_v37  ;;  %v5997_v41 = vmax.f32 %v5995_v23, %v5996_v17 }
 0x6d5   :  { %v5986_v36 = vmax.f32 %v5984_v57, %v5985_v60 }
 0x6d7   :  { %v5987_v45 = vrot.slane %v5986_v36, 2 }
 0x6d9   :  { %v5988_v10 = vmax.f32 %v5986_v36, %v5987_v45  ;;  %v11747_v36 = vld [vmem:[#allocation46_spill] sm:$0xff] }
 0x6db   :  { %7332 = vset.pattern.permute.xlu2 %v11695_v29 }
 0x6dc   :  { %1814 = vperm.xlu1 %7333, %v11741_v6  }
 0x6dd   :  { %v1717_v62 = vpop.permute.xlu2 %1716 }
 0x6de   :  { %v1705_v15 = vpop.permute.xlu1 %1704  ;;  %vm3546_vm6 = vcmp.gt.f32.partialorder %v1717_v62, 0.0 }
 0x6df   :  { %vm3544_vm14 = vcmp.gt.f32.partialorder %v1705_v15, 0.0  ;;  %v5082_v51 = vsel %vm3546_vm6, %v9616_v20, -inf  ;;  %v5989_v15 = vrot.slane %v5988_v10, 1 }
 0x6e0   :  { %v5080_v12 = vsel %vm3544_vm14, %v9601_v1, -inf  ;;  %v6000_v1 = vsel %vm42_vm0, %v5081_v54, -inf  ;;  %v6002_v3 = vsel %vm42_vm0, %v5082_v51, -inf }
 0x6e1   :  { %v5998_v59 = vsel %vm42_vm0, %v5080_v12, -inf  ;;  %v5990_v26 = vmax.f32 %v5988_v10, %v5989_v15 }
 0x6e2   :  { %v5999_v46 = vmax.f32 %v5997_v41, %v5998_v59 }
 0x6e3   :  { %1808 = vperm.xlu2 %7332, %v11741_v6   ;;  %v6781_v12 = vsel %vm6758_vm12, %v5990_v26, %v9855_v55  ;;  %v9979_v26 = vld [vmem:[%s11369_s0 + $0x18] sm:$0xff] }
 0x6e4   :  { %7335 = vset.pattern.permute.xlu1 %v11688_v48  ;;  %v6001_v44 = vmax.f32 %v5999_v46, %v6000_v1 }
 0x6e6   :  { %v6003_v63 = vmax.f32 %v6001_v44, %v6002_v3  ;;  %v9958_v44 = vld [vmem:[%s11369_s0] sm:$0xff] }
 0x6eb   :  { %7334 = vset.pattern.permute.xlu2 %v7702_v11 }
 0x6ec   :  { %1827 = vperm.xlu1 %7335, %v11745_v0  }
 0x6ed   :  { %v1730_v55 = vpop.permute.xlu2 %1729 }
 0x6ee   :  { %v1723_v61 = vpop.permute.xlu1 %1722  ;;  %vm3548_vm15 = vcmp.gt.f32.partialorder %v1730_v55, 0.0 }
 0x6ef   :  { %vm3547_vm7 = vcmp.gt.f32.partialorder %v1723_v61, 0.0  ;;  %v5084_v61 = vsel %vm3548_vm15, %v9958_v44, -inf }
 0x6f0   :  { %v5083_v24 = vsel %vm3547_vm7, %v9898_v52, -inf  ;;  %v6012_v10 = vsel %vm42_vm0, %v5084_v61, -inf }
 0x6f1   :  { %v6004_v22 = vsel %vm42_vm0, %v5083_v24, -inf }
 0x6f2   :  { %v6005_v42 = vmax.f32 %v6003_v63, %v6004_v22  ;;  %v11748_v63 = vld [vmem:[#allocation81_spill] sm:$0xff] }
 0x6f3   :  { %1820 = vperm.xlu2 %7334, %v11741_v6   ;;  %v11746_v6 = vld [vmem:[#allocation80_spill] sm:$0xff]  ;;  %vm3550_vm2 = vcmp.gt.f32.partialorder %v11748_v63, 0.0  ;;  %v10002_v63 = vld [vmem:[%s11369_s0 + $0x28] sm:$0xff] }
 0x6f4   :  { %v6006_v20 = vrot.slane %v6005_v42, 4  ;;  %7337 = vset.pattern.permute.xlu1 %v7777_v30 }
 0x6f6   :  { %v6007_v32 = vmax.f32 %v6005_v42, %v6006_v20 }
 0x6f8   :  { %v6008_v28 = vrot.slane %v6007_v32, 2 }
 0x6fa   :  { %v6009_v7 = vmax.f32 %v6007_v32, %v6008_v28  ;;  %v9972_v32 = vld [vmem:[%s11369_s0 + $0x10] sm:$0xff] }
 0x6fb   :  { %7336 = vset.pattern.permute.xlu2 %v11704_v58  ;;  %v5086_v28 = vsel %vm3550_vm2, %v9972_v32, -inf }
 0x6fc   :  { %1845 = vperm.xlu1 %7337, %v11745_v0   ;;  %v6010_v50 = vrot.slane %v6009_v7, 1  ;;  %v6015_v55 = vsel %vm42_vm0, %v5086_v28, -inf }
 0x6fd   :  { %v1748_v17 = vpop.permute.xlu2 %1747 }
 0x6fe   :  { %v6011_v23 = vmax.f32 %v6009_v7, %v6010_v50  ;;  %v1736_v57 = vpop.permute.xlu1 %1735  ;;  %vm3551_vm7 = vcmp.gt.f32.partialorder %v1748_v17, 0.0 }
 0x6ff   :  { %vm3549_vm1 = vcmp.gt.f32.partialorder %v1736_v57, 0.0  ;;  %v5087_v57 = vsel %vm3551_vm7, %v9979_v26, -inf }
 0x700   :  { %v6782_v49 = vsel %vm11483_vm13, %v6011_v23, %v6781_v12  ;;  %v5085_v45 = vsel %vm3549_vm1, %v9717_v53, -inf  ;;  %v11749_v23 = vld [vmem:[#allocation139_spill] sm:$0xff] }
 0x701   :  { %6817 = vrot.lane.b32.xlu0 %v6782_v49, %s7627_s19  ;;  %v6013_v20 = vsel %vm42_vm0, %v5085_v45, -inf }
 0x702   :  { %v6014_v12 = vmax.f32 %v6012_v10, %v6013_v20 }
 0x703   :  { %1839 = vperm.xlu2 %7336, %v11745_v0  }
 0x704   :  { %7339 = vset.pattern.permute.xlu1 %v11695_v29 }
 0x70b   :  { %7338 = vset.pattern.permute.xlu2 %v7797_v34 }
 0x70c   :  { %1857 = vperm.xlu1 %7339, %v11745_v0  }
 0x70d   :  { %v9943_v59 = vpop.permute.xlu2 %1759 }
 0x70e   :  { %v1754_v62 = vpop.permute.xlu1 %1753  ;;  %vm3553_vm1 = vcmp.gt.f32.partialorder %v9943_v59, 0.0 }
 0x70f   :  { %v5089_v59 = vsel %vm3553_vm1, %v10002_v63, -inf }
 0x713   :  { %1851 = vperm.xlu2 %7338, %v11745_v0  }
 0x714   :  { %7341 = vset.pattern.permute.xlu1 %v11688_v48 }
 0x71b   :  { %7340 = vset.pattern.permute.xlu2 %v7702_v11 }
 0x71c   :  { %1876 = vperm.xlu1 %7341, %v11746_v6  }
 0x71d   :  { %v1779_v41 = vpop.permute.xlu2 %1778 }
 0x71e   :  { %v9947_v54 = vpop.permute.xlu1 %1765  ;;  %vm3556_vm8 = vcmp.gt.f32.partialorder %v1779_v41, 0.0  ;;  %v9992_v41 = vld [vmem:[%s11369_s0 + $0x20] sm:$0xff] }
 0x723   :  { %1869 = vperm.xlu2 %7340, %v11745_v0   ;;  %v5092_v0 = vsel %vm3556_vm8, %v9958_v44, -inf  ;;  %vm3560_vm8 = vcmp.gt.f32.partialorder %v11749_v23, 0.0 }
 0x724   :  { %7343 = vset.pattern.permute.xlu1 %v11704_v58  ;;  %v6033_v24 = vsel %vm42_vm0, %v5092_v0, -inf }
 0x72b   :  { %7342 = vset.pattern.permute.xlu2 %v7829_v40 }
 0x72c   :  { %1888 = vperm.xlu1 %7343, %v11746_v6  }
 0x72d   :  { %v1791_v46 = vpop.permute.xlu2 %1790 }
 0x72e   :  { %v1785_v60 = vpop.permute.xlu1 %1784  ;;  %vm3558_vm14 = vcmp.gt.f32.partialorder %v1791_v46, 0.0 }
 0x72f   :  { %vm3557_vm9 = vcmp.gt.f32.partialorder %v1785_v60, 0.0  ;;  %v5094_v15 = vsel %vm3558_vm14, %v9972_v32, -inf  ;;  %v5096_v60 = vsel %vm3560_vm8, %v9992_v41, -inf }
 0x730   :  { %v5093_v3 = vsel %vm3557_vm9, %v9717_v53, -inf  ;;  %v6036_v49 = vsel %vm42_vm0, %v5094_v15, -inf  ;;  %vm3552_vm9 = vcmp.gt.f32.partialorder %v1754_v62, 0.0  ;;  %v6040_v62 = vsel %vm42_vm0, %v5096_v60, -inf  ;;  %v10014_v15 = vld [vmem:[%s11369_s0 + $0x30] sm:$0xff] }
 0x731   :  { %v6034_v22 = vsel %vm42_vm0, %v5093_v3, -inf  ;;  %v6017_v3 = vsel %vm42_vm0, %v5087_v57, -inf  ;;  %v5088_v61 = vsel %vm3552_vm9, %v9992_v41, -inf }
 0x732   :  { %v6035_v7 = vmax.f32 %v6033_v24, %v6034_v22  ;;  %v6019_v10 = vsel %vm42_vm0, %v5088_v61, -inf }
 0x733   :  { %1882 = vperm.xlu2 %7342, %v11746_v6  }
 0x734   :  { %7345 = vset.pattern.permute.xlu1 %v11695_v29  ;;  %v6037_v46 = vmax.f32 %v6035_v7, %v6036_v49  ;;  %v6021_v49 = vsel %vm42_vm0, %v5089_v59, -inf }
 0x73b   :  { %7344 = vset.pattern.permute.xlu2 %v7797_v34 }
 0x73c   :  { %1906 = vperm.xlu1 %7345, %v11746_v6  }
 0x73d   :  { %v1809_v51 = vpop.permute.xlu2 %1808 }
 0x73e   :  { %v1797_v1 = vpop.permute.xlu1 %1796  ;;  %vm3561_vm15 = vcmp.gt.f32.partialorder %v1809_v51, 0.0  ;;  %v11750_v51 = vld [vmem:[#allocation47_spill] sm:$0xff] }
 0x73f   :  { %vm3559_vm6 = vcmp.gt.f32.partialorder %v1797_v1, 0.0  ;;  %v6016_v1 = vmax.f32 %v6014_v12, %v6015_v55  ;;  %v5097_v24 = vsel %vm3561_vm15, %v10002_v63, -inf  ;;  %vm3565_vm2 = vcmp.gt.f32.partialorder %v11750_v51, 0.0 }
 0x740   :  { %v5095_v50 = vsel %vm3559_vm6, %v9979_v26, -inf  ;;  %vm3554_vm6 = vcmp.gt.f32.partialorder %v9947_v54, 0.0  ;;  %v6042_v7 = vsel %vm42_vm0, %v5097_v24, -inf  ;;  %v5101_v54 = vsel %vm3565_vm2, %v9717_v53, -inf }
 0x741   :  { %v6038_v17 = vsel %vm42_vm0, %v5095_v50, -inf  ;;  %v6018_v22 = vmax.f32 %v6016_v1, %v6017_v3  ;;  %v11751_v50 = vld [vmem:[#allocation28_spill] sm:$0xff]  ;;  %v5090_v12 = vsel %vm3554_vm6, %v10014_v15, -inf  ;;  %v6055_v1 = vsel %vm42_vm0, %v5101_v54, -inf }
 0x742   :  { %v6039_v45 = vmax.f32 %v6037_v46, %v6038_v17  ;;  %vm3555_vm9 = vcmp.gt.f32.partialorder %v11751_v50, 0.0  ;;  %v6023_v53 = vsel %vm42_vm0, %v5090_v12, -inf  ;;  %vm3570_vm2 = vcmp.gt.f32.partialorder %v9277_v13, 0.0 }
 0x743   :  { %1900 = vperm.xlu2 %7344, %v11746_v6   ;;  %v6020_v23 = vmax.f32 %v6018_v22, %v6019_v10 }
 0x744   :  { %7347 = vset.pattern.permute.xlu1 %v7702_v11 }
 0x74b   :  { %7346 = vset.pattern.permute.xlu2 %v7814_v37 }
 0x74c   :  { %1918 = vperm.xlu1 %7347, %v11746_v6  }
 0x74e   :  { %v1815_v42 = vpop.permute.xlu1 %1814 }
 0x74f   :  { %vm3562_vm14 = vcmp.gt.f32.partialorder %v1815_v42, 0.0  ;;  %v6041_v42 = vmax.f32 %v6039_v45, %v6040_v62 }
 0x750   :  { %v5098_v28 = vsel %vm3562_vm14, %v10014_v15, -inf }
 0x751   :  { %v6044_v55 = vsel %vm42_vm0, %v5098_v28, -inf  ;;  %v6043_v60 = vmax.f32 %v6041_v42, %v6042_v7 }
 0x753   :  { %1912 = vperm.xlu2 %7346, %v11746_v6   ;;  %v1821_v6 = vpop.permute.xlu2 %1820  ;;  %v6045_v3 = vmax.f32 %v6043_v60, %v6044_v55 }
 0x754   :  { %7349 = vset.pattern.permute.xlu1 %v11704_v58  ;;  %vm3563_vm8 = vcmp.gt.f32.partialorder %v1821_v6, 0.0  ;;  %v5091_v6 = vsel %vm3555_vm9, %v9898_v52, -inf }
 0x755   :  { %v5099_v46 = vsel %vm3563_vm8, %v9898_v52, -inf  ;;  %v6025_v22 = vsel %vm42_vm0, %v5091_v6, -inf }
 0x756   :  { %v6046_v45 = vsel %vm42_vm0, %v5099_v46, -inf }
 0x757   :  { %v6047_v59 = vmax.f32 %v6045_v3, %v6046_v45 }
 0x75b   :  { %7348 = vset.pattern.permute.xlu2 %v7829_v40 }
 0x75c   :  { %1937 = vperm.xlu1 %7349, %v11747_v36  }
 0x75d   :  { %v1840_v20 = vpop.permute.xlu2 %1839 }
 0x75e   :  { %v1828_v0 = vpop.permute.xlu1 %1827  ;;  %vm3566_vm15 = vcmp.gt.f32.partialorder %v1840_v20, 0.0 }
 0x75f   :  { %vm3564_vm7 = vcmp.gt.f32.partialorder %v1828_v0, 0.0  ;;  %v6022_v0 = vmax.f32 %v6020_v23, %v6021_v49  ;;  %v5102_v62 = vsel %vm3566_vm15, %v9972_v32, -inf  ;;  %v6048_v23 = vrot.slane %v6047_v59, 4 }
 0x760   :  { %v5100_v57 = vsel %vm3564_vm7, %v9958_v44, -inf  ;;  %v6057_v42 = vsel %vm42_vm0, %v5102_v62, -inf }
 0x761   :  { %v6054_v61 = vsel %vm42_vm0, %v5100_v57, -inf  ;;  %v6024_v51 = vmax.f32 %v6022_v0, %v6023_v53  ;;  %v6049_v46 = vmax.f32 %v6047_v59, %v6048_v23 }
 0x762   :  { %v6056_v10 = vmax.f32 %v6054_v61, %v6055_v1 }
 0x763   :  { %1931 = vperm.xlu2 %7348, %v11747_v36   ;;  %v6026_v28 = vmax.f32 %v6024_v51, %v6025_v22  ;;  %v6050_v45 = vrot.slane %v6049_v46, 2 }
 0x764   :  { %7351 = vset.pattern.permute.xlu1 %v7797_v34  ;;  %v6058_v50 = vmax.f32 %v6056_v10, %v6057_v42 }
 0x765   :  { %v6027_v49 = vrot.slane %v6026_v28, 4  ;;  %v6051_v10 = vmax.f32 %v6049_v46, %v6050_v45 }
 0x767   :  { %v6028_v0 = vmax.f32 %v6026_v28, %v6027_v49 }
 0x769   :  { %v6029_v51 = vrot.slane %v6028_v0, 2 }
 0x76b   :  { %7350 = vset.pattern.permute.xlu2 %v7777_v30  ;;  %v6030_v59 = vmax.f32 %v6028_v0, %v6029_v51 }
 0x76c   :  { %1949 = vperm.xlu1 %7351, %v11747_v36  }
 0x76d   :  { %v1852_v24 = vpop.permute.xlu2 %1851 }
 0x76e   :  { %v1846_v17 = vpop.permute.xlu1 %1845  ;;  %vm3568_vm14 = vcmp.gt.f32.partialorder %v1852_v24, 0.0 }
 0x76f   :  { %vm3567_vm1 = vcmp.gt.f32.partialorder %v1846_v17, 0.0  ;;  %v5104_v54 = vsel %vm3568_vm14, %v9992_v41, -inf  ;;  %v5106_v17 = vsel %vm3570_vm2, %v10014_v15, -inf }
 0x770   :  { %v5103_v20 = vsel %vm3567_vm1, %v9979_v26, -inf  ;;  %v6061_v55 = vsel %vm42_vm0, %v5104_v54, -inf  ;;  %v6065_v53 = vsel %vm42_vm0, %v5106_v17, -inf  ;;  %v6031_v54 = vrot.slane %v6030_v59, 1 }
 0x771   :  { %v6059_v7 = vsel %vm42_vm0, %v5103_v20, -inf }
 0x772   :  { %v6060_v12 = vmax.f32 %v6058_v50, %v6059_v7  ;;  %v6052_v7 = vrot.slane %v6051_v10, 1  ;;  %v11752_v50 = vld [vmem:[#allocation9_spill] sm:$0xff] }
 0x773   :  { %1943 = vperm.xlu2 %7350, %v11747_v36  }
 0x774   :  { %7353 = vset.pattern.permute.xlu1 %v7702_v11  ;;  %v6062_v6 = vmax.f32 %v6060_v12, %v6061_v55  ;;  %v6053_v12 = vmax.f32 %v6051_v10, %v6052_v7 }
 0x77b   :  { %7352 = vset.pattern.permute.xlu2 %v7814_v37 }
 0x77c   :  { %1967 = vperm.xlu1 %7353, %v11747_v36  }
 0x77d   :  { %v1870_v57 = vpop.permute.xlu2 %1869 }
 0x77e   :  { %v1858_v60 = vpop.permute.xlu1 %1857  ;;  %vm3571_vm6 = vcmp.gt.f32.partialorder %v1870_v57, 0.0 }
 0x77f   :  { %vm3569_vm7 = vcmp.gt.f32.partialorder %v1858_v60, 0.0  ;;  %v5107_v13 = vsel %vm3571_vm6, %v9898_v52, -inf }
 0x780   :  { %v5105_v1 = vsel %vm3569_vm7, %v10002_v63, -inf  ;;  %v6067_v62 = vsel %vm42_vm0, %v5107_v13, -inf }
 0x781   :  { %v6063_v3 = vsel %vm42_vm0, %v5105_v1, -inf }
 0x782   :  { %v6064_v61 = vmax.f32 %v6062_v6, %v6063_v3  ;;  %v11753_v6 = vld [vmem:[#allocation107_spill] sm:$0xff] }
 0x783   :  { %1961 = vperm.xlu2 %7352, %v11747_v36   ;;  %v6032_v36 = vmax.f32 %v6030_v59, %v6031_v54  ;;  %v11755_v54 = vld [vmem:[#allocation64_spill] sm:$0xff] }
 0x784   :  { %v6066_v24 = vmax.f32 %v6064_v61, %v6065_v53  ;;  %7355 = vset.pattern.permute.xlu1 %v7829_v40  ;;  %v10074_v61 = vld [vmem:[%s11369_s0 + $0x8] sm:$0xff]  ;;  %vm3580_vm6 = vcmp.gt.f32.partialorder %v11755_v54, 0.0  ;;  %v11756_v54 = vld [vmem:[#allocation118_spill] sm:$0xff] }
 0x785   :  { %v6783_v57 = vsel %vm6748_vm3, %v6053_v12, %v6032_v36 }
 0x786   :  { %v6068_v22 = vmax.f32 %v6066_v24, %v6067_v62  ;;  %v11754_v24 = vld [vmem:[#allocation106_spill] sm:$0xff] }
 0x787   :  { %vm3575_vm1 = vcmp.gt.f32.partialorder %v11754_v24, 0.0 }
 0x788   :  { %v6069_v20 = vrot.slane %v6068_v22, 4 }
 0x78a   :  { %v6070_v42 = vmax.f32 %v6068_v22, %v6069_v20 }
 0x78b   :  { %7354 = vset.pattern.permute.xlu2 %v11688_v48 }
 0x78c   :  { %v6071_v28 = vrot.slane %v6070_v42, 2  ;;  %1980 = vperm.xlu1 %7355, %v11752_v50  }
 0x78d   :  { %v1883_v46 = vpop.permute.xlu2 %1882 }
 0x78e   :  { %v6072_v23 = vmax.f32 %v6070_v42, %v6071_v28  ;;  %v1877_v60 = vpop.permute.xlu1 %1876  ;;  %vm3573_vm9 = vcmp.gt.f32.partialorder %v1883_v46, 0.0  ;;  %v5111_v42 = vsel %vm3575_vm1, %v9979_v26, -inf }
 0x78f   :  { %vm3572_vm8 = vcmp.gt.f32.partialorder %v1877_v60, 0.0  ;;  %v5109_v45 = vsel %vm3573_vm9, %v10074_v61, -inf }
 0x790   :  { %v6073_v49 = vrot.slane %v6072_v23, 1  ;;  %v5108_v3 = vsel %vm3572_vm8, %v9958_v44, -inf  ;;  %v6076_v22 = vsel %vm42_vm0, %v5109_v45, -inf }
 0x791   :  { %v6075_v51 = vsel %vm42_vm0, %v5108_v3, -inf }
 0x792   :  { %v6074_v55 = vmax.f32 %v6072_v23, %v6073_v49  ;;  %v6077_v7 = vmax.f32 %v6075_v51, %v6076_v22 }
 0x793   :  { %1974 = vperm.xlu2 %7354, %v11752_v50  }
 0x794   :  { %v10055_v17 = vsel %vm6750_vm4, %v6074_v55, %v6783_v57  ;;  %7357 = vset.pattern.permute.xlu1 %v7797_v34  ;;  %v5116_v55 = vsel %vm3580_vm6, %v9958_v44, -inf }
 0x79b   :  { %7356 = vset.pattern.permute.xlu2 %v7777_v30 }
 0x79c   :  { %1998 = vperm.xlu1 %7357, %v11752_v50  }
 0x79d   :  { %v1901_v13 = vpop.permute.xlu2 %1900 }
 0x79e   :  { %v1889_v1 = vpop.permute.xlu1 %1888  ;;  %vm3576_vm14 = vcmp.gt.f32.partialorder %v1901_v13, 0.0  ;;  %v6096_v13 = vsel %vm42_vm0, %v5116_v55, -inf }
 0x79f   :  { %vm3574_vm15 = vcmp.gt.f32.partialorder %v1889_v1, 0.0  ;;  %v5112_v23 = vsel %vm3576_vm14, %v9992_v41, -inf }
 0x7a0   :  { %v5110_v62 = vsel %vm3574_vm15, %v9972_v32, -inf  ;;  %v6082_v57 = vsel %vm42_vm0, %v5112_v23, -inf }
 0x7a1   :  { %v6078_v20 = vsel %vm42_vm0, %v5110_v62, -inf }
 0x7a2   :  { %v6079_v28 = vmax.f32 %v6077_v7, %v6078_v20 }
 0x7a3   :  { %1992 = vperm.xlu2 %7356, %v11752_v50  }
 0x7a4   :  { %7359 = vset.pattern.permute.xlu1 %v7814_v37 }
 0x7ab   :  { %7358 = vset.pattern.permute.xlu2 %v11695_v29 }
 0x7ac   :  { %2010 = vperm.xlu1 %7359, %v11752_v50  }
 0x7ad   :  { %v1913_v0 = vpop.permute.xlu2 %1912 }
 0x7ae   :  { %v1907_v53 = vpop.permute.xlu1 %1906  ;;  %vm3578_vm8 = vcmp.gt.f32.partialorder %v1913_v0, 0.0 }
 0x7af   :  { %vm3577_vm2 = vcmp.gt.f32.partialorder %v1907_v53, 0.0  ;;  %v5114_v3 = vsel %vm3578_vm8, %v10014_v15, -inf }
 0x7b0   :  { %v5113_v36 = vsel %vm3577_vm2, %v10002_v63, -inf  ;;  %v6086_v51 = vsel %vm42_vm0, %v5114_v3, -inf  ;;  %vm3585_vm2 = vcmp.gt.f32.partialorder %v11756_v54, 0.0 }
 0x7b1   :  { %v6084_v46 = vsel %vm42_vm0, %v5113_v36, -inf  ;;  %v5121_v55 = vsel %vm3585_vm2, %v10002_v63, -inf }
 0x7b3   :  { %2004 = vperm.xlu2 %7358, %v11752_v50   ;;  %v6080_v50 = vsel %vm42_vm0, %v5111_v42, -inf }
 0x7b4   :  { %7361 = vset.pattern.permute.xlu1 %v7829_v40  ;;  %v6081_v49 = vmax.f32 %v6079_v28, %v6080_v50 }
 0x7b6   :  { %v6083_v53 = vmax.f32 %v6081_v49, %v6082_v57 }
 0x7b8   :  { %v6085_v0 = vmax.f32 %v6083_v53, %v6084_v46 }
 0x7ba   :  { %v6087_v7 = vmax.f32 %v6085_v0, %v6086_v51 }
 0x7bb   :  { %7360 = vset.pattern.permute.xlu2 %v11688_v48 }
 0x7bc   :  { %2029 = vperm.xlu1 %7361, %v11753_v6  }
 0x7bd   :  { %v1932_v59 = vpop.permute.xlu2 %1931 }
 0x7be   :  { %v1919_v10 = vpop.permute.xlu1 %1918  ;;  %vm3581_vm7 = vcmp.gt.f32.partialorder %v1932_v59, 0.0 }
 0x7bf   :  { %v5117_v60 = vsel %vm3581_vm7, %v10074_v61, -inf  ;;  %vm3579_vm15 = vcmp.gt.f32.partialorder %v1919_v10, 0.0 }
 0x7c0   :  { %v6097_v45 = vsel %vm42_vm0, %v5117_v60, -inf  ;;  %v5115_v24 = vsel %vm3579_vm15, %v9898_v52, -inf }
 0x7c1   :  { %v6098_v22 = vmax.f32 %v6096_v13, %v6097_v45  ;;  %v6088_v59 = vsel %vm42_vm0, %v5115_v24, -inf  ;;  %v11757_v45 = vld [vmem:[#allocation27_spill] sm:$0xff] }
 0x7c2   :  { %v6089_v23 = vmax.f32 %v6087_v7, %v6088_v59 }
 0x7c3   :  { %2023 = vperm.xlu2 %7360, %v11753_v6  }
 0x7c4   :  { %7363 = vset.pattern.permute.xlu1 %v7777_v30  ;;  %v6090_v60 = vrot.slane %v6089_v23, 4 }
 0x7c6   :  { %v6091_v53 = vmax.f32 %v6089_v23, %v6090_v60 }
 0x7c8   :  { %v6092_v24 = vrot.slane %v6091_v53, 2 }
 0x7ca   :  { %v6093_v59 = vmax.f32 %v6091_v53, %v6092_v24 }
 0x7cb   :  { %7362 = vset.pattern.permute.xlu2 %v11704_v58 }
 0x7cc   :  { %2041 = vperm.xlu1 %7363, %v11753_v6  }
 0x7cd   :  { %v1944_v1 = vpop.permute.xlu2 %1943 }
 0x7ce   :  { %v1938_v12 = vpop.permute.xlu1 %1937  ;;  %vm3583_vm1 = vcmp.gt.f32.partialorder %v1944_v1, 0.0  ;;  %v6105_v1 = vsel %vm42_vm0, %v5121_v55, -inf }
 0x7cf   :  { %vm3582_vm9 = vcmp.gt.f32.partialorder %v1938_v12, 0.0  ;;  %v5119_v42 = vsel %vm3583_vm1, %v9979_v26, -inf }
 0x7d0   :  { %v5118_v62 = vsel %vm3582_vm9, %v9972_v32, -inf  ;;  %v6101_v12 = vsel %vm42_vm0, %v5119_v42, -inf }
 0x7d1   :  { %v6099_v20 = vsel %vm42_vm0, %v5118_v62, -inf }
 0x7d2   :  { %v6100_v28 = vmax.f32 %v6098_v22, %v6099_v20 }
 0x7d3   :  { %2035 = vperm.xlu2 %7362, %v11753_v6  }
 0x7d4   :  { %7365 = vset.pattern.permute.xlu1 %v7814_v37  ;;  %v6102_v57 = vmax.f32 %v6100_v28, %v6101_v12  ;;  %v6094_v28 = vrot.slane %v6093_v59, 1 }
 0x7d6   :  { %v6095_v23 = vmax.f32 %v6093_v59, %v6094_v28 }
 0x7db   :  { %7364 = vset.pattern.permute.xlu2 %v11695_v29 }
 0x7dc   :  { %2059 = vperm.xlu1 %7365, %v11753_v6  }
 0x7dd   :  { %v1962_v49 = vpop.permute.xlu2 %1961 }
 0x7de   :  { %v1950_v10 = vpop.permute.xlu1 %1949  ;;  %vm3586_vm6 = vcmp.gt.f32.partialorder %v1962_v49, 0.0 }
 0x7df   :  { %vm3584_vm14 = vcmp.gt.f32.partialorder %v1950_v10, 0.0  ;;  %v5122_v13 = vsel %vm3586_vm6, %v10014_v15, -inf }
 0x7e0   :  { %v5120_v50 = vsel %vm3584_vm14, %v9992_v41, -inf  ;;  %v6107_v62 = vsel %vm42_vm0, %v5122_v13, -inf }
 0x7e1   :  { %v6103_v36 = vsel %vm42_vm0, %v5120_v50, -inf }
 0x7e2   :  { %v6104_v46 = vmax.f32 %v6102_v57, %v6103_v36  ;;  %v6785_v36 = vsel %vm6752_vm5, %v6095_v23, %v10055_v17  ;;  %v11758_v57 = vld [vmem:[#allocation82_spill] sm:$0xff] }
 0x7e3   :  { %2053 = vperm.xlu2 %7364, %v11753_v6  }
 0x7e4   :  { %7367 = vset.pattern.permute.xlu1 %v11688_v48  ;;  %v6106_v3 = vmax.f32 %v6104_v46, %v6105_v1 }
 0x7e6   :  { %v6108_v51 = vmax.f32 %v6106_v3, %v6107_v62  ;;  %v11759_v3 = vld [vmem:[#allocation83_spill] sm:$0xff] }
 0x7e7   :  { %vm3590_vm15 = vcmp.gt.f32.partialorder %v11759_v3, 0.0 }
 0x7e8   :  { %v5126_v24 = vsel %vm3590_vm15, %v9972_v32, -inf }
 0x7eb   :  { %7366 = vset.pattern.permute.xlu2 %v7702_v11 }
 0x7ec   :  { %2072 = vperm.xlu1 %7367, %v11757_v45  }
 0x7ee   :  { %v1968_v0 = vpop.permute.xlu1 %1967 }
 0x7ef   :  { %vm3587_vm7 = vcmp.gt.f32.partialorder %v1968_v0, 0.0 }
 0x7f0   :  { %v5123_v22 = vsel %vm3587_vm7, %v9898_v52, -inf }
 0x7f1   :  { %v6109_v10 = vsel %vm42_vm0, %v5123_v22, -inf }
 0x7f2   :  { %v6110_v20 = vmax.f32 %v6108_v51, %v6109_v10  ;;  %v6120_v10 = vsel %vm42_vm0, %v5126_v24, -inf }
 0x7f3   :  { %2065 = vperm.xlu2 %7366, %v11753_v6   ;;  %v1975_v6 = vpop.permute.xlu2 %1974 }
 0x7f4   :  { %v6111_v42 = vrot.slane %v6110_v20, 4  ;;  %7369 = vset.pattern.permute.xlu1 %v7777_v30  ;;  %vm3588_vm8 = vcmp.gt.f32.partialorder %v1975_v6, 0.0 }
 0x7f5   :  { %v5124_v13 = vsel %vm3588_vm8, %v9958_v44, -inf }
 0x7f6   :  { %v6112_v7 = vmax.f32 %v6110_v20, %v6111_v42  ;;  %v6117_v62 = vsel %vm42_vm0, %v5124_v13, -inf }
 0x7f8   :  { %v6113_v50 = vrot.slane %v6112_v7, 2 }
 0x7fa   :  { %v6114_v54 = vmax.f32 %v6112_v7, %v6113_v50 }
 0x7fb   :  { %7368 = vset.pattern.permute.xlu2 %v11704_v58 }
 0x7fc   :  { %v6115_v12 = vrot.slane %v6114_v54, 1  ;;  %2090 = vperm.xlu1 %7369, %v11757_v45  }
 0x7fd   :  { %v1993_v60 = vpop.permute.xlu2 %1992 }
 0x7fe   :  { %v6116_v49 = vmax.f32 %v6114_v54, %v6115_v12  ;;  %v1981_v17 = vpop.permute.xlu1 %1980  ;;  %vm3591_vm1 = vcmp.gt.f32.partialorder %v1993_v60, 0.0 }
 0x7ff   :  { %vm3589_vm9 = vcmp.gt.f32.partialorder %v1981_v17, 0.0  ;;  %v5127_v20 = vsel %vm3591_vm1, %v9979_v26, -inf }
 0x800   :  { %v10127_v55 = vsel %vm6754_vm10, %v6116_v49, %v6785_v36  ;;  %v5125_v53 = vsel %vm3589_vm9, %v10074_v61, -inf  ;;  %v6122_v7 = vsel %vm42_vm0, %v5127_v20, -inf  ;;  %v11760_v49 = vld [vmem:[#allocation30_spill] sm:$0xff]  ;;  %v11761_v20 = vld [vmem:[#allocation140_spill] sm:$0xff] }
 0x801   :  { %vm3595_vm9 = vcmp.gt.f32.partialorder %v11760_v49, 0.0 }
 0x803   :  { %2084 = vperm.xlu2 %7368, %v11757_v45  }
 0x804   :  { %7371 = vset.pattern.permute.xlu1 %v11695_v29 }
 0x80b   :  { %7370 = vset.pattern.permute.xlu2 %v7797_v34 }
 0x80c   :  { %2102 = vperm.xlu1 %7371, %v11757_v45  }
 0x80d   :  { %v2005_v1 = vpop.permute.xlu2 %2004 }
 0x80e   :  { %v1999_v46 = vpop.permute.xlu1 %1998  ;;  %vm3593_vm2 = vcmp.gt.f32.partialorder %v2005_v1, 0.0  ;;  %v5131_v1 = vsel %vm3595_vm9, %v9898_v52, -inf }
 0x80f   :  { %vm3592_vm14 = vcmp.gt.f32.partialorder %v1999_v46, 0.0  ;;  %v5129_v23 = vsel %vm3593_vm2, %v10002_v63, -inf }
 0x810   :  { %v5128_v42 = vsel %vm3592_vm14, %v9992_v41, -inf  ;;  %v6126_v17 = vsel %vm42_vm0, %v5129_v23, -inf  ;;  %vm3600_vm14 = vcmp.gt.f32.partialorder %v11761_v20, 0.0 }
 0x811   :  { %v6124_v50 = vsel %vm42_vm0, %v5128_v42, -inf }
 0x813   :  { %2096 = vperm.xlu2 %7370, %v11757_v45  }
 0x814   :  { %7373 = vset.pattern.permute.xlu1 %v11688_v48 }
 0x81b   :  { %7372 = vset.pattern.permute.xlu2 %v7702_v11 }
 0x81c   :  { %2121 = vperm.xlu1 %7373, %v11758_v57  }
 0x81d   :  { %v2024_v51 = vpop.permute.xlu2 %2023 }
 0x81e   :  { %v2011_v0 = vpop.permute.xlu1 %2010  ;;  %vm3596_vm7 = vcmp.gt.f32.partialorder %v2024_v51, 0.0  ;;  %v6130_v51 = vsel %vm42_vm0, %v5131_v1, -inf }
 0x81f   :  { %vm3594_vm6 = vcmp.gt.f32.partialorder %v2011_v0, 0.0  ;;  %v5132_v60 = vsel %vm3596_vm7, %v9958_v44, -inf }
 0x820   :  { %v5130_v6 = vsel %vm3594_vm6, %v10014_v15, -inf }
 0x821   :  { %v6128_v13 = vsel %vm42_vm0, %v5130_v6, -inf }
 0x823   :  { %2114 = vperm.xlu2 %7372, %v11757_v45   ;;  %v6118_v45 = vsel %vm42_vm0, %v5125_v53, -inf }
 0x824   :  { %7375 = vset.pattern.permute.xlu1 %v11704_v58  ;;  %v6119_v22 = vmax.f32 %v6117_v62, %v6118_v45  ;;  %v6138_v62 = vsel %vm42_vm0, %v5132_v60, -inf }
 0x826   :  { %v6121_v59 = vmax.f32 %v6119_v22, %v6120_v10 }
 0x828   :  { %v6123_v54 = vmax.f32 %v6121_v59, %v6122_v7 }
 0x82a   :  { %v6125_v36 = vmax.f32 %v6123_v54, %v6124_v50  ;;  %v5136_v50 = vsel %vm3600_vm14, %v9992_v41, -inf }
 0x82b   :  { %7374 = vset.pattern.permute.xlu2 %v7829_v40 }
 0x82c   :  { %2133 = vperm.xlu1 %7375, %v11758_v57   ;;  %v6127_v3 = vmax.f32 %v6125_v36, %v6126_v17 }
 0x82d   :  { %v2036_v12 = vpop.permute.xlu2 %2035 }
 0x82e   :  { %v2030_v28 = vpop.permute.xlu1 %2029  ;;  %vm3598_vm15 = vcmp.gt.f32.partialorder %v2036_v12, 0.0  ;;  %v6129_v24 = vmax.f32 %v6127_v3, %v6128_v13  ;;  %v6145_v12 = vsel %vm42_vm0, %v5136_v50, -inf }
 0x82f   :  { %vm3597_vm8 = vcmp.gt.f32.partialorder %v2030_v28, 0.0  ;;  %v5134_v0 = vsel %vm3598_vm15, %v9972_v32, -inf }
 0x830   :  { %v5133_v46 = vsel %vm3597_vm8, %v10074_v61, -inf  ;;  %v6141_v59 = vsel %vm42_vm0, %v5134_v0, -inf  ;;  %v6131_v7 = vmax.f32 %v6129_v24, %v6130_v51 }
 0x831   :  { %v6139_v45 = vsel %vm42_vm0, %v5133_v46, -inf }
 0x832   :  { %v6140_v22 = vmax.f32 %v6138_v62, %v6139_v45  ;;  %v6132_v49 = vrot.slane %v6131_v7, 4 }
 0x833   :  { %2127 = vperm.xlu2 %7374, %v11758_v57  }
 0x834   :  { %7377 = vset.pattern.permute.xlu1 %v11695_v29  ;;  %v6142_v54 = vmax.f32 %v6140_v22, %v6141_v59  ;;  %v6133_v17 = vmax.f32 %v6131_v7, %v6132_v49 }
 0x836   :  { %v6134_v62 = vrot.slane %v6133_v17, 2 }
 0x838   :  { %v6135_v22 = vmax.f32 %v6133_v17, %v6134_v62 }
 0x83a   :  { %v6136_v59 = vrot.slane %v6135_v22, 1 }
 0x83b   :  { %7376 = vset.pattern.permute.xlu2 %v7797_v34 }
 0x83c   :  { %2151 = vperm.xlu1 %7377, %v11758_v57   ;;  %v6137_v50 = vmax.f32 %v6135_v22, %v6136_v59 }
 0x83d   :  { %v2054_v42 = vpop.permute.xlu2 %2053 }
 0x83e   :  { %v2042_v53 = vpop.permute.xlu1 %2041  ;;  %vm3601_vm2 = vcmp.gt.f32.partialorder %v2054_v42, 0.0 }
 0x83f   :  { %vm3599_vm1 = vcmp.gt.f32.partialorder %v2042_v53, 0.0  ;;  %v5137_v36 = vsel %vm3601_vm2, %v10002_v63, -inf  ;;  %vm3610_vm2 = vcmp.gt.f32.partialorder %v9294_v31, 0.0 }
 0x840   :  { %v5135_v10 = vsel %vm3599_vm1, %v9979_v26, -inf  ;;  %v6147_v60 = vsel %vm42_vm0, %v5137_v36, -inf  ;;  %v5146_v59 = vsel %vm3610_vm2, %v10014_v15, -inf }
 0x841   :  { %v6143_v28 = vsel %vm42_vm0, %v5135_v10, -inf  ;;  %v6170_v31 = vsel %vm42_vm0, %v5146_v59, -inf }
 0x842   :  { %v6144_v23 = vmax.f32 %v6142_v54, %v6143_v28  ;;  %v11762_v28 = vld [vmem:[#allocation48_spill] sm:$0xff] }
 0x843   :  { %2145 = vperm.xlu2 %7376, %v11758_v57  }
 0x844   :  { %7379 = vset.pattern.permute.xlu1 %v7702_v11  ;;  %v6146_v6 = vmax.f32 %v6144_v23, %v6145_v12  ;;  %v6787_v12 = vsel %vm6756_vm11, %v6137_v50, %v10127_v55 }
 0x846   :  { %v6148_v53 = vmax.f32 %v6146_v6, %v6147_v60  ;;  %v11763_v6 = vld [vmem:[#allocation49_spill] sm:$0xff] }
 0x847   :  { %vm3605_vm8 = vcmp.gt.f32.partialorder %v11763_v6, 0.0 }
 0x848   :  { %v5141_v17 = vsel %vm3605_vm8, %v10074_v61, -inf }
 0x84b   :  { %7378 = vset.pattern.permute.xlu2 %v7814_v37 }
 0x84c   :  { %2163 = vperm.xlu1 %7379, %v11758_v57  }
 0x84d   :  { %v2066_v46 = vpop.permute.xlu2 %2065 }
 0x84e   :  { %v2060_v1 = vpop.permute.xlu1 %2059  ;;  %vm3603_vm6 = vcmp.gt.f32.partialorder %v2066_v46, 0.0  ;;  %v6160_v46 = vsel %vm42_vm0, %v5141_v17, -inf }
 0x84f   :  { %vm3602_vm7 = vcmp.gt.f32.partialorder %v2060_v1, 0.0  ;;  %v5139_v13 = vsel %vm3603_vm6, %v9898_v52, -inf }
 0x850   :  { %v5138_v3 = vsel %vm3602_vm7, %v10014_v15, -inf  ;;  %v6151_v0 = vsel %vm42_vm0, %v5139_v13, -inf }
 0x851   :  { %v6149_v45 = vsel %vm42_vm0, %v5138_v3, -inf }
 0x852   :  { %v6150_v24 = vmax.f32 %v6148_v53, %v6149_v45 }
 0x853   :  { %2157 = vperm.xlu2 %7378, %v11758_v57  }
 0x854   :  { %v6152_v51 = vmax.f32 %v6150_v24, %v6151_v0  ;;  %7381 = vset.pattern.permute.xlu1 %v11704_v58 }
 0x856   :  { %v6153_v10 = vrot.slane %v6152_v51, 4 }
 0x858   :  { %v6154_v20 = vmax.f32 %v6152_v51, %v6153_v10 }
 0x85a   :  { %v6155_v42 = vrot.slane %v6154_v20, 2 }
 0x85b   :  { %7380 = vset.pattern.permute.xlu2 %v7829_v40 }
 0x85c   :  { %v6156_v7 = vmax.f32 %v6154_v20, %v6155_v42  ;;  %2182 = vperm.xlu1 %7381, %v11762_v28  }
 0x85d   :  { %v2085_v36 = vpop.permute.xlu2 %2084 }
 0x85e   :  { %v6157_v54 = vrot.slane %v6156_v7, 1  ;;  %v2073_v49 = vpop.permute.xlu1 %2072  ;;  %vm3606_vm15 = vcmp.gt.f32.partialorder %v2085_v36, 0.0 }
 0x85f   :  { %vm3604_vm9 = vcmp.gt.f32.partialorder %v2073_v49, 0.0  ;;  %v5142_v13 = vsel %vm3606_vm15, %v9972_v32, -inf }
 0x860   :  { %v6158_v23 = vmax.f32 %v6156_v7, %v6157_v54  ;;  %v5140_v60 = vsel %vm3604_vm9, %v9958_v44, -inf  ;;  %v6162_v45 = vsel %vm42_vm0, %v5142_v13, -inf }
 0x861   :  { %v6159_v1 = vsel %vm42_vm0, %v5140_v60, -inf }
 0x862   :  { %v6788_v57 = vsel %vm6758_vm12, %v6158_v23, %v6787_v12  ;;  %v6161_v3 = vmax.f32 %v6159_v1, %v6160_v46  ;;  %v11764_v46 = vld [vmem:[#allocation10_spill] sm:$0xff] }
 0x863   :  { %2176 = vperm.xlu2 %7380, %v11762_v28  }
 0x864   :  { %7383 = vset.pattern.permute.xlu1 %v7797_v34  ;;  %v6163_v24 = vmax.f32 %v6161_v3, %v6162_v45  ;;  %v11766_v45 = vld [vmem:[#allocation29_spill] sm:$0xff] }
 0x86b   :  { %7382 = vset.pattern.permute.xlu2 %v7777_v30 }
 0x86c   :  { %2194 = vperm.xlu1 %7383, %v11762_v28  }
 0x86d   :  { %v2097_v53 = vpop.permute.xlu2 %2096 }
 0x86e   :  { %v2091_v55 = vpop.permute.xlu1 %2090  ;;  %vm3608_vm14 = vcmp.gt.f32.partialorder %v2097_v53, 0.0 }
 0x86f   :  { %vm3607_vm1 = vcmp.gt.f32.partialorder %v2091_v55, 0.0  ;;  %v5144_v51 = vsel %vm3608_vm14, %v9992_v41, -inf }
 0x870   :  { %v5143_v62 = vsel %vm3607_vm1, %v9979_v26, -inf  ;;  %v6166_v10 = vsel %vm42_vm0, %v5144_v51, -inf }
 0x871   :  { %v6164_v0 = vsel %vm42_vm0, %v5143_v62, -inf }
 0x872   :  { %v6165_v22 = vmax.f32 %v6163_v24, %v6164_v0 }
 0x873   :  { %2188 = vperm.xlu2 %7382, %v11762_v28  }
 0x874   :  { %7385 = vset.pattern.permute.xlu1 %v7702_v11  ;;  %v6167_v7 = vmax.f32 %v6165_v22, %v6166_v10 }
 0x87b   :  { %7384 = vset.pattern.permute.xlu2 %v7814_v37 }
 0x87c   :  { %2212 = vperm.xlu1 %7385, %v11762_v28  }
 0x87d   :  { %v2115_v20 = vpop.permute.xlu2 %2114 }
 0x87e   :  { %v2103_v42 = vpop.permute.xlu1 %2102  ;;  %vm3611_vm6 = vcmp.gt.f32.partialorder %v2115_v20, 0.0 }
 0x87f   :  { %vm3609_vm7 = vcmp.gt.f32.partialorder %v2103_v42, 0.0  ;;  %v5147_v54 = vsel %vm3611_vm6, %v9898_v52, -inf }
 0x880   :  { %v5145_v50 = vsel %vm3609_vm7, %v10002_v63, -inf  ;;  %v6172_v49 = vsel %vm42_vm0, %v5147_v54, -inf }
 0x881   :  { %v6168_v23 = vsel %vm42_vm0, %v5145_v50, -inf }
 0x882   :  { %v6169_v12 = vmax.f32 %v6167_v7, %v6168_v23 }
 0x883   :  { %2206 = vperm.xlu2 %7384, %v11762_v28  }
 0x884   :  { %v6171_v36 = vmax.f32 %v6169_v12, %v6170_v31  ;;  %7387 = vset.pattern.permute.xlu1 %v7829_v40  ;;  %v11767_v31 = vld [vmem:[#allocation84_spill] sm:$0xff] }
 0x886   :  { %v6173_v6 = vmax.f32 %v6171_v36, %v6172_v49  ;;  %v11768_v49 = vld [vmem:[#allocation65_spill] sm:$0xff] }
 0x887   :  { %vm3620_vm8 = vcmp.gt.f32.partialorder %v11768_v49, 0.0 }
 0x888   :  { %v6174_v17 = vrot.slane %v6173_v6, 4 }
 0x88a   :  { %v6175_v60 = vmax.f32 %v6173_v6, %v6174_v17  ;;  %v5156_v17 = vsel %vm3620_vm8, %v9958_v44, -inf }
 0x88b   :  { %7386 = vset.pattern.permute.xlu2 %v11688_v48 }
 0x88c   :  { %v6176_v55 = vrot.slane %v6175_v60, 2  ;;  %2225 = vperm.xlu1 %7387, %v11764_v46  }
 0x88d   :  { %v2128_v53 = vpop.permute.xlu2 %2127 }
 0x88e   :  { %v6177_v52 = vmax.f32 %v6175_v60, %v6176_v55  ;;  %v2122_v3 = vpop.permute.xlu1 %2121  ;;  %vm3613_vm15 = vcmp.gt.f32.partialorder %v2128_v53, 0.0  ;;  %v11770_v53 = vld [vmem:[#allocation108_spill] sm:$0xff] }
 0x88f   :  { %vm3612_vm9 = vcmp.gt.f32.partialorder %v2122_v3, 0.0  ;;  %v5149_v55 = vsel %vm3613_vm15, %v10074_v61, -inf  ;;  %vm3615_vm8 = vcmp.gt.f32.partialorder %v11770_v53, 0.0 }
 0x890   :  { %v6178_v1 = vrot.slane %v6177_v52, 1  ;;  %v5148_v60 = vsel %vm3612_vm9, %v9958_v44, -inf }
 0x891   :  { %v6180_v3 = vsel %vm42_vm0, %v5148_v60, -inf }
 0x892   :  { %v6179_v13 = vmax.f32 %v6177_v52, %v6178_v1 }
 0x893   :  { %2219 = vperm.xlu2 %7386, %v11764_v46  }
 0x894   :  { %7389 = vset.pattern.permute.xlu1 %v7797_v34  ;;  %v10224_v28 = vsel %vm11483_vm13, %v6179_v13, %v6788_v57  ;;  %v11765_v57 = vld [vmem:[#allocation109_spill] sm:$0xff]  ;;  %v6201_v13 = vsel %vm42_vm0, %v5156_v17, -inf  ;;  %v5151_v17 = vsel %vm3615_vm8, %v9979_v26, -inf }
 0x89b   :  { %7388 = vset.pattern.permute.xlu2 %v7777_v30 }
 0x89c   :  { %2243 = vperm.xlu1 %7389, %v11764_v46  }
 0x89d   :  { %v10247_v62 = vpop.permute.xlu2 %2145 }
 0x89e   :  { %v2134_v0 = vpop.permute.xlu1 %2133 }
 0x89f   :  { %vm3614_vm6 = vcmp.gt.f32.partialorder %v2134_v0, 0.0 }
 0x8a0   :  { %v5150_v0 = vsel %vm3614_vm6, %v9972_v32, -inf }
 0x8a1   :  { %v6183_v60 = vsel %vm42_vm0, %v5150_v0, -inf }
 0x8a3   :  { %2237 = vperm.xlu2 %7388, %v11764_v46  }
 0x8a4   :  { %7391 = vset.pattern.permute.xlu1 %v7814_v37 }
 0x8ab   :  { %7390 = vset.pattern.permute.xlu2 %v11695_v29 }
 0x8ac   :  { %2255 = vperm.xlu1 %7391, %v11764_v46  }
 0x8ad   :  { %v10251_v24 = vpop.permute.xlu2 %2157 }
 0x8ae   :  { %v10254_v51 = vpop.permute.xlu1 %2151 }
 0x8af   :  { %vm3617_vm8 = vcmp.gt.f32.partialorder %v10254_v51, 0.0 }
 0x8b3   :  { %2249 = vperm.xlu2 %7390, %v11764_v46  }
 0x8b4   :  { %7393 = vset.pattern.permute.xlu1 %v7829_v40 }
 0x8bb   :  { %7392 = vset.pattern.permute.xlu2 %v11688_v48 }
 0x8bc   :  { %2274 = vperm.xlu1 %7393, %v11765_v57  }
 0x8bd   :  { %v2177_v22 = vpop.permute.xlu2 %2176 }
 0x8be   :  { %v10258_v10 = vpop.permute.xlu1 %2163  ;;  %vm3621_vm1 = vcmp.gt.f32.partialorder %v2177_v22, 0.0 }
 0x8bf   :  { %v5157_v46 = vsel %vm3621_vm1, %v10074_v61, -inf  ;;  %vm3616_vm1 = vcmp.gt.f32.partialorder %v10247_v62, 0.0  ;;  %v6185_v62 = vsel %vm42_vm0, %v5151_v17, -inf }
 0x8c3   :  { %2268 = vperm.xlu2 %7392, %v11765_v57  }
 0x8c4   :  { %7395 = vset.pattern.permute.xlu1 %v7777_v30 }
 0x8cb   :  { %7394 = vset.pattern.permute.xlu2 %v11704_v58 }
 0x8cc   :  { %2286 = vperm.xlu1 %7395, %v11765_v57  }
 0x8cd   :  { %v2189_v59 = vpop.permute.xlu2 %2188 }
 0x8ce   :  { %v2183_v20 = vpop.permute.xlu1 %2182  ;;  %vm3623_vm9 = vcmp.gt.f32.partialorder %v2189_v59, 0.0  ;;  %v11772_v59 = vld [vmem:[#allocation110_spill] sm:$0xff] }
 0x8cf   :  { %vm3622_vm7 = vcmp.gt.f32.partialorder %v2183_v20, 0.0  ;;  %vm3625_vm6 = vcmp.gt.f32.partialorder %v11772_v59, 0.0 }
 0x8d0   :  { %v5158_v22 = vsel %vm3622_vm7, %v9972_v32, -inf }
 0x8d3   :  { %2280 = vperm.xlu2 %7394, %v11765_v57  }
 0x8d4   :  { %7397 = vset.pattern.permute.xlu1 %v7814_v37 }
 0x8db   :  { %7396 = vset.pattern.permute.xlu2 %v11695_v29 }
 0x8dc   :  { %2304 = vperm.xlu1 %7397, %v11765_v57  }
 0x8dd   :  { %v10266_v7 = vpop.permute.xlu2 %2206 }
 0x8de   :  { %v10264_v42 = vpop.permute.xlu1 %2194 }
 0x8e3   :  { %2298 = vperm.xlu2 %7396, %v11765_v57  }
 0x8e4   :  { %7399 = vset.pattern.permute.xlu1 %v11688_v48 }
 0x8eb   :  { %7398 = vset.pattern.permute.xlu2 %v7702_v11 }
 0x8ec   :  { %2317 = vperm.xlu1 %7399, %v11766_v45  }
 0x8ed   :  { %v2220_v54 = vpop.permute.xlu2 %2219 }
 0x8ee   :  { %v10270_v50 = vpop.permute.xlu1 %2212  ;;  %vm3628_vm14 = vcmp.gt.f32.partialorder %v2220_v54, 0.0 }
 0x8ef   :  { %v5164_v52 = vsel %vm3628_vm14, %v9958_v44, -inf  ;;  %v6202_v44 = vsel %vm42_vm0, %v5157_v46, -inf  ;;  %v6204_v46 = vsel %vm42_vm0, %v5158_v22, -inf  ;;  %vm3624_vm14 = vcmp.gt.f32.partialorder %v10264_v42, 0.0 }
 0x8f0   :  { %v6222_v20 = vsel %vm42_vm0, %v5164_v52, -inf  ;;  %v5161_v22 = vsel %vm3625_vm6, %v10002_v63, -inf  ;;  %vm3619_vm6 = vcmp.gt.f32.partialorder %v10258_v10, 0.0 }
 0x8f3   :  { %2310 = vperm.xlu2 %7398, %v11765_v57   ;;  %v11769_v57 = vld [vmem:[#allocation85_spill] sm:$0xff] }
 0x8f4   :  { %7401 = vset.pattern.permute.xlu1 %v7777_v30  ;;  %vm3630_vm13 = vcmp.gt.f32.partialorder %v11769_v57, 0.0 }
 0x8f5   :  { %v5166_v49 = vsel %vm3630_vm13, %v9972_v32, -inf  ;;  %v5159_v32 = vsel %vm3623_vm9, %v9979_v26, -inf  ;;  %vm3626_vm9 = vcmp.gt.f32.partialorder %v10266_v7, 0.0 }
 0x8fb   :  { %7400 = vset.pattern.permute.xlu2 %v11704_v58 }
 0x8fc   :  { %2335 = vperm.xlu1 %7401, %v11766_v45  }
 0x8fd   :  { %v2238_v12 = vpop.permute.xlu2 %2237 }
 0x8fe   :  { %v2226_v23 = vpop.permute.xlu1 %2225  ;;  %vm3631_vm15 = vcmp.gt.f32.partialorder %v2238_v12, 0.0 }
 0x8ff   :  { %vm3629_vm2 = vcmp.gt.f32.partialorder %v2226_v23, 0.0  ;;  %v5167_v12 = vsel %vm3631_vm15, %v9979_v26, -inf  ;;  %v10318_v26 = vld [vmem:[%s11369_s0 + $0x38] sm:$0xff] }
 0x900   :  { %v5165_v1 = vsel %vm3629_vm2, %v10074_v61, -inf  ;;  %vm3635_vm2 = vcmp.gt.f32.partialorder %v11771_v18, 0.0  ;;  %v5155_v10 = vsel %vm3619_vm6, %v10318_v26, -inf }
 0x901   :  { %v6223_v54 = vsel %vm42_vm0, %v5165_v1, -inf  ;;  %v6225_v1 = vsel %vm42_vm0, %v5166_v49, -inf }
 0x902   :  { %v6224_v52 = vmax.f32 %v6222_v20, %v6223_v54  ;;  %v6227_v20 = vsel %vm42_vm0, %v5167_v12, -inf }
 0x903   :  { %2329 = vperm.xlu2 %7400, %v11766_v45  }
 0x904   :  { %7403 = vset.pattern.permute.xlu1 %v11695_v29  ;;  %v6226_v0 = vmax.f32 %v6224_v52, %v6225_v1  ;;  %v5153_v52 = vsel %vm3617_vm8, %v10002_v63, -inf }
 0x905   :  { %v6189_v12 = vsel %vm42_vm0, %v5153_v52, -inf  ;;  %v11773_v52 = vld [vmem:[#allocation141_spill] sm:$0xff] }
 0x90b   :  { %7402 = vset.pattern.permute.xlu2 %v7797_v34 }
 0x90c   :  { %2347 = vperm.xlu1 %7403, %v11766_v45  }
 0x90d   :  { %v10277_v6 = vpop.permute.xlu2 %2249 }
 0x90e   :  { %v2244_v36 = vpop.permute.xlu1 %2243  ;;  %vm3633_vm7 = vcmp.gt.f32.partialorder %v10277_v6, 0.0  ;;  %v6210_v6 = vsel %vm42_vm0, %v5161_v22, -inf }
 0x90f   :  { %vm3632_vm13 = vcmp.gt.f32.partialorder %v2244_v36, 0.0  ;;  %v6206_v36 = vsel %vm42_vm0, %v5159_v32, -inf  ;;  %v5162_v32 = vsel %vm3626_vm9, %v10014_v15, -inf  ;;  %vm3640_vm9 = vcmp.gt.f32.partialorder %v11773_v52, 0.0 }
 0x910   :  { %v5168_v18 = vsel %vm3632_vm13, %v9992_v41, -inf  ;;  %vm3618_vm13 = vcmp.gt.f32.partialorder %v10251_v24, 0.0 }
 0x913   :  { %2341 = vperm.xlu2 %7402, %v11766_v45  }
 0x914   :  { %7405 = vset.pattern.permute.xlu1 %v11688_v48 }
 0x91b   :  { %7404 = vset.pattern.permute.xlu2 %v7702_v11 }
 0x91c   :  { %2366 = vperm.xlu1 %7405, %v11767_v31  }
 0x91d   :  { %v2269_v53 = vpop.permute.xlu2 %2268 }
 0x91e   :  { %v2256_v23 = vpop.permute.xlu1 %2255 }
 0x91f   :  { %vm3634_vm15 = vcmp.gt.f32.partialorder %v2256_v23, 0.0 }
 0x920   :  { %v5170_v23 = vsel %vm3634_vm15, %v10014_v15, -inf }
 0x923   :  { %2359 = vperm.xlu2 %7404, %v11766_v45   ;;  %v6181_v45 = vsel %vm42_vm0, %v5149_v55, -inf  ;;  %v6203_v55 = vmax.f32 %v6201_v13, %v6202_v44  ;;  %v5152_v13 = vsel %vm3616_vm1, %v9992_v41, -inf  ;;  %v5171_v44 = vsel %vm3635_vm2, %v10318_v26, -inf }
 0x924   :  { %7407 = vset.pattern.permute.xlu1 %v11704_v58  ;;  %v6182_v57 = vmax.f32 %v6180_v3, %v6181_v45  ;;  %v5160_v45 = vsel %vm3624_vm14, %v9992_v41, -inf  ;;  %v6187_v17 = vsel %vm42_vm0, %v5152_v13, -inf  ;;  %vm3636_vm1 = vcmp.gt.f32.partialorder %v2269_v53, 0.0 }
 0x925   :  { %v6205_v42 = vmax.f32 %v6203_v55, %v6204_v46  ;;  %v6208_v41 = vsel %vm42_vm0, %v5160_v45, -inf  ;;  %v6228_v55 = vmax.f32 %v6226_v0, %v6227_v20  ;;  %v5169_v46 = vsel %vm3633_vm7, %v10002_v63, -inf  ;;  %v10341_v63 = vld [vmem:[%s11369_s0] sm:$0xff] }
 0x926   :  { %v6184_v3 = vmax.f32 %v6182_v57, %v6183_v60  ;;  %v6229_v60 = vsel %vm42_vm0, %v5168_v18, -inf  ;;  %vm3627_vm2 = vcmp.gt.f32.partialorder %v10270_v50, 0.0  ;;  %v6231_v53 = vsel %vm42_vm0, %v5169_v46, -inf  ;;  %v10369_v46 = vld [vmem:[%s11369_s0 + $0x18] sm:$0xff] }
 0x927   :  { %v6207_v57 = vmax.f32 %v6205_v42, %v6206_v36  ;;  %v6230_v7 = vmax.f32 %v6228_v55, %v6229_v60  ;;  %v5172_v24 = vsel %vm3636_vm1, %v10341_v63, -inf  ;;  %v6212_v42 = vsel %vm42_vm0, %v5162_v32, -inf }
 0x928   :  { %v6186_v49 = vmax.f32 %v6184_v3, %v6185_v62  ;;  %v5154_v62 = vsel %vm3618_vm13, %v10014_v15, -inf  ;;  %v5163_v45 = vsel %vm3627_vm2, %v10318_v26, -inf  ;;  %v6233_v36 = vsel %vm42_vm0, %v5170_v23, -inf }
 0x929   :  { %v6209_v51 = vmax.f32 %v6207_v57, %v6208_v41  ;;  %v6232_v18 = vmax.f32 %v6230_v7, %v6231_v53  ;;  %v6243_v22 = vsel %vm42_vm0, %v5172_v24, -inf  ;;  %v6235_v57 = vsel %vm42_vm0, %v5171_v44, -inf  ;;  %v10381_v53 = vld [vmem:[%s11369_s0 + $0x20] sm:$0xff] }
 0x92a   :  { %v6188_v59 = vmax.f32 %v6186_v49, %v6187_v17  ;;  %v6191_v49 = vsel %vm42_vm0, %v5154_v62, -inf  ;;  %v6214_v17 = vsel %vm42_vm0, %v5163_v45, -inf  ;;  %v5176_v24 = vsel %vm3640_vm9, %v10381_v53, -inf }
 0x92b   :  { %7406 = vset.pattern.permute.xlu2 %v7829_v40  ;;  %v6211_v13 = vmax.f32 %v6209_v51, %v6210_v6  ;;  %v6234_v41 = vmax.f32 %v6232_v18, %v6233_v36  ;;  %v6193_v51 = vsel %vm42_vm0, %v5155_v10, -inf  ;;  %vm3650_vm9 = vcmp.gt.f32.partialorder %v9319_v9, 0.0 }
 0x92c   :  { %2378 = vperm.xlu1 %7407, %v11767_v31   ;;  %v6190_v15 = vmax.f32 %v6188_v59, %v6189_v12 }
 0x92d   :  { %v2281_v1 = vpop.permute.xlu2 %2280  ;;  %v6213_v60 = vmax.f32 %v6211_v13, %v6212_v42  ;;  %v6236_v23 = vmax.f32 %v6234_v41, %v6235_v57  ;;  %v6250_v42 = vsel %vm42_vm0, %v5176_v24, -inf }
 0x92e   :  { %v2275_v54 = vpop.permute.xlu1 %2274  ;;  %vm3638_vm7 = vcmp.gt.f32.partialorder %v2281_v1, 0.0  ;;  %v6192_v32 = vmax.f32 %v6190_v15, %v6191_v49 }
 0x92f   :  { %vm3637_vm14 = vcmp.gt.f32.partialorder %v2275_v54, 0.0  ;;  %v10360_v54 = vld [vmem:[%s11369_s0 + $0x10] sm:$0xff]  ;;  %v6215_v7 = vmax.f32 %v6213_v60, %v6214_v17  ;;  %v6237_v45 = vrot.slane %v6236_v23, 4 }
 0x930   :  { %v5173_v3 = vsel %vm3637_vm14, %v10074_v61, -inf  ;;  %v5174_v50 = vsel %vm3638_vm7, %v10360_v54, -inf }
 0x931   :  { %v6244_v20 = vsel %vm42_vm0, %v5173_v3, -inf  ;;  %v6246_v1 = vsel %vm42_vm0, %v5174_v50, -inf  ;;  %v6194_v3 = vmax.f32 %v6192_v32, %v6193_v51  ;;  %v6216_v62 = vrot.slane %v6215_v7, 4 }
 0x932   :  { %v6245_v55 = vmax.f32 %v6243_v22, %v6244_v20  ;;  %v6238_v15 = vmax.f32 %v6236_v23, %v6237_v45 }
 0x933   :  { %2372 = vperm.xlu2 %7406, %v11767_v31   ;;  %v6195_v36 = vrot.slane %v6194_v3, 4  ;;  %v6217_v22 = vmax.f32 %v6215_v7, %v6216_v62 }
 0x934   :  { %7409 = vset.pattern.permute.xlu1 %v11695_v29  ;;  %v6247_v12 = vmax.f32 %v6245_v55, %v6246_v1  ;;  %v10398_v55 = vld [vmem:[%s11369_s0 + $0x30] sm:$0xff]  ;;  %v6239_v52 = vrot.slane %v6238_v15, 2 }
 0x935   :  { %v6196_v49 = vmax.f32 %v6194_v3, %v6195_v36  ;;  %v6218_v57 = vrot.slane %v6217_v22, 2 }
 0x937   :  { %v6197_v32 = vrot.slane %v6196_v49, 2 }
 0x939   :  { %v6198_v24 = vmax.f32 %v6196_v49, %v6197_v32 }
 0x93b   :  { %7408 = vset.pattern.permute.xlu2 %v7797_v34 }
 0x93c   :  { %2396 = vperm.xlu1 %7409, %v11767_v31  }
 0x93d   :  { %v2299_v44 = vpop.permute.xlu2 %2298 }
 0x93e   :  { %v2287_v0 = vpop.permute.xlu1 %2286  ;;  %vm3641_vm15 = vcmp.gt.f32.partialorder %v2299_v44, 0.0  ;;  %v6219_v44 = vmax.f32 %v6217_v22, %v6218_v57 }
 0x93f   :  { %vm3639_vm8 = vcmp.gt.f32.partialorder %v2287_v0, 0.0  ;;  %v10388_v0 = vld [vmem:[%s11369_s0 + $0x28] sm:$0xff] }
 0x940   :  { %v5175_v6 = vsel %vm3639_vm8, %v10369_v46, -inf  ;;  %v5177_v18 = vsel %vm3641_vm15, %v10388_v0, -inf }
 0x941   :  { %v6248_v59 = vsel %vm42_vm0, %v5175_v6, -inf  ;;  %v6252_v10 = vsel %vm42_vm0, %v5177_v18, -inf }
 0x942   :  { %v6249_v13 = vmax.f32 %v6247_v12, %v6248_v59  ;;  %v6240_v59 = vmax.f32 %v6238_v15, %v6239_v52  ;;  %v6220_v12 = vrot.slane %v6219_v44, 1 }
 0x943   :  { %2390 = vperm.xlu2 %7408, %v11767_v31  }
 0x944   :  { %7411 = vset.pattern.permute.xlu1 %v7702_v11  ;;  %v6251_v20 = vmax.f32 %v6249_v13, %v6250_v42  ;;  %v6241_v13 = vrot.slane %v6240_v59, 1  ;;  %v6199_v42 = vrot.slane %v6198_v24, 1  ;;  %v6221_v36 = vmax.f32 %v6219_v44, %v6220_v12 }
 0x946   :  { %v6253_v60 = vmax.f32 %v6251_v20, %v6252_v10  ;;  %v11774_v20 = vld [vmem:[#allocation50_spill] sm:$0xff]  ;;  %v6242_v10 = vmax.f32 %v6240_v59, %v6241_v13 }
 0x94b   :  { %7410 = vset.pattern.permute.xlu2 %v7814_v37 }
 0x94c   :  { %2408 = vperm.xlu1 %7411, %v11767_v31  }
 0x94d   :  { %v2311_v50 = vpop.permute.xlu2 %2310 }
 0x94e   :  { %v2305_v17 = vpop.permute.xlu1 %2304  ;;  %vm3643_vm1 = vcmp.gt.f32.partialorder %v2311_v50, 0.0 }
 0x94f   :  { %vm3642_vm14 = vcmp.gt.f32.partialorder %v2305_v17, 0.0  ;;  %v5179_v41 = vsel %vm3643_vm1, %v10318_v26, -inf }
 0x950   :  { %v5178_v6 = vsel %vm3642_vm14, %v10398_v55, -inf  ;;  %v6256_v1 = vsel %vm42_vm0, %v5179_v41, -inf }
 0x951   :  { %v6254_v51 = vsel %vm42_vm0, %v5178_v6, -inf }
 0x952   :  { %v6255_v7 = vmax.f32 %v6253_v60, %v6254_v51  ;;  %v11775_v60 = vld [vmem:[#allocation51_spill] sm:$0xff] }
 0x953   :  { %2402 = vperm.xlu2 %7410, %v11767_v31   ;;  %v6200_v31 = vmax.f32 %v6198_v24, %v6199_v42  ;;  %vm3645_vm13 = vcmp.gt.f32.partialorder %v11775_v60, 0.0 }
 0x954   :  { %v6257_v23 = vmax.f32 %v6255_v7, %v6256_v1  ;;  %7413 = vset.pattern.permute.xlu1 %v11704_v58  ;;  %v5181_v6 = vsel %vm3645_vm13, %v10074_v61, -inf }
 0x955   :  { %v6790_v50 = vsel %vm6748_vm3, %v6221_v36, %v6200_v31  ;;  %v6265_v1 = vsel %vm42_vm0, %v5181_v6, -inf }
 0x956   :  { %v6258_v3 = vrot.slane %v6257_v23, 4  ;;  %v6791_v15 = vsel %vm6750_vm4, %v6242_v10, %v6790_v50 }
 0x958   :  { %v6259_v62 = vmax.f32 %v6257_v23, %v6258_v3 }
 0x95a   :  { %v6260_v45 = vrot.slane %v6259_v62, 2 }
 0x95b   :  { %7412 = vset.pattern.permute.xlu2 %v7829_v40 }
 0x95c   :  { %v6261_v18 = vmax.f32 %v6259_v62, %v6260_v45  ;;  %2427 = vperm.xlu1 %7413, %v11774_v20   ;;  %v5186_v45 = vsel %vm3650_vm9, %v10398_v55, -inf }
 0x95d   :  { %v2330_v57 = vpop.permute.xlu2 %2329  ;;  %v6275_v9 = vsel %vm42_vm0, %v5186_v45, -inf }
 0x95e   :  { %v6262_v22 = vrot.slane %v6261_v18, 1  ;;  %v2318_v41 = vpop.permute.xlu1 %2317  ;;  %vm3646_vm6 = vcmp.gt.f32.partialorder %v2330_v57, 0.0 }
 0x95f   :  { %vm3644_vm2 = vcmp.gt.f32.partialorder %v2318_v41, 0.0  ;;  %v5182_v7 = vsel %vm3646_vm6, %v10360_v54, -inf }
 0x960   :  { %v6263_v17 = vmax.f32 %v6261_v18, %v6262_v22  ;;  %v5180_v52 = vsel %vm3644_vm2, %v10341_v63, -inf  ;;  %v6267_v61 = vsel %vm42_vm0, %v5182_v7, -inf }
 0x961   :  { %v6264_v32 = vsel %vm42_vm0, %v5180_v52, -inf  ;;  %v11776_v52 = vld [vmem:[#allocation11_spill] sm:$0xff] }
 0x962   :  { %v6792_v49 = vsel %vm6752_vm5, %v6263_v17, %v6791_v15  ;;  %v6266_v23 = vmax.f32 %v6264_v32, %v6265_v1 }
 0x963   :  { %2421 = vperm.xlu2 %7412, %v11774_v20  }
 0x964   :  { %7415 = vset.pattern.permute.xlu1 %v7797_v34  ;;  %v6268_v3 = vmax.f32 %v6266_v23, %v6267_v61 }
 0x96b   :  { %7414 = vset.pattern.permute.xlu2 %v7777_v30 }
 0x96c   :  { %2439 = vperm.xlu1 %7415, %v11774_v20  }
 0x96d   :  { %v2342_v44 = vpop.permute.xlu2 %2341 }
 0x96e   :  { %v2336_v51 = vpop.permute.xlu1 %2335  ;;  %vm3648_vm8 = vcmp.gt.f32.partialorder %v2342_v44, 0.0 }
 0x96f   :  { %vm3647_vm7 = vcmp.gt.f32.partialorder %v2336_v51, 0.0  ;;  %v5184_v12 = vsel %vm3648_vm8, %v10381_v53, -inf }
 0x970   :  { %v5183_v59 = vsel %vm3647_vm7, %v10369_v46, -inf  ;;  %v6271_v13 = vsel %vm42_vm0, %v5184_v12, -inf  ;;  %v10461_v12 = vld [vmem:[%s11369_s0 + $0x8] sm:$0xff] }
 0x971   :  { %v6269_v24 = vsel %vm42_vm0, %v5183_v59, -inf }
 0x972   :  { %v6270_v62 = vmax.f32 %v6268_v3, %v6269_v24 }
 0x973   :  { %2433 = vperm.xlu2 %7414, %v11774_v20  }
 0x974   :  { %7417 = vset.pattern.permute.xlu1 %v7702_v11  ;;  %v6272_v18 = vmax.f32 %v6270_v62, %v6271_v13 }
 0x97b   :  { %7416 = vset.pattern.permute.xlu2 %v7814_v37 }
 0x97c   :  { %2457 = vperm.xlu1 %7417, %v11774_v20  }
 0x97d   :  { %v2360_v42 = vpop.permute.xlu2 %2359 }
 0x97e   :  { %v2348_v36 = vpop.permute.xlu1 %2347  ;;  %vm3651_vm15 = vcmp.gt.f32.partialorder %v2360_v42, 0.0  ;;  %v11778_v42 = vld [vmem:[#allocation111_spill] sm:$0xff] }
 0x97f   :  { %vm3649_vm1 = vcmp.gt.f32.partialorder %v2348_v36, 0.0  ;;  %v5187_v31 = vsel %vm3651_vm15, %v10318_v26, -inf  ;;  %vm3655_vm6 = vcmp.gt.f32.partialorder %v11778_v42, 0.0 }
 0x980   :  { %v5185_v10 = vsel %vm3649_vm1, %v10388_v0, -inf  ;;  %v6277_v17 = vsel %vm42_vm0, %v5187_v31, -inf }
 0x981   :  { %v6273_v22 = vsel %vm42_vm0, %v5185_v10, -inf }
 0x982   :  { %v6274_v50 = vmax.f32 %v6272_v18, %v6273_v22 }
 0x983   :  { %2451 = vperm.xlu2 %7416, %v11774_v20  }
 0x984   :  { %v6276_v15 = vmax.f32 %v6274_v50, %v6275_v9  ;;  %7419 = vset.pattern.permute.xlu1 %v7829_v40  ;;  %v5191_v9 = vsel %vm3655_vm6, %v10369_v46, -inf }
 0x986   :  { %v6278_v41 = vmax.f32 %v6276_v15, %v6277_v17  ;;  %v6290_v17 = vsel %vm42_vm0, %v5191_v9, -inf  ;;  %v11779_v15 = vld [vmem:[#allocation66_spill] sm:$0xff] }
 0x987   :  { %vm3660_vm9 = vcmp.gt.f32.partialorder %v11779_v15, 0.0 }
 0x988   :  { %v6279_v57 = vrot.slane %v6278_v41, 4 }
 0x98a   :  { %v6280_v60 = vmax.f32 %v6278_v41, %v6279_v57 }
 0x98b   :  { %7418 = vset.pattern.permute.xlu2 %v11688_v48 }
 0x98c   :  { %v6281_v6 = vrot.slane %v6280_v60, 2  ;;  %2470 = vperm.xlu1 %7419, %v11776_v52  }
 0x98d   :  { %v2373_v44 = vpop.permute.xlu2 %2372 }
 0x98e   :  { %v6282_v51 = vmax.f32 %v6280_v60, %v6281_v6  ;;  %v2367_v7 = vpop.permute.xlu1 %2366  ;;  %vm3653_vm13 = vcmp.gt.f32.partialorder %v2373_v44, 0.0 }
 0x98f   :  { %vm3652_vm14 = vcmp.gt.f32.partialorder %v2367_v7, 0.0  ;;  %v5189_v62 = vsel %vm3653_vm13, %v10461_v12, -inf }
 0x990   :  { %v6283_v1 = vrot.slane %v6282_v51, 1  ;;  %v5188_v3 = vsel %vm3652_vm14, %v10341_v63, -inf  ;;  %v6286_v36 = vsel %vm42_vm0, %v5189_v62, -inf }
 0x991   :  { %v6285_v45 = vsel %vm42_vm0, %v5188_v3, -inf }
 0x992   :  { %v6284_v32 = vmax.f32 %v6282_v51, %v6283_v1  ;;  %v6287_v22 = vmax.f32 %v6285_v45, %v6286_v36 }
 0x993   :  { %2464 = vperm.xlu2 %7418, %v11776_v52  }
 0x994   :  { %7421 = vset.pattern.permute.xlu1 %v7797_v34  ;;  %v10443_v20 = vsel %vm6754_vm10, %v6284_v32, %v6792_v49  ;;  %v11777_v49 = vld [vmem:[#allocation112_spill] sm:$0xff] }
 0x99b   :  { %7420 = vset.pattern.permute.xlu2 %v7777_v30 }
 0x99c   :  { %2488 = vperm.xlu1 %7421, %v11776_v52  }
 0x99d   :  { %v2391_v59 = vpop.permute.xlu2 %2390 }
 0x99e   :  { %v2379_v23 = vpop.permute.xlu1 %2378  ;;  %vm3656_vm7 = vcmp.gt.f32.partialorder %v2391_v59, 0.0 }
 0x99f   :  { %vm3654_vm2 = vcmp.gt.f32.partialorder %v2379_v23, 0.0  ;;  %v5192_v41 = vsel %vm3656_vm7, %v10381_v53, -inf }
 0x9a0   :  { %v5190_v13 = vsel %vm3654_vm2, %v10360_v54, -inf  ;;  %v6292_v51 = vsel %vm42_vm0, %v5192_v41, -inf }
 0x9a1   :  { %v6288_v10 = vsel %vm42_vm0, %v5190_v13, -inf }
 0x9a2   :  { %v6289_v50 = vmax.f32 %v6287_v22, %v6288_v10 }
 0x9a3   :  { %2482 = vperm.xlu2 %7420, %v11776_v52  }
 0x9a4   :  { %7423 = vset.pattern.permute.xlu1 %v7814_v37  ;;  %v6291_v60 = vmax.f32 %v6289_v50, %v6290_v17  ;;  %v11780_v50 = vld [vmem:[#allocation96_spill] sm:$0xff] }
 0x9a5   :  { %vm3665_vm7 = vcmp.gt.f32.partialorder %v11780_v50, 0.0 }
 0x9a6   :  { %v6293_v23 = vmax.f32 %v6291_v60, %v6292_v51  ;;  %v5201_v60 = vsel %vm3665_vm7, %v10388_v0, -inf }
 0x9ab   :  { %7422 = vset.pattern.permute.xlu2 %v11695_v29 }
 0x9ac   :  { %2500 = vperm.xlu1 %7423, %v11776_v52  }
 0x9ad   :  { %v2403_v24 = vpop.permute.xlu2 %2402 }
 0x9ae   :  { %v2397_v61 = vpop.permute.xlu1 %2396  ;;  %vm3658_vm1 = vcmp.gt.f32.partialorder %v2403_v24, 0.0 }
 0x9af   :  { %vm3657_vm8 = vcmp.gt.f32.partialorder %v2397_v61, 0.0  ;;  %v5194_v59 = vsel %vm3658_vm1, %v10398_v55, -inf }
 0x9b0   :  { %v5193_v6 = vsel %vm3657_vm8, %v10388_v0, -inf  ;;  %v6296_v13 = vsel %vm42_vm0, %v5194_v59, -inf }
 0x9b1   :  { %v6294_v32 = vsel %vm42_vm0, %v5193_v6, -inf }
 0x9b2   :  { %v6295_v24 = vmax.f32 %v6293_v23, %v6294_v32 }
 0x9b3   :  { %2494 = vperm.xlu2 %7422, %v11776_v52   ;;  %v5196_v52 = vsel %vm3660_vm9, %v10341_v63, -inf }
 0x9b4   :  { %7425 = vset.pattern.permute.xlu1 %v7829_v40  ;;  %v6306_v44 = vsel %vm42_vm0, %v5196_v52, -inf }
 0x9bb   :  { %7424 = vset.pattern.permute.xlu2 %v11688_v48 }
 0x9bc   :  { %2519 = vperm.xlu1 %7425, %v11777_v49  }
 0x9bd   :  { %v2422_v31 = vpop.permute.xlu2 %2421 }
 0x9be   :  { %v2409_v18 = vpop.permute.xlu1 %2408  ;;  %vm3661_vm15 = vcmp.gt.f32.partialorder %v2422_v31, 0.0  ;;  %v6297_v31 = vmax.f32 %v6295_v24, %v6296_v13 }
 0x9bf   :  { %v5197_v1 = vsel %vm3661_vm15, %v10461_v12, -inf  ;;  %vm3659_vm13 = vcmp.gt.f32.partialorder %v2409_v18, 0.0 }
 0x9c0   :  { %v6307_v61 = vsel %vm42_vm0, %v5197_v1, -inf  ;;  %v5195_v62 = vsel %vm3659_vm13, %v10318_v26, -inf  ;;  %v6315_v1 = vsel %vm42_vm0, %v5201_v60, -inf }
 0x9c1   :  { %v6308_v42 = vmax.f32 %v6306_v44, %v6307_v61  ;;  %v6298_v18 = vsel %vm42_vm0, %v5195_v62, -inf }
 0x9c2   :  { %v6299_v17 = vmax.f32 %v6297_v31, %v6298_v18 }
 0x9c3   :  { %2513 = vperm.xlu2 %7424, %v11777_v49  }
 0x9c4   :  { %7427 = vset.pattern.permute.xlu1 %v7777_v30  ;;  %v6300_v52 = vrot.slane %v6299_v17, 4 }
 0x9cb   :  { %7426 = vset.pattern.permute.xlu2 %v11704_v58 }
 0x9cc   :  { %2531 = vperm.xlu1 %7427, %v11777_v49  }
 0x9cd   :  { %v2434_v7 = vpop.permute.xlu2 %2433 }
 0x9ce   :  { %v2428_v57 = vpop.permute.xlu1 %2427  ;;  %vm3663_vm2 = vcmp.gt.f32.partialorder %v2434_v7, 0.0  ;;  %v6301_v7 = vmax.f32 %v6299_v17, %v6300_v52 }
 0x9cf   :  { %vm3662_vm14 = vcmp.gt.f32.partialorder %v2428_v57, 0.0  ;;  %v5199_v10 = vsel %vm3663_vm2, %v10369_v46, -inf }
 0x9d0   :  { %v5198_v3 = vsel %vm3662_vm14, %v10360_v54, -inf  ;;  %v6311_v15 = vsel %vm42_vm0, %v5199_v10, -inf  ;;  %v6302_v61 = vrot.slane %v6301_v7, 2 }
 0x9d1   :  { %v6309_v36 = vsel %vm42_vm0, %v5198_v3, -inf }
 0x9d2   :  { %v6310_v9 = vmax.f32 %v6308_v42, %v6309_v36  ;;  %v6303_v42 = vmax.f32 %v6301_v7, %v6302_v61 }
 0x9d3   :  { %2525 = vperm.xlu2 %7426, %v11777_v49  }
 0x9d4   :  { %7429 = vset.pattern.permute.xlu1 %v7814_v37  ;;  %v6312_v6 = vmax.f32 %v6310_v9, %v6311_v15  ;;  %v6304_v18 = vrot.slane %v6303_v42, 1 }
 0x9d6   :  { %v6305_v9 = vmax.f32 %v6303_v42, %v6304_v18  ;;  %v11783_v18 = vld [vmem:[#allocation35_spill] sm:$0xff] }
 0x9d7   :  { %vm3675_vm7 = vcmp.gt.f32.partialorder %v11783_v18, 0.0 }
 0x9d8   :  { %v6794_v17 = vsel %vm6756_vm11, %v6305_v9, %v10443_v20  ;;  %v11781_v20 = vld [vmem:[#allocation87_spill] sm:$0xff]  ;;  %v5211_v9 = vsel %vm3675_vm7, %v10318_v26, -inf }
 0x9d9   :  { %vm3670_vm14 = vcmp.gt.f32.partialorder %v11781_v20, 0.0 }
 0x9db   :  { %7428 = vset.pattern.permute.xlu2 %v11695_v29 }
 0x9dc   :  { %2549 = vperm.xlu1 %7429, %v11777_v49  }
 0x9dd   :  { %v2452_v41 = vpop.permute.xlu2 %2451 }
 0x9de   :  { %v2440_v45 = vpop.permute.xlu1 %2439  ;;  %vm3666_vm8 = vcmp.gt.f32.partialorder %v2452_v41, 0.0 }
 0x9df   :  { %vm3664_vm6 = vcmp.gt.f32.partialorder %v2440_v45, 0.0  ;;  %v5202_v32 = vsel %vm3666_vm8, %v10398_v55, -inf }
 0x9e0   :  { %v5200_v22 = vsel %vm3664_vm6, %v10381_v53, -inf  ;;  %v6317_v23 = vsel %vm42_vm0, %v5202_v32, -inf }
 0x9e1   :  { %v6313_v57 = vsel %vm42_vm0, %v5200_v22, -inf }
 0x9e2   :  { %v6314_v51 = vmax.f32 %v6312_v6, %v6313_v57 }
 0x9e3   :  { %2543 = vperm.xlu2 %7428, %v11777_v49  }
 0x9e4   :  { %7431 = vset.pattern.permute.xlu1 %v11688_v48  ;;  %v6316_v44 = vmax.f32 %v6314_v51, %v6315_v1  ;;  %v5206_v1 = vsel %vm3670_vm14, %v10360_v54, -inf }
 0x9e6   :  { %v6318_v3 = vmax.f32 %v6316_v44, %v6317_v23  ;;  %v6330_v44 = vsel %vm42_vm0, %v5206_v1, -inf }
 0x9eb   :  { %7430 = vset.pattern.permute.xlu2 %v7702_v11 }
 0x9ec   :  { %2562 = vperm.xlu1 %7431, %v11683_v19  }
 0x9ee   :  { %v2458_v59 = vpop.permute.xlu1 %2457 }
 0x9ef   :  { %vm3667_vm9 = vcmp.gt.f32.partialorder %v2458_v59, 0.0 }
 0x9f0   :  { %v5203_v24 = vsel %vm3667_vm9, %v10318_v26, -inf  ;;  %vm11784_vm9 = vcmask 1047559  }
 0x9f1   :  { %v6319_v62 = vsel %vm42_vm0, %v5203_v24, -inf }
 0x9f2   :  { %v6320_v13 = vmax.f32 %v6318_v3, %v6319_v62 }
 0x9f3   :  { %2555 = vperm.xlu2 %7430, %v11777_v49   ;;  %v2465_v49 = vpop.permute.xlu2 %2464 }
 0x9f4   :  { %v6321_v45 = vrot.slane %v6320_v13, 4  ;;  %7433 = vset.pattern.permute.xlu1 %v7777_v30  ;;  %vm3668_vm15 = vcmp.gt.f32.partialorder %v2465_v49, 0.0 }
 0x9f5   :  { %v5204_v57 = vsel %vm3668_vm15, %v10341_v63, -inf }
 0x9f6   :  { %v6322_v36 = vmax.f32 %v6320_v13, %v6321_v45  ;;  %v6327_v52 = vsel %vm42_vm0, %v5204_v57, -inf }
 0x9f8   :  { %v6323_v10 = vrot.slane %v6322_v36, 2 }
 0x9fa   :  { %v6324_v31 = vmax.f32 %v6322_v36, %v6323_v10  ;;  %v11782_v36 = vld [vmem:[#allocation86_spill] sm:$0xff] }
 0x9fb   :  { %7432 = vset.pattern.permute.xlu2 %v11704_v58 }
 0x9fc   :  { %v6325_v22 = vrot.slane %v6324_v31, 1  ;;  %2580 = vperm.xlu1 %7433, %v11683_v19  }
 0x9fd   :  { %v2483_v6 = vpop.permute.xlu2 %2482 }
 0x9fe   :  { %v6326_v50 = vmax.f32 %v6324_v31, %v6325_v22  ;;  %v2471_v41 = vpop.permute.xlu1 %2470  ;;  %vm3671_vm13 = vcmp.gt.f32.partialorder %v2483_v6, 0.0 }
 0x9ff   :  { %vm3669_vm1 = vcmp.gt.f32.partialorder %v2471_v41, 0.0  ;;  %v5207_v23 = vsel %vm3671_vm13, %v10369_v46, -inf  ;;  %v6340_v41 = vsel %vm42_vm0, %v5211_v9, -inf }
 0xa00   :  { %v6795_v15 = vsel %vm6758_vm12, %v6326_v50, %v6794_v17  ;;  %v5205_v60 = vsel %vm3669_vm1, %v10461_v12, -inf  ;;  %v6332_v24 = vsel %vm42_vm0, %v5207_v23, -inf }
 0xa01   :  { %v6328_v51 = vsel %vm42_vm0, %v5205_v60, -inf }
 0xa02   :  { %v6329_v7 = vmax.f32 %v6327_v52, %v6328_v51 }
 0xa03   :  { %2574 = vperm.xlu2 %7432, %v11683_v19  }
 0xa04   :  { %7435 = vset.pattern.permute.xlu1 %v11695_v29  ;;  %v6331_v61 = vmax.f32 %v6329_v7, %v6330_v44 }
 0xa06   :  { %v6333_v13 = vmax.f32 %v6331_v61, %v6332_v24  ;;  %v11785_v61 = vld [vmem:[#allocation52_spill] sm:$0xff] }
 0xa0b   :  { %7434 = vset.pattern.permute.xlu2 %v7797_v34 }
 0xa0c   :  { %2592 = vperm.xlu1 %7435, %v11683_v19  }
 0xa0d   :  { %v2495_v59 = vpop.permute.xlu2 %2494 }
 0xa0e   :  { %v2489_v32 = vpop.permute.xlu1 %2488  ;;  %vm3673_vm6 = vcmp.gt.f32.partialorder %v2495_v59, 0.0 }
 0xa0f   :  { %vm3672_vm2 = vcmp.gt.f32.partialorder %v2489_v32, 0.0  ;;  %v5209_v42 = vsel %vm3673_vm6, %v10388_v0, -inf }
 0xa10   :  { %v5208_v3 = vsel %vm3672_vm2, %v10381_v53, -inf  ;;  %v6336_v10 = vsel %vm42_vm0, %v5209_v42, -inf }
 0xa11   :  { %v6334_v62 = vsel %vm42_vm0, %v5208_v3, -inf }
 0xa12   :  { %v6335_v45 = vmax.f32 %v6333_v13, %v6334_v62 }
 0xa13   :  { %2586 = vperm.xlu2 %7434, %v11683_v19  }
 0xa14   :  { %7437 = vset.pattern.permute.xlu1 %v11688_v48  ;;  %v6337_v22 = vmax.f32 %v6335_v45, %v6336_v10 }
 0xa1b   :  { %7436 = vset.pattern.permute.xlu2 %v7702_v11 }
 0xa1c   :  { %2611 = vperm.xlu1 %7437, %v11782_v36  }
 0xa1d   :  { %v2514_v7 = vpop.permute.xlu2 %2513 }
 0xa1e   :  { %v2501_v31 = vpop.permute.xlu1 %2500  ;;  %vm3676_vm15 = vcmp.gt.f32.partialorder %v2514_v7, 0.0 }
 0xa1f   :  { %vm3674_vm8 = vcmp.gt.f32.partialorder %v2501_v31, 0.0  ;;  %v5212_v3 = vsel %vm3676_vm15, %v10341_v63, -inf  ;;  %v11786_v31 = vld [vmem:[#allocation142_spill] sm:$0xff] }
 0xa20   :  { %v5210_v50 = vsel %vm3674_vm8, %v10398_v55, -inf  ;;  %v6348_v13 = vsel %vm42_vm0, %v5212_v3, -inf  ;;  %vm3680_vm2 = vcmp.gt.f32.partialorder %v11786_v31, 0.0 }
 0xa21   :  { %v6338_v17 = vsel %vm42_vm0, %v5210_v50, -inf }
 0xa22   :  { %v6339_v49 = vmax.f32 %v6337_v22, %v6338_v17  ;;  %v5216_v17 = vsel %vm3680_vm2, %v10381_v53, -inf  ;;  %vm3690_vm2 = vcmp.gt.f32.partialorder %v9344_v2, 0.0 }
 0xa23   :  { %2604 = vperm.xlu2 %7436, %v11683_v19  }
 0xa24   :  { %v6341_v57 = vmax.f32 %v6339_v49, %v6340_v41  ;;  %7439 = vset.pattern.permute.xlu1 %v11704_v58 }
 0xa26   :  { %v6342_v60 = vrot.slane %v6341_v57, 4 }
 0xa28   :  { %v6343_v6 = vmax.f32 %v6341_v57, %v6342_v60  ;;  %v6355_v60 = vsel %vm42_vm0, %v5216_v17, -inf }
 0xa2a   :  { %v6344_v20 = vrot.slane %v6343_v6, 2 }
 0xa2b   :  { %7438 = vset.pattern.permute.xlu2 %v7829_v40 }
 0xa2c   :  { %v6345_v52 = vmax.f32 %v6343_v6, %v6344_v20  ;;  %2623 = vperm.xlu1 %7439, %v11782_v36   ;;  %v11787_v20 = vld [vmem:[#allocation54_spill] sm:$0xff] }
 0xa2d   :  { %v2526_v44 = vpop.permute.xlu2 %2525 }
 0xa2e   :  { %v6346_v51 = vrot.slane %v6345_v52, 1  ;;  %vm3678_vm14 = vcmp.gt.f32.partialorder %v2526_v44, 0.0 }
 0xa2f   :  { %v5214_v45 = vsel %vm3678_vm14, %v10360_v54, -inf }
 0xa30   :  { %v6347_v1 = vmax.f32 %v6345_v52, %v6346_v51  ;;  %v6351_v9 = vsel %vm42_vm0, %v5214_v45, -inf }
 0xa32   :  { %v10545_v32 = vsel %vm11784_vm9, %v6347_v1, %v6795_v15  ;;  %v2520_v15 = vpop.permute.xlu1 %2519  ;;  %vm3685_vm9 = vcmp.gt.f32.partialorder %v11787_v20, 0.0 }
 0xa33   :  { %2617 = vperm.xlu2 %7438, %v11782_v36   ;;  %v7527_v19 = vpack.i.bf16 %v10545_v32, %v10224_v28  ;;  %vm3677_vm1 = vcmp.gt.f32.partialorder %v2520_v15, 0.0  ;;  %v5221_v44 = vsel %vm3685_vm9, %v10461_v12, -inf  ;;  %v11198_v28 = vld [vmem:[%s11369_s0 + $0x30] sm:$0xff] }
 0xa34   :  { %7441 = vset.pattern.permute.xlu1 %v11695_v29  ;;  %v5213_v24 = vsel %vm3677_vm1, %v10461_v12, -inf }
 0xa35   :  { %v6349_v42 = vsel %vm42_vm0, %v5213_v24, -inf }
 0xa36   :  { %v6350_v18 = vmax.f32 %v6348_v13, %v6349_v42  ;;  %v6370_v42 = vsel %vm42_vm0, %v5221_v44, -inf }
 0xa38   :  { %v6352_v49 = vmax.f32 %v6350_v18, %v6351_v9 }
 0xa3b   :  { %7440 = vset.pattern.permute.xlu2 %v7797_v34 }
 0xa3c   :  { %2641 = vperm.xlu1 %7441, %v11782_v36  }
 0xa3d   :  { %v2544_v59 = vpop.permute.xlu2 %2543 }
 0xa3e   :  { %v2532_v23 = vpop.permute.xlu1 %2531  ;;  %vm3681_vm6 = vcmp.gt.f32.partialorder %v2544_v59, 0.0 }
 0xa3f   :  { %vm3679_vm13 = vcmp.gt.f32.partialorder %v2532_v23, 0.0  ;;  %v5217_v6 = vsel %vm3681_vm6, %v10388_v0, -inf }
 0xa40   :  { %v5215_v10 = vsel %vm3679_vm13, %v10369_v46, -inf  ;;  %v6357_v15 = vsel %vm42_vm0, %v5217_v6, -inf }
 0xa41   :  { %v6353_v50 = vsel %vm42_vm0, %v5215_v10, -inf }
 0xa42   :  { %v6354_v41 = vmax.f32 %v6352_v49, %v6353_v50 }
 0xa43   :  { %2635 = vperm.xlu2 %7440, %v11782_v36  }
 0xa44   :  { %7443 = vset.pattern.permute.xlu1 %v7702_v11  ;;  %v6356_v52 = vmax.f32 %v6354_v41, %v6355_v60  ;;  %v5226_v60 = vsel %vm3690_vm2, %v10398_v55, -inf }
 0xa45   :  { %v6380_v2 = vsel %vm42_vm0, %v5226_v60, -inf }
 0xa46   :  { %v6358_v3 = vmax.f32 %v6356_v52, %v6357_v15 }
 0xa4b   :  { %7442 = vset.pattern.permute.xlu2 %v7814_v37 }
 0xa4c   :  { %2653 = vperm.xlu1 %7443, %v11782_v36  }
 0xa4e   :  { %v2550_v62 = vpop.permute.xlu1 %2549 }
 0xa4f   :  { %vm3682_vm7 = vcmp.gt.f32.partialorder %v2550_v62, 0.0 }
 0xa50   :  { %v5218_v51 = vsel %vm3682_vm7, %v10398_v55, -inf }
 0xa51   :  { %v6359_v23 = vsel %vm42_vm0, %v5218_v51, -inf }
 0xa52   :  { %v6360_v45 = vmax.f32 %v6358_v3, %v6359_v23 }
 0xa53   :  { %2647 = vperm.xlu2 %7442, %v11782_v36   ;;  %v2556_v36 = vpop.permute.xlu2 %2555 }
 0xa54   :  { %7445 = vset.pattern.permute.xlu1 %v11704_v58  ;;  %vm3683_vm15 = vcmp.gt.f32.partialorder %v2556_v36, 0.0 }
 0xa55   :  { %v5219_v24 = vsel %vm3683_vm15, %v10318_v26, -inf }
 0xa56   :  { %v6361_v10 = vsel %vm42_vm0, %v5219_v24, -inf }
 0xa5b   :  { %7444 = vset.pattern.permute.xlu2 %v7829_v40 }
 0xa5c   :  { %2672 = vperm.xlu1 %7445, %v11785_v61  }
 0xa5d   :  { %v2575_v57 = vpop.permute.xlu2 %2574 }
 0xa5e   :  { %v2563_v22 = vpop.permute.xlu1 %2562  ;;  %vm3686_vm1 = vcmp.gt.f32.partialorder %v2575_v57, 0.0 }
 0xa5f   :  { %vm3684_vm8 = vcmp.gt.f32.partialorder %v2563_v22, 0.0  ;;  %v5222_v62 = vsel %vm3686_vm1, %v10360_v54, -inf  ;;  %v6362_v22 = vmax.f32 %v6360_v45, %v6361_v10 }
 0xa60   :  { %v5220_v1 = vsel %vm3684_vm8, %v10341_v63, -inf  ;;  %v6372_v31 = vsel %vm42_vm0, %v5222_v62, -inf }
 0xa61   :  { %v6369_v59 = vsel %vm42_vm0, %v5220_v1, -inf  ;;  %v6363_v6 = vrot.slane %v6362_v22, 4 }
 0xa62   :  { %v6371_v36 = vmax.f32 %v6369_v59, %v6370_v42 }
 0xa63   :  { %2666 = vperm.xlu2 %7444, %v11785_v61   ;;  %v6364_v15 = vmax.f32 %v6362_v22, %v6363_v6 }
 0xa64   :  { %7447 = vset.pattern.permute.xlu1 %v7797_v34  ;;  %v6373_v50 = vmax.f32 %v6371_v36, %v6372_v31  ;;  %v11788_v36 = vld [vmem:[#allocation12_spill] sm:$0xff] }
 0xa65   :  { %v6365_v3 = vrot.slane %v6364_v15, 2 }
 0xa6b   :  { %7446 = vset.pattern.permute.xlu2 %v7777_v30 }
 0xa6c   :  { %2684 = vperm.xlu1 %7447, %v11785_v61  }
 0xa6d   :  { %v2587_v13 = vpop.permute.xlu2 %2586 }
 0xa6e   :  { %v2581_v7 = vpop.permute.xlu1 %2580  ;;  %vm3688_vm13 = vcmp.gt.f32.partialorder %v2587_v13, 0.0  ;;  %v6366_v13 = vmax.f32 %v6364_v15, %v6365_v3 }
 0xa6f   :  { %vm3687_vm14 = vcmp.gt.f32.partialorder %v2581_v7, 0.0  ;;  %v5224_v17 = vsel %vm3688_vm13, %v10381_v53, -inf }
 0xa70   :  { %v5223_v18 = vsel %vm3687_vm14, %v10369_v46, -inf  ;;  %v6376_v41 = vsel %vm42_vm0, %v5224_v17, -inf }
 0xa71   :  { %v6374_v9 = vsel %vm42_vm0, %v5223_v18, -inf  ;;  %v6367_v18 = vrot.slane %v6366_v13, 1 }
 0xa72   :  { %v6375_v49 = vmax.f32 %v6373_v50, %v6374_v9 }
 0xa73   :  { %2678 = vperm.xlu2 %7446, %v11785_v61   ;;  %v6368_v9 = vmax.f32 %v6366_v13, %v6367_v18 }
 0xa74   :  { %7449 = vset.pattern.permute.xlu1 %v7702_v11  ;;  %v6377_v52 = vmax.f32 %v6375_v49, %v6376_v41 }
 0xa7b   :  { %7448 = vset.pattern.permute.xlu2 %v7814_v37 }
 0xa7c   :  { %2702 = vperm.xlu1 %7449, %v11785_v61  }
 0xa7d   :  { %v2605_v57 = vpop.permute.xlu2 %2604 }
 0xa7e   :  { %v2593_v20 = vpop.permute.xlu1 %2592  ;;  %vm3691_vm6 = vcmp.gt.f32.partialorder %v2605_v57, 0.0  ;;  %v11789_v57 = vld [vmem:[#allocation114_spill] sm:$0xff] }
 0xa7f   :  { %vm3689_vm7 = vcmp.gt.f32.partialorder %v2593_v20, 0.0  ;;  %v5227_v1 = vsel %vm3691_vm6, %v10318_v26, -inf  ;;  %vm3695_vm15 = vcmp.gt.f32.partialorder %v11789_v57, 0.0 }
 0xa80   :  { %v5225_v51 = vsel %vm3689_vm7, %v10388_v0, -inf  ;;  %v6382_v23 = vsel %vm42_vm0, %v5227_v1, -inf }
 0xa81   :  { %v6378_v7 = vsel %vm42_vm0, %v5225_v51, -inf }
 0xa82   :  { %v6379_v44 = vmax.f32 %v6377_v52, %v6378_v7  ;;  %v5231_v52 = vsel %vm3695_vm15, %v10369_v46, -inf }
 0xa83   :  { %2696 = vperm.xlu2 %7448, %v11785_v61   ;;  %v6395_v15 = vsel %vm42_vm0, %v5231_v52, -inf }
 0xa84   :  { %v6381_v59 = vmax.f32 %v6379_v44, %v6380_v2  ;;  %7451 = vset.pattern.permute.xlu1 %v7829_v40 }
 0xa86   :  { %v6383_v24 = vmax.f32 %v6381_v59, %v6382_v23 }
 0xa88   :  { %v6384_v62 = vrot.slane %v6383_v24, 4 }
 0xa8a   :  { %v6385_v42 = vmax.f32 %v6383_v24, %v6384_v62 }
 0xa8b   :  { %7450 = vset.pattern.permute.xlu2 %v11688_v48 }
 0xa8c   :  { %v6386_v45 = vrot.slane %v6385_v42, 2  ;;  %2715 = vperm.xlu1 %7451, %v11788_v36  }
 0xa8d   :  { %v2618_v17 = vpop.permute.xlu2 %2617 }
 0xa8e   :  { %v6387_v10 = vmax.f32 %v6385_v42, %v6386_v45  ;;  %v2612_v50 = vpop.permute.xlu1 %2611  ;;  %vm3693_vm9 = vcmp.gt.f32.partialorder %v2618_v17, 0.0 }
 0xa8f   :  { %vm3692_vm8 = vcmp.gt.f32.partialorder %v2612_v50, 0.0  ;;  %v5229_v41 = vsel %vm3693_vm9, %v10461_v12, -inf }
 0xa90   :  { %v6388_v31 = vrot.slane %v6387_v10, 1  ;;  %v5228_v49 = vsel %vm3692_vm8, %v10341_v63, -inf  ;;  %v6391_v6 = vsel %vm42_vm0, %v5229_v41, -inf }
 0xa91   :  { %v6390_v60 = vsel %vm42_vm0, %v5228_v49, -inf }
 0xa92   :  { %v6389_v22 = vmax.f32 %v6387_v10, %v6388_v31  ;;  %v6392_v1 = vmax.f32 %v6390_v60, %v6391_v6 }
 0xa93   :  { %2709 = vperm.xlu2 %7450, %v11788_v36  }
 0xa94   :  { %v10610_v61 = vsel %vm6748_vm3, %v6389_v22, %v6368_v9  ;;  %7453 = vset.pattern.permute.xlu1 %v7797_v34  ;;  %v11790_v22 = vld [vmem:[#allocation115_spill] sm:$0xff] }
 0xa9b   :  { %7452 = vset.pattern.permute.xlu2 %v7777_v30 }
 0xa9c   :  { %2733 = vperm.xlu1 %7453, %v11788_v36  }
 0xa9d   :  { %v2636_v20 = vpop.permute.xlu2 %2635 }
 0xa9e   :  { %v2624_v51 = vpop.permute.xlu1 %2623  ;;  %vm3696_vm1 = vcmp.gt.f32.partialorder %v2636_v20, 0.0  ;;  %v11791_v20 = vld [vmem:[#allocation67_spill] sm:$0xff] }
 0xa9f   :  { %vm3694_vm14 = vcmp.gt.f32.partialorder %v2624_v51, 0.0  ;;  %v5232_v7 = vsel %vm3696_vm1, %v10381_v53, -inf  ;;  %vm3700_vm8 = vcmp.gt.f32.partialorder %v11791_v20, 0.0  ;;  %vm3705_vm1 = vcmp.gt.f32.partialorder %v8962_v4, 0.0 }
 0xaa0   :  { %v5230_v2 = vsel %vm3694_vm14, %v10360_v54, -inf  ;;  %v6397_v59 = vsel %vm42_vm0, %v5232_v7, -inf }
 0xaa1   :  { %v6393_v44 = vsel %vm42_vm0, %v5230_v2, -inf }
 0xaa2   :  { %v6394_v23 = vmax.f32 %v6392_v1, %v6393_v44 }
 0xaa3   :  { %2727 = vperm.xlu2 %7452, %v11788_v36  }
 0xaa4   :  { %v6396_v3 = vmax.f32 %v6394_v23, %v6395_v15  ;;  %7455 = vset.pattern.permute.xlu1 %v7814_v37 }
 0xaa6   :  { %v6398_v24 = vmax.f32 %v6396_v3, %v6397_v59 }
 0xaab   :  { %7454 = vset.pattern.permute.xlu2 %v11695_v29 }
 0xaac   :  { %2745 = vperm.xlu1 %7455, %v11788_v36  }
 0xaad   :  { %v2648_v62 = vpop.permute.xlu2 %2647 }
 0xaae   :  { %v2642_v13 = vpop.permute.xlu1 %2641  ;;  %vm3698_vm13 = vcmp.gt.f32.partialorder %v2648_v62, 0.0 }
 0xaaf   :  { %vm3697_vm2 = vcmp.gt.f32.partialorder %v2642_v13, 0.0  ;;  %v5234_v42 = vsel %vm3698_vm13, %v10398_v55, -inf }
 0xab0   :  { %v5233_v45 = vsel %vm3697_vm2, %v10388_v0, -inf  ;;  %v6401_v10 = vsel %vm42_vm0, %v5234_v42, -inf }
 0xab1   :  { %v6399_v18 = vsel %vm42_vm0, %v5233_v45, -inf }
 0xab2   :  { %v6400_v31 = vmax.f32 %v6398_v24, %v6399_v18 }
 0xab3   :  { %2739 = vperm.xlu2 %7454, %v11788_v36  }
 0xab4   :  { %v6402_v9 = vmax.f32 %v6400_v31, %v6401_v10  ;;  %7458 = vset.pattern.permute.xlu1 %v7829_v40 }
 0xabb   :  { %7457 = vset.pattern.permute.xlu2 %v11688_v48 }
 0xabc   :  { %2764 = vperm.xlu1 %7458, %v11790_v22  }
 0xabd   :  { %v2667_v57 = vpop.permute.xlu2 %2666 }
 0xabe   :  { %v2654_v50 = vpop.permute.xlu1 %2653  ;;  %vm3701_vm7 = vcmp.gt.f32.partialorder %v2667_v57, 0.0 }
 0xabf   :  { %vm3699_vm6 = vcmp.gt.f32.partialorder %v2654_v50, 0.0  ;;  %v5237_v52 = vsel %vm3701_vm7, %v10461_v12, -inf }
 0xac0   :  { %v5235_v17 = vsel %vm3699_vm6, %v10318_v26, -inf  ;;  %v5236_v26 = vsel %vm3700_vm8, %v10341_v63, -inf  ;;  %v6412_v2 = vsel %vm42_vm0, %v5237_v52, -inf }
 0xac1   :  { %v6403_v49 = vsel %vm42_vm0, %v5235_v17, -inf  ;;  %v6411_v23 = vsel %vm42_vm0, %v5236_v26, -inf  ;;  %v11793_v26 = vld [vmem:[#allocation91_spill] sm:$0xff] }
 0xac2   :  { %v6404_v41 = vmax.f32 %v6402_v9, %v6403_v49  ;;  %v6413_v3 = vmax.f32 %v6411_v23, %v6412_v2  ;;  %v11792_v49 = vld [vmem:[#allocation32_spill] sm:$0xff]  ;;  %vm3710_vm7 = vcmp.gt.f32.partialorder %v11793_v26, 0.0  ;;  %v10684_v2 = vld [vmem:[%s11369_s0] sm:$0xff] }
 0xac3   :  { %2758 = vperm.xlu2 %7457, %v11790_v22  }
 0xac4   :  { %v6405_v60 = vrot.slane %v6404_v41, 4  ;;  %7460 = vset.pattern.permute.xlu1 %v7777_v30 }
 0xac6   :  { %v6406_v36 = vmax.f32 %v6404_v41, %v6405_v60 }
 0xac8   :  { %v6407_v6 = vrot.slane %v6406_v36, 2 }
 0xaca   :  { %v6408_v51 = vmax.f32 %v6406_v36, %v6407_v6 }
 0xacb   :  { %7459 = vset.pattern.permute.xlu2 %v11704_v58 }
 0xacc   :  { %v6409_v1 = vrot.slane %v6408_v51, 1  ;;  %2776 = vperm.xlu1 %7460, %v11790_v22  }
 0xacd   :  { %v2679_v7 = vpop.permute.xlu2 %2678 }
 0xace   :  { %v6410_v15 = vmax.f32 %v6408_v51, %v6409_v1  ;;  %v2673_v44 = vpop.permute.xlu1 %2672  ;;  %vm3703_vm9 = vcmp.gt.f32.partialorder %v2679_v7, 0.0 }
 0xacf   :  { %vm3702_vm15 = vcmp.gt.f32.partialorder %v2673_v44, 0.0  ;;  %v5239_v59 = vsel %vm3703_vm9, %v10369_v46, -inf }
 0xad0   :  { %v6798_v24 = vsel %vm6750_vm4, %v6410_v15, %v10610_v61  ;;  %v5238_v63 = vsel %vm3702_vm15, %v10360_v54, -inf  ;;  %v6416_v13 = vsel %vm42_vm0, %v5239_v59, -inf  ;;  %v5241_v61 = vsel %vm3705_vm1, %v10388_v0, -inf  ;;  %v10691_v15 = vld [vmem:[%s11369_s0 + $0x10] sm:$0xff] }
 0xad1   :  { %v6414_v62 = vsel %vm42_vm0, %v5238_v63, -inf  ;;  %v6420_v31 = vsel %vm42_vm0, %v5241_v61, -inf  ;;  %v5246_v44 = vsel %vm3710_vm7, %v10691_v15, -inf }
 0xad2   :  { %v6415_v42 = vmax.f32 %v6413_v3, %v6414_v62  ;;  %v10699_v62 = vld [vmem:[%s11369_s0 + $0x18] sm:$0xff] }
 0xad3   :  { %2770 = vperm.xlu2 %7459, %v11790_v22  }
 0xad4   :  { %v6417_v45 = vmax.f32 %v6415_v42, %v6416_v13  ;;  %7462 = vset.pattern.permute.xlu1 %v7814_v37 }
 0xadb   :  { %7461 = vset.pattern.permute.xlu2 %v11695_v29 }
 0xadc   :  { %2794 = vperm.xlu1 %7462, %v11790_v22  }
 0xadd   :  { %v2697_v46 = vpop.permute.xlu2 %2696 }
 0xade   :  { %v2685_v54 = vpop.permute.xlu1 %2684  ;;  %vm3706_vm14 = vcmp.gt.f32.partialorder %v2697_v46, 0.0 }
 0xadf   :  { %vm3704_vm13 = vcmp.gt.f32.partialorder %v2685_v54, 0.0  ;;  %v5242_v10 = vsel %vm3706_vm14, %v10398_v55, -inf  ;;  %v10673_v55 = vld [vmem:[%s11369_s0 + $0x38] sm:$0xff] }
 0xae0   :  { %v5240_v18 = vsel %vm3704_vm13, %v10381_v53, -inf  ;;  %v6422_v4 = vsel %vm42_vm0, %v5242_v10, -inf }
 0xae1   :  { %v6418_v9 = vsel %vm42_vm0, %v5240_v18, -inf }
 0xae2   :  { %v6419_v50 = vmax.f32 %v6417_v45, %v6418_v9  ;;  %v6435_v45 = vsel %vm42_vm0, %v5246_v44, -inf }
 0xae3   :  { %2788 = vperm.xlu2 %7461, %v11790_v22  }
 0xae4   :  { %v6421_v17 = vmax.f32 %v6419_v50, %v6420_v31  ;;  %7464 = vset.pattern.permute.xlu1 %v11688_v48 }
 0xae6   :  { %v6423_v0 = vmax.f32 %v6421_v17, %v6422_v4  ;;  %v10719_v4 = vld [vmem:[%s11369_s0 + $0x20] sm:$0xff] }
 0xaeb   :  { %7463 = vset.pattern.permute.xlu2 %v7702_v11 }
 0xaec   :  { %2807 = vperm.xlu1 %7464, %v11792_v49  }
 0xaed   :  { %v2710_v36 = vpop.permute.xlu2 %2709 }
 0xaee   :  { %v2703_v53 = vpop.permute.xlu1 %2702  ;;  %vm3708_vm6 = vcmp.gt.f32.partialorder %v2710_v36, 0.0  ;;  %v11795_v36 = vld [vmem:[#allocation36_spill] sm:$0xff] }
 0xaef   :  { %vm3707_vm2 = vcmp.gt.f32.partialorder %v2703_v53, 0.0  ;;  %vm3715_vm14 = vcmp.gt.f32.partialorder %v11795_v36, 0.0 }
 0xaf0   :  { %v5243_v41 = vsel %vm3707_vm2, %v10673_v55, -inf }
 0xaf1   :  { %v6424_v57 = vsel %vm42_vm0, %v5243_v41, -inf }
 0xaf2   :  { %v6425_v60 = vmax.f32 %v6423_v0, %v6424_v57 }
 0xaf3   :  { %2800 = vperm.xlu2 %7463, %v11790_v22   ;;  %v5244_v22 = vsel %vm3708_vm6, %v10684_v2, -inf }
 0xaf4   :  { %v6426_v6 = vrot.slane %v6425_v60, 4  ;;  %7466 = vset.pattern.permute.xlu1 %v7777_v30  ;;  %v6432_v3 = vsel %vm42_vm0, %v5244_v22, -inf }
 0xaf6   :  { %v6427_v20 = vmax.f32 %v6425_v60, %v6426_v6  ;;  %v11794_v60 = vld [vmem:[#allocation89_spill] sm:$0xff] }
 0xaf8   :  { %v6428_v52 = vrot.slane %v6427_v20, 2 }
 0xafa   :  { %v6429_v51 = vmax.f32 %v6427_v20, %v6428_v52  ;;  %v5251_v20 = vsel %vm3715_vm14, %v10673_v55, -inf  ;;  %v10733_v52 = vld [vmem:[%s11369_s0 + $0x30] sm:$0xff] }
 0xafb   :  { %7465 = vset.pattern.permute.xlu2 %v11704_v58  ;;  %v6445_v22 = vsel %vm42_vm0, %v5251_v20, -inf }
 0xafc   :  { %v6430_v1 = vrot.slane %v6429_v51, 1  ;;  %2825 = vperm.xlu1 %7466, %v11792_v49  }
 0xafd   :  { %v2728_v7 = vpop.permute.xlu2 %2727 }
 0xafe   :  { %v6431_v23 = vmax.f32 %v6429_v51, %v6430_v1  ;;  %v2716_v59 = vpop.permute.xlu1 %2715  ;;  %vm3711_vm8 = vcmp.gt.f32.partialorder %v2728_v7, 0.0 }
 0xaff   :  { %vm3709_vm9 = vcmp.gt.f32.partialorder %v2716_v59, 0.0  ;;  %v5247_v13 = vsel %vm3711_vm8, %v10699_v62, -inf }
 0xb00   :  { %v5245_v63 = vsel %vm3709_vm9, %v10461_v12, -inf  ;;  %v6799_v42 = vsel %vm6752_vm5, %v6431_v23, %v6798_v24  ;;  %v6437_v54 = vsel %vm42_vm0, %v5247_v13, -inf  ;;  %v10713_v24 = vld [vmem:[%s11369_s0 + $0x28] sm:$0xff] }
 0xb01   :  { %v6433_v46 = vsel %vm42_vm0, %v5245_v63, -inf }
 0xb02   :  { %v6434_v61 = vmax.f32 %v6432_v3, %v6433_v46 }
 0xb03   :  { %2819 = vperm.xlu2 %7465, %v11792_v49  }
 0xb04   :  { %v6436_v18 = vmax.f32 %v6434_v61, %v6435_v45  ;;  %7468 = vset.pattern.permute.xlu1 %v11695_v29 }
 0xb06   :  { %v6438_v10 = vmax.f32 %v6436_v18, %v6437_v54 }
 0xb0b   :  { %7467 = vset.pattern.permute.xlu2 %v7797_v34 }
 0xb0c   :  { %2837 = vperm.xlu1 %7468, %v11792_v49  }
 0xb0d   :  { %v2740_v31 = vpop.permute.xlu2 %2739 }
 0xb0e   :  { %v2734_v9 = vpop.permute.xlu1 %2733  ;;  %vm3713_vm15 = vcmp.gt.f32.partialorder %v2740_v31, 0.0 }
 0xb0f   :  { %vm3712_vm1 = vcmp.gt.f32.partialorder %v2734_v9, 0.0  ;;  %v5249_v50 = vsel %vm3713_vm15, %v10713_v24, -inf }
 0xb10   :  { %v5248_v17 = vsel %vm3712_vm1, %v10719_v4, -inf  ;;  %v6441_v53 = vsel %vm42_vm0, %v5249_v50, -inf }
 0xb11   :  { %v6439_v0 = vsel %vm42_vm0, %v5248_v17, -inf }
 0xb12   :  { %v6440_v41 = vmax.f32 %v6438_v10, %v6439_v0 }
 0xb13   :  { %2831 = vperm.xlu2 %7467, %v11792_v49  }
 0xb14   :  { %v6442_v57 = vmax.f32 %v6440_v41, %v6441_v53  ;;  %7470 = vset.pattern.permute.xlu1 %v11688_v48  ;;  %v11796_v53 = vld [vmem:[#allocation144_spill] sm:$0xff] }
 0xb15   :  { %vm3720_vm8 = vcmp.gt.f32.partialorder %v11796_v53, 0.0 }
 0xb1b   :  { %7469 = vset.pattern.permute.xlu2 %v7702_v11 }
 0xb1c   :  { %2856 = vperm.xlu1 %7470, %v11794_v60  }
 0xb1d   :  { %v2759_v7 = vpop.permute.xlu2 %2758 }
 0xb1e   :  { %v2746_v6 = vpop.permute.xlu1 %2745  ;;  %vm3716_vm2 = vcmp.gt.f32.partialorder %v2759_v7, 0.0 }
 0xb1f   :  { %vm3714_vm13 = vcmp.gt.f32.partialorder %v2746_v6, 0.0  ;;  %v5252_v13 = vsel %vm3716_vm2, %v10684_v2, -inf }
 0xb20   :  { %v5250_v51 = vsel %vm3714_vm13, %v10733_v52, -inf }
 0xb21   :  { %v6443_v26 = vsel %vm42_vm0, %v5250_v51, -inf }
 0xb22   :  { %v6444_v1 = vmax.f32 %v6442_v57, %v6443_v26  ;;  %v5256_v57 = vsel %vm3720_vm8, %v10719_v4, -inf }
 0xb23   :  { %2849 = vperm.xlu2 %7469, %v11792_v49   ;;  %v6453_v49 = vsel %vm42_vm0, %v5252_v13, -inf  ;;  %v6460_v20 = vsel %vm42_vm0, %v5256_v57, -inf }
 0xb24   :  { %v6446_v44 = vmax.f32 %v6444_v1, %v6445_v22  ;;  %7472 = vset.pattern.permute.xlu1 %v11704_v58 }
 0xb26   :  { %v6447_v23 = vrot.slane %v6446_v44, 4 }
 0xb28   :  { %v6448_v59 = vmax.f32 %v6446_v44, %v6447_v23  ;;  %v11797_v44 = vld [vmem:[#allocation34_spill] sm:$0xff] }
 0xb2a   :  { %v6449_v3 = vrot.slane %v6448_v59, 2 }
 0xb2b   :  { %7471 = vset.pattern.permute.xlu2 %v7829_v40 }
 0xb2c   :  { %v6450_v63 = vmax.f32 %v6448_v59, %v6449_v3  ;;  %2868 = vperm.xlu1 %7472, %v11794_v60  }
 0xb2d   :  { %v2771_v45 = vpop.permute.xlu2 %2770 }
 0xb2e   :  { %v6451_v46 = vrot.slane %v6450_v63, 1  ;;  %v2765_v61 = vpop.permute.xlu1 %2764  ;;  %vm3718_vm6 = vcmp.gt.f32.partialorder %v2771_v45, 0.0 }
 0xb2f   :  { %vm3717_vm7 = vcmp.gt.f32.partialorder %v2765_v61, 0.0  ;;  %v5254_v54 = vsel %vm3718_vm6, %v10691_v15, -inf }
 0xb30   :  { %v6452_v18 = vmax.f32 %v6450_v63, %v6451_v46  ;;  %v5253_v10 = vsel %vm3717_vm7, %v10461_v12, -inf  ;;  %v6456_v9 = vsel %vm42_vm0, %v5254_v54, -inf }
 0xb31   :  { %v6454_v31 = vsel %vm42_vm0, %v5253_v10, -inf  ;;  %v11798_v10 = vld [vmem:[#allocation56_spill] sm:$0xff] }
 0xb32   :  { %v6455_v50 = vmax.f32 %v6453_v49, %v6454_v31  ;;  %v6800_v17 = vsel %vm6754_vm10, %v6452_v18, %v6799_v42  ;;  %vm3725_vm13 = vcmp.gt.f32.partialorder %v11798_v10, 0.0 }
 0xb33   :  { %2862 = vperm.xlu2 %7471, %v11794_v60  }
 0xb34   :  { %v6457_v0 = vmax.f32 %v6455_v50, %v6456_v9  ;;  %7474 = vset.pattern.permute.xlu1 %v11695_v29  ;;  %v11799_v9 = vld [vmem:[#allocation147_spill] sm:$0xff] }
 0xb3b   :  { %7473 = vset.pattern.permute.xlu2 %v7797_v34 }
 0xb3c   :  { %2886 = vperm.xlu1 %7474, %v11794_v60  }
 0xb3d   :  { %v2789_v41 = vpop.permute.xlu2 %2788 }
 0xb3e   :  { %v2777_v36 = vpop.permute.xlu1 %2776  ;;  %vm3721_vm9 = vcmp.gt.f32.partialorder %v2789_v41, 0.0 }
 0xb3f   :  { %vm3719_vm15 = vcmp.gt.f32.partialorder %v2777_v36, 0.0  ;;  %v5257_v42 = vsel %vm3721_vm9, %v10713_v24, -inf  ;;  %vm3730_vm9 = vcmp.gt.f32.partialorder %v9348_v27, 0.0 }
 0xb40   :  { %v5255_v6 = vsel %vm3719_vm15, %v10699_v62, -inf  ;;  %v6462_v1 = vsel %vm42_vm0, %v5257_v42, -inf  ;;  %v7616_v42 = vld [vmem:[%s11370_s1 + $0x38] sm:$0xff] }
 0xb41   :  { %v6458_v51 = vsel %vm42_vm0, %v5255_v6, -inf }
 0xb42   :  { %v6459_v26 = vmax.f32 %v6457_v0, %v6458_v51  ;;  %v5261_v0 = vsel %vm3725_vm13, %v10461_v12, -inf }
 0xb43   :  { %2880 = vperm.xlu2 %7473, %v11794_v60   ;;  %v6475_v51 = vsel %vm42_vm0, %v5261_v0, -inf }
 0xb44   :  { %v6461_v22 = vmax.f32 %v6459_v26, %v6460_v20  ;;  %7476 = vset.pattern.permute.xlu1 %v11688_v48  ;;  %v10779_v20 = vperm.slane %v7616_v42, 2 }
 0xb46   :  { %v6463_v7 = vmax.f32 %v6461_v22, %v6462_v1 }
 0xb4b   :  { %7475 = vset.pattern.permute.xlu2 %v7814_v37 }
 0xb4c   :  { %2905 = vperm.xlu1 %7476, %v11797_v44  }
 0xb4d   :  { %v2801_v23 = vpop.permute.xlu2 %2800 }
 0xb4e   :  { %v2795_v59 = vpop.permute.xlu1 %2794  ;;  %vm3723_vm1 = vcmp.gt.f32.partialorder %v2801_v23, 0.0 }
 0xb4f   :  { %vm3722_vm14 = vcmp.gt.f32.partialorder %v2795_v59, 0.0  ;;  %v5259_v3 = vsel %vm3723_vm1, %v10673_v55, -inf }
 0xb50   :  { %v5258_v63 = vsel %vm3722_vm14, %v10733_v52, -inf  ;;  %v6466_v45 = vsel %vm42_vm0, %v5259_v3, -inf }
 0xb51   :  { %v6464_v13 = vsel %vm42_vm0, %v5258_v63, -inf }
 0xb52   :  { %v6465_v46 = vmax.f32 %v6463_v7, %v6464_v13 }
 0xb53   :  { %2892 = vperm.xlu2 %7475, %v11794_v60  }
 0xb54   :  { %v6467_v61 = vmax.f32 %v6465_v46, %v6466_v45  ;;  %7479 = vset.pattern.permute.xlu1 %v7829_v40 }
 0xb56   :  { %v6468_v49 = vrot.slane %v6467_v61, 4 }
 0xb58   :  { %v6469_v54 = vmax.f32 %v6467_v61, %v6468_v49  ;;  %v11800_v61 = vld [vmem:[#allocation90_spill] sm:$0xff] }
 0xb5a   :  { %v6470_v18 = vrot.slane %v6469_v54, 2 }
 0xb5b   :  { %7478 = vset.pattern.permute.xlu2 %v11688_v48 }
 0xb5c   :  { %v6471_v31 = vmax.f32 %v6469_v54, %v6470_v18  ;;  %2960 = vperm.xlu1 %7479, %v11799_v9   ;;  %v5266_v54 = vsel %vm3730_vm9, %v10733_v52, -inf }
 0xb5d   :  { %v2820_v50 = vpop.permute.xlu2 %2819 }
 0xb5e   :  { %v6472_v53 = vrot.slane %v6471_v31, 1  ;;  %v2808_v41 = vpop.permute.xlu1 %2807  ;;  %vm3726_vm2 = vcmp.gt.f32.partialorder %v2820_v50, 0.0  ;;  %v6485_v50 = vsel %vm42_vm0, %v5266_v54, -inf }
 0xb5f   :  { %vm3724_vm6 = vcmp.gt.f32.partialorder %v2808_v41, 0.0  ;;  %v5262_v57 = vsel %vm3726_vm2, %v10691_v15, -inf }
 0xb60   :  { %v6473_v36 = vmax.f32 %v6471_v31, %v6472_v53  ;;  %v5260_v6 = vsel %vm3724_vm6, %v10684_v2, -inf  ;;  %v6477_v12 = vsel %vm42_vm0, %v5262_v57, -inf }
 0xb61   :  { %v6474_v26 = vsel %vm42_vm0, %v5260_v6, -inf }
 0xb62   :  { %v6476_v1 = vmax.f32 %v6474_v26, %v6475_v51  ;;  %v6801_v22 = vsel %vm6756_vm11, %v6473_v36, %v6800_v17 }
 0xb63   :  { %2954 = vperm.xlu2 %7478, %v11799_v9  }
 0xb64   :  { %v6478_v7 = vmax.f32 %v6476_v1, %v6477_v12  ;;  %3009 = vperm.xlu1 %7479, %v10779_v20   ;;  %v10811_v12 = vld [vmem:[%s11369_s0 + $0x8] sm:$0xff] }
 0xb6b   :  { %3003 = vperm.xlu2 %7478, %v10779_v20  }
 0xb6c   :  { %7481 = vset.pattern.permute.xlu1 %v11688_v48 }
 0xb6d   :  { %v2832_v23 = vpop.permute.xlu2 %2831 }
 0xb6e   :  { %v2826_v59 = vpop.permute.xlu1 %2825  ;;  %vm3728_vm7 = vcmp.gt.f32.partialorder %v2832_v23, 0.0 }
 0xb6f   :  { %vm3727_vm8 = vcmp.gt.f32.partialorder %v2826_v59, 0.0  ;;  %v5264_v3 = vsel %vm3728_vm7, %v10719_v4, -inf }
 0xb70   :  { %v5263_v63 = vsel %vm3727_vm8, %v10699_v62, -inf  ;;  %v6481_v17 = vsel %vm42_vm0, %v5264_v3, -inf }
 0xb71   :  { %v6479_v13 = vsel %vm42_vm0, %v5263_v63, -inf }
 0xb72   :  { %v6480_v45 = vmax.f32 %v6478_v7, %v6479_v13 }
 0xb73   :  { %7480 = vset.pattern.permute.xlu2 %v11704_v58 }
 0xb74   :  { %v6482_v46 = vmax.f32 %v6480_v45, %v6481_v17  ;;  %3052 = vperm.xlu1 %7481, %v11800_v61   ;;  %v11801_v17 = vld [vmem:[#allocation53_spill] sm:$0xff] }
 0xb7b   :  { %2966 = vperm.xlu2 %7480, %v11799_v9  }
 0xb7c   :  { %7483 = vset.pattern.permute.xlu1 %v11704_v58 }
 0xb7d   :  { %v2850_v49 = vpop.permute.xlu2 %2849 }
 0xb7e   :  { %v2838_v18 = vpop.permute.xlu1 %2837  ;;  %vm3731_vm15 = vcmp.gt.f32.partialorder %v2850_v49, 0.0 }
 0xb7f   :  { %vm3729_vm1 = vcmp.gt.f32.partialorder %v2838_v18, 0.0  ;;  %v5267_v31 = vsel %vm3731_vm15, %v10673_v55, -inf }
 0xb80   :  { %v5265_v10 = vsel %vm3729_vm1, %v10713_v24, -inf  ;;  %v6487_v27 = vsel %vm42_vm0, %v5267_v31, -inf }
 0xb81   :  { %v6483_v0 = vsel %vm42_vm0, %v5265_v10, -inf }
 0xb82   :  { %v6484_v53 = vmax.f32 %v6482_v46, %v6483_v0  ;;  %v11802_v46 = vld [vmem:[#allocation117_spill] sm:$0xff] }
 0xb83   :  { %7482 = vset.pattern.permute.xlu2 %v7829_v40  ;;  %vm3735_vm2 = vcmp.gt.f32.partialorder %v11802_v46, 0.0 }
 0xb84   :  { %v6486_v41 = vmax.f32 %v6484_v53, %v6485_v50  ;;  %3015 = vperm.xlu1 %7483, %v10779_v20   ;;  %v5271_v18 = vsel %vm3735_vm2, %v10699_v62, -inf }
 0xb85   :  { %v6500_v0 = vsel %vm42_vm0, %v5271_v18, -inf }
 0xb86   :  { %v6488_v57 = vmax.f32 %v6486_v41, %v6487_v27 }
 0xb88   :  { %v6489_v36 = vrot.slane %v6488_v57, 4 }
 0xb8a   :  { %v6490_v6 = vmax.f32 %v6488_v57, %v6489_v36 }
 0xb8b   :  { %3058 = vperm.xlu2 %7482, %v11800_v61  }
 0xb8c   :  { %v6491_v42 = vrot.slane %v6490_v6, 2  ;;  %7484 = vset.pattern.permute.xlu1 %v7777_v30 }
 0xb8d   :  { %v2863_v55 = vpop.permute.xlu2 %2862 }
 0xb8e   :  { %v6492_v51 = vmax.f32 %v6490_v6, %v6491_v42  ;;  %v2857_v26 = vpop.permute.xlu1 %2856  ;;  %vm3733_vm14 = vcmp.gt.f32.partialorder %v2863_v55, 0.0 }
 0xb8f   :  { %vm3732_vm13 = vcmp.gt.f32.partialorder %v2857_v26, 0.0  ;;  %v5269_v1 = vsel %vm3733_vm14, %v10811_v12, -inf }
 0xb90   :  { %v6493_v7 = vrot.slane %v6492_v51, 1  ;;  %v5268_v23 = vsel %vm3732_vm13, %v10684_v2, -inf  ;;  %v6496_v59 = vsel %vm42_vm0, %v5269_v1, -inf  ;;  %v11803_v1 = vld [vmem:[#allocation55_spill] sm:$0xff] }
 0xb91   :  { %v6495_v3 = vsel %vm42_vm0, %v5268_v23, -inf }
 0xb92   :  { %v6494_v63 = vmax.f32 %v6492_v51, %v6493_v7  ;;  %v6497_v13 = vmax.f32 %v6495_v3, %v6496_v59 }
 0xb93   :  { %3107 = vperm.xlu2 %7482, %v11801_v17  }
 0xb94   :  { %2923 = vperm.xlu1 %7484, %v11797_v44   ;;  %v10820_v45 = vsel %vm6758_vm12, %v6494_v63, %v6801_v22 }
 0xb9b   :  { %7485 = vset.pattern.permute.xlu2 %v7777_v30 }
 0xb9c   :  { %7486 = vset.pattern.permute.xlu1 %v11704_v58 }
 0xb9d   :  { %v2881_v49 = vpop.permute.xlu2 %2880 }
 0xb9e   :  { %v2869_v54 = vpop.permute.xlu1 %2868  ;;  %vm3736_vm6 = vcmp.gt.f32.partialorder %v2881_v49, 0.0 }
 0xb9f   :  { %vm3734_vm7 = vcmp.gt.f32.partialorder %v2869_v54, 0.0  ;;  %v5272_v31 = vsel %vm3736_vm6, %v10719_v4, -inf }
 0xba0   :  { %v5270_v10 = vsel %vm3734_vm7, %v10691_v15, -inf  ;;  %v6502_v53 = vsel %vm42_vm0, %v5272_v31, -inf }
 0xba1   :  { %v6498_v50 = vsel %vm42_vm0, %v5270_v10, -inf }
 0xba2   :  { %v6499_v22 = vmax.f32 %v6497_v13, %v6498_v50 }
 0xba3   :  { %2972 = vperm.xlu2 %7485, %v11799_v9  }
 0xba4   :  { %v6501_v27 = vmax.f32 %v6499_v22, %v6500_v0  ;;  %3064 = vperm.xlu1 %7486, %v11800_v61  }
 0xba6   :  { %v6503_v41 = vmax.f32 %v6501_v27, %v6502_v53 }
 0xbab   :  { %7488 = vset.pattern.permute.xlu2 %v7829_v40 }
 0xbac   :  { %7489 = vset.pattern.permute.xlu1 %v7777_v30 }
 0xbad   :  { %v2893_v57 = vpop.permute.xlu2 %2892 }
 0xbae   :  { %v2887_v36 = vpop.permute.xlu1 %2886  ;;  %vm3738_vm8 = vcmp.gt.f32.partialorder %v2893_v57, 0.0 }
 0xbaf   :  { %vm3737_vm9 = vcmp.gt.f32.partialorder %v2887_v36, 0.0  ;;  %v5274_v6 = vsel %vm3738_vm8, %v10733_v52, -inf }
 0xbb0   :  { %v5273_v42 = vsel %vm3737_vm9, %v10713_v24, -inf  ;;  %v6506_v51 = vsel %vm42_vm0, %v5274_v6, -inf  ;;  %v11804_v6 = vld [vmem:[#allocation123_spill] sm:$0xff] }
 0xbb1   :  { %v6504_v55 = vsel %vm42_vm0, %v5273_v42, -inf }
 0xbb2   :  { %v6505_v26 = vmax.f32 %v6503_v41, %v6504_v55 }
 0xbb3   :  { %3156 = vperm.xlu2 %7488, %v11803_v1  }
 0xbb4   :  { %v10840_v7 = vmax.f32 %v6505_v26, %v6506_v51  ;;  %3021 = vperm.xlu1 %7489, %v10779_v20  }
 0xbbb   :  { %7491 = vset.pattern.permute.xlu2 %v11688_v48 }
 0xbbc   :  { %7492 = vset.pattern.permute.xlu1 %v7829_v40 }
 0xbbd   :  { %v2955_v23 = vpop.permute.xlu2 %2954 }
 0xbbe   :  { %v10847_v59 = vpop.permute.xlu1 %2905  ;;  %vm3748_vm15 = vcmp.gt.f32.partialorder %v2955_v23, 0.0 }
 0xbbf   :  { %v5284_v63 = vsel %vm3748_vm15, %v10684_v2, -inf }
 0xbc0   :  { %v6537_v46 = vsel %vm42_vm0, %v5284_v63, -inf  ;;  %v11805_v63 = vld [vmem:[#allocation68_spill] sm:$0xff] }
 0xbc1   :  { %vm3772_vm8 = vcmp.gt.f32.partialorder %v11805_v63, 0.0 }
 0xbc3   :  { %3199 = vperm.xlu2 %7491, %v8409_v25  }
 0xbc4   :  { %3205 = vperm.xlu1 %7492, %v8409_v25  }
 0xbc5   :  { %v3004_v3 = vpop.permute.xlu2 %3003 }
 0xbc6   :  { %vm3756_vm14 = vcmp.gt.f32.partialorder %v3004_v3, 0.0 }
 0xbc7   :  { %v5292_v10 = vsel %vm3756_vm14, %v10684_v2, -inf }
 0xbc8   :  { %v6558_v22 = vsel %vm42_vm0, %v5292_v10, -inf }
 0xbcb   :  { %7493 = vset.pattern.permute.xlu2 %v7797_v34 }
 0xbcc   :  { %7494 = vset.pattern.permute.xlu1 %v7797_v34 }
 0xbce   :  { %v2961_v13 = vpop.permute.xlu1 %2960 }
 0xbcf   :  { %vm3749_vm1 = vcmp.gt.f32.partialorder %v2961_v13, 0.0  ;;  %v11806_v13 = vld [vmem:[#allocation95_spill] sm:$0xff] }
 0xbd0   :  { %v5285_v49 = vsel %vm3749_vm1, %v10811_v12, -inf  ;;  %vm3774_vm9 = vcmp.gt.f32.partialorder %v11806_v13, 0.0 }
 0xbd1   :  { %v6538_v54 = vsel %vm42_vm0, %v5285_v49, -inf  ;;  %v5310_v10 = vsel %vm3774_vm9, %v10691_v15, -inf }
 0xbd2   :  { %v6539_v18 = vmax.f32 %v6537_v46, %v6538_v54  ;;  %v5308_v46 = vsel %vm3772_vm8, %v10684_v2, -inf  ;;  %v11807_v54 = vld [vmem:[#allocation125_spill] sm:$0xff] }
 0xbd3   :  { %2929 = vperm.xlu2 %7493, %v11797_v44   ;;  %vm3775_vm15 = vcmp.gt.f32.partialorder %v11807_v54, 0.0  ;;  %v11809_v54 = vld [vmem:[#allocation57_spill] sm:$0xff] }
 0xbd4   :  { %2978 = vperm.xlu1 %7494, %v11799_v9  }
 0xbd5   :  { %v2967_v31 = vpop.permute.xlu2 %2966 }
 0xbd6   :  { %vm3750_vm13 = vcmp.gt.f32.partialorder %v2967_v31, 0.0  ;;  %v3010_v50 = vpop.permute.xlu1 %3009 }
 0xbd7   :  { %v5286_v0 = vsel %vm3750_vm13, %v10691_v15, -inf  ;;  %vm3757_vm2 = vcmp.gt.f32.partialorder %v3010_v50, 0.0  ;;  %v6600_v50 = vsel %vm42_vm0, %v5308_v46, -inf }
 0xbd8   :  { %v6540_v53 = vsel %vm42_vm0, %v5286_v0, -inf  ;;  %v5293_v27 = vsel %vm3757_vm2, %v10811_v12, -inf  ;;  %vm3740_vm2 = vcmp.gt.f32.partialorder %v10847_v59, 0.0 }
 0xbd9   :  { %v10862_v41 = vmax.f32 %v6539_v18, %v6540_v53  ;;  %v6559_v57 = vsel %vm42_vm0, %v5293_v27, -inf  ;;  %v11808_v18 = vld [vmem:[#allocation148_spill] sm:$0xff]  ;;  %v6603_v27 = vsel %vm42_vm0, %v5310_v10, -inf  ;;  %v5276_v10 = vsel %vm3740_vm2, %v10684_v2, -inf }
 0xbda   :  { %v6560_v36 = vmax.f32 %v6558_v22, %v6559_v57  ;;  %vm3776_vm1 = vcmp.gt.f32.partialorder %v11808_v18, 0.0  ;;  %v5311_v22 = vsel %vm3775_vm15, %v10699_v62, -inf  ;;  %v6516_v59 = vsel %vm42_vm0, %v5276_v10, -inf }
 0xbdb   :  { %7495 = vset.pattern.permute.xlu2 %v11704_v58  ;;  %v5312_v0 = vsel %vm3776_vm1, %v10719_v4, -inf }
 0xbdc   :  { %7496 = vset.pattern.permute.xlu1 %v11688_v48 }
 0xbe3   :  { %3162 = vperm.xlu2 %7495, %v11803_v1  }
 0xbe4   :  { %3248 = vperm.xlu1 %7496, %v11804_v6  }
 0xbe5   :  { %v3059_v42 = vpop.permute.xlu2 %3058 }
 0xbe6   :  { %vm3765_vm6 = vcmp.gt.f32.partialorder %v3059_v42, 0.0  ;;  %v3053_v55 = vpop.permute.xlu1 %3052  ;;  %v6605_v42 = vsel %vm42_vm0, %v5311_v22, -inf }
 0xbe7   :  { %v5301_v51 = vsel %vm3765_vm6, %v10811_v12, -inf  ;;  %vm3764_vm7 = vcmp.gt.f32.partialorder %v3053_v55, 0.0  ;;  %v6607_v55 = vsel %vm42_vm0, %v5312_v0, -inf  ;;  %vm3741_vm6 = vcmp.gt.f32.partialorder %v11809_v54, 0.0 }
 0xbe8   :  { %v10871_v26 = vsel %vm42_vm0, %v5301_v51, -inf  ;;  %v5300_v23 = vsel %vm3764_vm7, %v10684_v2, -inf }
 0xbe9   :  { %v10875_v3 = vsel %vm42_vm0, %v5300_v23, -inf }
 0xbea   :  { %v6581_v48 = vmax.f32 %v10875_v3, %v10871_v26 }
 0xbeb   :  { %7497 = vset.pattern.permute.xlu2 %v7829_v40 }
 0xbec   :  { %7498 = vset.pattern.permute.xlu1 %v7797_v34 }
 0xbed   :  { %v3108_v49 = vpop.permute.xlu2 %3107 }
 0xbee   :  { %vm3773_vm14 = vcmp.gt.f32.partialorder %v3108_v49, 0.0 }
 0xbef   :  { %v5309_v31 = vsel %vm3773_vm14, %v10811_v12, -inf }
 0xbf0   :  { %v6601_v40 = vsel %vm42_vm0, %v5309_v31, -inf }
 0xbf1   :  { %v6602_v53 = vmax.f32 %v6600_v50, %v6601_v40  ;;  %v5277_v50 = vsel %vm3741_vm6, %v10811_v12, -inf }
 0xbf2   :  { %v6517_v0 = vsel %vm42_vm0, %v5277_v50, -inf }
 0xbf3   :  { %v6604_v57 = vmax.f32 %v6602_v53, %v6603_v27  ;;  %3254 = vperm.xlu2 %7497, %v11804_v6   ;;  %v6518_v27 = vmax.f32 %v6516_v59, %v6517_v0 }
 0xbf4   :  { %3027 = vperm.xlu1 %7498, %v10779_v20  }
 0xbf5   :  { %v6606_v51 = vmax.f32 %v6604_v57, %v6605_v42 }
 0xbf6   :  { %v3016_v23 = vpop.permute.xlu1 %3015 }
 0xbf7   :  { %vm3758_vm13 = vcmp.gt.f32.partialorder %v3016_v23, 0.0  ;;  %v10897_v63 = vmax.f32 %v6606_v51, %v6607_v55 }
 0xbf8   :  { %v5294_v13 = vsel %vm3758_vm13, %v10691_v15, -inf }
 0xbf9   :  { %v6561_v46 = vsel %vm42_vm0, %v5294_v13, -inf }
 0xbfa   :  { %v10901_v49 = vmax.f32 %v6560_v36, %v6561_v46  ;;  %v11810_v36 = vld [vmem:[#allocation93_spill] sm:$0xff]  ;;  %v11811_v46 = vld [vmem:[#allocation120_spill] sm:$0xff] }
 0xbfb   :  { %7500 = vset.pattern.permute.xlu2 %v11704_v58  ;;  %vm3742_vm8 = vcmp.gt.f32.partialorder %v11810_v36, 0.0  ;;  %vm3767_vm15 = vcmp.gt.f32.partialorder %v11811_v46, 0.0 }
 0xbfc   :  { %7501 = vset.pattern.permute.xlu1 %v11695_v29  ;;  %v5278_v53 = vsel %vm3742_vm8, %v10691_v15, -inf }
 0xbfd   :  { %v2973_v18 = vpop.permute.xlu2 %2972  ;;  %v6519_v42 = vsel %vm42_vm0, %v5278_v53, -inf }
 0xbfe   :  { %vm3751_vm7 = vcmp.gt.f32.partialorder %v2973_v18, 0.0  ;;  %v6520_v51 = vmax.f32 %v6518_v27, %v6519_v42  ;;  %v5303_v18 = vsel %vm3767_vm15, %v10699_v62, -inf  ;;  %vm3753_vm15 = vcmp.gt.f32.partialorder %v9017_v56, 0.0 }
 0xbff   :  { %v5287_v31 = vsel %vm3751_vm7, %v10699_v62, -inf  ;;  %v10938_v36 = vsel %vm42_vm0, %v5303_v18, -inf }
 0xc00   :  { %v10911_v40 = vsel %vm42_vm0, %v5287_v31, -inf }
 0xc01   :  { %v6543_v22 = vmax.f32 %v10862_v41, %v10911_v40 }
 0xc03   :  { %3211 = vperm.xlu2 %7500, %v8409_v25  }
 0xc04   :  { %2935 = vperm.xlu1 %7501, %v11797_v44  }
 0xc06   :  { %v2924_v57 = vpop.permute.xlu1 %2923 }
 0xc07   :  { %vm3743_vm9 = vcmp.gt.f32.partialorder %v2924_v57, 0.0 }
 0xc08   :  { %v5279_v55 = vsel %vm3743_vm9, %v10699_v62, -inf }
 0xc09   :  { %v6521_v23 = vsel %vm42_vm0, %v5279_v55, -inf }
 0xc0a   :  { %v6522_v13 = vmax.f32 %v6520_v51, %v6521_v23 }
 0xc0b   :  { %7502 = vset.pattern.permute.xlu2 %v7797_v34 }
 0xc0c   :  { %7503 = vset.pattern.permute.xlu1 %v7777_v30 }
 0xc0d   :  { %v3157_v59 = vpop.permute.xlu2 %3156 }
 0xc0e   :  { %vm3781_vm6 = vcmp.gt.f32.partialorder %v3157_v59, 0.0 }
 0xc13   :  { %3076 = vperm.xlu2 %7502, %v11800_v61  }
 0xc14   :  { %3168 = vperm.xlu1 %7503, %v11803_v1  }
 0xc16   :  { %v3065_v54 = vpop.permute.xlu1 %3064 }
 0xc17   :  { %vm3766_vm1 = vcmp.gt.f32.partialorder %v3065_v54, 0.0  ;;  %v11812_v54 = vld [vmem:[#allocation69_spill] sm:$0xff] }
 0xc18   :  { %v5302_v10 = vsel %vm3766_vm1, %v10691_v15, -inf  ;;  %vm3780_vm8 = vcmp.gt.f32.partialorder %v11812_v54, 0.0 }
 0xc19   :  { %v6582_v31 = vsel %vm42_vm0, %v5302_v10, -inf  ;;  %v5317_v10 = vsel %vm3781_vm6, %v10811_v12, -inf }
 0xc1a   :  { %v10935_v50 = vmax.f32 %v6581_v48, %v6582_v31 }
 0xc1b   :  { %7504 = vset.pattern.permute.xlu2 %v11704_v58 }
 0xc1c   :  { %7505 = vset.pattern.permute.xlu1 %v11695_v29  ;;  %v6585_v0 = vmax.f32 %v10935_v50, %v10938_v36 }
 0xc1d   :  { %v3200_v53 = vpop.permute.xlu2 %3199 }
 0xc1e   :  { %vm3788_vm2 = vcmp.gt.f32.partialorder %v3200_v53, 0.0  ;;  %v5316_v53 = vsel %vm3780_vm8, %v10684_v2, -inf }
 0xc1f   :  { %v5324_v51 = vsel %vm3788_vm2, %v10684_v2, -inf }
 0xc20   :  { %v6642_v46 = vsel %vm42_vm0, %v5324_v51, -inf  ;;  %v5289_v51 = vsel %vm3753_vm15, %v10713_v24, -inf }
 0xc21   :  { %v10981_v54 = vsel %vm42_vm0, %v5289_v51, -inf }
 0xc23   :  { %3260 = vperm.xlu2 %7504, %v11804_v6  }
 0xc24   :  { %3033 = vperm.xlu1 %7505, %v10779_v20  }
 0xc26   :  { %v3022_v27 = vpop.permute.xlu1 %3021 }
 0xc27   :  { %vm3759_vm14 = vcmp.gt.f32.partialorder %v3022_v27, 0.0  ;;  %v6621_v27 = vsel %vm42_vm0, %v5316_v53, -inf }
 0xc28   :  { %v5295_v26 = vsel %vm3759_vm14, %v10699_v62, -inf }
 0xc29   :  { %v10948_v3 = vsel %vm42_vm0, %v5295_v26, -inf }
 0xc2a   :  { %v6564_v58 = vmax.f32 %v10901_v49, %v10948_v3 }
 0xc2b   :  { %7506 = vset.pattern.permute.xlu2 %v7777_v30 }
 0xc2c   :  { %7507 = vset.pattern.permute.xlu1 %v7702_v11 }
 0xc2d   :  { %v2930_v48 = vpop.permute.xlu2 %2929 }
 0xc2e   :  { %vm3744_vm13 = vcmp.gt.f32.partialorder %v2930_v48, 0.0 }
 0xc2f   :  { %v5280_v57 = vsel %vm3744_vm13, %v10719_v4, -inf }
 0xc30   :  { %v6523_v42 = vsel %vm42_vm0, %v5280_v57, -inf }
 0xc31   :  { %v10956_v55 = vmax.f32 %v6522_v13, %v6523_v42 }
 0xc33   :  { %3217 = vperm.xlu2 %7506, %v8409_v25  }
 0xc34   :  { %2898 = vperm.xlu1 %7507, %v11794_v60   ;;  %v6622_v60 = vsel %vm42_vm0, %v5317_v10, -inf }
 0xc35   :  { %v6623_v26 = vmax.f32 %v6621_v27, %v6622_v60 }
 0xc36   :  { %v3206_v23 = vpop.permute.xlu1 %3205 }
 0xc37   :  { %vm3789_vm7 = vcmp.gt.f32.partialorder %v3206_v23, 0.0 }
 0xc38   :  { %v5325_v18 = vsel %vm3789_vm7, %v10811_v12, -inf  ;;  %vm3769_vm7 = vcmp.gt.f32.partialorder %v9071_v8, 0.0 }
 0xc39   :  { %v6643_v13 = vsel %vm42_vm0, %v5325_v18, -inf }
 0xc3a   :  { %v6644_v31 = vmax.f32 %v6642_v46, %v6643_v13 }
 0xc3b   :  { %7508 = vset.pattern.permute.xlu2 %v7814_v37 }
 0xc3c   :  { %7509 = vset.pattern.permute.xlu1 %v7814_v37 }
 0xc3d   :  { %v3163_v59 = vpop.permute.xlu2 %3162 }
 0xc3e   :  { %vm3782_vm9 = vcmp.gt.f32.partialorder %v3163_v59, 0.0 }
 0xc3f   :  { %v5318_v48 = vsel %vm3782_vm9, %v10691_v15, -inf }
 0xc40   :  { %v6624_v57 = vsel %vm42_vm0, %v5318_v48, -inf }
 0xc41   :  { %v10973_v42 = vmax.f32 %v6623_v26, %v6624_v57 }
 0xc43   :  { %2941 = vperm.xlu2 %7508, %v11797_v44  }
 0xc44   :  { %2990 = vperm.xlu1 %7509, %v11799_v9  }
 0xc46   :  { %v2979_v23 = vpop.permute.xlu1 %2978 }
 0xc47   :  { %vm3752_vm1 = vcmp.gt.f32.partialorder %v2979_v23, 0.0 }
 0xc48   :  { %v5288_v46 = vsel %vm3752_vm1, %v10719_v4, -inf }
 0xc49   :  { %v6544_v18 = vsel %vm42_vm0, %v5288_v46, -inf  ;;  %v5305_v46 = vsel %vm3769_vm7, %v10713_v24, -inf  ;;  %vm3412_vm7 = vcmp.gt.f32.partialorder %v9252_v21, 0.0 }
 0xc4a   :  { %v10987_v10 = vmax.f32 %v6543_v22, %v6544_v18  ;;  %v11024_v3 = vsel %vm42_vm0, %v5305_v46, -inf }
 0xc4b   :  { %7510 = vset.pattern.permute.xlu2 %v7797_v34 }
 0xc4c   :  { %7511 = vset.pattern.permute.xlu1 %v7777_v30  ;;  %v6547_v56 = vmax.f32 %v10987_v10, %v10981_v54  ;;  %v11816_v54 = vld [vmem:[#allocation150_spill] sm:$0xff]  ;;  %v6958_v10 = vpop.f32.mrf.mxu2 }
 0xc4d   :  { %v3255_v13 = vpop.permute.xlu2 %3254 }
 0xc4e   :  { %vm3797_vm14 = vcmp.gt.f32.partialorder %v3255_v13, 0.0 }
 0xc4f   :  { %v5333_v53 = vsel %vm3797_vm14, %v10811_v12, -inf }
 0xc50   :  { %v6664_v41 = vsel %vm42_vm0, %v5333_v53, -inf }
 0xc53   :  { %3174 = vperm.xlu2 %7510, %v11803_v1  }
 0xc54   :  { %3266 = vperm.xlu1 %7511, %v11804_v6  }
 0xc56   :  { %v3249_v60 = vpop.permute.xlu1 %3248 }
 0xc57   :  { %vm3796_vm13 = vcmp.gt.f32.partialorder %v3249_v60, 0.0 }
 0xc58   :  { %v5332_v40 = vsel %vm3796_vm13, %v10684_v2, -inf  ;;  %vm3793_vm13 = vcmp.gt.f32.partialorder %v9108_v33, 0.0 }
 0xc59   :  { %v6663_v34 = vsel %vm42_vm0, %v5332_v40, -inf }
 0xc5a   :  { %v6665_v30 = vmax.f32 %v6663_v34, %v6664_v41 }
 0xc5b   :  { %7512 = vset.pattern.permute.xlu2 %v7814_v37 }
 0xc5c   :  { %7513 = vset.pattern.permute.xlu1 %v11695_v29 }
 0xc5d   :  { %v3212_v22 = vpop.permute.xlu2 %3211 }
 0xc5e   :  { %vm3790_vm2 = vcmp.gt.f32.partialorder %v3212_v22, 0.0 }
 0xc5f   :  { %v5326_v59 = vsel %vm3790_vm2, %v10691_v15, -inf  ;;  %vm3794_vm2 = vcmp.gt.f32.partialorder %v9355_v43, 0.0 }
 0xc60   :  { %v6645_v27 = vsel %vm42_vm0, %v5326_v59, -inf  ;;  %v11813_v59 = vld [vmem:[#allocation149_spill] sm:$0xff] }
 0xc61   :  { %v6646_v26 = vmax.f32 %v6644_v31, %v6645_v27  ;;  %vm3792_vm14 = vcmp.gt.f32.partialorder %v11813_v59, 0.0 }
 0xc62   :  { %v5328_v27 = vsel %vm3792_vm14, %v10719_v4, -inf  ;;  %vm3416_vm14 = vcmp.gt.f32.partialorder %v9254_v38, 0.0 }
 0xc63   :  { %3039 = vperm.xlu2 %7512, %v10779_v20  }
 0xc64   :  { %3131 = vperm.xlu1 %7513, %v11801_v17  }
 0xc66   :  { %v3028_v48 = vpop.permute.xlu1 %3027 }
 0xc67   :  { %vm3760_vm6 = vcmp.gt.f32.partialorder %v3028_v48, 0.0 }
 0xc68   :  { %v5296_v57 = vsel %vm3760_vm6, %v10719_v4, -inf }
 0xc69   :  { %v6565_v51 = vsel %vm42_vm0, %v5296_v57, -inf }
 0xc6a   :  { %v11010_v23 = vmax.f32 %v6564_v58, %v6565_v51  ;;  %v5329_v51 = vsel %vm3793_vm13, %v10713_v24, -inf }
 0xc6b   :  { %7514 = vset.pattern.permute.xlu2 %v7702_v11  ;;  %v6651_v43 = vsel %vm42_vm0, %v5329_v51, -inf }
 0xc6c   :  { %7515 = vset.pattern.permute.xlu1 %v7702_v11 }
 0xc6d   :  { %v3077_v31 = vpop.permute.xlu2 %3076 }
 0xc6e   :  { %vm3768_vm8 = vcmp.gt.f32.partialorder %v3077_v31, 0.0  ;;  %v5330_v31 = vsel %vm3794_vm2, %v10733_v52, -inf  ;;  %vm3417_vm2 = vcmp.gt.f32.partialorder %v9272_v14, 0.0 }
 0xc6f   :  { %v5304_v18 = vsel %vm3768_vm8, %v10719_v4, -inf  ;;  %vm3413_vm8 = vcmp.gt.f32.partialorder %v9246_v16, 0.0  ;;  %v4953_v38 = vsel %vm3417_vm2, %v10713_v24, -inf }
 0xc70   :  { %v6586_v13 = vsel %vm42_vm0, %v5304_v18, -inf  ;;  %v6649_v18 = vsel %vm42_vm0, %v5328_v27, -inf  ;;  %v5664_v14 = vsel %vm42_vm0, %v4953_v38, -inf }
 0xc71   :  { %v11021_v49 = vmax.f32 %v6585_v0, %v6586_v13  ;;  %v6653_v13 = vsel %vm42_vm0, %v5330_v31, -inf }
 0xc73   :  { %2947 = vperm.xlu2 %7514, %v11797_v44   ;;  %v6589_v8 = vmax.f32 %v11021_v49, %v11024_v3 }
 0xc74   :  { %2996 = vperm.xlu1 %7515, %v11799_v9  }
 0xc76   :  { %v2936_v58 = vpop.permute.xlu1 %2935 }
 0xc77   :  { %vm3745_vm9 = vcmp.gt.f32.partialorder %v2936_v58, 0.0 }
 0xc78   :  { %v5281_v53 = vsel %vm3745_vm9, %v10713_v24, -inf  ;;  %vm3414_vm9 = vcmp.gt.f32.partialorder %v9258_v47, 0.0 }
 0xc79   :  { %v11032_v60 = vsel %vm42_vm0, %v5281_v53, -inf  ;;  %v4949_v53 = vsel %vm3413_vm8, %v10811_v12, -inf  ;;  %v4950_v16 = vsel %vm3414_vm9, %v10691_v15, -inf }
 0xc7a   :  { %v6526_v50 = vmax.f32 %v10956_v55, %v11032_v60  ;;  %v5658_v12 = vsel %vm42_vm0, %v4950_v16, -inf }
 0xc7b   :  { %7516 = vset.pattern.permute.xlu2 %v7814_v37 }
 0xc7c   :  { %7517 = vset.pattern.permute.xlu1 %v11695_v29 }
 0xc7d   :  { %v3261_v44 = vpop.permute.xlu2 %3260 }
 0xc7e   :  { %vm3798_vm15 = vcmp.gt.f32.partialorder %v3261_v44, 0.0 }
 0xc7f   :  { %v5334_v36 = vsel %vm3798_vm15, %v10691_v15, -inf }
 0xc80   :  { %v6666_v9 = vsel %vm42_vm0, %v5334_v36, -inf  ;;  %v11814_v36 = vld [vmem:[#allocation98_spill] sm:$0xff] }
 0xc81   :  { %v11040_v0 = vmax.f32 %v6665_v30, %v6666_v9 }
 0xc83   :  { %3088 = vperm.xlu2 %7516, %v11800_v61  }
 0xc84   :  { %3180 = vperm.xlu1 %7517, %v11803_v1  }
 0xc86   :  { %v3169_v41 = vpop.permute.xlu1 %3168 }
 0xc87   :  { %vm3783_vm1 = vcmp.gt.f32.partialorder %v3169_v41, 0.0  ;;  %v5656_v41 = vsel %vm42_vm0, %v4949_v53, -inf }
 0xc88   :  { %v5319_v40 = vsel %vm3783_vm1, %v10699_v62, -inf  ;;  %vm3415_vm1 = vcmp.gt.f32.partialorder %v11814_v36, 0.0 }
 0xc89   :  { %v11046_v34 = vsel %vm42_vm0, %v5319_v40, -inf  ;;  %v4951_v15 = vsel %vm3415_vm1, %v10699_v62, -inf  ;;  %vm11815_vm1 = vcmask 1047559  }
 0xc8a   :  { %v6627_v22 = vmax.f32 %v10973_v42, %v11046_v34  ;;  %v5660_v27 = vsel %vm42_vm0, %v4951_v15, -inf }
 0xc8b   :  { %7519 = vset.pattern.permute.xlu2 %v7702_v11 }
 0xc8c   :  { %7520 = vset.pattern.permute.xlu1 %v7814_v37 }
 0xc8d   :  { %v3218_v30 = vpop.permute.xlu2 %3217 }
 0xc8e   :  { %vm3791_vm6 = vcmp.gt.f32.partialorder %v3218_v30, 0.0 }
 0xc8f   :  { %v5327_v48 = vsel %vm3791_vm6, %v10699_v62, -inf  ;;  %vm3418_vm6 = vcmp.gt.f32.partialorder %v9262_v5, 0.0 }
 0xc90   :  { %v6647_v57 = vsel %vm42_vm0, %v5327_v48, -inf  ;;  %v4954_v55 = vsel %vm3418_vm6, %v10733_v52, -inf  ;;  %vm11817_vm6 = vmmov %vm11815_vm1 }
 0xc91   :  { %v6648_v46 = vmax.f32 %v6646_v26, %v6647_v57  ;;  %v4948_v26 = vsel %vm3412_vm7, %v10684_v2, -inf  ;;  %v4952_v57 = vsel %vm3416_vm14, %v10719_v4, -inf  ;;  %vm3419_vm7 = vcmp.gt.f32.partialorder %v9289_v39, 0.0 }
 0xc92   :  { %v5655_v9 = vsel %vm42_vm0, %v4948_v26, -inf  ;;  %v5662_v31 = vsel %vm42_vm0, %v4952_v57, -inf }
 0xc93   :  { %v6650_v33 = vmax.f32 %v6648_v46, %v6649_v18  ;;  %3045 = vperm.xlu2 %7519, %v10779_v20   ;;  %v5657_v40 = vmax.f32 %v5655_v9, %v5656_v41  ;;  %v5666_v18 = vsel %vm42_vm0, %v4954_v55, -inf }
 0xc94   :  { %3137 = vperm.xlu1 %7520, %v11801_v17  }
 0xc95   :  { %v6652_v58 = vmax.f32 %v6650_v33, %v6651_v43  ;;  %v5659_v30 = vmax.f32 %v5657_v40, %v5658_v12 }
 0xc96   :  { %v3034_v44 = vpop.permute.xlu1 %3033 }
 0xc97   :  { %vm3761_vm15 = vcmp.gt.f32.partialorder %v3034_v44, 0.0  ;;  %v11070_v21 = vmax.f32 %v6652_v58, %v6653_v13  ;;  %v5661_v51 = vmax.f32 %v5659_v30, %v5660_v27 }
 0xc98   :  { %v5297_v20 = vsel %vm3761_vm15, %v10713_v24, -inf  ;;  %v11108_v24 = vld [vmem:[%s11369_s0 + $0x38] sm:$0xff] }
 0xc99   :  { %v11078_v47 = vsel %vm42_vm0, %v5297_v20, -inf  ;;  %v5663_v46 = vmax.f32 %v5661_v51, %v5662_v31  ;;  %v4955_v5 = vsel %vm3419_vm7, %v11108_v24, -inf }
 0xc9a   :  { %v6568_v2 = vmax.f32 %v11010_v23, %v11078_v47  ;;  %v5668_v43 = vsel %vm42_vm0, %v4955_v5, -inf  ;;  %v11152_v23 = vld [vmem:[%s11369_s0 + $0x20] sm:$0xff] }
 0xc9b   :  { %3094 = vperm.xlu2 %7519, %v11800_v61  }
 0xc9c   :  { %3186 = vperm.xlu1 %7520, %v11803_v1  }
 0xc9d   :  { %v2942_v59 = vpop.permute.xlu2 %2941 }
 0xc9e   :  { %vm3746_vm13 = vcmp.gt.f32.partialorder %v2942_v59, 0.0 }
 0xc9f   :  { %v5282_v48 = vsel %vm3746_vm13, %v10733_v52, -inf  ;;  %vm3800_vm13 = vcmp.gt.f32.partialorder %v11816_v54, 0.0 }
 0xca0   :  { %v6527_v61 = vsel %vm42_vm0, %v5282_v48, -inf }
 0xca1   :  { %v11095_v62 = vmax.f32 %v6526_v50, %v6527_v61  ;;  %v5665_v50 = vmax.f32 %v5663_v46, %v5664_v14 }
 0xca3   :  { %7522 = vset.pattern.permute.xlu2 %v11695_v29  ;;  %v5667_v13 = vmax.f32 %v5665_v50, %v5666_v18 }
 0xca4   :  { %7523 = vset.pattern.permute.xlu1 %v7702_v11 }
 0xca5   :  { %v5669_v53 = vmax.f32 %v5667_v13, %v5668_v43 }
 0xca6   :  { %v2899_v60 = vpop.permute.xlu1 %2898 }
 0xca7   :  { %vm3739_vm8 = vcmp.gt.f32.partialorder %v2899_v60, 0.0  ;;  %v5670_v9 = vrot.slane %v5669_v53, 4 }
 0xca8   :  { %v5275_v29 = vsel %vm3739_vm8, %v11108_v24, -inf }
 0xca9   :  { %v6508_v33 = vsel %vm42_vm0, %v5275_v29, -inf }
 0xcaa   :  { %v6509_v39 = vmax.f32 %v10840_v7, %v6508_v33 }
 0xcab   :  { %3278 = vperm.xlu2 %7522, %v11804_v6  }
 0xcac   :  { %v6510_v58 = vrot.slane %v6509_v39, 4  ;;  %3143 = vperm.xlu1 %7523, %v11801_v17   ;;  %v5671_v17 = vmax.f32 %v5669_v53, %v5670_v9 }
 0xcad   :  { %v3175_v26 = vpop.permute.xlu2 %3174 }
 0xcae   :  { %v6511_v44 = vmax.f32 %v6509_v39, %v6510_v58  ;;  %vm3784_vm9 = vcmp.gt.f32.partialorder %v3175_v26, 0.0  ;;  %v5672_v34 = vrot.slane %v5671_v17, 2 }
 0xcaf   :  { %v5320_v16 = vsel %vm3784_vm9, %v10719_v4, -inf }
 0xcb0   :  { %v6512_v20 = vrot.slane %v6511_v44, 2  ;;  %v6628_v36 = vsel %vm42_vm0, %v5320_v16, -inf  ;;  %v5673_v30 = vmax.f32 %v5671_v17, %v5672_v34 }
 0xcb1   :  { %v11123_v7 = vmax.f32 %v6627_v22, %v6628_v36 }
 0xcb2   :  { %v6513_v41 = vmax.f32 %v6511_v44, %v6512_v20  ;;  %v5674_v57 = vrot.slane %v5673_v30, 1 }
 0xcb3   :  { %7524 = vset.pattern.permute.xlu2 %v7702_v11 }
 0xcb4   :  { %v6514_v12 = vrot.slane %v6513_v41, 1  ;;  %7525 = vset.pattern.permute.xlu1 %v7814_v37 }
 0xcb6   :  { %v2991_v15 = vpop.permute.xlu1 %2990  ;;  %v6515_v40 = vmax.f32 %v6513_v41, %v6514_v12 }
 0xcb7   :  { %vm3754_vm15 = vcmp.gt.f32.partialorder %v2991_v15, 0.0 }
 0xcb8   :  { %v5290_v4 = vsel %vm3754_vm15, %v10733_v52, -inf  ;;  %v6803_v59 = vsel %vm11815_vm1, %v6515_v40, %v10820_v45 }
 0xcb9   :  { %v6548_v42 = vsel %vm42_vm0, %v5290_v4, -inf }
 0xcba   :  { %v6549_v22 = vmax.f32 %v6547_v56, %v6548_v42  ;;  %v5675_v56 = vmax.f32 %v5673_v30, %v5674_v57 }
 0xcbb   :  { %3192 = vperm.xlu2 %7524, %v11803_v1   ;;  %v11145_v1 = vld [vmem:[%s11374_s5] ss:$0 sm:$0xff] }
 0xcbc   :  { %3284 = vperm.xlu1 %7525, %v11804_v6   ;;  %v6986_v47 = vmul.f32 %v11145_v1, %v6958_v10  ;;  %v6768_v31 = vsel %vm11817_vm6, %v5675_v56, %v9238_v35 }
 0xcbd   :  { %v3040_v37 = vpop.permute.xlu2 %3039 }
 0xcbe   :  { %vm3762_vm14 = vcmp.gt.f32.partialorder %v3040_v37, 0.0 }
 0xcbf   :  { %v5298_v27 = vsel %vm3762_vm14, %v10733_v52, -inf }
 0xcc0   :  { %v6569_v48 = vsel %vm42_vm0, %v5298_v27, -inf }
 0xcc1   :  { %v6570_v45 = vmax.f32 %v6568_v2, %v6569_v48  ;;  %v11159_v2 = vld [vmem:[%s11375_s6] ss:$0 sm:$0xff]  ;;  %s7628_s6 = smov 32  }
 0xcc2   :  { %v11174_v46 = vadd.f32 %v11159_v2, %v6986_v47 }
 0xcc3   :  { %3241 = vperm.xlu2 %7524, %v8409_v25   ;;  %v5336_v25 = vsel %vm3800_vm13, %v11152_v23, -inf }
 0xcc4   :  { %7526 = vset.pattern.permute.xlu1 %v7702_v11  ;;  %v11164_v11 = vld [vmem:[%s11369_s0 + $0x18] sm:$0xff]  ;;  %v6670_v14 = vsel %vm42_vm0, %v5336_v25, -inf }
 0xcc6   :  { %v3267_v52 = vpop.permute.xlu1 %3266 }
 0xcc7   :  { %vm3799_vm2 = vcmp.gt.f32.partialorder %v3267_v52, 0.0 }
 0xcc8   :  { %v5335_v61 = vsel %vm3799_vm2, %v11164_v11, -inf }
 0xcc9   :  { %v6668_v51 = vsel %vm42_vm0, %v5335_v61, -inf }
 0xcca   :  { %v6669_v38 = vmax.f32 %v11040_v0, %v6668_v51  ;;  %v7006_v0 = vmax.f32 %v11174_v46, 0.0  ;;  %v127_v51 = vpop.f32.mrf.mxu0 }
 0xccb   :  { %6813 = vrot.lane.b32.xlu2 %v6768_v31, %s7627_s19 }
 0xccc   :  { %3290 = vperm.xlu1 %7526, %v11804_v6   ;;  %v11177_v55 = vmax.f32 %v6669_v38, %v6670_v14  ;;  %7538 = vtanh.f32 %v7006_v0  ;;  %v11818_v6 = vld [vmem:[#allocation121_spill] sm:$0xff] }
 0xccd   :  { %v2948_v60 = vpop.permute.xlu2 %2947 }
 0xcce   :  { %vm3747_vm7 = vcmp.gt.f32.partialorder %v2948_v60, 0.0 }
 0xccf   :  { %v5283_v50 = vsel %vm3747_vm7, %v11108_v24, -inf }
 0xcd0   :  { %v6529_v5 = vsel %vm42_vm0, %v5283_v50, -inf }
 0xcd1   :  { %v6530_v35 = vmax.f32 %v11095_v62, %v6529_v5 }
 0xcd2   :  { %v7539_v29 = vpop.eup %7538  ;;  %v11216_v50 = vpop.f32.mrf.mxu0 }
 0xcd3   :  { %7528 = vrot.lane.b32.xlu2 %v7527_v19, %s7627_s19  ;;  %v6531_v39 = vrot.slane %v6530_v35, 4 }
 0xcd4   :  { %6815 = vrot.lane.b32.xlu1 %v11818_v6, %s7627_s19  ;;  %v11223_v6 = vld [vmem:[%s11369_s0 + $0x28] sm:$0xff] }
 0xcd5   :  { %v6532_v43 = vmax.f32 %v6530_v35, %v6531_v39 }
 0xcd6   :  { %v11193_v33 = vpop.permute.xlu1 %3131 }
 0xcd7   :  { %v6533_v53 = vrot.slane %v6532_v43, 2 }
 0xcd9   :  { %v6534_v36 = vmax.f32 %v6532_v43, %v6533_v53  ;;  %v11819_v43 = vld [vmem:[#allocation14_spill] sm:$0xff] }
 0xcdb   :  { %7030 = vrot.lane.b32.xlu2 %v7539_v29, %s7628_s6 }
 0xcdc   :  { %6823 = vrot.lane.b32.xlu1 %v6803_v59, %s7627_s19 }
 0xcdd   :  { %v3089_v18 = vpop.permute.xlu2 %3088 }
 0xcde   :  { %vm3770_vm8 = vcmp.gt.f32.partialorder %v3089_v18, 0.0 }
 0xcdf   :  { %v5306_v32 = vsel %vm3770_vm8, %v11198_v28, -inf  ;;  %vm11821_vm8 = vcmask 261120  }
 0xce0   :  { %v6590_v19 = vsel %vm42_vm0, %v5306_v32, -inf }
 0xce1   :  { %v6591_v62 = vmax.f32 %v6589_v8, %v6590_v19  ;;  %v6535_v8 = vrot.slane %v6534_v36, 1 }
 0xce3   :  { %v6536_v42 = vmax.f32 %v6534_v36, %v6535_v8 }
 0xce6   :  { %v2997_v13 = vpop.permute.xlu1 %2996 }
 0xce7   :  { %vm3755_vm9 = vcmp.gt.f32.partialorder %v2997_v13, 0.0  ;;  %v68_v13 = vmax.f32 %v11819_v43, 1.0 }
 0xce8   :  { %v5291_v58 = vsel %vm3755_vm9, %v11108_v24, -inf }
 0xce9   :  { %v6550_v26 = vsel %vm42_vm0, %v5291_v58, -inf  ;;  %v11232_v58 = vpop.f32.mrf.mxu0  ;;  %7540 = vrcp.f32 %v68_v13 }
 0xcea   :  { %v6551_v44 = vmax.f32 %v6549_v22, %v6550_v26 }
 0xcec   :  { %v6552_v16 = vrot.slane %v6551_v44, 4 }
 0xced   :  { %v3046_v20 = vpop.permute.xlu2 %3045 }
 0xcee   :  { %v6553_v9 = vmax.f32 %v6551_v44, %v6552_v16  ;;  %vm3763_vm15 = vcmp.gt.f32.partialorder %v3046_v20, 0.0 }
 0xcef   :  { %v5299_v41 = vsel %vm3763_vm15, %v11108_v24, -inf  ;;  %vm11829_vm15 = vmmov %vm11821_vm8 }
 0xcf0   :  { %v6554_v12 = vrot.slane %v6553_v9, 2  ;;  %v6571_v49 = vsel %vm42_vm0, %v5299_v41, -inf }
 0xcf1   :  { %v6572_v3 = vmax.f32 %v6570_v45, %v6571_v49 }
 0xcf2   :  { %v6555_v17 = vmax.f32 %v6553_v9, %v6554_v12 }
 0xcf3   :  { %v6573_v15 = vrot.slane %v6572_v3, 4 }
 0xcf4   :  { %v6556_v40 = vrot.slane %v6555_v17, 1 }
 0xcf5   :  { %v6574_v4 = vmax.f32 %v6572_v3, %v6573_v15  ;;  %v3095_v59 = vpop.permute.xlu2 %3094 }
 0xcf6   :  { %v6557_v34 = vmax.f32 %v6555_v17, %v6556_v40  ;;  %vm3771_vm1 = vcmp.gt.f32.partialorder %v3095_v59, 0.0  ;;  %v3181_v56 = vpop.permute.xlu1 %3180  ;;  %v11244_v59 = vpop.f32.mrf.mxu0 }
 0xcf7   :  { %v6575_v22 = vrot.slane %v6574_v4, 2  ;;  %v5307_v37 = vsel %vm3771_vm1, %v11108_v24, -inf  ;;  %vm11830_vm1 = vmmov %vm11821_vm8 }
 0xcf8   :  { %v6804_v30 = vsel %vm6748_vm3, %v6557_v34, %v6536_v42  ;;  %v6592_v27 = vsel %vm42_vm0, %v5307_v37, -inf  ;;  %vm3785_vm3 = vcmp.gt.f32.partialorder %v3181_v56, 0.0 }
 0xcf9   :  { %v6576_v48 = vmax.f32 %v6574_v4, %v6575_v22  ;;  %v6593_v57 = vmax.f32 %v6591_v62, %v6592_v27  ;;  %v5321_v29 = vsel %vm3785_vm3, %v11223_v6, -inf  ;;  %v7541_v4 = vpop.eup %7540  ;;  %vm11831_vm3 = vmmov %vm11830_vm1 }
 0xcfa   :  { %v6630_v32 = vsel %vm42_vm0, %v5321_v29, -inf }
 0xcfb   :  { %v6577_v54 = vrot.slane %v6576_v48, 1  ;;  %v6594_v45 = vrot.slane %v6593_v57, 4  ;;  %v6631_v62 = vmax.f32 %v11123_v7, %v6630_v32 }
 0xcfd   :  { %v6578_v10 = vmax.f32 %v6576_v48, %v6577_v54  ;;  %v6595_v52 = vmax.f32 %v6593_v57, %v6594_v45  ;;  %v149_v48 = vmul.f32 %v7541_v4, %v127_v51 }
 0xcff   :  { %v6805_v25 = vsel %vm6750_vm4, %v6578_v10, %v6804_v30  ;;  %v6596_v47 = vrot.slane %v6595_v52, 2 }
 0xd01   :  { %v6597_v61 = vmax.f32 %v6595_v52, %v6596_v47 }
 0xd03   :  { %v6598_v38 = vrot.slane %v6597_v61, 1 }
 0xd05   :  { %v6599_v31 = vmax.f32 %v6597_v61, %v6598_v38  ;;  %v11218_v5 = vpop.permute.xlu2 %3278  ;;  %v139_v38 = vpop.f32.mrf.mxu0 }
 0xd06   :  { %v3138_v14 = vpop.permute.xlu1 %3137  ;;  %vm3801_vm7 = vcmp.gt.f32.partialorder %v11218_v5, 0.0 }
 0xd07   :  { %v11214_v60 = vsel %vm6752_vm5, %v6599_v31, %v6805_v25  ;;  %vm3777_vm5 = vcmp.gt.f32.partialorder %v11193_v33, 0.0  ;;  %vm3778_vm13 = vcmp.gt.f32.partialorder %v3138_v14, 0.0 }
 0xd08   :  { %v5313_v44 = vsel %vm3777_vm5, %v11223_v6, -inf  ;;  %v5314_v36 = vsel %vm3778_vm13, %v11198_v28, -inf  ;;  %vm11833_vm5 = vmmov %vm11830_vm1 }
 0xd09   :  { %v6609_v7 = vsel %vm42_vm0, %v5313_v44, -inf  ;;  %v6611_v9 = vsel %vm42_vm0, %v5314_v36, -inf  ;;  %v7623_v36 = vld [vmem:[%s11369_s0] sm:$0xff]  ;;  %vm11835_vm13 = vmmov %vm11830_vm1 }
 0xd0a   :  { %v6610_v12 = vmax.f32 %v10897_v63, %v6609_v7  ;;  %v11820_v63 = vld [vmem:[#allocation78_spill] sm:$0xff] }
 0xd0b   :  { %v72_v37 = vmax.f32 %v11820_v63, 1.0 }
 0xd0c   :  { %v6612_v17 = vmax.f32 %v6610_v12, %v6611_v9 }
 0xd0d   :  { %7542 = vrcp.f32 %v72_v37 }
 0xd0e   :  { %v3187_v35 = vpop.permute.xlu1 %3186 }
 0xd0f   :  { %vm3786_vm4 = vcmp.gt.f32.partialorder %v3187_v35, 0.0 }
 0xd10   :  { %v5322_v18 = vsel %vm3786_vm4, %v11198_v28, -inf  ;;  %vm11832_vm4 = vmmov %vm11830_vm1 }
 0xd11   :  { %v6632_v19 = vsel %vm42_vm0, %v5322_v18, -inf }
 0xd12   :  { %v6633_v26 = vmax.f32 %v6631_v62, %v6632_v19 }
 0xd13   :  { %v7543_v29 = vpop.eup %7542 }
 0xd14   :  { %v153_v51 = vmul.f32 %v7543_v29, %v139_v38 }
 0xd15   :  { %v3193_v39 = vpop.permute.xlu2 %3192 }
 0xd16   :  { %vm3787_vm14 = vcmp.gt.f32.partialorder %v3193_v39, 0.0 }
 0xd17   :  { %v5323_v53 = vsel %vm3787_vm14, %v11108_v24, -inf  ;;  %vm11834_vm14 = vmmov %vm11830_vm1 }
 0xd18   :  { %v6634_v16 = vsel %vm42_vm0, %v5323_v53, -inf }
 0xd19   :  { %v6635_v20 = vmax.f32 %v6633_v26, %v6634_v16 }
 0xd1b   :  { %v6636_v33 = vrot.slane %v6635_v20, 4 }
 0xd1d   :  { %v3242_v41 = vpop.permute.xlu2 %3241  ;;  %v6637_v3 = vmax.f32 %v6635_v20, %v6636_v33  ;;  %v11822_v33 = vld [vmem:[#allocation88_spill] sm:$0xff] }
 0xd1e   :  { %vm3795_vm2 = vcmp.gt.f32.partialorder %v3242_v41, 0.0  ;;  %v3144_v49 = vpop.permute.xlu1 %3143  ;;  %v69_v5 = vmax.f32 %v11822_v33, 1.0 }
 0xd1f   :  { %v5331_v8 = vsel %vm3795_vm2, %v11108_v24, -inf  ;;  %vm3779_vm6 = vcmp.gt.f32.partialorder %v3144_v49, 0.0  ;;  %v6638_v30 = vrot.slane %v6637_v3, 2  ;;  %v11823_v49 = vld [vmem:[#allocation16_spill] sm:$0xff]  ;;  %vm11836_vm2 = vmmov %vm11830_vm1 }
 0xd20   :  { %v6655_v15 = vsel %vm42_vm0, %v5331_v8, -inf  ;;  %v5315_v40 = vsel %vm3779_vm6, %v11108_v24, -inf  ;;  %7544 = vrcp.f32 %v69_v5  ;;  %vm11837_vm6 = vmmov %vm11830_vm1 }
 0xd21   :  { %v6656_v42 = vmax.f32 %v11070_v21, %v6655_v15  ;;  %v6613_v34 = vsel %vm42_vm0, %v5315_v40, -inf  ;;  %v6639_v56 = vmax.f32 %v6637_v3, %v6638_v30  ;;  %v73_v3 = vmax.f32 %v11823_v49, 1.0  ;;  %v11824_v40 = vld [vmem:[#allocation92_spill] sm:$0xff] }
 0xd22   :  { %v6614_v22 = vmax.f32 %v6612_v17, %v6613_v34  ;;  %v70_v4 = vmax.f32 %v11824_v40, 1.0 }
 0xd23   :  { %v6657_v27 = vrot.slane %v6656_v42, 4  ;;  %v6640_v31 = vrot.slane %v6639_v56, 1  ;;  %7546 = vrcp.f32 %v73_v3 }
 0xd24   :  { %v6615_v57 = vrot.slane %v6614_v22, 4  ;;  %7548 = vrcp.f32 %v70_v4 }
 0xd25   :  { %v6658_v54 = vmax.f32 %v6656_v42, %v6657_v27  ;;  %v6814_v45 = vpop.permute.xlu2 %6813  ;;  %v6641_v62 = vmax.f32 %v6639_v56, %v6640_v31  ;;  %v6818_v56 = vpop.permute.xlu0 %6817 }
 0xd26   :  { %v6616_v10 = vmax.f32 %v6614_v22, %v6615_v57  ;;  %v6836_v52 = vsel %vm42_vm0, %v149_v48, %v6814_v45  ;;  %v7545_v34 = vpop.eup %7544  ;;  %v11825_v57 = vld [vmem:[#allocation75_spill] sm:$0xff] }
 0xd27   :  { %v6659_v25 = vrot.slane %v6658_v54, 2  ;;  %6882 = vmatmul.f32.gmra.mxu1 %v6836_v52  ;;  %v150_v63 = vmul.f32 %v7545_v34, %v11216_v50  ;;  %v142_v52 = vpop.f32.mrf.mxu0 }
 0xd28   :  { %v6617_v47 = vrot.slane %v6616_v10, 2 }
 0xd29   :  { %v6660_v21 = vmax.f32 %v6658_v54, %v6659_v25  ;;  %v7547_v48 = vpop.eup %7546  ;;  %v71_v54 = vmax.f32 %v11825_v57, 1.0 }
 0xd2a   :  { %v6618_v61 = vmax.f32 %v6616_v10, %v6617_v47  ;;  %v7549_v10 = vpop.eup %7548 }
 0xd2b   :  { %v6661_v14 = vrot.slane %v6660_v21, 1  ;;  %v151_v47 = vmul.f32 %v7549_v10, %v11232_v58  ;;  %7550 = vrcp.f32 %v71_v54 }
 0xd2c   :  { %v6619_v35 = vrot.slane %v6618_v61, 1 }
 0xd2d   :  { %v11250_v18 = vpop.permute.xlu2 %7528  ;;  %v6662_v39 = vmax.f32 %v6660_v21, %v6661_v14  ;;  %v154_v21 = vmul.f32 %v7547_v48, %v142_v52  ;;  %v6838_v38 = vsel %vm42_vm0, %v151_v47, %v6818_v56 }
 0xd2e   :  { %v6620_v32 = vmax.f32 %v6618_v61, %v6619_v35  ;;  %v7531_v19 = vunpack.i.h.bf16 %v11250_v18  ;;  %v3285_v44 = vpop.permute.xlu1 %3284  ;;  %v7530_v35 = vunpack.i.l.bf16 %v11250_v18 }
 0xd2f   :  { %vm3802_vm9 = vcmp.gt.f32.partialorder %v3285_v44, 0.0 }
 0xd30   :  { %v6840_v43 = vsel %vm42_vm0, %v153_v51, %v7531_v19  ;;  %v6807_v13 = vsel %vm6754_vm10, %v6620_v32, %v11214_v60  ;;  %v5337_v60 = vsel %vm3801_vm7, %v11223_v6, -inf  ;;  %v5338_v9 = vsel %vm3802_vm9, %v11198_v28, -inf  ;;  %v7624_v19 = vld [vmem:[%s11372_s3] ss:$0 sm:$0xff]  ;;  %vm11838_vm7 = vmmov %vm11830_vm1 }
 0xd31   :  { %6894 = vmatmul.f32.vlgmr.msra.gmra.mxu3 %v6840_v43  ;;  %v6808_v26 = vsel %vm6756_vm11, %v6641_v62, %v6807_v13  ;;  %v6672_v46 = vsel %vm42_vm0, %v5337_v60, -inf  ;;  %vm11826_vm11 = vcmask 1047559   ;;  %v7551_v29 = vpop.eup %7550  ;;  %v11828_v43 = vld [vmem:[#allocation94_spill] sm:$0xff]  ;;  %vm11840_vm9 = vmmov %vm11830_vm1 }
 0xd32   :  { %v6809_v53 = vsel %vm6758_vm12, %v6662_v39, %v6808_v26  ;;  %v6673_v41 = vmax.f32 %v11177_v55, %v6672_v46  ;;  %v152_v51 = vmul.f32 %v7551_v29, %v11244_v59  ;;  %vm11827_vm12 = vmmov %vm11821_vm8  ;;  %v74_v13 = vmax.f32 %v11828_v43, 1.0  ;;  %v145_v26 = vpop.f32.mrf.mxu0  ;;  %v7625_v43 = vld [vmem:[%s11369_s0 + $0x8] sm:$0xff] }
 0xd34   :  { %v6839_v58 = vsel %vm42_vm0, %v152_v51, %v7530_v35  ;;  %7552 = vrcp.f32 %v74_v13 }
 0xd35   :  { %v7031_v16 = vpop.permute.xlu2 %7030 }
 0xd36   :  { %v7054_v20 = vsel %vm11821_vm8, %v7006_v0, %v7031_v16  ;;  %v6674_v0 = vsel %vm42_vm0, %v5338_v9, -inf  ;;  %vm11839_vm8 = vmmov %vm11830_vm1 }
 0xd37   :  { %v7062_v7 = vadd.f32 %v7623_v36, %v7054_v20  ;;  %v6675_v8 = vmax.f32 %v6673_v41, %v6674_v0 }
 0xd39   :  { %7070 = vst.msk [vmem:[%s11376_s7] sm:$0xff] %vm42_vm0, %v7062_v7 }
 0xd3a   :  { %v7553_v18 = vpop.eup %7552 }
 0xd3e   :  { %v3291_v12 = vpop.permute.xlu1 %3290 }
 0xd3f   :  { %vm3803_vm10 = vcmp.gt.f32.partialorder %v3291_v12, 0.0 }
 0xd40   :  { %v5339_v17 = vsel %vm3803_vm10, %v11108_v24, -inf  ;;  %vm11841_vm10 = vmmov %vm11830_vm1 }
 0xd41   :  { %v6676_v15 = vsel %vm42_vm0, %v5339_v17, -inf }
 0xd42   :  { %v6677_v42 = vmax.f32 %v6675_v8, %v6676_v15 }
 0xd44   :  { %v6678_v22 = vrot.slane %v6677_v42, 4 }
 0xd46   :  { %v6679_v37 = vmax.f32 %v6677_v42, %v6678_v22  ;;  %v6816_v55 = vpop.permute.xlu1 %6815 }
 0xd47   :  { %v6837_v30 = vsel %vm42_vm0, %v150_v63, %v6816_v55 }
 0xd48   :  { %v6680_v27 = vrot.slane %v6679_v37, 2  ;;  %6885 = vmatmul.f32.gmra.mxu1 %v6837_v30 }
 0xd4a   :  { %v6681_v45 = vmax.f32 %v6679_v37, %v6680_v27 }
 0xd4c   :  { %v6682_v25 = vrot.slane %v6681_v45, 1 }
 0xd4e   :  { %v6824_v50 = vpop.permute.xlu1 %6823  ;;  %v6683_v61 = vmax.f32 %v6681_v45, %v6682_v25 }
 0xd4f   :  { %v6841_v31 = vsel %vm42_vm0, %v154_v21, %v6824_v50 }
 0xd50   :  { %6888 = vmatmul.f32.gmra.mxu1 %v6838_v38  ;;  %6897 = vmatmul.f32.gmra.mxu3 %v6841_v31  ;;  %v6810_v14 = vsel %vm11826_vm11, %v6683_v61, %v6809_v53  ;;  %v155_v53 = vmul.f32 %v7553_v18, %v145_v26 }
 0xd51   :  { %6825 = vrot.lane.b32.xlu0 %v6810_v14, %s7627_s19 }
 0xd58   :  { %6891 = vmatmul.f32.gmra.mxu1 %v6839_v58 }
 0xda4   :  { %v6883_v32 = vpop.f32.mrf.mxu1 }
 0xda5   :  { %v6884_v62 = vadd.f32 %v7624_v19, %v6883_v32 }
 0xda7   :  { %v6905_v39 = vmax.f32 %v6884_v62, 0.0 }
 0xda9   :  { %7091 = vmatmul.msk.f32.gmra.mxu2 %vm11827_vm12, %v6905_v39 }
 0xdb4   :  { %v6895_v0 = vpop.f32.mrf.mxu3 }
 0xdb5   :  { %v6896_v41 = vadd.f32 %v7624_v19, %v6895_v0 }
 0xdb7   :  { %v6909_v12 = vmax.f32 %v6896_v41, 0.0 }
 0xdc3   :  { %v6826_v44 = vpop.permute.xlu0 %6825 }
 0xdc4   :  { %v6842_v59 = vsel %vm42_vm0, %v155_v53, %v6826_v44 }
 0xdc5   :  { %v6886_v16 = vpop.f32.mrf.mxu1  ;;  %6900 = vmatmul.f32.gmra.mxu3 %v6842_v59 }
 0xdc6   :  { %v6887_v20 = vadd.f32 %v7624_v19, %v6886_v16  ;;  %v7626_v16 = vld [vmem:[%s11369_s0 + $0x10] sm:$0xff] }
 0xdc8   :  { %v6906_v36 = vmax.f32 %v6887_v20, 0.0 }
 0xdca   :  { %7092 = vmatmul.msk.f32.gmra.mxu2 %vm11829_vm15, %v6906_v36 }
 0xdcd   :  { %v6889_v7 = vpop.f32.mrf.mxu1 }
 0xdce   :  { %v6890_v60 = vadd.f32 %v7624_v19, %v6889_v7 }
 0xdd0   :  { %v6907_v33 = vmax.f32 %v6890_v60, 0.0 }
 0xdd2   :  { %7093 = vmatmul.msk.f32.gmra.mxu2 %vm11830_vm1, %v6907_v33 }
 0xdd3   :  { %v6898_v49 = vpop.f32.mrf.mxu3 }
 0xdd4   :  { %v6899_v3 = vadd.f32 %v7624_v19, %v6898_v49 }
 0xdd5   :  { %v6892_v5 = vpop.f32.mrf.mxu1 }
 0xdd6   :  { %v6893_v9 = vadd.f32 %v7624_v19, %v6892_v5  ;;  %v6910_v8 = vmax.f32 %v6899_v3, 0.0 }
 0xdd8   :  { %v6908_v46 = vmax.f32 %v6893_v9, 0.0 }
 0xdda   :  { %7094 = vmatmul.msk.f32.gmra.mxu2 %vm11831_vm3, %v6908_v46 }
 0xde2   :  { %7095 = vmatmul.msk.f32.gmra.mxu2 %vm11832_vm4, %v6909_v12 }
 0xdea   :  { %7096 = vmatmul.msk.f32.gmra.mxu2 %vm11833_vm5, %v6910_v8 }
 0xe2c   :  { %v6961_v17 = vpop.f32.mrf.mxu2 }
 0xe2d   :  { %v6987_v15 = vmul.f32 %v11145_v1, %v6961_v17 }
 0xe2f   :  { %v6999_v40 = vadd.f32 %v11159_v2, %v6987_v15 }
 0xe31   :  { %v7007_v4 = vmax.f32 %v6999_v40, 0.0 }
 0xe33   :  { %7554 = vtanh.f32 %v7007_v4 }
 0xe39   :  { %v7555_v42 = vpop.eup %7554 }
 0xe3a   :  { %7032 = vrot.lane.b32.xlu1 %v7555_v42, %s7628_s6 }
 0xe48   :  { %v6901_v34 = vpop.f32.mrf.mxu3 }
 0xe49   :  { %v6902_v22 = vadd.f32 %v7624_v19, %v6901_v34 }
 0xe4b   :  { %v6911_v63 = vmax.f32 %v6902_v22, 0.0 }
 0xe4d   :  { %v6964_v37 = vpop.f32.mrf.mxu2  ;;  %7097 = vmatmul.msk.f32.gmra.mxu2 %vm11834_vm14, %v6911_v63 }
 0xe4e   :  { %v6988_v55 = vmul.f32 %v11145_v1, %v6964_v37 }
 0xe50   :  { %v7000_v30 = vadd.f32 %v11159_v2, %v6988_v55 }
 0xe52   :  { %v7008_v27 = vmax.f32 %v7000_v30, 0.0 }
 0xe54   :  { %7556 = vtanh.f32 %v7008_v27 }
 0xe55   :  { %v6967_v48 = vpop.f32.mrf.mxu2 }
 0xe56   :  { %v6989_v57 = vmul.f32 %v11145_v1, %v6967_v48 }
 0xe58   :  { %v7001_v54 = vadd.f32 %v11159_v2, %v6989_v57 }
 0xe5a   :  { %v7557_v45 = vpop.eup %7556  ;;  %v7009_v10 = vmax.f32 %v7001_v54, 0.0 }
 0xe5b   :  { %7034 = vrot.lane.b32.xlu0 %v7557_v45, %s7628_s6 }
 0xe5c   :  { %7558 = vtanh.f32 %v7009_v10 }
 0xe5d   :  { %v6970_v52 = vpop.f32.mrf.mxu2 }
 0xe5e   :  { %v6990_v56 = vmul.f32 %v11145_v1, %v6970_v52 }
 0xe60   :  { %v7002_v25 = vadd.f32 %v11159_v2, %v6990_v56 }
 0xe62   :  { %v7559_v47 = vpop.eup %7558  ;;  %v7010_v21 = vmax.f32 %v7002_v25, 0.0 }
 0xe63   :  { %7036 = vrot.lane.b32.xlu2 %v7559_v47, %s7628_s6 }
 0xe64   :  { %7560 = vtanh.f32 %v7010_v21 }
 0xe65   :  { %v6973_v50 = vpop.f32.mrf.mxu2 }
 0xe66   :  { %v6991_v61 = vmul.f32 %v11145_v1, %v6973_v50 }
 0xe68   :  { %v7003_v38 = vadd.f32 %v11159_v2, %v6991_v61 }
 0xe6a   :  { %v7561_v31 = vpop.eup %7560  ;;  %v7011_v14 = vmax.f32 %v7003_v38, 0.0 }
 0xe6b   :  { %7038 = vrot.lane.b32.xlu1 %v7561_v31, %s7628_s6 }
 0xe6c   :  { %7562 = vtanh.f32 %v7011_v14 }
 0xe6d   :  { %v6976_v35 = vpop.f32.mrf.mxu2 }
 0xe6e   :  { %v6992_v29 = vmul.f32 %v11145_v1, %v6976_v35 }
 0xe70   :  { %v7004_v51 = vadd.f32 %v11159_v2, %v6992_v29 }
 0xe72   :  { %v7563_v58 = vpop.eup %7562  ;;  %v7012_v32 = vmax.f32 %v7004_v51, 0.0 }
 0xe73   :  { %7040 = vrot.lane.b32.xlu0 %v7563_v58, %s7628_s6 }
 0xe74   :  { %7564 = vtanh.f32 %v7012_v32 }
 0xe7a   :  { %v7565_v19 = vpop.eup %7564 }
 0xe7b   :  { %7042 = vrot.lane.b32.xlu2 %v7565_v19, %s7628_s6 }
 0xeac   :  { %v7033_v62 = vpop.permute.xlu1 %7032 }
 0xead   :  { %v7055_v39 = vsel %vm11835_vm13, %v7007_v4, %v7033_v62 }
 0xeae   :  { %v7063_v13 = vadd.f32 %v7625_v43, %v7055_v39 }
 0xeb0   :  { %7071 = vst.msk [vmem:[%s11376_s7 + $0x8] sm:$0xff] %vm42_vm0, %v7063_v13 }
 0xebd   :  { %v7037_v26 = vpop.permute.xlu2 %7036 }
 0xebe   :  { %v7057_v18 = vsel %vm11836_vm2, %v7009_v10, %v7037_v26 }
 0xebf   :  { %v7065_v53 = vadd.f32 %v11164_v11, %v7057_v18 }
 0xec1   :  { %7073 = vst.msk [vmem:[%s11376_s7 + $0x18] sm:$0xff] %vm42_vm0, %v7065_v53 }
 0xecd   :  { %v7035_v44 = vpop.permute.xlu0 %7034 }
 0xece   :  { %v7056_v59 = vsel %vm11837_vm6, %v7008_v27, %v7035_v44 }
 0xecf   :  { %v7064_v20 = vadd.f32 %v7626_v16, %v7056_v59 }
 0xed0   :  { %v6979_v36 = vpop.f32.mrf.mxu2 }
 0xed1   :  { %7072 = vst.msk [vmem:[%s11376_s7 + $0x10] sm:$0xff] %vm42_vm0, %v7064_v20  ;;  %v6993_v11 = vmul.f32 %v11145_v1, %v6979_v36 }
 0xed3   :  { %v7005_v7 = vadd.f32 %v11159_v2, %v6993_v11 }
 0xed5   :  { %v7013_v60 = vmax.f32 %v7005_v7, 0.0  ;;  %v7043_v33 = vpop.permute.xlu2 %7042 }
 0xed6   :  { %v7060_v5 = vsel %vm11838_vm7, %v7012_v32, %v7043_v33 }
 0xed7   :  { %7566 = vtanh.f32 %v7013_v60  ;;  %v7068_v9 = vadd.f32 %v11198_v28, %v7060_v5 }
 0xed9   :  { %7076 = vst.msk [vmem:[%s11376_s7 + $0x30] sm:$0xff] %vm42_vm0, %v7068_v9 }
 0xedd   :  { %v7567_v46 = vpop.eup %7566  ;;  %v7039_v0 = vpop.permute.xlu1 %7038 }
 0xede   :  { %v7058_v41 = vsel %vm11839_vm8, %v7010_v21, %v7039_v0  ;;  %7044 = vrot.lane.b32.xlu1 %v7567_v46, %s7628_s6 }
 0xedf   :  { %v7066_v1 = vadd.f32 %v11152_v23, %v7058_v41 }
 0xee1   :  { %7074 = vst.msk [vmem:[%s11376_s7 + $0x20] sm:$0xff] %vm42_vm0, %v7066_v1 }
 0xee5   :  { %v7041_v2 = vpop.permute.xlu0 %7040 }
 0xee6   :  { %v7059_v28 = vsel %vm11840_vm9, %v7011_v14, %v7041_v2 }
 0xee7   :  { %v7067_v12 = vadd.f32 %v11223_v6, %v7059_v28 }
 0xee9   :  { %7075 = vst.msk [vmem:[%s11376_s7 + $0x28] sm:$0xff] %vm42_vm0, %v7067_v12 }
 0xf50   :  { %v7045_v49 = vpop.permute.xlu1 %7044 }
 0xf51   :  { %v7061_v3 = vsel %vm11841_vm10, %v7013_v60, %v7045_v49 }
 0xf52   :  { %v7069_v23 = vadd.f32 %v11108_v24, %v7061_v3 }
 0xf54   :  { %7077 = vst.msk [vmem:[%s11376_s7 + $0x38] sm:$0xff] %vm42_vm0, %v7069_v23 }

</bundles_post_ra>
